<compile_context>
chip_gen: v5e
topology: v5e:2x2
jax: 0.10.0
libtpu: 0.0.40
codegen_flags: <defaults>
</compile_context>

<pallas_src>
import functools

import jax
import jax.numpy as jnp
from jax.experimental import pallas as pl
from jax.experimental.pallas import tpu as pltpu

EPS = 1e-5


def _round_up(n, m):
    return (n + m - 1) // m * m


def _vmem_capacity_bytes():
    try:
        return int(pltpu.get_tpu_info().vmem_capacity_bytes)
    except Exception:
        return 64 * 2**20  # conservative (v7x-sized) fallback


def _per_step_vmem_bytes(th, W, Cp, store_item, compute_item):
    """Conservative per-grid-step VMEM estimate for the heaviest pass."""
    tb = th * W * Cp * 4
    sb = th * W * Cp * store_item
    cb = th * W * Cp * compute_item
    weights = 2 * 3 * Cp * 3 * Cp * compute_item      # double-buffered weight block
    halo = 4 * W * Cp * (4 + store_item + compute_item)
    io = 2 * max(sb, cb) + 2 * max(sb, tb)            # pipelined in/out blocks
    tmp = cb + 13 * tb                                 # halo'd tile + matmul accs + taps
    return io + tmp + weights + halo


def _choose_tile_h(H, batch, fits, min_rows=16, target_steps=8):
    divisors = sorted((d for d in range(1, H + 1) if H % d == 0), reverse=True)
    fit = [d for d in divisors if fits(d)]
    if not fit:
        # TODO(synk): W / channel tiling for this regime.
        raise NotImplementedError(
            "even a 1-row tile exceeds the VMEM budget; W/channel tiling "
            "is not implemented")
    th = fit[0]                       # largest tile that fits VMEM
    # Shrink (among fitting divisors) for pipelining / v7x megacore, but keep
    # tiles tall enough that the 2-row halo overhead stays small.
    for d in fit:
        if d < th and d >= min_rows and batch * (H // th) < target_steps:
            th = d
    return th


# ----------------------------------------------------------------------------
# Kernels
# ----------------------------------------------------------------------------

def _conv3x3_reflect_tile(xh, w_ref, b_row):
    """3x3 reflect-pad conv on a halo'd row tile.

    xh:    (TH+2, W, Cp), compute dtype; rows 0 / TH+1 are the halo rows
           (reflect boundary already resolved by the caller's index_map).
    w_ref: (3, Cp, 3*Cp) ref; w_ref[ky][cin, kx*Cp + cout].
    b_row: (1, 1, Cp) f32.
    Returns (TH, W, Cp) f32.
    """
    THp2, W, Cp = xh.shape
    TH = THp2 - 2

    # ky taps: three accumulating MXU matmuls (contraction Cp, output 3*Cp).
    # No im2col lane-concat buffer is materialized.
    t = jnp.einsum("hwc,co->hwo", xh[0:TH], w_ref[0],
                   preferred_element_type=jnp.float32)
    t = t + jnp.einsum("hwc,co->hwo", xh[1:TH + 1], w_ref[1],
                       preferred_element_type=jnp.float32)
    t = t + jnp.einsum("hwc,co->hwo", xh[2:TH + 2], w_ref[2],
                       preferred_element_type=jnp.float32)

    # kx taps live on the (128-aligned) lane axis.
    t0 = t[:, :, :Cp]           # needs column w-1
    t1 = t[:, :, Cp:2 * Cp]     # column w
    t2 = t[:, :, 2 * Cp:]       # needs column w+1

    # W-axis shifts on the XLU (roll) instead of sublane-concat copies; a
    # one-column reflect fix-up handles the boundary (col -1 -> 1, col W -> W-2).
    left = pltpu.roll(t0, shift=1, axis=1)
    right = pltpu.roll(t2, shift=W - 1, axis=1)
    col = jax.lax.broadcasted_iota(jnp.int32, (1, W, 1), 1)
    left = jnp.where(col == 0, t0[:, 1:2, :], left)
    right = jnp.where(col == W - 1, t2[:, W - 2:W - 1, :], right)

    return left + t1 + right + b_row


def _partial_stats(y, st_ref):
    # Fused into the conv epilogue: per-tile sum / sum-of-squares -> (2, Cp).
    s = jnp.sum(y, axis=(0, 1), keepdims=True)
    s2 = jnp.sum(y * y, axis=(0, 1), keepdims=True)
    st_ref[0, 0] = jnp.concatenate([s[0], s2[0]], axis=0)


def _pass1_kernel(x_ref, up_ref, dn_ref, w_ref, b_ref, y_ref, st_ref):
    """conv1 on one row tile + per-tile partial InstanceNorm stats."""
    Cp = x_ref.shape[-1]
    xh = jnp.concatenate([up_ref[0], x_ref[0], dn_ref[0]], axis=0)
    y = _conv3x3_reflect_tile(xh, w_ref, b_ref[...].reshape(1, 1, Cp))
    y_ref[0] = y.astype(y_ref.dtype)
    _partial_stats(y, st_ref)


def _pass2_kernel(y1_ref, up_ref, dn_ref, st1_ref, w_ref, b_ref, y2_ref, st_ref):
    """IN(conv1) + ReLU + conv2 on one row tile + partial stats of conv2."""
    Cp = y1_ref.shape[-1]
    st1 = st1_ref[...]                      # (1, 2, Cp) f32: [mean, rstd]
    mean = st1[:, 0:1, :]
    rstd = st1[:, 1:2, :]
    y1h = jnp.concatenate([up_ref[0], y1_ref[0], dn_ref[0]],
                          axis=0).astype(jnp.float32)
    # InstanceNorm + ReLU in f32 (v5e has no bf16 VPU path), single cast for MXU.
    h = jnp.maximum((y1h - mean) * rstd, 0.0).astype(w_ref.dtype)
    y = _conv3x3_reflect_tile(h, w_ref, b_ref[...].reshape(1, 1, Cp))
    y2_ref[0] = y.astype(y2_ref.dtype)
    _partial_stats(y, st_ref)


def _pass3_kernel(x_ref, y2_ref, st2_ref, o_ref):
    """IN(conv2) + residual add (elementwise)."""
    st2 = st2_ref[...]                      # (1, 2, Cp)
    mean = st2[:, 0:1, :]
    rstd = st2[:, 1:2, :]
    o_ref[...] = x_ref[...] + (y2_ref[...].astype(jnp.float32) - mean) * rstd


# ----------------------------------------------------------------------------
# Wrappers
# ----------------------------------------------------------------------------

def _finalize_stats(partial, hw):
    """(B, nH, 2, Cp) partial sums -> (B, 2, Cp) [mean, rstd]."""
    s = jnp.sum(partial, axis=1)
    mean = s[:, 0] * (1.0 / hw)
    # NOTE: single-pass variance (E[x^2] - m^2) in f32; clamped at 0 to guard
    # against cancellation on near-constant channels.
    var = jnp.maximum(s[:, 1] * (1.0 / hw) - mean * mean, 0.0)
    rstd = jax.lax.rsqrt(var + EPS)
    return jnp.stack([mean, rstd], axis=1)


def prepare_params(w1, b1, w2, b2, *, compute_dtype=jnp.float32):
    """Pre-layout Conv2d parameters ONCE at parameter-load time.

    w*: (Cout, Cin, 3, 3) PyTorch layout; b*: (C,).
    Returns lane-dense matmul weights (3, Cp, 3*Cp) and biases (1, Cp).
    """
    C = w1.shape[0]
    Cp = max(128, _round_up(C, 128))

    def prep_w(w):
        wt = jnp.transpose(w.astype(jnp.float32), (2, 1, 3, 0))  # (ky,cin,kx,cout)
        wt = jnp.pad(wt, ((0, 0), (0, Cp - C), (0, 0), (0, Cp - C)))
        return wt.reshape(3, Cp, 3 * Cp).astype(compute_dtype)

    def prep_b(b):
        return jnp.pad(b.astype(jnp.float32), (0, Cp - C)).reshape(1, Cp)

    return {"w1": prep_w(w1), "b1": prep_b(b1), "w2": prep_w(w2), "b2": prep_b(b2)}


@functools.partial(jax.jit, static_argnames=("compute_dtype", "tile_h"))
def residual_block_nhwc(x, params, *, compute_dtype=jnp.float32, tile_h=None):
    """y = x + IN(conv3x3_r(relu(IN(conv3x3_r(x))))) on NHWC input (preferred)."""
    B, H, W, C = x.shape
    assert H >= 2 and W >= 2, "reflect pad=1 needs H, W >= 2"
    Cp = params["b1"].shape[-1]
    cdt = jnp.dtype(compute_dtype)
    sdt = cdt                             # inter-pass (conv1 output) storage dtype

    x32 = x.astype(jnp.float32)
    if Cp != C:
        # Zero channels are inert through conv / IN / ReLU / residual.
        x32 = jnp.pad(x32, ((0, 0), (0, 0), (0, 0), (0, Cp - C)))
    x_in = x32.astype(cdt)                # conv-1 input DMA'd at compute precision

    # ---- generation-aware VMEM budget & row-tile selection ------------------
    cap = _vmem_capacity_bytes()
    vmem_limit = max(32 * 2**20, min(int(cap * 0.78), cap - 8 * 2**20))
    budget = vmem_limit - 2 * 2**20
    fits = lambda th_: _per_step_vmem_bytes(th_, W, Cp, sdt.itemsize,
                                            cdt.itemsize) <= budget
    if tile_h is None:
        th = _choose_tile_h(H, B, fits)
    else:
        th = int(tile_h)
        assert H % th == 0, "tile_h must divide H"
    nH = H // th
    hw = float(H * W)

    grid = (B, nH)
    cparams = pltpu.CompilerParams(
        dimension_semantics=("parallel", "parallel"),
        vmem_limit_bytes=int(vmem_limit))

    # Row-tile spec + two 1-row halo specs; the halo index_map resolves the
    # reflect boundary (row -1 -> 1, row H -> H-2), so no padded copy exists.
    def tile_spec():
        return pl.BlockSpec((1, th, W, Cp), lambda b, t: (b, t, 0, 0))

    row_above = pl.BlockSpec(
        (1, 1, W, Cp), lambda b, t: (b, jnp.where(t == 0, 1, t * th - 1), 0, 0))
    row_below = pl.BlockSpec(
        (1, 1, W, Cp),
        lambda b, t: (b, jnp.where(t == nH - 1, H - 2, (t + 1) * th), 0, 0))
    # TODO(synk): pipeline_mode=pl.Buffered(1) on these constant-index blocks.
    w_spec = pl.BlockSpec((3, Cp, 3 * Cp), lambda b, t: (0, 0, 0))
    b_spec = pl.BlockSpec((1, Cp), lambda b, t: (0, 0))
    st_in_spec = pl.BlockSpec((1, 2, Cp), lambda b, t: (b, 0, 0))
    st_out_spec = pl.BlockSpec((1, 1, 2, Cp), lambda b, t: (b, t, 0, 0))

    # ---- pass 1: conv1 + per-tile stats -------------------------------------
    y1, p1 = pl.pallas_call(
        _pass1_kernel,
        out_shape=(jax.ShapeDtypeStruct((B, H, W, Cp), sdt),
                   jax.ShapeDtypeStruct((B, nH, 2, Cp), jnp.float32)),
        grid=grid,
        in_specs=[tile_spec(), row_above, row_below, w_spec, b_spec],
        out_specs=(tile_spec(), st_out_spec),
        compiler_params=cparams,
    )(x_in, x_in, x_in, params["w1"], params["b1"])
    stats1 = _finalize_stats(p1, hw)

    # ---- pass 2: IN1 + ReLU + conv2 + per-tile stats -------------------------
    y2, p2 = pl.pallas_call(
        _pass2_kernel,
        out_shape=(jax.ShapeDtypeStruct((B, H, W, Cp), jnp.float32),
                   jax.ShapeDtypeStruct((B, nH, 2, Cp), jnp.float32)),
        grid=grid,
        in_specs=[tile_spec(), row_above, row_below, st_in_spec, w_spec, b_spec],
        out_specs=(tile_spec(), st_out_spec),
        compiler_params=cparams,
    )(y1, y1, y1, stats1, params["w2"], params["b2"])
    stats2 = _finalize_stats(p2, hw)

    # ---- pass 3: IN2 + residual add ------------------------------------------
    out = pl.pallas_call(
        _pass3_kernel,
        out_shape=jax.ShapeDtypeStruct((B, H, W, Cp), jnp.float32),
        grid=grid,
        in_specs=[tile_spec(), tile_spec(), st_in_spec],
        out_specs=tile_spec(),
        compiler_params=cparams,
    )(x32, y2, stats2)

    if Cp != C:
        out = out[..., :C]
    return out.astype(x.dtype)


def residual_block(x_nchw, w1, b1, w2, b2, *, compute_dtype=jnp.float32,
                   tile_h=None):
    """PyTorch-parity entry point (NCHW in/out).

    Prefer prepare_params(...) once + residual_block_nhwc(...) in a real model:
    parameters are laid out once and the NCHW<->NHWC transposes disappear.
    """
    params = prepare_params(w1, b1, w2, b2, compute_dtype=compute_dtype)
    x = jnp.transpose(x_nchw, (0, 2, 3, 1))
    y = residual_block_nhwc(x, params, compute_dtype=compute_dtype, tile_h=tile_h)
    return jnp.transpose(y, (0, 3, 1, 2))


# ----------------------------------------------------------------------------
# Pure-JAX reference (matches the PyTorch module) and self-test
# ----------------------------------------------------------------------------

def _reference(x, w1, b1, w2, b2):
    def conv(h, w, b):
        hp = jnp.pad(h, ((0, 0), (0, 0), (1, 1), (1, 1)), mode="reflect")
        y = jax.lax.conv_general_dilated(
            hp, w, window_strides=(1, 1), padding="VALID",
            dimension_numbers=("NCHW", "OIHW", "NCHW"))
        return y + b.reshape(1, -1, 1, 1)

    def inorm(y):
        m = y.mean(axis=(2, 3), keepdims=True)
        v = ((y - m) ** 2).mean(axis=(2, 3), keepdims=True)
        return (y - m) / jnp.sqrt(v + EPS)

    h = jnp.maximum(inorm(conv(x, w1, b1)), 0.0)
    h = inorm(conv(h, w2, b2))
    return x + h


if __name__ == "__main__":
    B, C, H, W = 2, 4, 16, 16

    key = jax.random.PRNGKey(0)
    kx_, kw1, kb1, kw2, kb2 = jax.random.split(key, 5)
    x = jax.random.normal(kx_, (B, C, H, W), dtype=jnp.float32)
    w1 = 0.1 * jax.random.normal(kw1, (C, C, 3, 3), dtype=jnp.float32)
    b1 = 0.1 * jax.random.normal(kb1, (C,), dtype=jnp.float32)
    w2 = 0.1 * jax.random.normal(kw2, (C, C, 3, 3), dtype=jnp.float32)
    b2 = 0.1 * jax.random.normal(kb2, (C,), dtype=jnp.float32)

    ref = _reference(x, w1, b1, w2, b2)

    # f32 path, auto tile selection: exact-semantics check (tight tolerance).
    out = residual_block(x, w1, b1, w2, b2)
    jax.block_until_ready(out)
    assert out.shape == (B, C, H, W)
    assert jnp.allclose(out, ref, atol=2e-3, rtol=2e-3), "f32 mismatch vs reference"

    # f32 path, forced multi-tile grid: exercises halo rows + partial stats.
    out_t = residual_block(x, w1, b1, w2, b2, tile_h=4)
    jax.block_until_ready(out_t)
    assert jnp.allclose(out_t, ref, atol=2e-3, rtol=2e-3), "tiled mismatch vs reference"

    # bf16 MXU path (opt-in): perf mode, looser tolerance.
    out_bf = residual_block(x, w1, b1, w2, b2, compute_dtype=jnp.bfloat16, tile_h=8)
    jax.block_until_ready(out_bf)
    assert jnp.allclose(out_bf, ref, atol=4e-2, rtol=4e-2), "bf16 mismatch vs reference"

    print("KERNEL_OK")
</pallas_src>

<mosaic_0001>
module attributes {stable_mosaic.version = 11 : i64} {
  func.func @_pass1_kernel(%arg0: i32, %arg1: i32, %arg2: memref<1x16x16x128xf32, #tpu.memory_space<vmem>>, %arg3: memref<1x1x16x128xf32, #tpu.memory_space<vmem>>, %arg4: memref<1x1x16x128xf32, #tpu.memory_space<vmem>>, %arg5: memref<3x128x384xf32, #tpu.memory_space<vmem>>, %arg6: memref<1x128xf32, #tpu.memory_space<vmem>>, %arg7: memref<1x16x16x128xf32, #tpu.memory_space<vmem>>, %arg8: memref<1x1x2x128xf32, #tpu.memory_space<vmem>>) attributes {dimension_semantics = [#tpu.dimension_semantics<parallel>, #tpu.dimension_semantics<parallel>], iteration_bounds = array<i64: 2, 1>, scalar_prefetch = 0 : i64, scratch_operands = 0 : i64, tpu.core_type = #tpu.core_type<tc>, window_params = [{transform_indices = @transform_0, window_bounds = array<i64: 1, 16, 16, 128>}, {transform_indices = @transform_1, window_bounds = array<i64: 1, 1, 16, 128>}, {transform_indices = @transform_2, window_bounds = array<i64: 1, 1, 16, 128>}, {pipeline_mode = #tpu.pipeline_mode<synchronous>, transform_indices = @transform_3, window_bounds = array<i64: 3, 128, 384>}, {pipeline_mode = #tpu.pipeline_mode<synchronous>, transform_indices = @transform_4, window_bounds = array<i64: 1, 128>}, {transform_indices = @transform_5, window_bounds = array<i64: 1, 16, 16, 128>}, {transform_indices = @transform_6, window_bounds = array<i64: 1, 1, 2, 128>}]} {
    %c0 = arith.constant 0 : index
    %c0_0 = arith.constant 0 : index
    %c0_1 = arith.constant 0 : index
    %c0_2 = arith.constant 0 : index
    %0 = vector.load %arg3[%c0, %c0_0, %c0_1, %c0_2] : memref<1x1x16x128xf32, #tpu.memory_space<vmem>>, vector<1x1x16x128xf32>
    %1 = vector.shape_cast %0 : vector<1x1x16x128xf32> to vector<1x16x128xf32>
    %c0_3 = arith.constant 0 : index
    %c0_4 = arith.constant 0 : index
    %c0_5 = arith.constant 0 : index
    %c0_6 = arith.constant 0 : index
    %2 = vector.load %arg2[%c0_3, %c0_4, %c0_5, %c0_6] : memref<1x16x16x128xf32, #tpu.memory_space<vmem>>, vector<1x16x16x128xf32>
    %3 = vector.shape_cast %2 : vector<1x16x16x128xf32> to vector<16x16x128xf32>
    %c0_7 = arith.constant 0 : index
    %c0_8 = arith.constant 0 : index
    %c0_9 = arith.constant 0 : index
    %c0_10 = arith.constant 0 : index
    %4 = vector.load %arg4[%c0_7, %c0_8, %c0_9, %c0_10] : memref<1x1x16x128xf32, #tpu.memory_space<vmem>>, vector<1x1x16x128xf32>
    %5 = vector.shape_cast %4 : vector<1x1x16x128xf32> to vector<1x16x128xf32>
    %6 = tpu.concatenate %1, %3, %5 in 0 : vector<1x16x128xf32>, vector<16x16x128xf32>, vector<1x16x128xf32> -> vector<18x16x128xf32>
    %c0_11 = arith.constant 0 : index
    %c0_12 = arith.constant 0 : index
    %7 = vector.load %arg6[%c0_11, %c0_12] : memref<1x128xf32, #tpu.memory_space<vmem>>, vector<1x128xf32>
    %8 = vector.shape_cast %7 : vector<1x128xf32> to vector<1x1x128xf32>
    %9 = vector.extract_strided_slice %6 {offsets = [0, 0, 0], sizes = [16, 16, 128], strides = [1, 1, 1]} : vector<18x16x128xf32> to vector<16x16x128xf32>
    %c0_13 = arith.constant 0 : index
    %c0_14 = arith.constant 0 : index
    %c0_15 = arith.constant 0 : index
    %10 = vector.load %arg5[%c0_13, %c0_14, %c0_15] : memref<3x128x384xf32, #tpu.memory_space<vmem>>, vector<1x128x384xf32>
    %11 = vector.shape_cast %10 : vector<1x128x384xf32> to vector<128x384xf32>
    "tpu.trace_start"() <{level = 10 : i32, message = "hwc,co->hwo"}> : () -> ()
    %cst = arith.constant dense<0.000000e+00> : vector<16x16x384xf32>
    %12 = tpu.matmul %9, %11, %cst {dimension_numbers = #tpu.dot_dimension_numbers<[2], [0], [0, 1], [1], [0, 0, 0, 1, 1, 1], [], []>} : vector<16x16x128xf32>, vector<128x384xf32>, vector<16x16x384xf32> -> vector<16x16x384xf32>
    "tpu.trace_stop"() : () -> ()
    %13 = vector.extract_strided_slice %6 {offsets = [1, 0, 0], sizes = [16, 16, 128], strides = [1, 1, 1]} : vector<18x16x128xf32> to vector<16x16x128xf32>
    %c1 = arith.constant 1 : index
    %c0_16 = arith.constant 0 : index
    %c0_17 = arith.constant 0 : index
    %14 = vector.load %arg5[%c1, %c0_16, %c0_17] : memref<3x128x384xf32, #tpu.memory_space<vmem>>, vector<1x128x384xf32>
    %15 = vector.shape_cast %14 : vector<1x128x384xf32> to vector<128x384xf32>
    "tpu.trace_start"() <{level = 10 : i32, message = "hwc,co->hwo"}> : () -> ()
    %cst_18 = arith.constant dense<0.000000e+00> : vector<16x16x384xf32>
    %16 = tpu.matmul %13, %15, %cst_18 {dimension_numbers = #tpu.dot_dimension_numbers<[2], [0], [0, 1], [1], [0, 0, 0, 1, 1, 1], [], []>} : vector<16x16x128xf32>, vector<128x384xf32>, vector<16x16x384xf32> -> vector<16x16x384xf32>
    "tpu.trace_stop"() : () -> ()
    %17 = arith.addf %12, %16 : vector<16x16x384xf32>
    %18 = vector.extract_strided_slice %6 {offsets = [2, 0, 0], sizes = [16, 16, 128], strides = [1, 1, 1]} : vector<18x16x128xf32> to vector<16x16x128xf32>
    %c2 = arith.constant 2 : index
    %c0_19 = arith.constant 0 : index
    %c0_20 = arith.constant 0 : index
    %19 = vector.load %arg5[%c2, %c0_19, %c0_20] : memref<3x128x384xf32, #tpu.memory_space<vmem>>, vector<1x128x384xf32>
    %20 = vector.shape_cast %19 : vector<1x128x384xf32> to vector<128x384xf32>
    "tpu.trace_start"() <{level = 10 : i32, message = "hwc,co->hwo"}> : () -> ()
    %cst_21 = arith.constant dense<0.000000e+00> : vector<16x16x384xf32>
    %21 = tpu.matmul %18, %20, %cst_21 {dimension_numbers = #tpu.dot_dimension_numbers<[2], [0], [0, 1], [1], [0, 0, 0, 1, 1, 1], [], []>} : vector<16x16x128xf32>, vector<128x384xf32>, vector<16x16x384xf32> -> vector<16x16x384xf32>
    "tpu.trace_stop"() : () -> ()
    %22 = arith.addf %17, %21 : vector<16x16x384xf32>
    %23 = vector.extract_strided_slice %22 {offsets = [0, 0, 0], sizes = [16, 16, 128], strides = [1, 1, 1]} : vector<16x16x384xf32> to vector<16x16x128xf32>
    %24 = vector.extract_strided_slice %22 {offsets = [0, 0, 128], sizes = [16, 16, 128], strides = [1, 1, 1]} : vector<16x16x384xf32> to vector<16x16x128xf32>
    %25 = vector.extract_strided_slice %22 {offsets = [0, 0, 256], sizes = [16, 16, 128], strides = [1, 1, 1]} : vector<16x16x384xf32> to vector<16x16x128xf32>
    %c1_i32 = arith.constant 1 : i32
    %26 = tpu.dynamic_rotate %23 by %c1_i32 dim 1 : vector<16x16x128xf32>, i32 -> vector<16x16x128xf32>
    %c15_i32 = arith.constant 15 : i32
    %27 = tpu.dynamic_rotate %25 by %c15_i32 dim 1 : vector<16x16x128xf32>, i32 -> vector<16x16x128xf32>
    %28 = tpu.iota {dimensions = array<i32: 1>} : vector<1x16x1xi32>
    %c0_i32 = arith.constant 0 : i32
    %29 = vector.broadcast %c0_i32 : i32 to vector<1x16x1xi32>
    %30 = arith.cmpi eq, %28, %29 : vector<1x16x1xi32>
    %31 = vector.extract_strided_slice %23 {offsets = [0, 1, 0], sizes = [16, 1, 128], strides = [1, 1, 1]} : vector<16x16x128xf32> to vector<16x1x128xf32>
    %32 = vector.shape_cast %30 : vector<1x16x1xi1> to vector<1x16x1xi1>
    %33 = vector.broadcast %32 : vector<1x16x1xi1> to vector<16x16x128xi1>
    %34 = vector.shape_cast %31 : vector<16x1x128xf32> to vector<16x1x128xf32>
    %35 = vector.broadcast %34 : vector<16x1x128xf32> to vector<16x16x128xf32>
    %36 = arith.select %33, %35, %26 : vector<16x16x128xi1>, vector<16x16x128xf32>
    %c15_i32_22 = arith.constant 15 : i32
    %37 = vector.broadcast %c15_i32_22 : i32 to vector<1x16x1xi32>
    %38 = arith.cmpi eq, %28, %37 : vector<1x16x1xi32>
    %39 = vector.extract_strided_slice %25 {offsets = [0, 14, 0], sizes = [16, 1, 128], strides = [1, 1, 1]} : vector<16x16x128xf32> to vector<16x1x128xf32>
    %40 = vector.shape_cast %38 : vector<1x16x1xi1> to vector<1x16x1xi1>
    %41 = vector.broadcast %40 : vector<1x16x1xi1> to vector<16x16x128xi1>
    %42 = vector.shape_cast %39 : vector<16x1x128xf32> to vector<16x1x128xf32>
    %43 = vector.broadcast %42 : vector<16x1x128xf32> to vector<16x16x128xf32>
    %44 = arith.select %41, %43, %27 : vector<16x16x128xi1>, vector<16x16x128xf32>
    %45 = arith.addf %36, %24 : vector<16x16x128xf32>
    %46 = arith.addf %45, %44 : vector<16x16x128xf32>
    %47 = vector.broadcast %8 : vector<1x1x128xf32> to vector<16x16x128xf32>
    %48 = arith.addf %46, %47 : vector<16x16x128xf32>
    %c0_23 = arith.constant 0 : index
    %c0_24 = arith.constant 0 : index
    %c0_25 = arith.constant 0 : index
    %c0_26 = arith.constant 0 : index
    %49 = vector.load %arg7[%c0_23, %c0_24, %c0_25, %c0_26] : memref<1x16x16x128xf32, #tpu.memory_space<vmem>>, vector<1x16x16x128xf32>
    %50 = vector.shape_cast %49 : vector<1x16x16x128xf32> to vector<16x16x128xf32>
    %51 = vector.shape_cast %48 : vector<16x16x128xf32> to vector<1x16x16x128xf32>
    tpu.vector_store %arg7[%c0_23, %c0_24, %c0_25, %c0_26], %51 {strides = array<i32>} : memref<1x16x16x128xf32, #tpu.memory_space<vmem>>, vector<1x16x16x128xf32>,
    %cst_27 = arith.constant dense<0.000000e+00> : vector<128xf32>
    %52 = vector.multi_reduction <add>, %48, %cst_27 [0, 1] : vector<16x16x128xf32> to vector<128xf32>
    %53 = vector.shape_cast %52 : vector<128xf32> to vector<1x1x128xf32>
    %54 = arith.mulf %48, %48 : vector<16x16x128xf32>
    %cst_28 = arith.constant dense<0.000000e+00> : vector<128xf32>
    %55 = vector.multi_reduction <add>, %54, %cst_28 [0, 1] : vector<16x16x128xf32> to vector<128xf32>
    %56 = vector.shape_cast %55 : vector<128xf32> to vector<1x1x128xf32>
    %57 = vector.shape_cast %53 : vector<1x1x128xf32> to vector<1x128xf32>
    %58 = vector.shape_cast %56 : vector<1x1x128xf32> to vector<1x128xf32>
    %59 = tpu.concatenate %57, %58 in 0 : vector<1x128xf32>, vector<1x128xf32> -> vector<2x128xf32>
    %c0_29 = arith.constant 0 : index
    %c0_30 = arith.constant 0 : index
    %c0_31 = arith.constant 0 : index
    %c0_32 = arith.constant 0 : index
    %60 = vector.load %arg8[%c0_29, %c0_30, %c0_31, %c0_32] : memref<1x1x2x128xf32, #tpu.memory_space<vmem>>, vector<1x1x2x128xf32>
    %61 = vector.shape_cast %60 : vector<1x1x2x128xf32> to vector<2x128xf32>
    %62 = vector.shape_cast %59 : vector<2x128xf32> to vector<1x1x2x128xf32>
    tpu.vector_store %arg8[%c0_29, %c0_30, %c0_31, %c0_32], %62 {strides = array<i32>} : memref<1x1x2x128xf32, #tpu.memory_space<vmem>>, vector<1x1x2x128xf32>,
    return
  }
  func.func @transform_0(%arg0: i32, %arg1: i32) -> (i32, i32, i32, i32) {
    %c0_i32 = arith.constant 0 : i32
    %c0_i32_0 = arith.constant 0 : i32
    %c0_i32_1 = arith.constant 0 : i32
    return %arg0, %arg1, %c0_i32, %c0_i32_0 : i32, i32, i32, i32
  }
  func.func @transform_1(%arg0: i32, %arg1: i32) -> (i32, i32, i32, i32) {
    %c0_i32 = arith.constant 0 : i32
    %0 = arith.cmpi eq, %arg1, %c0_i32 : i32
    %c16_i32 = arith.constant 16 : i32
    %1 = arith.muli %arg1, %c16_i32 : i32
    %c1_i32 = arith.constant 1 : i32
    %2 = arith.subi %1, %c1_i32 : i32
    %c1_i32_0 = arith.constant 1 : i32
    %3 = arith.select %0, %c1_i32_0, %2 : i32
    %c0_i32_1 = arith.constant 0 : i32
    %c0_i32_2 = arith.constant 0 : i32
    %c0_i32_3 = arith.constant 0 : i32
    return %arg0, %3, %c0_i32_1, %c0_i32_2 : i32, i32, i32, i32
  }
  func.func @transform_2(%arg0: i32, %arg1: i32) -> (i32, i32, i32, i32) {
    %c0_i32 = arith.constant 0 : i32
    %0 = arith.cmpi eq, %arg1, %c0_i32 : i32
    %c1_i32 = arith.constant 1 : i32
    %1 = arith.addi %arg1, %c1_i32 : i32
    %c16_i32 = arith.constant 16 : i32
    %2 = arith.muli %1, %c16_i32 : i32
    %c14_i32 = arith.constant 14 : i32
    %3 = arith.select %0, %c14_i32, %2 : i32
    %c0_i32_0 = arith.constant 0 : i32
    %c0_i32_1 = arith.constant 0 : i32
    %c0_i32_2 = arith.constant 0 : i32
    return %arg0, %3, %c0_i32_0, %c0_i32_1 : i32, i32, i32, i32
  }
  func.func @transform_3(%arg0: i32, %arg1: i32) -> (i32, i32, i32) {
    %c0_i32 = arith.constant 0 : i32
    %c0_i32_0 = arith.constant 0 : i32
    %c0_i32_1 = arith.constant 0 : i32
    %c0_i32_2 = arith.constant 0 : i32
    return %c0_i32, %c0_i32_0, %c0_i32_1 : i32, i32, i32
  }
  func.func @transform_4(%arg0: i32, %arg1: i32) -> (i32, i32) {
    %c0_i32 = arith.constant 0 : i32
    %c0_i32_0 = arith.constant 0 : i32
    %c0_i32_1 = arith.constant 0 : i32
    return %c0_i32, %c0_i32_0 : i32, i32
  }
  func.func @transform_5(%arg0: i32, %arg1: i32) -> (i32, i32, i32, i32) {
    %c0_i32 = arith.constant 0 : i32
    %c0_i32_0 = arith.constant 0 : i32
    %c0_i32_1 = arith.constant 0 : i32
    return %arg0, %arg1, %c0_i32, %c0_i32_0 : i32, i32, i32, i32
  }
  func.func @transform_6(%arg0: i32, %arg1: i32) -> (i32, i32, i32, i32) {
    %c0_i32 = arith.constant 0 : i32
    %c0_i32_0 = arith.constant 0 : i32
    %c0_i32_1 = arith.constant 0 : i32
    return %arg0, %arg1, %c0_i32, %c0_i32_0 : i32, i32, i32, i32
  }
}

module attributes {stable_mosaic.version = 11 : i64} {
  func.func @_pass3_kernel(%arg0: i32, %arg1: i32, %arg2: memref<1x16x16x128xf32, #tpu.memory_space<vmem>>, %arg3: memref<1x16x16x128xf32, #tpu.memory_space<vmem>>, %arg4: memref<1x2x128xf32, #tpu.memory_space<vmem>>, %arg5: memref<1x16x16x128xf32, #tpu.memory_space<vmem>>) attributes {dimension_semantics = [#tpu.dimension_semantics<parallel>, #tpu.dimension_semantics<parallel>], iteration_bounds = array<i64: 2, 1>, scalar_prefetch = 0 : i64, scratch_operands = 0 : i64, tpu.core_type = #tpu.core_type<tc>, window_params = [{transform_indices = @transform_0, window_bounds = array<i64: 1, 16, 16, 128>}, {transform_indices = @transform_1, window_bounds = array<i64: 1, 16, 16, 128>}, {transform_indices = @transform_2, window_bounds = array<i64: 1, 2, 128>}, {transform_indices = @transform_3, window_bounds = array<i64: 1, 16, 16, 128>}]} {
    %c0 = arith.constant 0 : index
    %c0_0 = arith.constant 0 : index
    %c0_1 = arith.constant 0 : index
    %0 = vector.load %arg4[%c0, %c0_0, %c0_1] : memref<1x2x128xf32, #tpu.memory_space<vmem>>, vector<1x2x128xf32>
    %1 = vector.extract_strided_slice %0 {offsets = [0, 0, 0], sizes = [1, 1, 128], strides = [1, 1, 1]} : vector<1x2x128xf32> to vector<1x1x128xf32>
    %2 = vector.extract_strided_slice %0 {offsets = [0, 1, 0], sizes = [1, 1, 128], strides = [1, 1, 1]} : vector<1x2x128xf32> to vector<1x1x128xf32>
    %c0_2 = arith.constant 0 : index
    %c0_3 = arith.constant 0 : index
    %c0_4 = arith.constant 0 : index
    %c0_5 = arith.constant 0 : index
    %3 = vector.load %arg2[%c0_2, %c0_3, %c0_4, %c0_5] : memref<1x16x16x128xf32, #tpu.memory_space<vmem>>, vector<1x16x16x128xf32>
    %c0_6 = arith.constant 0 : index
    %c0_7 = arith.constant 0 : index
    %c0_8 = arith.constant 0 : index
    %c0_9 = arith.constant 0 : index
    %4 = vector.load %arg3[%c0_6, %c0_7, %c0_8, %c0_9] : memref<1x16x16x128xf32, #tpu.memory_space<vmem>>, vector<1x16x16x128xf32>
    %5 = vector.shape_cast %1 : vector<1x1x128xf32> to vector<1x1x1x128xf32>
    %6 = vector.broadcast %5 : vector<1x1x1x128xf32> to vector<1x16x16x128xf32>
    %7 = arith.subf %4, %6 : vector<1x16x16x128xf32>
    %8 = vector.shape_cast %2 : vector<1x1x128xf32> to vector<1x1x1x128xf32>
    %9 = vector.broadcast %8 : vector<1x1x1x128xf32> to vector<1x16x16x128xf32>
    %10 = arith.mulf %7, %9 : vector<1x16x16x128xf32>
    %11 = arith.addf %3, %10 : vector<1x16x16x128xf32>
    %c0_10 = arith.constant 0 : index
    %c0_11 = arith.constant 0 : index
    %c0_12 = arith.constant 0 : index
    %c0_13 = arith.constant 0 : index
    %12 = vector.load %arg5[%c0_10, %c0_11, %c0_12, %c0_13] : memref<1x16x16x128xf32, #tpu.memory_space<vmem>>, vector<1x16x16x128xf32>
    tpu.vector_store %arg5[%c0_10, %c0_11, %c0_12, %c0_13], %11 {strides = array<i32>} : memref<1x16x16x128xf32, #tpu.memory_space<vmem>>, vector<1x16x16x128xf32>,
    return
  }
  func.func @transform_0(%arg0: i32, %arg1: i32) -> (i32, i32, i32, i32) {
    %c0_i32 = arith.constant 0 : i32
    %c0_i32_0 = arith.constant 0 : i32
    %c0_i32_1 = arith.constant 0 : i32
    return %arg0, %arg1, %c0_i32, %c0_i32_0 : i32, i32, i32, i32
  }
  func.func @transform_1(%arg0: i32, %arg1: i32) -> (i32, i32, i32, i32) {
    %c0_i32 = arith.constant 0 : i32
    %c0_i32_0 = arith.constant 0 : i32
    %c0_i32_1 = arith.constant 0 : i32
    return %arg0, %arg1, %c0_i32, %c0_i32_0 : i32, i32, i32, i32
  }
  func.func @transform_2(%arg0: i32, %arg1: i32) -> (i32, i32, i32) {
    %c0_i32 = arith.constant 0 : i32
    %c0_i32_0 = arith.constant 0 : i32
    %c0_i32_1 = arith.constant 0 : i32
    return %arg0, %c0_i32, %c0_i32_0 : i32, i32, i32
  }
  func.func @transform_3(%arg0: i32, %arg1: i32) -> (i32, i32, i32, i32) {
    %c0_i32 = arith.constant 0 : i32
    %c0_i32_0 = arith.constant 0 : i32
    %c0_i32_1 = arith.constant 0 : i32
    return %arg0, %arg1, %c0_i32, %c0_i32_0 : i32, i32, i32, i32
  }
}

module attributes {stable_mosaic.version = 11 : i64} {
  func.func @_pass2_kernel(%arg0: i32, %arg1: i32, %arg2: memref<1x16x16x128xf32, #tpu.memory_space<vmem>>, %arg3: memref<1x1x16x128xf32, #tpu.memory_space<vmem>>, %arg4: memref<1x1x16x128xf32, #tpu.memory_space<vmem>>, %arg5: memref<1x2x128xf32, #tpu.memory_space<vmem>>, %arg6: memref<3x128x384xf32, #tpu.memory_space<vmem>>, %arg7: memref<1x128xf32, #tpu.memory_space<vmem>>, %arg8: memref<1x16x16x128xf32, #tpu.memory_space<vmem>>, %arg9: memref<1x1x2x128xf32, #tpu.memory_space<vmem>>) attributes {dimension_semantics = [#tpu.dimension_semantics<parallel>, #tpu.dimension_semantics<parallel>], iteration_bounds = array<i64: 2, 1>, scalar_prefetch = 0 : i64, scratch_operands = 0 : i64, tpu.core_type = #tpu.core_type<tc>, window_params = [{transform_indices = @transform_0, window_bounds = array<i64: 1, 16, 16, 128>}, {transform_indices = @transform_1, window_bounds = array<i64: 1, 1, 16, 128>}, {transform_indices = @transform_2, window_bounds = array<i64: 1, 1, 16, 128>}, {transform_indices = @transform_3, window_bounds = array<i64: 1, 2, 128>}, {pipeline_mode = #tpu.pipeline_mode<synchronous>, transform_indices = @transform_4, window_bounds = array<i64: 3, 128, 384>}, {pipeline_mode = #tpu.pipeline_mode<synchronous>, transform_indices = @transform_5, window_bounds = array<i64: 1, 128>}, {transform_indices = @transform_6, window_bounds = array<i64: 1, 16, 16, 128>}, {transform_indices = @transform_7, window_bounds = array<i64: 1, 1, 2, 128>}]} {
    %c0 = arith.constant 0 : index
    %c0_0 = arith.constant 0 : index
    %c0_1 = arith.constant 0 : index
    %0 = vector.load %arg5[%c0, %c0_0, %c0_1] : memref<1x2x128xf32, #tpu.memory_space<vmem>>, vector<1x2x128xf32>
    %1 = vector.extract_strided_slice %0 {offsets = [0, 0, 0], sizes = [1, 1, 128], strides = [1, 1, 1]} : vector<1x2x128xf32> to vector<1x1x128xf32>
    %2 = vector.extract_strided_slice %0 {offsets = [0, 1, 0], sizes = [1, 1, 128], strides = [1, 1, 1]} : vector<1x2x128xf32> to vector<1x1x128xf32>
    %c0_2 = arith.constant 0 : index
    %c0_3 = arith.constant 0 : index
    %c0_4 = arith.constant 0 : index
    %c0_5 = arith.constant 0 : index
    %3 = vector.load %arg3[%c0_2, %c0_3, %c0_4, %c0_5] : memref<1x1x16x128xf32, #tpu.memory_space<vmem>>, vector<1x1x16x128xf32>
    %4 = vector.shape_cast %3 : vector<1x1x16x128xf32> to vector<1x16x128xf32>
    %c0_6 = arith.constant 0 : index
    %c0_7 = arith.constant 0 : index
    %c0_8 = arith.constant 0 : index
    %c0_9 = arith.constant 0 : index
    %5 = vector.load %arg2[%c0_6, %c0_7, %c0_8, %c0_9] : memref<1x16x16x128xf32, #tpu.memory_space<vmem>>, vector<1x16x16x128xf32>
    %6 = vector.shape_cast %5 : vector<1x16x16x128xf32> to vector<16x16x128xf32>
    %c0_10 = arith.constant 0 : index
    %c0_11 = arith.constant 0 : index
    %c0_12 = arith.constant 0 : index
    %c0_13 = arith.constant 0 : index
    %7 = vector.load %arg4[%c0_10, %c0_11, %c0_12, %c0_13] : memref<1x1x16x128xf32, #tpu.memory_space<vmem>>, vector<1x1x16x128xf32>
    %8 = vector.shape_cast %7 : vector<1x1x16x128xf32> to vector<1x16x128xf32>
    %9 = tpu.concatenate %4, %6, %8 in 0 : vector<1x16x128xf32>, vector<16x16x128xf32>, vector<1x16x128xf32> -> vector<18x16x128xf32>
    %10 = vector.broadcast %1 : vector<1x1x128xf32> to vector<18x16x128xf32>
    %11 = arith.subf %9, %10 : vector<18x16x128xf32>
    %12 = vector.broadcast %2 : vector<1x1x128xf32> to vector<18x16x128xf32>
    %13 = arith.mulf %11, %12 : vector<18x16x128xf32>
    %cst = arith.constant 0.000000e+00 : f32
    %14 = vector.broadcast %cst : f32 to vector<18x16x128xf32>
    %15 = arith.maximumf %13, %14 : vector<18x16x128xf32>
    %c0_14 = arith.constant 0 : index
    %c0_15 = arith.constant 0 : index
    %16 = vector.load %arg7[%c0_14, %c0_15] : memref<1x128xf32, #tpu.memory_space<vmem>>, vector<1x128xf32>
    %17 = vector.shape_cast %16 : vector<1x128xf32> to vector<1x1x128xf32>
    %18 = vector.extract_strided_slice %15 {offsets = [0, 0, 0], sizes = [16, 16, 128], strides = [1, 1, 1]} : vector<18x16x128xf32> to vector<16x16x128xf32>
    %c0_16 = arith.constant 0 : index
    %c0_17 = arith.constant 0 : index
    %c0_18 = arith.constant 0 : index
    %19 = vector.load %arg6[%c0_16, %c0_17, %c0_18] : memref<3x128x384xf32, #tpu.memory_space<vmem>>, vector<1x128x384xf32>
    %20 = vector.shape_cast %19 : vector<1x128x384xf32> to vector<128x384xf32>
    "tpu.trace_start"() <{level = 10 : i32, message = "hwc,co->hwo"}> : () -> ()
    %cst_19 = arith.constant dense<0.000000e+00> : vector<16x16x384xf32>
    %21 = tpu.matmul %18, %20, %cst_19 {dimension_numbers = #tpu.dot_dimension_numbers<[2], [0], [0, 1], [1], [0, 0, 0, 1, 1, 1], [], []>} : vector<16x16x128xf32>, vector<128x384xf32>, vector<16x16x384xf32> -> vector<16x16x384xf32>
    "tpu.trace_stop"() : () -> ()
    %22 = vector.extract_strided_slice %15 {offsets = [1, 0, 0], sizes = [16, 16, 128], strides = [1, 1, 1]} : vector<18x16x128xf32> to vector<16x16x128xf32>
    %c1 = arith.constant 1 : index
    %c0_20 = arith.constant 0 : index
    %c0_21 = arith.constant 0 : index
    %23 = vector.load %arg6[%c1, %c0_20, %c0_21] : memref<3x128x384xf32, #tpu.memory_space<vmem>>, vector<1x128x384xf32>
    %24 = vector.shape_cast %23 : vector<1x128x384xf32> to vector<128x384xf32>
    "tpu.trace_start"() <{level = 10 : i32, message = "hwc,co->hwo"}> : () -> ()
    %cst_22 = arith.constant dense<0.000000e+00> : vector<16x16x384xf32>
    %25 = tpu.matmul %22, %24, %cst_22 {dimension_numbers = #tpu.dot_dimension_numbers<[2], [0], [0, 1], [1], [0, 0, 0, 1, 1, 1], [], []>} : vector<16x16x128xf32>, vector<128x384xf32>, vector<16x16x384xf32> -> vector<16x16x384xf32>
    "tpu.trace_stop"() : () -> ()
    %26 = arith.addf %21, %25 : vector<16x16x384xf32>
    %27 = vector.extract_strided_slice %15 {offsets = [2, 0, 0], sizes = [16, 16, 128], strides = [1, 1, 1]} : vector<18x16x128xf32> to vector<16x16x128xf32>
    %c2 = arith.constant 2 : index
    %c0_23 = arith.constant 0 : index
    %c0_24 = arith.constant 0 : index
    %28 = vector.load %arg6[%c2, %c0_23, %c0_24] : memref<3x128x384xf32, #tpu.memory_space<vmem>>, vector<1x128x384xf32>
    %29 = vector.shape_cast %28 : vector<1x128x384xf32> to vector<128x384xf32>
    "tpu.trace_start"() <{level = 10 : i32, message = "hwc,co->hwo"}> : () -> ()
    %cst_25 = arith.constant dense<0.000000e+00> : vector<16x16x384xf32>
    %30 = tpu.matmul %27, %29, %cst_25 {dimension_numbers = #tpu.dot_dimension_numbers<[2], [0], [0, 1], [1], [0, 0, 0, 1, 1, 1], [], []>} : vector<16x16x128xf32>, vector<128x384xf32>, vector<16x16x384xf32> -> vector<16x16x384xf32>
    "tpu.trace_stop"() : () -> ()
    %31 = arith.addf %26, %30 : vector<16x16x384xf32>
    %32 = vector.extract_strided_slice %31 {offsets = [0, 0, 0], sizes = [16, 16, 128], strides = [1, 1, 1]} : vector<16x16x384xf32> to vector<16x16x128xf32>
    %33 = vector.extract_strided_slice %31 {offsets = [0, 0, 128], sizes = [16, 16, 128], strides = [1, 1, 1]} : vector<16x16x384xf32> to vector<16x16x128xf32>
    %34 = vector.extract_strided_slice %31 {offsets = [0, 0, 256], sizes = [16, 16, 128], strides = [1, 1, 1]} : vector<16x16x384xf32> to vector<16x16x128xf32>
    %c1_i32 = arith.constant 1 : i32
    %35 = tpu.dynamic_rotate %32 by %c1_i32 dim 1 : vector<16x16x128xf32>, i32 -> vector<16x16x128xf32>
    %c15_i32 = arith.constant 15 : i32
    %36 = tpu.dynamic_rotate %34 by %c15_i32 dim 1 : vector<16x16x128xf32>, i32 -> vector<16x16x128xf32>
    %37 = tpu.iota {dimensions = array<i32: 1>} : vector<1x16x1xi32>
    %c0_i32 = arith.constant 0 : i32
    %38 = vector.broadcast %c0_i32 : i32 to vector<1x16x1xi32>
    %39 = arith.cmpi eq, %37, %38 : vector<1x16x1xi32>
    %40 = vector.extract_strided_slice %32 {offsets = [0, 1, 0], sizes = [16, 1, 128], strides = [1, 1, 1]} : vector<16x16x128xf32> to vector<16x1x128xf32>
    %41 = vector.shape_cast %39 : vector<1x16x1xi1> to vector<1x16x1xi1>
    %42 = vector.broadcast %41 : vector<1x16x1xi1> to vector<16x16x128xi1>
    %43 = vector.shape_cast %40 : vector<16x1x128xf32> to vector<16x1x128xf32>
    %44 = vector.broadcast %43 : vector<16x1x128xf32> to vector<16x16x128xf32>
    %45 = arith.select %42, %44, %35 : vector<16x16x128xi1>, vector<16x16x128xf32>
    %c15_i32_26 = arith.constant 15 : i32
    %46 = vector.broadcast %c15_i32_26 : i32 to vector<1x16x1xi32>
    %47 = arith.cmpi eq, %37, %46 : vector<1x16x1xi32>
    %48 = vector.extract_strided_slice %34 {offsets = [0, 14, 0], sizes = [16, 1, 128], strides = [1, 1, 1]} : vector<16x16x128xf32> to vector<16x1x128xf32>
    %49 = vector.shape_cast %47 : vector<1x16x1xi1> to vector<1x16x1xi1>
    %50 = vector.broadcast %49 : vector<1x16x1xi1> to vector<16x16x128xi1>
    %51 = vector.shape_cast %48 : vector<16x1x128xf32> to vector<16x1x128xf32>
    %52 = vector.broadcast %51 : vector<16x1x128xf32> to vector<16x16x128xf32>
    %53 = arith.select %50, %52, %36 : vector<16x16x128xi1>, vector<16x16x128xf32>
    %54 = arith.addf %45, %33 : vector<16x16x128xf32>
    %55 = arith.addf %54, %53 : vector<16x16x128xf32>
    %56 = vector.broadcast %17 : vector<1x1x128xf32> to vector<16x16x128xf32>
    %57 = arith.addf %55, %56 : vector<16x16x128xf32>
    %c0_27 = arith.constant 0 : index
    %c0_28 = arith.constant 0 : index
    %c0_29 = arith.constant 0 : index
    %c0_30 = arith.constant 0 : index
    %58 = vector.load %arg8[%c0_27, %c0_28, %c0_29, %c0_30] : memref<1x16x16x128xf32, #tpu.memory_space<vmem>>, vector<1x16x16x128xf32>
    %59 = vector.shape_cast %58 : vector<1x16x16x128xf32> to vector<16x16x128xf32>
    %60 = vector.shape_cast %57 : vector<16x16x128xf32> to vector<1x16x16x128xf32>
    tpu.vector_store %arg8[%c0_27, %c0_28, %c0_29, %c0_30], %60 {strides = array<i32>} : memref<1x16x16x128xf32, #tpu.memory_space<vmem>>, vector<1x16x16x128xf32>,
    %cst_31 = arith.constant dense<0.000000e+00> : vector<128xf32>
    %61 = vector.multi_reduction <add>, %57, %cst_31 [0, 1] : vector<16x16x128xf32> to vector<128xf32>
    %62 = vector.shape_cast %61 : vector<128xf32> to vector<1x1x128xf32>
    %63 = arith.mulf %57, %57 : vector<16x16x128xf32>
    %cst_32 = arith.constant dense<0.000000e+00> : vector<128xf32>
    %64 = vector.multi_reduction <add>, %63, %cst_32 [0, 1] : vector<16x16x128xf32> to vector<128xf32>
    %65 = vector.shape_cast %64 : vector<128xf32> to vector<1x1x128xf32>
    %66 = vector.shape_cast %62 : vector<1x1x128xf32> to vector<1x128xf32>
    %67 = vector.shape_cast %65 : vector<1x1x128xf32> to vector<1x128xf32>
    %68 = tpu.concatenate %66, %67 in 0 : vector<1x128xf32>, vector<1x128xf32> -> vector<2x128xf32>
    %c0_33 = arith.constant 0 : index
    %c0_34 = arith.constant 0 : index
    %c0_35 = arith.constant 0 : index
    %c0_36 = arith.constant 0 : index
    %69 = vector.load %arg9[%c0_33, %c0_34, %c0_35, %c0_36] : memref<1x1x2x128xf32, #tpu.memory_space<vmem>>, vector<1x1x2x128xf32>
    %70 = vector.shape_cast %69 : vector<1x1x2x128xf32> to vector<2x128xf32>
    %71 = vector.shape_cast %68 : vector<2x128xf32> to vector<1x1x2x128xf32>
    tpu.vector_store %arg9[%c0_33, %c0_34, %c0_35, %c0_36], %71 {strides = array<i32>} : memref<1x1x2x128xf32, #tpu.memory_space<vmem>>, vector<1x1x2x128xf32>,
    return
  }
  func.func @transform_0(%arg0: i32, %arg1: i32) -> (i32, i32, i32, i32) {
    %c0_i32 = arith.constant 0 : i32
    %c0_i32_0 = arith.constant 0 : i32
    %c0_i32_1 = arith.constant 0 : i32
    return %arg0, %arg1, %c0_i32, %c0_i32_0 : i32, i32, i32, i32
  }
  func.func @transform_1(%arg0: i32, %arg1: i32) -> (i32, i32, i32, i32) {
    %c0_i32 = arith.constant 0 : i32
    %0 = arith.cmpi eq, %arg1, %c0_i32 : i32
    %c16_i32 = arith.constant 16 : i32
    %1 = arith.muli %arg1, %c16_i32 : i32
    %c1_i32 = arith.constant 1 : i32
    %2 = arith.subi %1, %c1_i32 : i32
    %c1_i32_0 = arith.constant 1 : i32
    %3 = arith.select %0, %c1_i32_0, %2 : i32
    %c0_i32_1 = arith.constant 0 : i32
    %c0_i32_2 = arith.constant 0 : i32
    %c0_i32_3 = arith.constant 0 : i32
    return %arg0, %3, %c0_i32_1, %c0_i32_2 : i32, i32, i32, i32
  }
  func.func @transform_2(%arg0: i32, %arg1: i32) -> (i32, i32, i32, i32) {
    %c0_i32 = arith.constant 0 : i32
    %0 = arith.cmpi eq, %arg1, %c0_i32 : i32
    %c1_i32 = arith.constant 1 : i32
    %1 = arith.addi %arg1, %c1_i32 : i32
    %c16_i32 = arith.constant 16 : i32
    %2 = arith.muli %1, %c16_i32 : i32
    %c14_i32 = arith.constant 14 : i32
    %3 = arith.select %0, %c14_i32, %2 : i32
    %c0_i32_0 = arith.constant 0 : i32
    %c0_i32_1 = arith.constant 0 : i32
    %c0_i32_2 = arith.constant 0 : i32
    return %arg0, %3, %c0_i32_0, %c0_i32_1 : i32, i32, i32, i32
  }
  func.func @transform_3(%arg0: i32, %arg1: i32) -> (i32, i32, i32) {
    %c0_i32 = arith.constant 0 : i32
    %c0_i32_0 = arith.constant 0 : i32
    %c0_i32_1 = arith.constant 0 : i32
    return %arg0, %c0_i32, %c0_i32_0 : i32, i32, i32
  }
  func.func @transform_4(%arg0: i32, %arg1: i32) -> (i32, i32, i32) {
    %c0_i32 = arith.constant 0 : i32
    %c0_i32_0 = arith.constant 0 : i32
    %c0_i32_1 = arith.constant 0 : i32
    %c0_i32_2 = arith.constant 0 : i32
    return %c0_i32, %c0_i32_0, %c0_i32_1 : i32, i32, i32
  }
  func.func @transform_5(%arg0: i32, %arg1: i32) -> (i32, i32) {
    %c0_i32 = arith.constant 0 : i32
    %c0_i32_0 = arith.constant 0 : i32
    %c0_i32_1 = arith.constant 0 : i32
    return %c0_i32, %c0_i32_0 : i32, i32
  }
  func.func @transform_6(%arg0: i32, %arg1: i32) -> (i32, i32, i32, i32) {
    %c0_i32 = arith.constant 0 : i32
    %c0_i32_0 = arith.constant 0 : i32
    %c0_i32_1 = arith.constant 0 : i32
    return %arg0, %arg1, %c0_i32, %c0_i32_0 : i32, i32, i32, i32
  }
  func.func @transform_7(%arg0: i32, %arg1: i32) -> (i32, i32, i32, i32) {
    %c0_i32 = arith.constant 0 : i32
    %c0_i32_0 = arith.constant 0 : i32
    %c0_i32_1 = arith.constant 0 : i32
    return %arg0, %arg1, %c0_i32, %c0_i32_0 : i32, i32, i32, i32
  }
}

</mosaic_0001>

<bundles_post_ra>
// kernel: residual_block_nhwc.5
= control target key start
LH: loop header
LB: loop body
LE: loop exit
PB: predicated region body
PF: predicated region fallthrough
CT: control target
= control target key end

     0   :  { %s680_s12 = smov 0   ;;  %s682_s13 = smov 0   ;;  %s894_s0 = inlined_call_operand.vmem [shape: f32[2,16,16,128], index: 0, kind: input, shape index: {}]   ;;  %s895_s1 = inlined_call_operand.vmem [shape: f32[2,16,16,128], index: 1, kind: input, shape index: {}]   ;;  %s896_s2 = inlined_call_operand.vmem [shape: f32[2,2,128], index: 2, kind: input, shape index: {}]   ;;  %s897_s3 = inlined_call_operand.vmem [shape: f32[2,16,16,128], index: 3, kind: output, shape index: {}]  }
   0x1   :  { %s684_s14 = smov 0  }
   0x2 LB: > { %s25_s15 = sadd.s32 1, %s654_s13  ;;  %p599_p0 = scmp.ge.s32.totalorder %s658_s14, 1  ;;  %s658_s14 = sphi %s684_s14, %s13_s14   ;;  %s654_s13 = sphi %s682_s13, %s899_s13   ;;  %s650_s12 = sphi %s680_s12, %s898_s12  }
   0x3   : > { %p27_p1 = scmp.ge.s32.totalorder %s25_s15, 2  ;;  %p186_p2 = scmp.lt.s32.totalorder %s658_s14, 3 }
   0x5   : > { %s901_s15 = smov (%p27_p1, %s25_s15), 0  ;;  %p187_p3 = pnand %p599_p0, %p186_p2 }
   0x6   : > { %p235_p4 = scmp.lt.s32.totalorder (!%p187_p3), %s650_s12, 1 }
   0x7   : > { %190 = sbr.rel (%p187_p3) target bundleno = 56 (0x38), region = 32 }
   0xc   : > { %s903_s12 = smov (!%p235_p4, %s650_s12), 1 }
   0xd   : > { %s698_s16 = sshll.u32 %s903_s12, 8  ;;  %s604_s17 = sshll.u32 %s903_s12, 1 }
   0xe   : > { %s704_s20 = scalar_lea.vmem %s895_s1, %s698_s16  ;;  %s259_s23 = scalar_lea.vmem %s896_s2, %s604_s17 }
   0xf   : > { %s713_s26 = scalar_lea.vmem %s894_s0, %s698_s16  ;;  %v271_v0 = vld [vmem:[%s259_s23] sm:$0x3]  ;;  %v305_v2 = vld [vmem:[%s704_s20 + $0x8] sm:$0xff]  ;;  %v306_v5 = vld [vmem:[%s704_s20 + $0x10] sm:$0xff]  ;;  %s747_s29 = scalar_lea.vmem %s897_s3, %s698_s16 }
  0x10   : > { %v304_v1 = vld [vmem:[%s704_s20] sm:$0xff]  ;;  %v717_v3 = vperm.slane %v271_v0, 0  ;;  %v719_v4 = vperm.slane %v271_v0, 1  ;;  %v307_v6 = vld [vmem:[%s704_s20 + $0x18] sm:$0xff]  ;;  %v309_v13 = vld [vmem:[%s704_s20 + $0x28] sm:$0xff] }
  0x11   : > { %v308_v7 = vld [vmem:[%s704_s20 + $0x20] sm:$0xff]  ;;  %v310_v14 = vld [vmem:[%s704_s20 + $0x30] sm:$0xff]  ;;  %v273_v15 = vld [vmem:[%s713_s26 + $0x8] sm:$0xff] }
  0x12   : > { %v272_v8 = vld [vmem:[%s713_s26] sm:$0xff]  ;;  %v337_v9 = vsub.f32 %v304_v1, %v717_v3  ;;  %v338_v10 = vsub.f32 %v305_v2, %v717_v3  ;;  %v339_v11 = vsub.f32 %v306_v5, %v717_v3  ;;  %v340_v12 = vsub.f32 %v307_v6, %v717_v3  ;;  %v274_v16 = vld [vmem:[%s713_s26 + $0x10] sm:$0xff]  ;;  %v311_v20 = vld [vmem:[%s704_s20 + $0x38] sm:$0xff] }
  0x13   : > { %v341_v17 = vsub.f32 %v308_v7, %v717_v3  ;;  %v342_v18 = vsub.f32 %v309_v13, %v717_v3  ;;  %v343_v19 = vsub.f32 %v310_v14, %v717_v3  ;;  %v275_v24 = vld [vmem:[%s713_s26 + $0x18] sm:$0xff]  ;;  %v276_v26 = vld [vmem:[%s713_s26 + $0x20] sm:$0xff]  ;;  %v344_v29 = vsub.f32 %v311_v20, %v717_v3  ;;  %v313_v31 = vld [vmem:[%s704_s20 + $0x48] sm:$0xff] }
  0x14   : > { %v370_v21 = vmul.f32 %v719_v4, %v337_v9  ;;  %v371_v22 = vmul.f32 %v719_v4, %v338_v10  ;;  %v372_v23 = vmul.f32 %v719_v4, %v339_v11  ;;  %v373_v25 = vmul.f32 %v719_v4, %v340_v12  ;;  %v312_v30 = vld [vmem:[%s704_s20 + $0x40] sm:$0xff]  ;;  %v314_v32 = vld [vmem:[%s704_s20 + $0x50] sm:$0xff]  ;;  %v277_v36 = vld [vmem:[%s713_s26 + $0x28] sm:$0xff] }
  0x15   : > { %v374_v27 = vmul.f32 %v719_v4, %v341_v17  ;;  %v375_v28 = vmul.f32 %v719_v4, %v342_v18  ;;  %v376_v37 = vmul.f32 %v719_v4, %v343_v19  ;;  %v315_v38 = vld [vmem:[%s704_s20 + $0x58] sm:$0xff]  ;;  %v316_v39 = vld [vmem:[%s704_s20 + $0x60] sm:$0xff]  ;;  %v278_v42 = vld [vmem:[%s713_s26 + $0x30] sm:$0xff]  ;;  %v377_v43 = vmul.f32 %v719_v4, %v344_v29 }
  0x16   : > { %v402_v33 = vadd.f32 %v370_v21, %v272_v8  ;;  %v403_v34 = vadd.f32 %v371_v22, %v273_v15  ;;  %v404_v35 = vadd.f32 %v372_v23, %v274_v16  ;;  %v405_v40 = vadd.f32 %v373_v25, %v275_v24  ;;  %v317_v44 = vld [vmem:[%s704_s20 + $0x68] sm:$0xff]  ;;  %v279_v45 = vld [vmem:[%s713_s26 + $0x38] sm:$0xff]  ;;  %v318_v50 = vld [vmem:[%s704_s20 + $0x70] sm:$0xff] }
  0x17   : > { %v406_v41 = vadd.f32 %v374_v27, %v276_v26  ;;  %v345_v46 = vsub.f32 %v312_v30, %v717_v3  ;;  %v346_v47 = vsub.f32 %v313_v31, %v717_v3  ;;  %v347_v48 = vsub.f32 %v314_v32, %v717_v3  ;;  %v319_v51 = vld [vmem:[%s704_s20 + $0x78] sm:$0xff]  ;;  %v280_v53 = vld [vmem:[%s713_s26 + $0x40] sm:$0xff]  ;;  %v281_v59 = vld [vmem:[%s713_s26 + $0x48] sm:$0xff] }
  0x18   : > { %434 = vst [vmem:[%s747_s29] sm:$0xff] %v402_v33  ;;  %v348_v49 = vsub.f32 %v315_v38, %v717_v3  ;;  %v407_v52 = vadd.f32 %v375_v28, %v277_v36  ;;  %v349_v54 = vsub.f32 %v316_v39, %v717_v3  ;;  %v350_v55 = vsub.f32 %v317_v44, %v717_v3  ;;  %v282_v61 = vld [vmem:[%s713_s26 + $0x50] sm:$0xff]  ;;  %v320_v2 = vld [vmem:[%s704_s20 + $0x80] sm:$0xff]  ;;  %v321_v5 = vld [vmem:[%s704_s20 + $0x88] sm:$0xff] }
  0x19   : > { %435 = vst [vmem:[%s747_s29 + $0x8] sm:$0xff] %v403_v34  ;;  %v351_v56 = vsub.f32 %v318_v50, %v717_v3  ;;  %v408_v57 = vadd.f32 %v376_v37, %v278_v42  ;;  %v378_v58 = vmul.f32 %v719_v4, %v345_v46  ;;  %v379_v60 = vmul.f32 %v719_v4, %v346_v47  ;;  %v322_v6 = vld [vmem:[%s704_s20 + $0x90] sm:$0xff]  ;;  %v283_v8 = vld [vmem:[%s713_s26 + $0x58] sm:$0xff]  ;;  %v284_v12 = vld [vmem:[%s713_s26 + $0x60] sm:$0xff] }
  0x1a   : > { %436 = vst [vmem:[%s747_s29 + $0x10] sm:$0xff] %v404_v35  ;;  %v380_v62 = vmul.f32 %v719_v4, %v347_v48  ;;  %v409_v63 = vadd.f32 %v377_v43, %v279_v45  ;;  %v381_v0 = vmul.f32 %v719_v4, %v348_v49  ;;  %v352_v1 = vsub.f32 %v319_v51, %v717_v3  ;;  %v323_v10 = vld [vmem:[%s704_s20 + $0x98] sm:$0xff]  ;;  %v324_v15 = vld [vmem:[%s704_s20 + $0xa0] sm:$0xff]  ;;  %v285_v17 = vld [vmem:[%s713_s26 + $0x68] sm:$0xff] }
  0x1b   : > { %437 = vst [vmem:[%s747_s29 + $0x18] sm:$0xff] %v405_v40  ;;  %v410_v7 = vadd.f32 %v378_v58, %v280_v53  ;;  %v382_v9 = vmul.f32 %v719_v4, %v349_v54  ;;  %v411_v11 = vadd.f32 %v379_v60, %v281_v59  ;;  %v383_v13 = vmul.f32 %v719_v4, %v350_v55  ;;  %v325_v21 = vld [vmem:[%s704_s20 + $0xa8] sm:$0xff]  ;;  %v286_v23 = vld [vmem:[%s713_s26 + $0x70] sm:$0xff]  ;;  %v287_v28 = vld [vmem:[%s713_s26 + $0x78] sm:$0xff] }
  0x1c   : > { %438 = vst [vmem:[%s747_s29 + $0x20] sm:$0xff] %v406_v41  ;;  %v384_v14 = vmul.f32 %v719_v4, %v351_v56  ;;  %v412_v16 = vadd.f32 %v380_v62, %v282_v61  ;;  %v353_v18 = vsub.f32 %v320_v2, %v717_v3  ;;  %v354_v19 = vsub.f32 %v321_v5, %v717_v3  ;;  %v326_v26 = vld [vmem:[%s704_s20 + $0xb0] sm:$0xff]  ;;  %v327_v31 = vld [vmem:[%s704_s20 + $0xb8] sm:$0xff]  ;;  %v288_v33 = vld [vmem:[%s713_s26 + $0x80] sm:$0xff] }
  0x1d   : > { %439 = vst [vmem:[%s747_s29 + $0x28] sm:$0xff] %v407_v52  ;;  %v355_v20 = vsub.f32 %v322_v6, %v717_v3  ;;  %v413_v22 = vadd.f32 %v381_v0, %v283_v8  ;;  %v385_v24 = vmul.f32 %v719_v4, %v352_v1  ;;  %v356_v25 = vsub.f32 %v323_v10, %v717_v3  ;;  %v328_v36 = vld [vmem:[%s704_s20 + $0xc0] sm:$0xff]  ;;  %v289_v38 = vld [vmem:[%s713_s26 + $0x88] sm:$0xff]  ;;  %v290_v43 = vld [vmem:[%s713_s26 + $0x90] sm:$0xff] }
  0x1e   : > { %440 = vst [vmem:[%s747_s29 + $0x30] sm:$0xff] %v408_v57  ;;  %v414_v27 = vadd.f32 %v382_v9, %v284_v12  ;;  %v386_v29 = vmul.f32 %v719_v4, %v353_v18  ;;  %v357_v30 = vsub.f32 %v324_v15, %v717_v3  ;;  %v415_v32 = vadd.f32 %v383_v13, %v285_v17  ;;  %v329_v41 = vld [vmem:[%s704_s20 + $0xc8] sm:$0xff]  ;;  %v330_v46 = vld [vmem:[%s704_s20 + $0xd0] sm:$0xff]  ;;  %v291_v48 = vld [vmem:[%s713_s26 + $0x98] sm:$0xff] }
  0x1f   : > { %441 = vst [vmem:[%s747_s29 + $0x38] sm:$0xff] %v409_v63  ;;  %v387_v34 = vmul.f32 %v719_v4, %v354_v19  ;;  %v358_v35 = vsub.f32 %v325_v21, %v717_v3  ;;  %v416_v37 = vadd.f32 %v384_v14, %v286_v23  ;;  %v388_v39 = vmul.f32 %v719_v4, %v355_v20  ;;  %v331_v51 = vld [vmem:[%s704_s20 + $0xd8] sm:$0xff]  ;;  %v292_v53 = vld [vmem:[%s713_s26 + $0xa0] sm:$0xff]  ;;  %v293_v58 = vld [vmem:[%s713_s26 + $0xa8] sm:$0xff] }
  0x20   : > { %442 = vst [vmem:[%s747_s29 + $0x40] sm:$0xff] %v410_v7  ;;  %v359_v40 = vsub.f32 %v326_v26, %v717_v3  ;;  %v417_v42 = vadd.f32 %v385_v24, %v287_v28  ;;  %v389_v44 = vmul.f32 %v719_v4, %v356_v25  ;;  %v360_v45 = vsub.f32 %v327_v31, %v717_v3  ;;  %v332_v56 = vld [vmem:[%s704_s20 + $0xe0] sm:$0xff]  ;;  %v333_v61 = vld [vmem:[%s704_s20 + $0xe8] sm:$0xff]  ;;  %v294_v63 = vld [vmem:[%s713_s26 + $0xb0] sm:$0xff] }
  0x21   : > { %443 = vst [vmem:[%s747_s29 + $0x48] sm:$0xff] %v411_v11  ;;  %v418_v47 = vadd.f32 %v386_v29, %v288_v33  ;;  %v390_v49 = vmul.f32 %v719_v4, %v357_v30  ;;  %v361_v50 = vsub.f32 %v328_v36, %v717_v3  ;;  %v419_v52 = vadd.f32 %v387_v34, %v289_v38  ;;  %v334_v2 = vld [vmem:[%s704_s20 + $0xf0] sm:$0xff]  ;;  %v295_v6 = vld [vmem:[%s713_s26 + $0xb8] sm:$0xff]  ;;  %v296_v11 = vld [vmem:[%s713_s26 + $0xc0] sm:$0xff] }
  0x22   : > { %444 = vst [vmem:[%s747_s29 + $0x50] sm:$0xff] %v412_v16  ;;  %v391_v54 = vmul.f32 %v719_v4, %v358_v35  ;;  %v362_v55 = vsub.f32 %v329_v41, %v717_v3  ;;  %v420_v57 = vadd.f32 %v388_v39, %v290_v43  ;;  %v392_v59 = vmul.f32 %v719_v4, %v359_v40  ;;  %v335_v9 = vld [vmem:[%s704_s20 + $0xf8] sm:$0xff]  ;;  %v297_v15 = vld [vmem:[%s713_s26 + $0xc8] sm:$0xff]  ;;  %v298_v19 = vld [vmem:[%s713_s26 + $0xd0] sm:$0xff] }
  0x23   : > { %445 = vst [vmem:[%s747_s29 + $0x58] sm:$0xff] %v413_v22  ;;  %v363_v60 = vsub.f32 %v330_v46, %v717_v3  ;;  %v421_v62 = vadd.f32 %v389_v44, %v291_v48  ;;  %v393_v0 = vmul.f32 %v719_v4, %v360_v45  ;;  %v364_v1 = vsub.f32 %v331_v51, %v717_v3  ;;  %v299_v23 = vld [vmem:[%s713_s26 + $0xd8] sm:$0xff]  ;;  %v300_v26 = vld [vmem:[%s713_s26 + $0xe0] sm:$0xff]  ;;  %v301_v29 = vld [vmem:[%s713_s26 + $0xe8] sm:$0xff] }
  0x24   : > { %446 = vst [vmem:[%s747_s29 + $0x60] sm:$0xff] %v414_v27  ;;  %v422_v5 = vadd.f32 %v390_v49, %v292_v53  ;;  %v394_v7 = vmul.f32 %v719_v4, %v361_v50  ;;  %v365_v8 = vsub.f32 %v332_v56, %v717_v3  ;;  %v423_v10 = vadd.f32 %v391_v54, %v293_v58  ;;  %v302_v31 = vld [vmem:[%s713_s26 + $0xf0] sm:$0xff]  ;;  %v303_v34 = vld [vmem:[%s713_s26 + $0xf8] sm:$0xff] }
  0x25   : > { %447 = vst [vmem:[%s747_s29 + $0x68] sm:$0xff] %v415_v32  ;;  %v395_v12 = vmul.f32 %v719_v4, %v362_v55  ;;  %v366_v13 = vsub.f32 %v333_v61, %v717_v3  ;;  %v424_v14 = vadd.f32 %v392_v59, %v294_v63  ;;  %v396_v16 = vmul.f32 %v719_v4, %v363_v60 }
  0x26   : > { %448 = vst [vmem:[%s747_s29 + $0x70] sm:$0xff] %v416_v37  ;;  %v367_v17 = vsub.f32 %v334_v2, %v717_v3  ;;  %v425_v18 = vadd.f32 %v393_v0, %v295_v6  ;;  %v397_v20 = vmul.f32 %v719_v4, %v364_v1  ;;  %v368_v21 = vsub.f32 %v335_v9, %v717_v3 }
  0x27   : > { %449 = vst [vmem:[%s747_s29 + $0x78] sm:$0xff] %v417_v42  ;;  %v426_v22 = vadd.f32 %v394_v7, %v296_v11  ;;  %v398_v24 = vmul.f32 %v719_v4, %v365_v8  ;;  %v427_v25 = vadd.f32 %v395_v12, %v297_v15  ;;  %v399_v27 = vmul.f32 %v719_v4, %v366_v13 }
  0x28   : > { %450 = vst [vmem:[%s747_s29 + $0x80] sm:$0xff] %v418_v47  ;;  %v428_v28 = vadd.f32 %v396_v16, %v298_v19  ;;  %v400_v3 = vmul.f32 %v719_v4, %v367_v17  ;;  %v429_v30 = vadd.f32 %v397_v20, %v299_v23  ;;  %v401_v32 = vmul.f32 %v719_v4, %v368_v21 }
  0x29   : > { %451 = vst [vmem:[%s747_s29 + $0x88] sm:$0xff] %v419_v52  ;;  %v430_v33 = vadd.f32 %v398_v24, %v300_v26  ;;  %v431_v35 = vadd.f32 %v399_v27, %v301_v29 }
  0x2a   : > { %452 = vst [vmem:[%s747_s29 + $0x90] sm:$0xff] %v420_v57  ;;  %v432_v36 = vadd.f32 %v400_v3, %v302_v31  ;;  %v433_v37 = vadd.f32 %v401_v32, %v303_v34 }
  0x2b   : > { %453 = vst [vmem:[%s747_s29 + $0x98] sm:$0xff] %v421_v62 }
  0x2c   : > { %454 = vst [vmem:[%s747_s29 + $0xa0] sm:$0xff] %v422_v5 }
  0x2d   : > { %455 = vst [vmem:[%s747_s29 + $0xa8] sm:$0xff] %v423_v10 }
  0x2e   : > { %456 = vst [vmem:[%s747_s29 + $0xb0] sm:$0xff] %v424_v14 }
  0x2f   : > { %457 = vst [vmem:[%s747_s29 + $0xb8] sm:$0xff] %v425_v18 }
  0x30   : > { %458 = vst [vmem:[%s747_s29 + $0xc0] sm:$0xff] %v426_v22 }
  0x31   : > { %459 = vst [vmem:[%s747_s29 + $0xc8] sm:$0xff] %v427_v25 }
  0x32   : > { %460 = vst [vmem:[%s747_s29 + $0xd0] sm:$0xff] %v428_v28 }
  0x33   : > { %461 = vst [vmem:[%s747_s29 + $0xd8] sm:$0xff] %v429_v30 }
  0x34   : > { %462 = vst [vmem:[%s747_s29 + $0xe0] sm:$0xff] %v430_v33 }
  0x35   : > { %463 = vst [vmem:[%s747_s29 + $0xe8] sm:$0xff] %v431_v35 }
  0x36   : > { %464 = vst [vmem:[%s747_s29 + $0xf0] sm:$0xff] %v432_v36 }
  0x37   : > { %465 = vst [vmem:[%s747_s29 + $0xf8] sm:$0xff] %v433_v37 }
  0x38 PF: > { %s13_s14 = sadd.s32 1, %s658_s14   ;;  %s898_s12 = smov %s654_s13 }
  0x39   : > { %p10_p5 = scmp.ge.s32.totalorder %s13_s14, 4   ;;  %s899_s13 = smov %s901_s15 }
  0x3b   :  { %12 = sbr.rel (!%p10_p5) target bundleno = 2 (0x2), region = 68 }

// kernel: residual_block_nhwc.3
= control target key start
LH: loop header
LB: loop body
LE: loop exit
PB: predicated region body
PF: predicated region fallthrough
CT: control target
= control target key end

     0   :  { %s2673_s21 = smov 0   ;;  %s2675_s22 = smov 0   ;;  %s4323_s0 = inlined_call_operand.vmem [shape: f32[2,16,16,128], index: 0, kind: input, shape index: {}, may-alias: {0,1,2}]   ;;  %s4324_s1 = inlined_call_operand.vmem [shape: f32[2,16,16,128], index: 1, kind: input, shape index: {}, may-alias: {0,1,2}]   ;;  %s4325_s2 = inlined_call_operand.vmem [shape: f32[2,16,16,128], index: 2, kind: input, shape index: {}, may-alias: {0,1,2}]   ;;  %s4326_s3 = inlined_call_operand.vmem [shape: f32[3,128,384], index: 3, kind: input, shape index: {}]   ;;  %s4327_s4 = inlined_call_operand.vmem [shape: f32[1,128], index: 4, kind: input, shape index: {}]   ;;  %s4328_s5 = inlined_call_operand.vmem [shape: f32[2,16,16,128], index: 5, kind: output, shape index: {0}]   ;;  %s4329_s6 = inlined_call_operand.vmem [shape: f32[2,1,2,128], index: 6, kind: output, shape index: {1}]  }
   0x1   :  { %s2677_s23 = smov 0  }
   0x2 LB: > { %s29_s24 = sadd.s32 1, %s2632_s22  ;;  %p2399_p0 = scmp.ge.s32.totalorder %s2636_s23, 1  ;;  %s2636_s23 = sphi %s2677_s23, %s17_s23   ;;  %s2632_s22 = sphi %s2675_s22, %s4545_s22   ;;  %s2628_s21 = sphi %s2673_s21, %s4544_s21  }
   0x3   : > { %p31_p1 = scmp.ge.s32.totalorder %s29_s24, 2  ;;  %p303_p2 = scmp.lt.s32.totalorder %s2636_s23, 3 }
   0x5   : > { %s4547_s24 = smov (%p31_p1, %s29_s24), 0  ;;  %p304_p3 = pnand %p2399_p0, %p303_p2 }
   0x7   : > { %307 = sbr.rel (%p304_p3) target bundleno = 777 (0x309), region = 40 }
   0xc   : > { %v2454_v0 = vld [vmem:[%s4326_s3 + $0x2e8] sm:$0xff]  ;;  %v2451_v1 = vld [vmem:[%s4326_s3 + $0x2d0] sm:$0xff]  ;;  %v2448_v2 = vld [vmem:[%s4326_s3 + $0x2b8] sm:$0xff]  ;;  %p377_p4 = scmp.lt.s32.totalorder %s2628_s21, 1  ;;  %vm2213_vm4 = vcmask 1040384  }
   0xd   : > { %2515 = vmatpush.msra.mxu1 %v2454_v0  ;;  %2516 = vmatpush.msra.mxu2 %v2454_v0  ;;  %v2445_v3 = vld [vmem:[%s4326_s3 + $0x2a0] sm:$0xff]  ;;  %v2442_v4 = vld [vmem:[%s4326_s3 + $0x288] sm:$0xff]  ;;  %v2439_v5 = vld [vmem:[%s4326_s3 + $0x270] sm:$0xff] }
   0xe   : > { %2517 = vmatpush.msra.mxu3 %v2454_v0  ;;  %573 = vmatpush.msra.mxu0 %v2454_v0  ;;  %v2436_v6 = vld [vmem:[%s4326_s3 + $0x258] sm:$0xff]  ;;  %v2433_v7 = vld [vmem:[%s4326_s3 + $0x240] sm:$0xff]  ;;  %v2430_v8 = vld [vmem:[%s4326_s3 + $0x228] sm:$0xff]  ;;  %s4549_s21 = smov (!%p377_p4, %s2628_s21), 1 }
   0xf   : > { %2518 = vmatpush.msra.mxu1 %v2451_v1  ;;  %2519 = vmatpush.msra.mxu2 %v2451_v1  ;;  %v2427_v9 = vld [vmem:[%s4326_s3 + $0x210] sm:$0xff]  ;;  %v2424_v10 = vld [vmem:[%s4326_s3 + $0x1f8] sm:$0xff]  ;;  %v2421_v11 = vld [vmem:[%s4326_s3 + $0x1e0] sm:$0xff]  ;;  %s2737_s7 = sshll.u32 %s4549_s21, 8  ;;  %s2408_s16 = sshll.u32 %s4549_s21, 1 }
  0x10   : > { %2520 = vmatpush.msra.mxu3 %v2451_v1  ;;  %574 = vmatpush.msra.mxu0 %v2451_v1  ;;  %v2418_v12 = vld [vmem:[%s4326_s3 + $0x1c8] sm:$0xff]  ;;  %v2415_v13 = vld [vmem:[%s4326_s3 + $0x1b0] sm:$0xff]  ;;  %v2412_v14 = vld [vmem:[%s4326_s3 + $0x198] sm:$0xff]  ;;  %s2749_s14 = scalar_lea.vmem %s4323_s0, %s2737_s7  ;;  %s2509_s15 = sadd.s32 16, %s2737_s7 }
  0x11   : > { %2521 = vmatpush.msra.mxu1 %v2448_v2  ;;  %2522 = vmatpush.msra.mxu2 %v2448_v2  ;;  %v2409_v15 = vld [vmem:[%s4326_s3 + $0x180] sm:$0xff]  ;;  %v2456_v19 = vld [vmem:[%s4326_s3 + $0x2f8] sm:$0xff]  ;;  %v521_v21 = vld [vmem:[%s4326_s3 + $0x168] sm:$0xff]  ;;  %s399_s20 = scalar_lea.vmem %s4324_s1, %s2509_s15  ;;  %s3838_s10 = scalar_lea.vmem %s4328_s5, %s2737_s7 }
  0x12   : > { %2523 = vmatpush.msra.mxu3 %v2448_v2  ;;  %575 = vmatpush.msra.mxu0 %v2448_v2  ;;  %v2755_v16 = vld [vmem:[%s2749_s14 + $0x40] sm:$0xff]  ;;  %v2455_v23 = vld [vmem:[%s4326_s3 + $0x2f0] sm:$0xff]  ;;  %v2450_v26 = vld [vmem:[%s4326_s3 + $0x2c8] sm:$0xff]  ;;  %s2511_s11 = sadd.s32 224, %s2737_s7  ;;  %s438_s19 = scalar_lea.vmem %s4329_s6, %s2408_s16 }
  0x13   : > { %2524 = vmatpush.msra.mxu1 %v2445_v3  ;;  %2525 = vmatpush.msra.mxu2 %v2445_v3  ;;  %v2758_v17 = vld [vmem:[%s2749_s14 + $0x80] sm:$0xff]  ;;  %v522_v24 = vld [vmem:[%s4326_s3 + $0x170] sm:$0xff]  ;;  %v2452_v27 = vld [vmem:[%s4326_s3 + $0x2d8] sm:$0xff]  ;;  %s4045_s7 = scalar_lea.vmem %s4325_s2, %s2511_s11 }
  0x14   : > { %2526 = vmatpush.msra.mxu3 %v2445_v3  ;;  %576 = vmatpush.msra.mxu0 %v2445_v3  ;;  %v2761_v18 = vld [vmem:[%s2749_s14 + $0xc0] sm:$0xff]  ;;  %v518_v25 = vld [vmem:[%s4326_s3 + $0x150] sm:$0xff]  ;;  %v519_v28 = vld [vmem:[%s4326_s3 + $0x158] sm:$0xff] }
  0x15   : > { %2527 = vmatpush.msra.mxu1 %v2442_v4  ;;  %2528 = vmatpush.msra.mxu2 %v2442_v4  ;;  %v2768_v20 = vld [vmem:[%s2749_s14] sm:$0xff]  ;;  %v515_v29 = vld [vmem:[%s4326_s3 + $0x138] sm:$0xff]  ;;  %v2801_v30 = vld [vmem:[%s2749_s14 + $0x48] sm:$0xff] }
  0x16   : > { %2529 = vmatpush.msra.mxu3 %v2442_v4  ;;  %577 = vmatpush.msra.mxu0 %v2442_v4  ;;  %v2453_v22 = vld [vmem:[%s4326_s3 + $0x2e0] sm:$0xff]  ;;  %v2447_v31 = vld [vmem:[%s4326_s3 + $0x2b0] sm:$0xff]  ;;  %v2807_v32 = vld [vmem:[%s2749_s14 + $0x88] sm:$0xff] }
  0x17   : > { %2530 = vmatpush.msra.mxu1 %v2439_v5  ;;  %2531 = vmatpush.msra.mxu2 %v2439_v5  ;;  %v2810_v33 = vld [vmem:[%s2749_s14 + $0xc8] sm:$0xff]  ;;  %v2449_v34 = vld [vmem:[%s4326_s3 + $0x2c0] sm:$0xff]  ;;  %v2444_v35 = vld [vmem:[%s4326_s3 + $0x298] sm:$0xff] }
  0x18   : > { %2532 = vmatpush.msra.mxu3 %v2439_v5  ;;  %578 = vmatpush.msra.mxu0 %v2439_v5  ;;  %v2820_v36 = vld [vmem:[%s2749_s14 + $0x8] sm:$0xff]  ;;  %v512_v37 = vld [vmem:[%s4326_s3 + $0x120] sm:$0xff]  ;;  %v2443_v43 = vld [vmem:[%s4326_s3 + $0x290] sm:$0xff] }
  0x19   : > { %2533 = vmatpush.msra.mxu1 %v2436_v6  ;;  %2534 = vmatpush.msra.mxu2 %v2436_v6  ;;  %v516_v38 = vld [vmem:[%s4326_s3 + $0x140] sm:$0xff]  ;;  %v2446_v39 = vld [vmem:[%s4326_s3 + $0x2a8] sm:$0xff]  ;;  %v506_v45 = vld [vmem:[%s4326_s3 + $0xf0] sm:$0xff] }
  0x1a   : > { %2535 = vmatpush.msra.mxu3 %v2436_v6  ;;  %579 = vmatpush.msra.mxu0 %v2436_v6  ;;  %v2441_v40 = vld [vmem:[%s4326_s3 + $0x280] sm:$0xff]  ;;  %v509_v41 = vld [vmem:[%s4326_s3 + $0x108] sm:$0xff]  ;;  %v2853_v46 = vld [vmem:[%s2749_s14 + $0x50] sm:$0xff] }
  0x1b   : > { %2536 = vmatpush.msra.mxu1 %v2433_v7  ;;  %2537 = vmatpush.msra.mxu2 %v2433_v7  ;;  %v513_v42 = vld [vmem:[%s4326_s3 + $0x128] sm:$0xff]  ;;  %v510_v47 = vld [vmem:[%s4326_s3 + $0x110] sm:$0xff]  ;;  %v2440_v50 = vld [vmem:[%s4326_s3 + $0x278] sm:$0xff] }
  0x1c   : > { %2538 = vmatpush.msra.mxu3 %v2433_v7  ;;  %580 = vmatpush.msra.mxu0 %v2433_v7  ;;  %v2438_v44 = vld [vmem:[%s4326_s3 + $0x268] sm:$0xff]  ;;  %v2859_v48 = vld [vmem:[%s2749_s14 + $0x90] sm:$0xff]  ;;  %v503_v53 = vld [vmem:[%s4326_s3 + $0xd8] sm:$0xff] }
  0x1d   : > { %2539 = vmatpush.msra.mxu1 %v2430_v8  ;;  %2540 = vmatpush.msra.mxu2 %v2430_v8  ;;  %v2862_v49 = vld [vmem:[%s2749_s14 + $0xd0] sm:$0xff]  ;;  %v507_v54 = vld [vmem:[%s4326_s3 + $0xf8] sm:$0xff]  ;;  %v2437_v55 = vld [vmem:[%s4326_s3 + $0x260] sm:$0xff] }
  0x1e   : > { %2541 = vmatpush.msra.mxu3 %v2430_v8  ;;  %581 = vmatpush.msra.mxu0 %v2430_v8  ;;  %v2435_v51 = vld [vmem:[%s4326_s3 + $0x250] sm:$0xff]  ;;  %v2432_v56 = vld [vmem:[%s4326_s3 + $0x238] sm:$0xff]  ;;  %v500_v57 = vld [vmem:[%s4326_s3 + $0xc0] sm:$0xff] }
  0x1f   : > { %2542 = vmatpush.msra.mxu1 %v2427_v9  ;;  %2543 = vmatpush.msra.mxu2 %v2427_v9  ;;  %v2872_v52 = vld [vmem:[%s2749_s14 + $0x10] sm:$0xff]  ;;  %v504_v58 = vld [vmem:[%s4326_s3 + $0xe0] sm:$0xff]  ;;  %v2434_v59 = vld [vmem:[%s4326_s3 + $0x248] sm:$0xff] }
  0x20   : > { %2544 = vmatpush.msra.mxu3 %v2427_v9  ;;  %582 = vmatpush.msra.mxu0 %v2427_v9  ;;  %v2429_v60 = vld [vmem:[%s4326_s3 + $0x220] sm:$0xff]  ;;  %v497_v61 = vld [vmem:[%s4326_s3 + $0xa8] sm:$0xff]  ;;  %v2905_v62 = vld [vmem:[%s2749_s14 + $0x58] sm:$0xff] }
  0x21   : > { %2545 = vmatpush.msra.mxu1 %v2424_v10  ;;  %2546 = vmatpush.msra.mxu2 %v2424_v10  ;;  %v501_v63 = vld [vmem:[%s4326_s3 + $0xc8] sm:$0xff]  ;;  %v2911_v0 = vld [vmem:[%s2749_s14 + $0x98] sm:$0xff]  ;;  %v2431_v2 = vld [vmem:[%s4326_s3 + $0x230] sm:$0xff] }
  0x22   : > { %2547 = vmatpush.msra.mxu3 %v2424_v10  ;;  %583 = vmatpush.msra.mxu0 %v2424_v10  ;;  %v2914_v1 = vld [vmem:[%s2749_s14 + $0xd8] sm:$0xff]  ;;  %v2426_v3 = vld [vmem:[%s4326_s3 + $0x208] sm:$0xff]  ;;  %v494_v5 = vld [vmem:[%s4326_s3 + $0x90] sm:$0xff] }
  0x23   : > { %2548 = vmatpush.msra.mxu1 %v2421_v11  ;;  %2549 = vmatpush.msra.mxu2 %v2421_v11  ;;  %v2924_v4 = vld [vmem:[%s2749_s14 + $0x18] sm:$0xff]  ;;  %v498_v6 = vld [vmem:[%s4326_s3 + $0xb0] sm:$0xff] }
  0x24   : > { %2550 = vmatpush.msra.mxu3 %v2421_v11  ;;  %584 = vmatpush.msra.mxu0 %v2421_v11  ;;  %v2428_v7 = vld [vmem:[%s4326_s3 + $0x218] sm:$0xff]  ;;  %v2423_v8 = vld [vmem:[%s4326_s3 + $0x1f0] sm:$0xff]  ;;  %v2425_v11 = vld [vmem:[%s4326_s3 + $0x200] sm:$0xff] }
  0x25   : > { %2551 = vmatpush.msra.mxu1 %v2418_v12  ;;  %2552 = vmatpush.msra.mxu2 %v2418_v12  ;;  %v491_v9 = vld [vmem:[%s4326_s3 + $0x78] sm:$0xff] }
  0x26   : > { %2553 = vmatpush.msra.mxu3 %v2418_v12  ;;  %585 = vmatpush.msra.mxu0 %v2418_v12  ;;  %v495_v10 = vld [vmem:[%s4326_s3 + $0x98] sm:$0xff] }
  0x27   : > { %2554 = vmatpush.msra.mxu1 %v2415_v13  ;;  %2555 = vmatpush.msra.mxu2 %v2415_v13  ;;  %v2420_v12 = vld [vmem:[%s4326_s3 + $0x1d8] sm:$0xff] }
  0x28   : > { %2556 = vmatpush.msra.mxu3 %v2415_v13  ;;  %586 = vmatpush.msra.mxu0 %v2415_v13  ;;  %v488_v13 = vld [vmem:[%s4326_s3 + $0x60] sm:$0xff] }
  0x29   : > { %2557 = vmatpush.msra.mxu1 %v2412_v14  ;;  %2558 = vmatpush.msra.mxu2 %v2412_v14 }
  0x2a   : > { %2559 = vmatpush.msra.mxu3 %v2412_v14  ;;  %587 = vmatpush.msra.mxu0 %v2412_v14  ;;  %v2957_v14 = vld [vmem:[%s2749_s14 + $0x60] sm:$0xff] }
  0x2b   : > { %2560 = vmatpush.msra.mxu1 %v2409_v15  ;;  %2561 = vmatpush.msra.mxu2 %v2409_v15 }
  0x2c   : > { %2562 = vmatpush.msra.mxu3 %v2409_v15  ;;  %613 = vmatmul.f32.vlgmr.msra.gmra.mxu1 %v2755_v16 }
  0x2d   : > { %637 = vmatmul.f32.vlgmr.msra.gmra.mxu2 %v2758_v17  ;;  %661 = vmatmul.f32.vlgmr.msra.gmra.mxu3 %v2761_v18 }
  0x2e   : > { %799 = vmatpush.msrb.mxu2 %v2456_v19  ;;  %588 = vmatpush.msra.mxu0 %v2409_v15  ;;  %v492_v15 = vld [vmem:[%s4326_s3 + $0x80] sm:$0xff] }
  0x2f   : > { %589 = vmatmul.f32.vlgmr.msra.gmra.mxu0 %v2768_v20  ;;  %912 = vmatpush.msrb.mxu3 %v521_v21  ;;  %v2963_v19 = vld [vmem:[%s2749_s14 + $0xa0] sm:$0xff] }
  0x30   : > { %800 = vmatpush.msrb.mxu2 %v2453_v22  ;;  %686 = vmatpush.msrb.mxu1 %v2455_v23  ;;  %v2966_v21 = vld [vmem:[%s2749_s14 + $0xe0] sm:$0xff]  ;;  %v2422_v22 = vld [vmem:[%s4326_s3 + $0x1e8] sm:$0xff] }
  0x31   : > { %1025 = vmatpush.msrb.mxu0 %v522_v24  ;;  %913 = vmatpush.msrb.mxu3 %v518_v25  ;;  %v2417_v23 = vld [vmem:[%s4326_s3 + $0x1c0] sm:$0xff]  ;;  %v485_v25 = vld [vmem:[%s4326_s3 + $0x48] sm:$0xff] }
  0x32   : > { %801 = vmatpush.msrb.mxu2 %v2450_v26  ;;  %687 = vmatpush.msrb.mxu1 %v2452_v27  ;;  %v2976_v24 = vld [vmem:[%s2749_s14 + $0x20] sm:$0xff]  ;;  %v489_v26 = vld [vmem:[%s4326_s3 + $0x68] sm:$0xff]  ;;  %v2419_v27 = vld [vmem:[%s4326_s3 + $0x1d0] sm:$0xff] }
  0x33   : > { %1026 = vmatpush.msrb.mxu0 %v519_v28  ;;  %914 = vmatpush.msrb.mxu3 %v515_v29  ;;  %v2414_v28 = vld [vmem:[%s4326_s3 + $0x1a8] sm:$0xff]  ;;  %v482_v29 = vld [vmem:[%s4326_s3 + $0x30] sm:$0xff] }
  0x34   : > { %616 = vmatmul.f32.gmra.mxu1 %v2801_v30  ;;  %802 = vmatpush.msrb.mxu2 %v2447_v31  ;;  %v486_v31 = vld [vmem:[%s4326_s3 + $0x50] sm:$0xff] }
  0x35   : > { %640 = vmatmul.f32.gmra.mxu2 %v2807_v32  ;;  %664 = vmatmul.f32.gmra.mxu3 %v2810_v33 }
  0x36   : > { %688 = vmatpush.msrb.mxu1 %v2449_v34  ;;  %803 = vmatpush.msrb.mxu2 %v2444_v35  ;;  %v2416_v34 = vld [vmem:[%s4326_s3 + $0x1b8] sm:$0xff]  ;;  %v2411_v35 = vld [vmem:[%s4326_s3 + $0x190] sm:$0xff] }
  0x37   : > { %592 = vmatmul.f32.gmra.mxu0 %v2820_v36  ;;  %915 = vmatpush.msrb.mxu3 %v512_v37  ;;  %v479_v37 = vld [vmem:[%s4326_s3 + $0x18] sm:$0xff] }
  0x38   : > { %1027 = vmatpush.msrb.mxu0 %v516_v38  ;;  %689 = vmatpush.msrb.mxu1 %v2446_v39  ;;  %v3009_v38 = vld [vmem:[%s2749_s14 + $0x68] sm:$0xff]  ;;  %v483_v39 = vld [vmem:[%s4326_s3 + $0x38] sm:$0xff] }
  0x39   : > { %804 = vmatpush.msrb.mxu2 %v2441_v40  ;;  %916 = vmatpush.msrb.mxu3 %v509_v41  ;;  %v3015_v40 = vld [vmem:[%s2749_s14 + $0xa8] sm:$0xff] }
  0x3a   : > { %1028 = vmatpush.msrb.mxu0 %v513_v42  ;;  %690 = vmatpush.msrb.mxu1 %v2443_v43  ;;  %v3018_v41 = vld [vmem:[%s2749_s14 + $0xe8] sm:$0xff]  ;;  %v2413_v42 = vld [vmem:[%s4326_s3 + $0x1a0] sm:$0xff] }
  0x3b   : > { %805 = vmatpush.msrb.mxu2 %v2438_v44  ;;  %917 = vmatpush.msrb.mxu3 %v506_v45  ;;  %v476_v43 = vld [vmem:[%s4326_s3] sm:$0xff]  ;;  %v3028_v44 = vld [vmem:[%s2749_s14 + $0x28] sm:$0xff] }
  0x3c   : > { %619 = vmatmul.f32.gmra.mxu1 %v2853_v46  ;;  %1029 = vmatpush.msrb.mxu0 %v510_v47  ;;  %v2502_v45 = vld [vmem:[%s4326_s3 + $0x468] sm:$0xff] }
  0x3d   : > { %643 = vmatmul.f32.gmra.mxu2 %v2859_v48  ;;  %667 = vmatmul.f32.gmra.mxu3 %v2862_v49  ;;  %v2410_v47 = vld [vmem:[%s4326_s3 + $0x188] sm:$0xff] }
  0x3e   : > { %691 = vmatpush.msrb.mxu1 %v2440_v50  ;;  %806 = vmatpush.msrb.mxu2 %v2435_v51  ;;  %v480_v50 = vld [vmem:[%s4326_s3 + $0x20] sm:$0xff]  ;;  %v2503_v51 = vld [vmem:[%s4326_s3 + $0x470] sm:$0xff] }
  0x3f   : > { %595 = vmatmul.f32.gmra.mxu0 %v2872_v52  ;;  %918 = vmatpush.msrb.mxu3 %v503_v53  ;;  %v523_v53 = vld [vmem:[%s4326_s3 + $0x178] sm:$0xff] }
  0x40   : > { %1030 = vmatpush.msrb.mxu0 %v507_v54  ;;  %692 = vmatpush.msrb.mxu1 %v2437_v55  ;;  %v477_v54 = vld [vmem:[%s4326_s3 + $0x8] sm:$0xff]  ;;  %v2504_v55 = vld [vmem:[%s4326_s3 + $0x478] sm:$0xff] }
  0x41   : > { %807 = vmatpush.msrb.mxu2 %v2432_v56  ;;  %919 = vmatpush.msrb.mxu3 %v500_v57  ;;  %v3055_v56 = vld [vmem:[%s2749_s14 + $0x70] sm:$0xff] }
  0x42   : > { %1031 = vmatpush.msrb.mxu0 %v504_v58  ;;  %693 = vmatpush.msrb.mxu1 %v2434_v59  ;;  %v3058_v57 = vld [vmem:[%s2749_s14 + $0xb0] sm:$0xff] }
  0x43   : > { %808 = vmatpush.msrb.mxu2 %v2429_v60  ;;  %920 = vmatpush.msrb.mxu3 %v497_v61  ;;  %v3061_v58 = vld [vmem:[%s2749_s14 + $0xf0] sm:$0xff]  ;;  %v2500_v61 = vld [vmem:[%s4326_s3 + $0x458] sm:$0xff] }
  0x44   : > { %622 = vmatmul.f32.gmra.mxu1 %v2905_v62  ;;  %1032 = vmatpush.msrb.mxu0 %v501_v63  ;;  %v3065_v59 = vld [vmem:[%s2749_s14 + $0x30] sm:$0xff]  ;;  %v520_v63 = vld [vmem:[%s4326_s3 + $0x160] sm:$0xff] }
  0x45   : > { %646 = vmatmul.f32.gmra.mxu2 %v2911_v0  ;;  %670 = vmatmul.f32.gmra.mxu3 %v2914_v1  ;;  %v2499_v60 = vld [vmem:[%s4326_s3 + $0x450] sm:$0xff] }
  0x46   : > { %694 = vmatpush.msrb.mxu1 %v2431_v2  ;;  %809 = vmatpush.msrb.mxu2 %v2426_v3  ;;  %v3080_v2 = vld [vmem:[%s2749_s14 + $0x78] sm:$0xff] }
  0x47   : > { %598 = vmatmul.f32.gmra.mxu0 %v2924_v4  ;;  %921 = vmatpush.msrb.mxu3 %v494_v5  ;;  %v3083_v3 = vld [vmem:[%s2749_s14 + $0xb8] sm:$0xff] }
  0x48   : > { %1033 = vmatpush.msrb.mxu0 %v498_v6  ;;  %695 = vmatpush.msrb.mxu1 %v2428_v7  ;;  %v3086_v5 = vld [vmem:[%s2749_s14 + $0xf8] sm:$0xff]  ;;  %v2501_v7 = vld [vmem:[%s4326_s3 + $0x460] sm:$0xff] }
  0x49   : > { %810 = vmatpush.msrb.mxu2 %v2423_v8  ;;  %922 = vmatpush.msrb.mxu3 %v491_v9  ;;  %v3090_v6 = vld [vmem:[%s2749_s14 + $0x38] sm:$0xff]  ;;  %v3102_v8 = vld [vmem:[%s399_s20] sm:$0xff] }
  0x4a   : > { %1034 = vmatpush.msrb.mxu0 %v495_v10  ;;  %696 = vmatpush.msrb.mxu1 %v2425_v11  ;;  %v2496_v9 = vld [vmem:[%s4326_s3 + $0x438] sm:$0xff]  ;;  %v2497_v10 = vld [vmem:[%s4326_s3 + $0x440] sm:$0xff]  ;;  %v517_v11 = vld [vmem:[%s4326_s3 + $0x148] sm:$0xff] }
  0x4b   : > { %811 = vmatpush.msrb.mxu2 %v2420_v12  ;;  %923 = vmatpush.msrb.mxu3 %v488_v13  ;;  %v3117_v12 = vld [vmem:[%s399_s20 + $0x8] sm:$0xff] }
  0x4c   : > { %625 = vmatmul.f32.gmra.mxu1 %v2957_v14  ;;  %1035 = vmatpush.msrb.mxu0 %v492_v15  ;;  %v2498_v13 = vld [vmem:[%s4326_s3 + $0x448] sm:$0xff]  ;;  %v2493_v15 = vld [vmem:[%s4326_s3 + $0x420] sm:$0xff] }
  0x4d   : > { %649 = vmatmul.f32.gmra.mxu2 %v2963_v19  ;;  %673 = vmatmul.f32.gmra.mxu3 %v2966_v21 }
  0x4e   : > { %697 = vmatpush.msrb.mxu1 %v2422_v22  ;;  %812 = vmatpush.msrb.mxu2 %v2417_v23  ;;  %v2494_v22 = vld [vmem:[%s4326_s3 + $0x428] sm:$0xff]  ;;  %v514_v23 = vld [vmem:[%s4326_s3 + $0x130] sm:$0xff] }
  0x4f   : > { %601 = vmatmul.f32.gmra.mxu0 %v2976_v24  ;;  %924 = vmatpush.msrb.mxu3 %v485_v25  ;;  %v2490_v25 = vld [vmem:[%s4326_s3 + $0x408] sm:$0xff] }
  0x50   : > { %1036 = vmatpush.msrb.mxu0 %v489_v26  ;;  %698 = vmatpush.msrb.mxu1 %v2419_v27  ;;  %v2491_v26 = vld [vmem:[%s4326_s3 + $0x410] sm:$0xff]  ;;  %v2492_v27 = vld [vmem:[%s4326_s3 + $0x418] sm:$0xff] }
  0x51   : > { %813 = vmatpush.msrb.mxu2 %v2414_v28  ;;  %925 = vmatpush.msrb.mxu3 %v482_v29  ;;  %v2487_v28 = vld [vmem:[%s4326_s3 + $0x3f0] sm:$0xff]  ;;  %v2488_v29 = vld [vmem:[%s4326_s3 + $0x3f8] sm:$0xff] }
  0x52   : > { %1037 = vmatpush.msrb.mxu0 %v486_v31  ;;  %699 = vmatpush.msrb.mxu1 %v2416_v34  ;;  %v508_v31 = vld [vmem:[%s4326_s3 + $0x100] sm:$0xff] }
  0x53   : > { %814 = vmatpush.msrb.mxu2 %v2411_v35  ;;  %926 = vmatpush.msrb.mxu3 %v479_v37  ;;  %v2489_v34 = vld [vmem:[%s4326_s3 + $0x400] sm:$0xff] }
  0x54   : > { %628 = vmatmul.f32.gmra.mxu1 %v3009_v38  ;;  %1038 = vmatpush.msrb.mxu0 %v483_v39  ;;  %v2484_v39 = vld [vmem:[%s4326_s3 + $0x3d8] sm:$0xff] }
  0x55   : > { %652 = vmatmul.f32.gmra.mxu2 %v3015_v40  ;;  %676 = vmatmul.f32.gmra.mxu3 %v3018_v41 }
  0x56   : > { %700 = vmatpush.msrb.mxu1 %v2413_v42  ;;  %927 = vmatpush.msrb.mxu3 %v476_v43 }
  0x57   : > { %604 = vmatmul.f32.gmra.mxu0 %v3028_v44  ;;  %1300 = vmatpush.msra.mxu2 %v2502_v45 }
  0x58   : > { %701 = vmatpush.msrb.mxu1 %v2410_v47  ;;  %1039 = vmatpush.msrb.mxu0 %v480_v50  ;;  %v2485_v47 = vld [vmem:[%s4326_s3 + $0x3e0] sm:$0xff] }
  0x59   : > { %1413 = vmatpush.msra.mxu3 %v2503_v51  ;;  %1301 = vmatpush.msra.mxu2 %v2499_v60  ;;  %v505_v51 = vld [vmem:[%s4326_s3 + $0xe8] sm:$0xff] }
  0x5a   : > { %1138 = vmatpush.msra.mxu1 %v523_v53  ;;  %1040 = vmatpush.msrb.mxu0 %v477_v54  ;;  %v2486_v53 = vld [vmem:[%s4326_s3 + $0x3e8] sm:$0xff] }
  0x5b   : > { %1414 = vmatpush.msra.mxu3 %v2500_v61  ;;  %1302 = vmatpush.msra.mxu2 %v2496_v9 }
  0x5c   : > { %1526 = vmatpush.msra.mxu0 %v2504_v55  ;;  %631 = vmatmul.f32.gmra.mxu1 %v3055_v56 }
  0x5d   : > { %655 = vmatmul.f32.gmra.mxu2 %v3058_v57  ;;  %679 = vmatmul.f32.gmra.mxu3 %v3061_v58 }
  0x5e   : > { %1139 = vmatpush.msra.mxu1 %v520_v63  ;;  %1527 = vmatpush.msra.mxu0 %v2501_v7  ;;  %v2481_v63 = vld [vmem:[%s4326_s3 + $0x3c0] sm:$0xff] }
  0x5f   : > { %607 = vmatmul.f32.gmra.mxu0 %v3065_v59  ;;  %1415 = vmatpush.msra.mxu3 %v2497_v10 }
  0x60   : > { %1140 = vmatpush.msra.mxu1 %v517_v11  ;;  %1528 = vmatpush.msra.mxu0 %v2498_v13  ;;  %v2482_v11 = vld [vmem:[%s4326_s3 + $0x3c8] sm:$0xff] }
  0x61   : > { %1303 = vmatpush.msra.mxu2 %v2493_v15  ;;  %1416 = vmatpush.msra.mxu3 %v2494_v22  ;;  %v502_v15 = vld [vmem:[%s4326_s3 + $0xd0] sm:$0xff] }
  0x62   : > { %1141 = vmatpush.msra.mxu1 %v514_v23 }
  0x63   : > { %1304 = vmatpush.msra.mxu2 %v2490_v25  ;;  %1417 = vmatpush.msra.mxu3 %v2491_v26  ;;  %v2478_v26 = vld [vmem:[%s4326_s3 + $0x3a8] sm:$0xff] }
  0x64   : > { %634 = vmatmul.f32.gmra.mxu1 %v3080_v2 }
  0x65   : > { %658 = vmatmul.f32.gmra.mxu2 %v3083_v3  ;;  %682 = vmatmul.f32.gmra.mxu3 %v3086_v5 }
  0x66   : > { %1305 = vmatpush.msra.mxu2 %v2487_v28  ;;  %1418 = vmatpush.msra.mxu3 %v2488_v29  ;;  %v2479_v28 = vld [vmem:[%s4326_s3 + $0x3b0] sm:$0xff] }
  0x67   : > { %610 = vmatmul.f32.gmra.mxu0 %v3090_v6 }
  0x68   : > { %1306 = vmatpush.msra.mxu2 %v2484_v39  ;;  %1419 = vmatpush.msra.mxu3 %v2485_v47 }
  0x6a   : > { %1307 = vmatpush.msra.mxu2 %v2481_v63  ;;  %1420 = vmatpush.msra.mxu3 %v2482_v11 }
  0x6c   : > { %702 = vmatmul.f32.vlgmr.msrb.gmra.mxu1 %v2768_v20  ;;  %1308 = vmatpush.msra.mxu2 %v2478_v26  ;;  %v2477_v26 = vld [vmem:[%s4326_s3 + $0x3a0] sm:$0xff] }
  0x6d   : > { %815 = vmatmul.f32.vlgmr.msrb.gmra.mxu2 %v2768_v20  ;;  %928 = vmatmul.f32.vlgmr.msrb.gmra.mxu3 %v3102_v8 }
  0x6e   : > { %1421 = vmatpush.msra.mxu3 %v2479_v28 }
  0x6f   : > { %1041 = vmatmul.f32.vlgmr.msrb.gmra.mxu0 %v3102_v8 }
  0x74   : > { %705 = vmatmul.f32.gmra.mxu1 %v2820_v36 }
  0x75   : > { %818 = vmatmul.f32.gmra.mxu2 %v2820_v36  ;;  %931 = vmatmul.f32.gmra.mxu3 %v3117_v12 }
  0x77   : > { %1044 = vmatmul.f32.gmra.mxu0 %v3117_v12 }
  0x7c   : > { %708 = vmatmul.f32.gmra.mxu1 %v2872_v52 }
  0x7d   : > { %821 = vmatmul.f32.gmra.mxu2 %v2872_v52  ;;  %934 = vmatmul.f32.gmra.mxu3 %v2768_v20 }
  0x7f   : > { %1047 = vmatmul.f32.gmra.mxu0 %v2768_v20  ;;  %v2495_v20 = vld [vmem:[%s4326_s3 + $0x430] sm:$0xff] }
  0x80   : > { %1529 = vmatpush.msra.mxu0 %v2495_v20 }
  0x82   : > { %1530 = vmatpush.msra.mxu0 %v2492_v27 }
  0x84   : > { %711 = vmatmul.f32.gmra.mxu1 %v2924_v4  ;;  %1531 = vmatpush.msra.mxu0 %v2489_v34 }
  0x85   : > { %824 = vmatmul.f32.gmra.mxu2 %v2924_v4  ;;  %937 = vmatmul.f32.gmra.mxu3 %v2820_v36 }
  0x86   : > { %1532 = vmatpush.msra.mxu0 %v2486_v53  ;;  %v2475_v53 = vld [vmem:[%s4326_s3 + $0x390] sm:$0xff] }
  0x87   : > { %1050 = vmatmul.f32.gmra.mxu0 %v2820_v36  ;;  %v511_v36 = vld [vmem:[%s4326_s3 + $0x118] sm:$0xff]  ;;  %1309 = vmatpush.msra.mxu2 %v2475_v53 }
  0x88   : > { %1142 = vmatpush.msra.mxu1 %v511_v36 }
  0x8a   : > { %1143 = vmatpush.msra.mxu1 %v508_v31  ;;  %v2480_v31 = vld [vmem:[%s4326_s3 + $0x3b8] sm:$0xff] }
  0x8c   : > { %714 = vmatmul.f32.gmra.mxu1 %v2976_v24 }
  0x8d   : > { %827 = vmatmul.f32.gmra.mxu2 %v2976_v24  ;;  %940 = vmatmul.f32.gmra.mxu3 %v2872_v52 }
  0x8e   : > { %1144 = vmatpush.msra.mxu1 %v505_v51 }
  0x8f   : > { %1053 = vmatmul.f32.gmra.mxu0 %v2872_v52 }
  0x90   : > { %1145 = vmatpush.msra.mxu1 %v502_v15  ;;  %v2476_v15 = vld [vmem:[%s4326_s3 + $0x398] sm:$0xff] }
  0x91   : > { %1422 = vmatpush.msra.mxu3 %v2476_v15  ;;  %v2472_v15 = vld [vmem:[%s4326_s3 + $0x378] sm:$0xff] }
  0x92   : > { %1310 = vmatpush.msra.mxu2 %v2472_v15  ;;  %v2474_v15 = vld [vmem:[%s4326_s3 + $0x388] sm:$0xff] }
  0x94   : > { %717 = vmatmul.f32.gmra.mxu1 %v3028_v44 }
  0x95   : > { %830 = vmatmul.f32.gmra.mxu2 %v3028_v44  ;;  %943 = vmatmul.f32.gmra.mxu3 %v2924_v4 }
  0x97   : > { %1056 = vmatmul.f32.gmra.mxu0 %v2924_v4 }
  0x9c   : > { %720 = vmatmul.f32.gmra.mxu1 %v3065_v59 }
  0x9d   : > { %833 = vmatmul.f32.gmra.mxu2 %v3065_v59  ;;  %946 = vmatmul.f32.gmra.mxu3 %v2976_v24 }
  0x9f   : > { %1059 = vmatmul.f32.gmra.mxu0 %v2976_v24 }
  0xa4   : > { %723 = vmatmul.f32.gmra.mxu1 %v3090_v6 }
  0xa5   : > { %836 = vmatmul.f32.gmra.mxu2 %v3090_v6  ;;  %949 = vmatmul.f32.gmra.mxu3 %v3028_v44 }
  0xa7   : > { %1062 = vmatmul.f32.gmra.mxu0 %v3028_v44 }
  0xa9   : > { %v3186_v35 = vpop.f32.mrf.mxu1 }
  0xac   : > { %v3188_v37 = vpop.f32.mrf.mxu0  ;;  %726 = vmatmul.f32.gmra.mxu1 %v2755_v16 }
  0xad   : > { %839 = vmatmul.f32.gmra.mxu2 %v2755_v16  ;;  %952 = vmatmul.f32.gmra.mxu3 %v3065_v59 }
  0xaf   : > { %1065 = vmatmul.f32.gmra.mxu0 %v3065_v59 }
  0xb0   : > { %v3197_v42 = vpop.f32.mrf.mxu2  ;;  %v3199_v43 = vpop.f32.mrf.mxu3 }
  0xb1   : > { %4330 = vst [vmem:[#allocation2_spill] sm:$0xff] %v3197_v42  ;;  %v3201_v45 = vpop.f32.mrf.mxu1 }
  0xb2   : > { %4331 = vst [vmem:[#allocation3_spill] sm:$0xff] %v3199_v43 }
  0xb4   : > { %v3206_v50 = vpop.f32.mrf.mxu0  ;;  %729 = vmatmul.f32.gmra.mxu1 %v2801_v30 }
  0xb5   : > { %842 = vmatmul.f32.gmra.mxu2 %v2801_v30  ;;  %955 = vmatmul.f32.gmra.mxu3 %v3090_v6 }
  0xb7   : > { %1068 = vmatmul.f32.gmra.mxu0 %v3090_v6 }
  0xb8   : > { %v3218_v54 = vpop.f32.mrf.mxu2  ;;  %v3220_v55 = vpop.f32.mrf.mxu3 }
  0xb9   : > { %4332 = vst [vmem:[#allocation4_spill] sm:$0xff] %v3218_v54  ;;  %v3222_v60 = vpop.f32.mrf.mxu1 }
  0xba   : > { %4333 = vst [vmem:[#allocation5_spill] sm:$0xff] %v3220_v55 }
  0xbb   : > { %4334 = vst [vmem:[#allocation6_spill] sm:$0xff] %v3222_v60 }
  0xbc   : > { %v3224_v61 = vpop.f32.mrf.mxu0  ;;  %732 = vmatmul.f32.gmra.mxu1 %v2853_v46 }
  0xbd   : > { %845 = vmatmul.f32.gmra.mxu2 %v2853_v46  ;;  %958 = vmatmul.f32.gmra.mxu3 %v2755_v16 }
  0xbf   : > { %1071 = vmatmul.f32.gmra.mxu0 %v2755_v16  ;;  %v2483_v16 = vld [vmem:[%s4326_s3 + $0x3d0] sm:$0xff] }
  0xc0   : > { %v3233_v7 = vpop.f32.mrf.mxu2  ;;  %v3235_v9 = vpop.f32.mrf.mxu3  ;;  %1533 = vmatpush.msra.mxu0 %v2483_v16 }
  0xc1   : > { %4335 = vst [vmem:[#allocation7_spill] sm:$0xff] %v3233_v7  ;;  %v3237_v10 = vpop.f32.mrf.mxu1 }
  0xc2   : > { %4336 = vst [vmem:[#allocation8_spill] sm:$0xff] %v3235_v9  ;;  %1534 = vmatpush.msra.mxu0 %v2480_v31 }
  0xc3   : > { %4337 = vst [vmem:[#allocation9_spill] sm:$0xff] %v3237_v10 }
  0xc4   : > { %v3242_v13 = vpop.f32.mrf.mxu0  ;;  %735 = vmatmul.f32.gmra.mxu1 %v2905_v62  ;;  %1535 = vmatpush.msra.mxu0 %v2477_v26 }
  0xc5   : > { %848 = vmatmul.f32.gmra.mxu2 %v2905_v62  ;;  %961 = vmatmul.f32.gmra.mxu3 %v2801_v30 }
  0xc6   : > { %1536 = vmatpush.msra.mxu0 %v2474_v15 }
  0xc7   : > { %1074 = vmatmul.f32.gmra.mxu0 %v2801_v30 }
  0xc8   : > { %v3254_v22 = vpop.f32.mrf.mxu2  ;;  %v3256_v23 = vpop.f32.mrf.mxu3 }
  0xc9   : > { %4338 = vst [vmem:[#allocation10_spill] sm:$0xff] %v3254_v22  ;;  %v3258_v20 = vpop.f32.mrf.mxu1  ;;  %v2467_v22 = vld [vmem:[%s4326_s3 + $0x350] sm:$0xff] }
  0xca   : > { %4339 = vst [vmem:[#allocation11_spill] sm:$0xff] %v3256_v23 }
  0xcb   : > { %4340 = vst [vmem:[#allocation12_spill] sm:$0xff] %v3258_v20 }
  0xcc   : > { %v3260_v25 = vpop.f32.mrf.mxu0  ;;  %738 = vmatmul.f32.gmra.mxu1 %v2957_v14 }
  0xcd   : > { %851 = vmatmul.f32.gmra.mxu2 %v2957_v14  ;;  %964 = vmatmul.f32.gmra.mxu3 %v2853_v46 }
  0xcf   : > { %1077 = vmatmul.f32.gmra.mxu0 %v2853_v46  ;;  %v499_v46 = vld [vmem:[%s4326_s3 + $0xb8] sm:$0xff] }
  0xd0   : > { %v3269_v30 = vpop.f32.mrf.mxu2  ;;  %v3271_v36 = vpop.f32.mrf.mxu3  ;;  %1146 = vmatpush.msra.mxu1 %v499_v46 }
  0xd1   : > { %4341 = vst [vmem:[#allocation13_spill] sm:$0xff] %v3269_v30  ;;  %v3273_v27 = vpop.f32.mrf.mxu1 }
  0xd2   : > { %4342 = vst [vmem:[#allocation14_spill] sm:$0xff] %v3271_v36 }
  0xd3   : > { %4343 = vst [vmem:[#allocation15_spill] sm:$0xff] %v3273_v27 }
  0xd4   : > { %v3278_v29 = vpop.f32.mrf.mxu0  ;;  %741 = vmatmul.f32.gmra.mxu1 %v3009_v38 }
  0xd5   : > { %854 = vmatmul.f32.gmra.mxu2 %v3009_v38  ;;  %967 = vmatmul.f32.gmra.mxu3 %v2905_v62 }
  0xd7   : > { %1080 = vmatmul.f32.gmra.mxu0 %v2905_v62 }
  0xd8   : > { %v3290_v34 = vpop.f32.mrf.mxu2  ;;  %v3292_v39 = vpop.f32.mrf.mxu3 }
  0xd9   : > { %4344 = vst [vmem:[#allocation16_spill] sm:$0xff] %v3290_v34  ;;  %v3294_v47 = vpop.f32.mrf.mxu1 }
  0xda   : > { %4345 = vst [vmem:[#allocation17_spill] sm:$0xff] %v3292_v39  ;;  %v2473_v39 = vld [vmem:[%s4326_s3 + $0x380] sm:$0xff] }
  0xdb   : > { %4346 = vst [vmem:[#allocation18_spill] sm:$0xff] %v3294_v47  ;;  %1423 = vmatpush.msra.mxu3 %v2473_v39 }
  0xdc   : > { %v3296_v51 = vpop.f32.mrf.mxu0  ;;  %744 = vmatmul.f32.gmra.mxu1 %v3055_v56 }
  0xdd   : > { %857 = vmatmul.f32.gmra.mxu2 %v3055_v56  ;;  %970 = vmatmul.f32.gmra.mxu3 %v2957_v14 }
  0xdf   : > { %1083 = vmatmul.f32.gmra.mxu0 %v2957_v14  ;;  %v496_v14 = vld [vmem:[%s4326_s3 + $0xa0] sm:$0xff] }
  0xe0   : > { %v3305_v62 = vpop.f32.mrf.mxu2  ;;  %v3307_v63 = vpop.f32.mrf.mxu3  ;;  %1147 = vmatpush.msra.mxu1 %v496_v14 }
  0xe1   : > { %4347 = vst [vmem:[#allocation19_spill] sm:$0xff] %v3305_v62  ;;  %v3309_v11 = vpop.f32.mrf.mxu1 }
  0xe2   : > { %4348 = vst [vmem:[#allocation20_spill] sm:$0xff] %v3307_v63 }
  0xe3   : > { %4349 = vst [vmem:[#allocation21_spill] sm:$0xff] %v3309_v11  ;;  %v2464_v11 = vld [vmem:[%s4326_s3 + $0x338] sm:$0xff] }
  0xe4   : > { %v3314_v16 = vpop.f32.mrf.mxu0  ;;  %747 = vmatmul.f32.gmra.mxu1 %v3080_v2 }
  0xe5   : > { %860 = vmatmul.f32.gmra.mxu2 %v3080_v2  ;;  %973 = vmatmul.f32.gmra.mxu3 %v3009_v38 }
  0xe7   : > { %1086 = vmatmul.f32.gmra.mxu0 %v3009_v38 }
  0xe8   : > { %v3326_v28 = vpop.f32.mrf.mxu2  ;;  %v3328_v46 = vpop.f32.mrf.mxu3 }
  0xe9   : > { %4350 = vst [vmem:[#allocation22_spill] sm:$0xff] %v3326_v28  ;;  %v3330_v31 = vpop.f32.mrf.mxu1  ;;  %v2470_v28 = vld [vmem:[%s4326_s3 + $0x368] sm:$0xff] }
  0xea   : > { %4351 = vst [vmem:[#allocation23_spill] sm:$0xff] %v3328_v46  ;;  %1424 = vmatpush.msra.mxu3 %v2470_v28 }
  0xec   : > { %v3332_v53 = vpop.f32.mrf.mxu0  ;;  %750 = vmatmul.f32.gmra.mxu1 %v2758_v17  ;;  %1425 = vmatpush.msra.mxu3 %v2467_v22 }
  0xed   : > { %863 = vmatmul.f32.gmra.mxu2 %v2758_v17  ;;  %976 = vmatmul.f32.gmra.mxu3 %v3055_v56 }
  0xee   : > { %1426 = vmatpush.msra.mxu3 %v2464_v11 }
  0xef   : > { %1089 = vmatmul.f32.gmra.mxu0 %v3055_v56 }
  0xf0   : > { %v3341_v14 = vpop.f32.mrf.mxu2  ;;  %v929_v26 = vpop.f32.mrf.mxu3 }
  0xf1   : > { %v3344_v46 = vadd.f32 %v929_v26, %v3188_v37  ;;  %v3346_v63 = vpop.f32.mrf.mxu1  ;;  %v493_v37 = vld [vmem:[%s4326_s3 + $0x88] sm:$0xff] }
  0xf2   : > { %1148 = vmatpush.msra.mxu1 %v493_v37  ;;  %v2469_v37 = vld [vmem:[%s4326_s3 + $0x360] sm:$0xff] }
  0xf3   : > { %1311 = vmatpush.msra.mxu2 %v2469_v37 }
  0xf4   : > { %v3351_v36 = vpop.f32.mrf.mxu0  ;;  %753 = vmatmul.f32.gmra.mxu1 %v2807_v32 }
  0xf5   : > { %866 = vmatmul.f32.gmra.mxu2 %v2807_v32  ;;  %979 = vmatmul.f32.gmra.mxu3 %v3080_v2 }
  0xf7   : > { %1092 = vmatmul.f32.gmra.mxu0 %v3080_v2 }
  0xf8   : > { %v3363_v39 = vpop.f32.mrf.mxu2  ;;  %v932_v26 = vpop.f32.mrf.mxu3 }
  0xf9   : > { %v3366_v23 = vadd.f32 %v932_v26, %v3206_v50  ;;  %v3368_v9 = vpop.f32.mrf.mxu1 }
  0xfc   : > { %v3370_v55 = vpop.f32.mrf.mxu0  ;;  %756 = vmatmul.f32.gmra.mxu1 %v2859_v48 }
  0xfd   : > { %869 = vmatmul.f32.gmra.mxu2 %v2859_v48  ;;  %982 = vmatmul.f32.gmra.mxu3 %v2758_v17 }
  0xff   : > { %1095 = vmatmul.f32.gmra.mxu0 %v2758_v17  ;;  %v490_v17 = vld [vmem:[%s4326_s3 + $0x70] sm:$0xff] }
 0x100   : > { %v3379_v15 = vpop.f32.mrf.mxu2  ;;  %v935_v50 = vpop.f32.mrf.mxu3  ;;  %1149 = vmatpush.msra.mxu1 %v490_v17 }
 0x101   : > { %v3382_v26 = vadd.f32 %v935_v50, %v3224_v61  ;;  %v3384_v43 = vpop.f32.mrf.mxu1  ;;  %v2471_v61 = vld [vmem:[%s4326_s3 + $0x370] sm:$0xff] }
 0x102   : > { %1537 = vmatpush.msra.mxu0 %v2471_v61 }
 0x104   : > { %v3389_v62 = vpop.f32.mrf.mxu0  ;;  %759 = vmatmul.f32.gmra.mxu1 %v2911_v0 }
 0x105   : > { %872 = vmatmul.f32.gmra.mxu2 %v2911_v0  ;;  %985 = vmatmul.f32.gmra.mxu3 %v2807_v32 }
 0x107   : > { %1098 = vmatmul.f32.gmra.mxu0 %v2807_v32  ;;  %v2466_v32 = vld [vmem:[%s4326_s3 + $0x348] sm:$0xff] }
 0x108   : > { %v3401_v28 = vpop.f32.mrf.mxu2  ;;  %v938_v37 = vpop.f32.mrf.mxu3  ;;  %1312 = vmatpush.msra.mxu2 %v2466_v32 }
 0x109   : > { %v3404_v50 = vadd.f32 %v938_v37, %v3242_v13  ;;  %v3406_v34 = vpop.f32.mrf.mxu1 }
 0x10c   : > { %v3408_v30 = vpop.f32.mrf.mxu0  ;;  %762 = vmatmul.f32.gmra.mxu1 %v2963_v19 }
 0x10d   : > { %875 = vmatmul.f32.gmra.mxu2 %v2963_v19  ;;  %988 = vmatmul.f32.gmra.mxu3 %v2859_v48 }
 0x10f   : > { %1101 = vmatmul.f32.gmra.mxu0 %v2859_v48  ;;  %v487_v48 = vld [vmem:[%s4326_s3 + $0x58] sm:$0xff] }
 0x110   : > { %v3417_v17 = vpop.f32.mrf.mxu2  ;;  %v941_v13 = vpop.f32.mrf.mxu3  ;;  %1150 = vmatpush.msra.mxu1 %v487_v48 }
 0x111   : > { %v3420_v61 = vadd.f32 %v941_v13, %v3260_v25  ;;  %v3422_v37 = vpop.f32.mrf.mxu1  ;;  %v2468_v25 = vld [vmem:[%s4326_s3 + $0x358] sm:$0xff] }
 0x112   : > { %1538 = vmatpush.msra.mxu0 %v2468_v25 }
 0x114   : > { %v3427_v7 = vpop.f32.mrf.mxu0  ;;  %765 = vmatmul.f32.gmra.mxu1 %v3015_v40 }
 0x115   : > { %878 = vmatmul.f32.gmra.mxu2 %v3015_v40  ;;  %991 = vmatmul.f32.gmra.mxu3 %v2911_v0 }
 0x117   : > { %1104 = vmatmul.f32.gmra.mxu0 %v2911_v0  ;;  %v2463_v0 = vld [vmem:[%s4326_s3 + $0x330] sm:$0xff] }
 0x118   : > { %v3439_v22 = vpop.f32.mrf.mxu2  ;;  %v944_v32 = vpop.f32.mrf.mxu3  ;;  %1313 = vmatpush.msra.mxu2 %v2463_v0 }
 0x119   : > { %v3442_v13 = vadd.f32 %v944_v32, %v3278_v29  ;;  %v3444_v54 = vpop.f32.mrf.mxu1 }
 0x11c   : > { %v3446_v42 = vpop.f32.mrf.mxu0  ;;  %768 = vmatmul.f32.gmra.mxu1 %v3058_v57 }
 0x11d   : > { %881 = vmatmul.f32.gmra.mxu2 %v3058_v57  ;;  %994 = vmatmul.f32.gmra.mxu3 %v2963_v19 }
 0x11f   : > { %1107 = vmatmul.f32.gmra.mxu0 %v2963_v19  ;;  %v484_v19 = vld [vmem:[%s4326_s3 + $0x40] sm:$0xff] }
 0x120   : > { %v3455_v48 = vpop.f32.mrf.mxu2  ;;  %v947_v29 = vpop.f32.mrf.mxu3  ;;  %1151 = vmatpush.msra.mxu1 %v484_v19 }
 0x121   : > { %v3458_v25 = vadd.f32 %v947_v29, %v3296_v51  ;;  %v3460_v32 = vpop.f32.mrf.mxu1  ;;  %v2465_v51 = vld [vmem:[%s4326_s3 + $0x340] sm:$0xff] }
 0x122   : > { %1539 = vmatpush.msra.mxu0 %v2465_v51 }
 0x124   : > { %v3465_v47 = vpop.f32.mrf.mxu0  ;;  %771 = vmatmul.f32.gmra.mxu1 %v3083_v3 }
 0x125   : > { %884 = vmatmul.f32.gmra.mxu2 %v3083_v3  ;;  %997 = vmatmul.f32.gmra.mxu3 %v3015_v40 }
 0x127   : > { %1110 = vmatmul.f32.gmra.mxu0 %v3015_v40  ;;  %v2460_v40 = vld [vmem:[%s4326_s3 + $0x318] sm:$0xff] }
 0x128   : > { %v3477_v11 = vpop.f32.mrf.mxu2  ;;  %v950_v0 = vpop.f32.mrf.mxu3  ;;  %1314 = vmatpush.msra.mxu2 %v2460_v40  ;;  %v2462_v40 = vld [vmem:[%s4326_s3 + $0x328] sm:$0xff] }
 0x129   : > { %v3480_v29 = vadd.f32 %v950_v0, %v3314_v16  ;;  %v3482_v27 = vpop.f32.mrf.mxu1  ;;  %v2461_v0 = vld [vmem:[%s4326_s3 + $0x320] sm:$0xff]  ;;  %1540 = vmatpush.msra.mxu0 %v2462_v40 }
 0x12a   : > { %4352 = vst [vmem:[#allocation24_spill] sm:$0xff] %v3482_v27  ;;  %1427 = vmatpush.msra.mxu3 %v2461_v0 }
 0x12c   : > { %v3484_v20 = vpop.f32.mrf.mxu0  ;;  %774 = vmatmul.f32.gmra.mxu1 %v2761_v18 }
 0x12d   : > { %4353 = vst [vmem:[#allocation25_spill] sm:$0xff] %v3484_v20  ;;  %887 = vmatmul.f32.gmra.mxu2 %v2761_v18  ;;  %1000 = vmatmul.f32.gmra.mxu3 %v3058_v57 }
 0x12f   : > { %1113 = vmatmul.f32.gmra.mxu0 %v3058_v57  ;;  %v481_v57 = vld [vmem:[%s4326_s3 + $0x28] sm:$0xff] }
 0x130   : > { %v3493_v19 = vpop.f32.mrf.mxu2  ;;  %v3495_v16 = vpop.f32.mrf.mxu3  ;;  %1152 = vmatpush.msra.mxu1 %v481_v57  ;;  %v2457_v57 = vld [vmem:[%s4326_s3 + $0x300] sm:$0xff] }
 0x131   : > { %v3497_v51 = vpop.f32.mrf.mxu1  ;;  %1315 = vmatpush.msra.mxu2 %v2457_v57  ;;  %v2459_v57 = vld [vmem:[%s4326_s3 + $0x310] sm:$0xff] }
 0x132   : > { %1541 = vmatpush.msra.mxu0 %v2459_v57 }
 0x134   : > { %v3502_v10 = vpop.f32.mrf.mxu0  ;;  %777 = vmatmul.f32.gmra.mxu1 %v2810_v33 }
 0x135   : > { %4354 = vst [vmem:[#allocation26_spill] sm:$0xff] %v3502_v10  ;;  %890 = vmatmul.f32.gmra.mxu2 %v2810_v33  ;;  %1003 = vmatmul.f32.gmra.mxu3 %v3083_v3 }
 0x137   : > { %1116 = vmatmul.f32.gmra.mxu0 %v3083_v3 }
 0x138   : > { %v3514_v0 = vpop.f32.mrf.mxu2  ;;  %v3516_v60 = vpop.f32.mrf.mxu3 }
 0x139   : > { %v3518_v20 = vpop.f32.mrf.mxu1 }
 0x13a   : > { %4355 = vst [vmem:[#allocation27_spill] sm:$0xff] %v3518_v20 }
 0x13c   : > { %v3520_v27 = vpop.f32.mrf.mxu0  ;;  %780 = vmatmul.f32.gmra.mxu1 %v2862_v49 }
 0x13d   : > { %4356 = vst [vmem:[#allocation28_spill] sm:$0xff] %v3520_v27  ;;  %893 = vmatmul.f32.gmra.mxu2 %v2862_v49  ;;  %1006 = vmatmul.f32.gmra.mxu3 %v2761_v18  ;;  %v2458_v27 = vld [vmem:[%s4326_s3 + $0x308] sm:$0xff] }
 0x13e   : > { %1428 = vmatpush.msra.mxu3 %v2458_v27 }
 0x13f   : > { %1119 = vmatmul.f32.gmra.mxu0 %v2761_v18  ;;  %v478_v18 = vld [vmem:[%s4326_s3 + $0x10] sm:$0xff] }
 0x140   : > { %v3529_v3 = vpop.f32.mrf.mxu2  ;;  %v3531_v40 = vpop.f32.mrf.mxu3  ;;  %1153 = vmatpush.msra.mxu1 %v478_v18 }
 0x141   : > { %4357 = vst [vmem:[#allocation29_spill] sm:$0xff] %v3531_v40  ;;  %v3533_v20 = vpop.f32.mrf.mxu1 }
 0x142   : > { %4358 = vst [vmem:[#allocation30_spill] sm:$0xff] %v3533_v20 }
 0x144   : > { %v3538_v10 = vpop.f32.mrf.mxu0  ;;  %783 = vmatmul.f32.gmra.mxu1 %v2914_v1 }
 0x145   : > { %4359 = vst [vmem:[#allocation31_spill] sm:$0xff] %v3538_v10  ;;  %896 = vmatmul.f32.gmra.mxu2 %v2914_v1  ;;  %1009 = vmatmul.f32.gmra.mxu3 %v2810_v33 }
 0x147   : > { %1122 = vmatmul.f32.gmra.mxu0 %v2810_v33 }
 0x148   : > { %v3550_v27 = vpop.f32.mrf.mxu2  ;;  %v3552_v10 = vpop.f32.mrf.mxu3 }
 0x149   : > { %4360 = vst [vmem:[#allocation32_spill] sm:$0xff] %v3550_v27  ;;  %v3554_v20 = vpop.f32.mrf.mxu1 }
 0x14a   : > { %4361 = vst [vmem:[#allocation33_spill] sm:$0xff] %v3554_v20 }
 0x14c   : > { %v3556_v40 = vpop.f32.mrf.mxu0  ;;  %786 = vmatmul.f32.gmra.mxu1 %v2966_v21 }
 0x14d   : > { %4362 = vst [vmem:[#allocation34_spill] sm:$0xff] %v3556_v40  ;;  %899 = vmatmul.f32.gmra.mxu2 %v2966_v21  ;;  %1012 = vmatmul.f32.gmra.mxu3 %v2862_v49 }
 0x14f   : > { %1125 = vmatmul.f32.gmra.mxu0 %v2862_v49 }
 0x150   : > { %v3562_v18 = vpop.f32.mrf.mxu2  ;;  %v3564_v57 = vpop.f32.mrf.mxu3 }
 0x151   : > { %4363 = vst [vmem:[#allocation35_spill] sm:$0xff] %v3562_v18  ;;  %v3566_v33 = vpop.f32.mrf.mxu1 }
 0x152   : > { %4364 = vst [vmem:[#allocation36_spill] sm:$0xff] %v3564_v57 }
 0x153   : > { %4365 = vst [vmem:[#allocation37_spill] sm:$0xff] %v3566_v33 }
 0x154   : > { %v3568_v27 = vpop.f32.mrf.mxu0  ;;  %789 = vmatmul.f32.gmra.mxu1 %v3018_v41 }
 0x155   : > { %4366 = vst [vmem:[#allocation38_spill] sm:$0xff] %v3568_v27  ;;  %902 = vmatmul.f32.gmra.mxu2 %v3018_v41  ;;  %1015 = vmatmul.f32.gmra.mxu3 %v2914_v1 }
 0x157   : > { %1128 = vmatmul.f32.gmra.mxu0 %v2914_v1 }
 0x158   : > { %v3574_v40 = vpop.f32.mrf.mxu2  ;;  %v3576_v20 = vpop.f32.mrf.mxu3 }
 0x159   : > { %v3578_v49 = vpop.f32.mrf.mxu1 }
 0x15a   : > { %4367 = vst [vmem:[#allocation39_spill] sm:$0xff] %v3578_v49 }
 0x15c   : > { %v3580_v18 = vpop.f32.mrf.mxu0  ;;  %792 = vmatmul.f32.gmra.mxu1 %v3061_v58 }
 0x15d   : > { %4368 = vst [vmem:[#allocation40_spill] sm:$0xff] %v3580_v18  ;;  %905 = vmatmul.f32.gmra.mxu2 %v3061_v58  ;;  %1018 = vmatmul.f32.gmra.mxu3 %v2966_v21 }
 0x15f   : > { %1131 = vmatmul.f32.gmra.mxu0 %v2966_v21 }
 0x160   : > { %v3586_v27 = vpop.f32.mrf.mxu2  ;;  %v3588_v33 = vpop.f32.mrf.mxu3 }
 0x161   : > { %4369 = vst [vmem:[#allocation41_spill] sm:$0xff] %v3588_v33  ;;  %v3590_v1 = vpop.f32.mrf.mxu1 }
 0x162   : > { %4370 = vst [vmem:[#allocation42_spill] sm:$0xff] %v3590_v1 }
 0x164   : > { %v3592_v57 = vpop.f32.mrf.mxu0  ;;  %795 = vmatmul.f32.gmra.mxu1 %v3086_v5 }
 0x165   : > { %4371 = vst [vmem:[#allocation43_spill] sm:$0xff] %v3592_v57  ;;  %908 = vmatmul.f32.gmra.mxu2 %v3086_v5  ;;  %1021 = vmatmul.f32.gmra.mxu3 %v3018_v41 }
 0x167   : > { %1134 = vmatmul.f32.gmra.mxu0 %v3018_v41 }
 0x168   : > { %v3598_v58 = vpop.f32.mrf.mxu2  ;;  %v3600_v18 = vpop.f32.mrf.mxu3 }
 0x169   : > { %4372 = vst [vmem:[#allocation44_spill] sm:$0xff] %v3600_v18  ;;  %v3602_v21 = vpop.f32.mrf.mxu1 }
 0x16a   : > { %4373 = vst [vmem:[#allocation45_spill] sm:$0xff] %v3602_v21 }
 0x16c   : > { %v3604_v49 = vpop.f32.mrf.mxu0  ;;  %1154 = vmatmul.f32.vlgmr.msra.gmra.mxu1 %v3102_v8 }
 0x16d   : > { %4374 = vst [vmem:[#allocation46_spill] sm:$0xff] %v3604_v49  ;;  %1316 = vmatmul.f32.vlgmr.msra.gmra.mxu2 %v2872_v52  ;;  %1429 = vmatmul.f32.vlgmr.msra.gmra.mxu3 %v2872_v52 }
 0x16f   : > { %1542 = vmatmul.f32.vlgmr.msra.gmra.mxu0 %v2872_v52 }
 0x170   : > { %v3610_v5 = vpop.f32.mrf.mxu2  ;;  %v3612_v41 = vpop.f32.mrf.mxu3 }
 0x171   : > { %4375 = vst [vmem:[#allocation47_spill] sm:$0xff] %v3610_v5  ;;  %v3614_v57 = vpop.f32.mrf.mxu1 }
 0x172   : > { %4376 = vst [vmem:[#allocation48_spill] sm:$0xff] %v3612_v41 }
 0x173   : > { %4377 = vst [vmem:[#allocation49_spill] sm:$0xff] %v3614_v57  ;;  %v2588_v57 = vld [vmem:[%s2749_s14] sm:$0xff] }
 0x174   : > { %v3616_v1 = vpop.f32.mrf.mxu0  ;;  %1157 = vmatmul.f32.gmra.mxu1 %v3117_v12 }
 0x175   : > { %4378 = vst [vmem:[#allocation50_spill] sm:$0xff] %v3616_v1  ;;  %1319 = vmatmul.f32.gmra.mxu2 %v2924_v4  ;;  %1432 = vmatmul.f32.gmra.mxu3 %v2924_v4 }
 0x177   : > { %1545 = vmatmul.f32.gmra.mxu0 %v2924_v4 }
 0x178   : > { %v3622_v8 = vpop.f32.mrf.mxu2  ;;  %v3624_v52 = vpop.f32.mrf.mxu3 }
 0x179   : > { %4379 = vst [vmem:[#allocation51_spill] sm:$0xff] %v3622_v8  ;;  %v3626_v49 = vpop.f32.mrf.mxu1 }
 0x17a   : > { %4380 = vst [vmem:[#allocation52_spill] sm:$0xff] %v3624_v52 }
 0x17b   : > { %4381 = vst [vmem:[#allocation53_spill] sm:$0xff] %v3626_v49  ;;  %v2589_v49 = vld [vmem:[%s2749_s14 + $0x8] sm:$0xff] }
 0x17c   : > { %v3628_v21 = vpop.f32.mrf.mxu0  ;;  %1160 = vmatmul.f32.gmra.mxu1 %v2588_v57 }
 0x17d   : > { %4382 = vst [vmem:[#allocation54_spill] sm:$0xff] %v3628_v21  ;;  %1322 = vmatmul.f32.gmra.mxu2 %v2976_v24  ;;  %1435 = vmatmul.f32.gmra.mxu3 %v2976_v24 }
 0x17f   : > { %1548 = vmatmul.f32.gmra.mxu0 %v2976_v24 }
 0x180   : > { %v3634_v12 = vpop.f32.mrf.mxu2  ;;  %v3636_v1 = vpop.f32.mrf.mxu3 }
 0x181   : > { %4383 = vst [vmem:[#allocation55_spill] sm:$0xff] %v3634_v12  ;;  %v3638_v41 = vpop.f32.mrf.mxu1 }
 0x182   : > { %4384 = vst [vmem:[#allocation56_spill] sm:$0xff] %v3636_v1  ;;  %v2590_v1 = vld [vmem:[%s2749_s14 + $0x10] sm:$0xff] }
 0x183   : > { %4385 = vst [vmem:[#allocation57_spill] sm:$0xff] %v3638_v41 }
 0x184   : > { %v3640_v52 = vpop.f32.mrf.mxu0  ;;  %1163 = vmatmul.f32.gmra.mxu1 %v2589_v49 }
 0x185   : > { %4386 = vst [vmem:[#allocation58_spill] sm:$0xff] %v3640_v52  ;;  %1325 = vmatmul.f32.gmra.mxu2 %v3028_v44  ;;  %1438 = vmatmul.f32.gmra.mxu3 %v3028_v44 }
 0x187   : > { %1551 = vmatmul.f32.gmra.mxu0 %v3028_v44 }
 0x188   : > { %v3646_v57 = vpop.f32.mrf.mxu2  ;;  %v3648_v21 = vpop.f32.mrf.mxu3 }
 0x189   : > { %4387 = vst [vmem:[#allocation59_spill] sm:$0xff] %v3646_v57  ;;  %v3650_v8 = vpop.f32.mrf.mxu1 }
 0x18a   : > { %4388 = vst [vmem:[#allocation60_spill] sm:$0xff] %v3648_v21 }
 0x18b   : > { %4389 = vst [vmem:[#allocation61_spill] sm:$0xff] %v3650_v8 }
 0x18c   : > { %v3652_v12 = vpop.f32.mrf.mxu0  ;;  %1166 = vmatmul.f32.gmra.mxu1 %v2590_v1 }
 0x18d   : > { %4390 = vst [vmem:[#allocation62_spill] sm:$0xff] %v3652_v12  ;;  %1328 = vmatmul.f32.gmra.mxu2 %v3065_v59  ;;  %1441 = vmatmul.f32.gmra.mxu3 %v3065_v59 }
 0x18f   : > { %1554 = vmatmul.f32.gmra.mxu0 %v3065_v59 }
 0x190   : > { %v3658_v49 = vpop.f32.mrf.mxu2  ;;  %v3660_v52 = vpop.f32.mrf.mxu3 }
 0x191   : > { %4391 = vst [vmem:[#allocation63_spill] sm:$0xff] %v3658_v49  ;;  %v3662_v41 = vpop.f32.mrf.mxu1 }
 0x192   : > { %4392 = vst [vmem:[#allocation64_spill] sm:$0xff] %v3660_v52 }
 0x193   : > { %4393 = vst [vmem:[#allocation65_spill] sm:$0xff] %v3662_v41 }
 0x194   : > { %v3664_v21 = vpop.f32.mrf.mxu0  ;;  %1169 = vmatmul.f32.gmra.mxu1 %v2924_v4 }
 0x195   : > { %4394 = vst [vmem:[#allocation66_spill] sm:$0xff] %v3664_v21  ;;  %1331 = vmatmul.f32.gmra.mxu2 %v3090_v6  ;;  %1444 = vmatmul.f32.gmra.mxu3 %v3090_v6  ;;  %v2591_v21 = vld [vmem:[%s2749_s14 + $0x40] sm:$0xff] }
 0x197   : > { %1557 = vmatmul.f32.gmra.mxu0 %v3090_v6 }
 0x198   : > { %v3670_v1 = vpop.f32.mrf.mxu2  ;;  %v3672_v12 = vpop.f32.mrf.mxu3 }
 0x199   : > { %4395 = vst [vmem:[#allocation67_spill] sm:$0xff] %v3670_v1  ;;  %v3674_v8 = vpop.f32.mrf.mxu1 }
 0x19a   : > { %4396 = vst [vmem:[#allocation68_spill] sm:$0xff] %v3672_v12 }
 0x19b   : > { %4397 = vst [vmem:[#allocation69_spill] sm:$0xff] %v3674_v8  ;;  %v2592_v8 = vld [vmem:[%s2749_s14 + $0x48] sm:$0xff] }
 0x19c   : > { %v3676_v52 = vpop.f32.mrf.mxu0  ;;  %1172 = vmatmul.f32.gmra.mxu1 %v2976_v24 }
 0x19d   : > { %4398 = vst [vmem:[#allocation70_spill] sm:$0xff] %v3676_v52  ;;  %1334 = vmatmul.f32.gmra.mxu2 %v2591_v21  ;;  %1447 = vmatmul.f32.gmra.mxu3 %v2591_v21 }
 0x19f   : > { %1560 = vmatmul.f32.gmra.mxu0 %v2591_v21 }
 0x1a0   : > { %v3680_v4 = vpop.f32.mrf.mxu2  ;;  %v3682_v41 = vpop.f32.mrf.mxu3 }
 0x1a1   : > { %4399 = vst [vmem:[#allocation71_spill] sm:$0xff] %v3680_v4  ;;  %v3684_v49 = vpop.f32.mrf.mxu1 }
 0x1a2   : > { %4400 = vst [vmem:[#allocation72_spill] sm:$0xff] %v3682_v41 }
 0x1a3   : > { %4401 = vst [vmem:[#allocation73_spill] sm:$0xff] %v3684_v49  ;;  %v2593_v49 = vld [vmem:[%s2749_s14 + $0x50] sm:$0xff] }
 0x1a4   : > { %v3686_v1 = vpop.f32.mrf.mxu0  ;;  %1175 = vmatmul.f32.gmra.mxu1 %v3028_v44 }
 0x1a5   : > { %4402 = vst [vmem:[#allocation74_spill] sm:$0xff] %v3686_v1  ;;  %1337 = vmatmul.f32.gmra.mxu2 %v2592_v8  ;;  %1450 = vmatmul.f32.gmra.mxu3 %v2592_v8 }
 0x1a7   : > { %1563 = vmatmul.f32.gmra.mxu0 %v2592_v8 }
 0x1a8   : > { %v3690_v24 = vpop.f32.mrf.mxu2  ;;  %v3692_v52 = vpop.f32.mrf.mxu3 }
 0x1a9   : > { %4403 = vst [vmem:[#allocation75_spill] sm:$0xff] %v3690_v24  ;;  %v3694_v12 = vpop.f32.mrf.mxu1 }
 0x1aa   : > { %4404 = vst [vmem:[#allocation76_spill] sm:$0xff] %v3692_v52 }
 0x1ab   : > { %4405 = vst [vmem:[#allocation77_spill] sm:$0xff] %v3694_v12  ;;  %v2594_v12 = vld [vmem:[%s2749_s14 + $0x58] sm:$0xff] }
 0x1ac   : > { %v3696_v4 = vpop.f32.mrf.mxu0  ;;  %1178 = vmatmul.f32.gmra.mxu1 %v3065_v59 }
 0x1ad   : > { %4406 = vst [vmem:[#allocation78_spill] sm:$0xff] %v3696_v4  ;;  %1340 = vmatmul.f32.gmra.mxu2 %v2593_v49  ;;  %1453 = vmatmul.f32.gmra.mxu3 %v2593_v49 }
 0x1af   : > { %1566 = vmatmul.f32.gmra.mxu0 %v2593_v49 }
 0x1b0   : > { %v3700_v44 = vpop.f32.mrf.mxu2  ;;  %v3702_v1 = vpop.f32.mrf.mxu3 }
 0x1b1   : > { %4407 = vst [vmem:[#allocation79_spill] sm:$0xff] %v3700_v44  ;;  %v3704_v41 = vpop.f32.mrf.mxu1 }
 0x1b2   : > { %4408 = vst [vmem:[#allocation80_spill] sm:$0xff] %v3702_v1  ;;  %v2595_v1 = vld [vmem:[%s2749_s14 + $0x60] sm:$0xff] }
 0x1b3   : > { %4409 = vst [vmem:[#allocation81_spill] sm:$0xff] %v3704_v41 }
 0x1b4   : > { %v3706_v24 = vpop.f32.mrf.mxu0  ;;  %1181 = vmatmul.f32.gmra.mxu1 %v3090_v6 }
 0x1b5   : > { %4410 = vst [vmem:[#allocation82_spill] sm:$0xff] %v3706_v24  ;;  %1343 = vmatmul.f32.gmra.mxu2 %v2594_v12  ;;  %1456 = vmatmul.f32.gmra.mxu3 %v2594_v12 }
 0x1b7   : > { %1569 = vmatmul.f32.gmra.mxu0 %v2594_v12 }
 0x1b8   : > { %v3710_v59 = vpop.f32.mrf.mxu2  ;;  %v3712_v4 = vpop.f32.mrf.mxu3 }
 0x1b9   : > { %4411 = vst [vmem:[#allocation83_spill] sm:$0xff] %v3710_v59  ;;  %v3714_v52 = vpop.f32.mrf.mxu1  ;;  %v3793_v59 = vld [vmem:[%s2749_s14 + $0x98] sm:$0xff] }
 0x1ba   : > { %4412 = vst [vmem:[#allocation84_spill] sm:$0xff] %v3712_v4 }
 0x1bb   : > { %4413 = vst [vmem:[#allocation85_spill] sm:$0xff] %v3714_v52 }
 0x1bc   : > { %v3716_v57 = vpop.f32.mrf.mxu0  ;;  %1184 = vmatmul.f32.gmra.mxu1 %v2591_v21 }
 0x1bd   : > { %4414 = vst [vmem:[#allocation86_spill] sm:$0xff] %v3716_v57  ;;  %1346 = vmatmul.f32.gmra.mxu2 %v2595_v1  ;;  %1459 = vmatmul.f32.gmra.mxu3 %v2595_v1 }
 0x1bf   : > { %1572 = vmatmul.f32.gmra.mxu0 %v2595_v1 }
 0x1c0   : > { %v3719_v24 = vpop.f32.mrf.mxu2  ;;  %v3721_v6 = vpop.f32.mrf.mxu3 }
 0x1c1   : > { %4415 = vst [vmem:[#allocation87_spill] sm:$0xff] %v3719_v24  ;;  %v3723_v41 = vpop.f32.mrf.mxu1 }
 0x1c2   : > { %4416 = vst [vmem:[#allocation88_spill] sm:$0xff] %v3721_v6 }
 0x1c3   : > { %4417 = vst [vmem:[#allocation89_spill] sm:$0xff] %v3723_v41 }
 0x1c4   : > { %v3725_v44 = vpop.f32.mrf.mxu0  ;;  %1187 = vmatmul.f32.gmra.mxu1 %v2592_v8 }
 0x1c5   : > { %4418 = vst [vmem:[#allocation90_spill] sm:$0xff] %v3725_v44  ;;  %1349 = vmatmul.f32.gmra.mxu2 %v3009_v38  ;;  %1462 = vmatmul.f32.gmra.mxu3 %v3009_v38 }
 0x1c7   : > { %1575 = vmatmul.f32.gmra.mxu0 %v3009_v38 }
 0x1c8   : > { %v3730_v21 = vpop.f32.mrf.mxu2  ;;  %v3732_v57 = vpop.f32.mrf.mxu3 }
 0x1c9   : > { %4419 = vst [vmem:[#allocation91_spill] sm:$0xff] %v3730_v21  ;;  %v3734_v52 = vpop.f32.mrf.mxu1 }
 0x1ca   : > { %4420 = vst [vmem:[#allocation92_spill] sm:$0xff] %v3732_v57 }
 0x1cb   : > { %4421 = vst [vmem:[#allocation93_spill] sm:$0xff] %v3734_v52 }
 0x1cc   : > { %v3736_v24 = vpop.f32.mrf.mxu0  ;;  %1190 = vmatmul.f32.gmra.mxu1 %v2593_v49 }
 0x1cd   : > { %4422 = vst [vmem:[#allocation94_spill] sm:$0xff] %v3736_v24  ;;  %1352 = vmatmul.f32.gmra.mxu2 %v3055_v56  ;;  %1465 = vmatmul.f32.gmra.mxu3 %v3055_v56 }
 0x1cf   : > { %1578 = vmatmul.f32.gmra.mxu0 %v3055_v56 }
 0x1d0   : > { %v3741_v8 = vpop.f32.mrf.mxu2  ;;  %v3743_v44 = vpop.f32.mrf.mxu3 }
 0x1d1   : > { %4423 = vst [vmem:[#allocation95_spill] sm:$0xff] %v3741_v8  ;;  %v3745_v38 = vpop.f32.mrf.mxu1 }
 0x1d2   : > { %4424 = vst [vmem:[#allocation96_spill] sm:$0xff] %v3743_v44 }
 0x1d3   : > { %4425 = vst [vmem:[#allocation97_spill] sm:$0xff] %v3745_v38  ;;  %v2596_v38 = vld [vmem:[%s2749_s14 + $0x80] sm:$0xff] }
 0x1d4   : > { %v3747_v41 = vpop.f32.mrf.mxu0  ;;  %1193 = vmatmul.f32.gmra.mxu1 %v2594_v12 }
 0x1d5   : > { %4426 = vst [vmem:[#allocation98_spill] sm:$0xff] %v3747_v41  ;;  %1355 = vmatmul.f32.gmra.mxu2 %v3080_v2  ;;  %1468 = vmatmul.f32.gmra.mxu3 %v3080_v2 }
 0x1d7   : > { %1581 = vmatmul.f32.gmra.mxu0 %v3080_v2 }
 0x1d8   : > { %v3752_v49 = vpop.f32.mrf.mxu2  ;;  %v3754_v24 = vpop.f32.mrf.mxu3 }
 0x1d9   : > { %4427 = vst [vmem:[#allocation99_spill] sm:$0xff] %v3752_v49  ;;  %v3756_v52 = vpop.f32.mrf.mxu1  ;;  %v2597_v49 = vld [vmem:[%s2749_s14 + $0x68] sm:$0xff] }
 0x1da   : > { %4428 = vst [vmem:[#allocation100_spill] sm:$0xff] %v3754_v24  ;;  %v3771_v24 = vld [vmem:[%s2749_s14 + $0x88] sm:$0xff] }
 0x1db   : > { %4429 = vst [vmem:[#allocation101_spill] sm:$0xff] %v3756_v52 }
 0x1dc   : > { %v3758_v44 = vpop.f32.mrf.mxu0  ;;  %1196 = vmatmul.f32.gmra.mxu1 %v2595_v1 }
 0x1dd   : > { %4430 = vst [vmem:[#allocation102_spill] sm:$0xff] %v3758_v44  ;;  %1358 = vmatmul.f32.gmra.mxu2 %v2596_v38  ;;  %1471 = vmatmul.f32.gmra.mxu3 %v2596_v38 }
 0x1df   : > { %1584 = vmatmul.f32.gmra.mxu0 %v2596_v38 }
 0x1e0   : > { %v3761_v12 = vpop.f32.mrf.mxu2  ;;  %v3763_v41 = vpop.f32.mrf.mxu3 }
 0x1e1   : > { %4431 = vst [vmem:[#allocation103_spill] sm:$0xff] %v3761_v12  ;;  %v3765_v8 = vpop.f32.mrf.mxu1  ;;  %v1767_v12 = vlaneseq }
 0x1e2   : > { %4432 = vst [vmem:[#allocation104_spill] sm:$0xff] %v3763_v41 }
 0x1e3   : > { %4433 = vst [vmem:[#allocation105_spill] sm:$0xff] %v3765_v8  ;;  %v3789_v4 = vshrl.u32 %v1767_v12, 7 }
 0x1e4   : > { %v3767_v57 = vpop.f32.mrf.mxu0  ;;  %1199 = vmatmul.f32.gmra.mxu1 %v2597_v49 }
 0x1e5   : > { %4434 = vst [vmem:[#allocation106_spill] sm:$0xff] %v3767_v57  ;;  %1361 = vmatmul.f32.gmra.mxu2 %v3771_v24  ;;  %1474 = vmatmul.f32.gmra.mxu3 %v3771_v24  ;;  %v3782_v57 = vld [vmem:[%s2749_s14 + $0x90] sm:$0xff]  ;;  %vm1834_vm0 = vcmp.lt.s32.totalorder %v3789_v4, 7  ;;  %vm1769_vm1 = vcmp.lt.s32.totalorder %v3789_v4, 1  ;;  %vm1868_vm2 = vcmp.eq.s32.totalorder %v3789_v4, 0 }
 0x1e7   : > { %1587 = vmatmul.f32.gmra.mxu0 %v3771_v24 }
 0x1e8   : > { %v3776_v1 = vpop.f32.mrf.mxu2  ;;  %v3778_v44 = vpop.f32.mrf.mxu3 }
 0x1e9   : > { %4435 = vst [vmem:[#allocation107_spill] sm:$0xff] %v3776_v1  ;;  %v1155_v52 = vpop.f32.mrf.mxu1 }
 0x1ea   : > { %4436 = vst [vmem:[#allocation108_spill] sm:$0xff] %v3778_v44  ;;  %v1156_v1 = vadd.f32 %v1155_v52, %v3341_v14 }
 0x1ec   : > { %v1543_v41 = vpop.f32.mrf.mxu0  ;;  %1202 = vmatmul.f32.gmra.mxu1 %v3055_v56 }
 0x1ed   : > { %1364 = vmatmul.f32.gmra.mxu2 %v3782_v57  ;;  %1477 = vmatmul.f32.gmra.mxu3 %v3782_v57  ;;  %v1641_v5 = vadd.f32 %v1543_v41, %v1156_v1  ;;  %v1046_v41 = vadd.f32 %v3351_v36, %v3346_v63 }
 0x1ef   : > { %1590 = vmatmul.f32.gmra.mxu0 %v3782_v57 }
 0x1f0   : > { %v1317_v49 = vpop.f32.mrf.mxu2  ;;  %v1430_v8 = vpop.f32.mrf.mxu3 }
 0x1f1   : > { %v1158_v6 = vpop.f32.mrf.mxu1  ;;  %v1639_v18 = vadd.f32 %v1317_v49, %v3344_v46  ;;  %v1802_v46 = vrot.slane %v1641_v5, 1  ;;  %v3818_v5 = vld [vmem:[%s2749_s14 + $0xa0] sm:$0xff] }
 0x1f2   : > { %v1159_v44 = vadd.f32 %v1158_v6, %v3363_v39  ;;  %v3800_v6 = vadd.s32 8, %v3789_v4 }
 0x1f3   : > { %v1735_v12 = vrot.slane %v1639_v18, 7  ;;  %v1874_v33 = vperm.slane %v1639_v18, 1 }
 0x1f4   : > { %v1546_v21 = vpop.f32.mrf.mxu0  ;;  %1205 = vmatmul.f32.gmra.mxu1 %v3080_v2  ;;  %vm1923_vm3 = vcmp.eq.s32.totalorder %v3800_v6, 15 }
 0x1f5   : > { %v1644_v56 = vadd.f32 %v1546_v21, %v1159_v44  ;;  %1367 = vmatmul.f32.gmra.mxu2 %v3793_v59  ;;  %1480 = vmatmul.f32.gmra.mxu3 %v3793_v59  ;;  %v1043_v21 = vadd.f32 %v3332_v53, %v3330_v31 }
 0x1f7   : > { %1593 = vmatmul.f32.gmra.mxu0 %v3793_v59  ;;  %v1818_v14 = vrot.slane %v1644_v56, 1  ;;  %v1928_v1 = vperm.slane %v1644_v56, 6  ;;  %v1640_v53 = vadd.f32 %v1430_v8, %v1043_v21  ;;  %v3827_v8 = vld [vmem:[%s4327_s4] ss:$0 sm:$0xff] }
 0x1f8   : > { %v1320_v52 = vpop.f32.mrf.mxu2  ;;  %v1433_v39 = vpop.f32.mrf.mxu3 }
 0x1f9   : > { %v1642_v2 = vadd.f32 %v1320_v52, %v3366_v23  ;;  %v1161_v44 = vpop.f32.mrf.mxu1  ;;  %v1851_v23 = vsel %vm1834_vm0, %v1818_v14, %v1802_v46  ;;  %v1643_v52 = vadd.f32 %v1433_v39, %v1046_v41 }
 0x1fa   : > { %v1945_v39 = vsel %vm1923_vm3, %v1928_v1, %v1851_v23  ;;  %v1162_v23 = vadd.f32 %v1161_v44, %v3379_v15 }
 0x1fb   : > { %v1751_v49 = vrot.slane %v1642_v2, 7  ;;  %v1835_v2 = vsel %vm1834_vm0, %v1802_v46, %v1818_v14 }
 0x1fc   : > { %v1549_v31 = vpop.f32.mrf.mxu0  ;;  %1208 = vmatmul.f32.gmra.mxu1 %v2596_v38 }
 0x1fd   : > { %v1786_v36 = vsel %vm1769_vm1, %v1751_v49, %v1735_v12  ;;  %v1770_v63 = vsel %vm1769_vm1, %v1735_v12, %v1751_v49  ;;  %1370 = vmatmul.f32.gmra.mxu2 %v3818_v5  ;;  %1483 = vmatmul.f32.gmra.mxu3 %v3818_v5  ;;  %v1647_v15 = vadd.f32 %v1549_v31, %v1162_v23 }
 0x1fe   : > { %v1890_v18 = vsel %vm1868_vm2, %v1874_v33, %v1786_v36  ;;  %v1977_v38 = vadd.f32 %v1770_v63, %v1643_v52 }
 0x1ff   : > { %v1976_v56 = vadd.f32 %v1890_v18, %v1640_v53  ;;  %1596 = vmatmul.f32.gmra.mxu0 %v3818_v5 }
 0x200   : > { %v2009_v21 = vadd.f32 %v1977_v38, %v1945_v39  ;;  %v1323_v41 = vpop.f32.mrf.mxu2  ;;  %v1436_v12 = vpop.f32.mrf.mxu3  ;;  %v3848_v38 = vld [vmem:[%s2749_s14 + $0xa8] sm:$0xff] }
 0x201   : > { %v2008_v33 = vadd.f32 %v1976_v56, %v1835_v2  ;;  %v1164_v49 = vpop.f32.mrf.mxu1 }
 0x202   : > { %v2044_v1 = vadd.f32 %v3827_v8, %v2009_v21  ;;  %v1165_v52 = vadd.f32 %v1164_v49, %v3401_v28  ;;  %v1645_v28 = vadd.f32 %v1323_v41, %v3382_v26  ;;  %v1803_v49 = vrot.slane %v1647_v15, 1 }
 0x203   : > { %v2043_v14 = vadd.f32 %v3827_v8, %v2008_v33  ;;  %v1052_v33 = vadd.f32 %v3389_v62, %v3384_v43  ;;  %v3867_v62 = vld [vmem:[%s2749_s14 + $0xb0] sm:$0xff] }
 0x204   : > { %2076 = vst [vmem:[%s3838_s10 + $0x8] sm:$0xff] %v2044_v1  ;;  %v2145_v46 = vmul.f32 %v2044_v1, %v2044_v1  ;;  %v1552_v53 = vpop.f32.mrf.mxu0  ;;  %1211 = vmatmul.f32.gmra.mxu1 %v3771_v24  ;;  %v1736_v31 = vrot.slane %v1645_v28, 7  ;;  %v1875_v26 = vperm.slane %v1645_v28, 1 }
 0x205   : > { %2075 = vst [vmem:[%s3838_s10] sm:$0xff] %v2043_v14  ;;  %v2107_v36 = vadd.f32 %v2044_v1, %v2043_v14  ;;  %v2144_v63 = vmul.f32 %v2043_v14, %v2043_v14  ;;  %v1650_v18 = vadd.f32 %v1552_v53, %v1165_v52  ;;  %1373 = vmatmul.f32.gmra.mxu2 %v3848_v38 }
 0x206   : > { %1486 = vmatmul.f32.gmra.mxu3 %v3848_v38  ;;  %v1049_v1 = vadd.f32 %v3370_v55, %v3368_v9 }
 0x207   : > { %v2176_v44 = vadd.f32 %v2145_v46, %v2144_v63  ;;  %1599 = vmatmul.f32.gmra.mxu0 %v3848_v38  ;;  %v1819_v56 = vrot.slane %v1650_v18, 1  ;;  %v1929_v23 = vperm.slane %v1650_v18, 6 }
 0x208   : > { %v1326_v39 = vpop.f32.mrf.mxu2  ;;  %v1439_v2 = vpop.f32.mrf.mxu3 }
 0x209   : > { %v1648_v24 = vadd.f32 %v1326_v39, %v3404_v50  ;;  %v1167_v21 = vpop.f32.mrf.mxu1  ;;  %v1852_v41 = vsel %vm1834_vm0, %v1819_v56, %v1803_v49  ;;  %v1649_v14 = vadd.f32 %v1439_v2, %v1052_v33  ;;  %v1646_v50 = vadd.f32 %v1436_v12, %v1049_v1 }
 0x20a   : > { %v1836_v12 = vsel %vm1834_vm0, %v1803_v49, %v1819_v56  ;;  %v1168_v33 = vadd.f32 %v1167_v21, %v3417_v17 }
 0x20b   : > { %v1752_v52 = vrot.slane %v1648_v24, 7 }
 0x20c   : > { %v1555_v46 = vpop.f32.mrf.mxu0  ;;  %1214 = vmatmul.f32.gmra.mxu1 %v3782_v57  ;;  %v1947_v57 = vsel %vm1923_vm3, %v1929_v23, %v1852_v41 }
 0x20d   : > { %v1787_v53 = vsel %vm1769_vm1, %v1752_v52, %v1736_v31  ;;  %v1771_v43 = vsel %vm1769_vm1, %v1736_v31, %v1752_v52  ;;  %1376 = vmatmul.f32.gmra.mxu2 %v3867_v62  ;;  %v1653_v41 = vadd.f32 %v1555_v46, %v1168_v33  ;;  %v1055_v46 = vadd.f32 %v3408_v30, %v3406_v34 }
 0x20e   : > { %1489 = vmatmul.f32.gmra.mxu3 %v3867_v62  ;;  %v1892_v55 = vsel %vm1868_vm2, %v1875_v26, %v1787_v53  ;;  %v1979_v9 = vadd.f32 %v1771_v43, %v1649_v14  ;;  %v3886_v26 = vld [vmem:[%s2749_s14 + $0xb8] sm:$0xff] }
 0x20f   : > { %v1978_v63 = vadd.f32 %v1892_v55, %v1646_v50  ;;  %1602 = vmatmul.f32.gmra.mxu0 %v3867_v62 }
 0x210   : > { %v2011_v18 = vadd.f32 %v1979_v9, %v1947_v57  ;;  %v1329_v15 = vpop.f32.mrf.mxu2  ;;  %v1442_v28 = vpop.f32.mrf.mxu3  ;;  %v1058_v9 = vadd.f32 %v3427_v7, %v3422_v37  ;;  %v3905_v37 = vld [vmem:[%s2749_s14 + $0xc0] sm:$0xff] }
 0x211   : > { %v2010_v39 = vadd.f32 %v1978_v63, %v1836_v12  ;;  %v1170_v2 = vpop.f32.mrf.mxu1  ;;  %v1651_v14 = vadd.f32 %v1329_v15, %v3420_v61  ;;  %v1804_v63 = vrot.slane %v1653_v41, 1 }
 0x212   : > { %v2046_v24 = vadd.f32 %v3827_v8, %v2011_v18  ;;  %v1171_v1 = vadd.f32 %v1170_v2, %v3439_v22 }
 0x213   : > { %v2045_v31 = vadd.f32 %v3827_v8, %v2010_v39  ;;  %v1876_v12 = vperm.slane %v1651_v14, 1 }
 0x214   : > { %2078 = vst [vmem:[%s3838_s10 + $0x18] sm:$0xff] %v2046_v24  ;;  %v1558_v23 = vpop.f32.mrf.mxu0  ;;  %1217 = vmatmul.f32.gmra.mxu1 %v3793_v59  ;;  %v2147_v21 = vmul.f32 %v2046_v24, %v2046_v24 }
 0x215   : > { %2077 = vst [vmem:[%s3838_s10 + $0x10] sm:$0xff] %v2045_v31  ;;  %v2108_v56 = vadd.f32 %v2107_v36, %v2045_v31  ;;  %v2146_v49 = vmul.f32 %v2045_v31, %v2045_v31  ;;  %v1656_v52 = vadd.f32 %v1558_v23, %v1171_v1  ;;  %1379 = vmatmul.f32.gmra.mxu2 %v3886_v26 }
 0x216   : > { %1492 = vmatmul.f32.gmra.mxu3 %v3886_v26 }
 0x217   : > { %v2109_v17 = vadd.f32 %v2108_v56, %v2046_v24  ;;  %v2177_v22 = vadd.f32 %v2176_v44, %v2146_v49  ;;  %1605 = vmatmul.f32.gmra.mxu0 %v3886_v26  ;;  %v1820_v50 = vrot.slane %v1656_v52, 1  ;;  %v1737_v44 = vrot.slane %v1651_v14, 7 }
 0x218   : > { %v1332_v59 = vpop.f32.mrf.mxu2  ;;  %v1445_v53 = vpop.f32.mrf.mxu3  ;;  %v1930_v57 = vperm.slane %v1656_v52, 6 }
 0x219   : > { %v2178_v36 = vadd.f32 %v2177_v22, %v2147_v21  ;;  %v1654_v43 = vadd.f32 %v1332_v59, %v3442_v13  ;;  %v1173_v55 = vpop.f32.mrf.mxu1  ;;  %v1853_v18 = vsel %vm1834_vm0, %v1820_v50, %v1804_v63  ;;  %v1655_v15 = vadd.f32 %v1445_v53, %v1058_v9  ;;  %v3924_v53 = vld [vmem:[%s2749_s14 + $0xc8] sm:$0xff] }
 0x21a   : > { %v1652_v13 = vadd.f32 %v1442_v28, %v1055_v46  ;;  %v1837_v28 = vsel %vm1834_vm0, %v1804_v63, %v1820_v50  ;;  %v1174_v52 = vadd.f32 %v1173_v55, %v3455_v48 }
 0x21b   : > { %v1753_v61 = vrot.slane %v1654_v43, 7 }
 0x21c   : > { %v1561_v39 = vpop.f32.mrf.mxu0  ;;  %1220 = vmatmul.f32.gmra.mxu1 %v3818_v5  ;;  %v1949_v5 = vsel %vm1923_vm3, %v1930_v57, %v1853_v18  ;;  %v1061_v18 = vadd.f32 %v3446_v42, %v3444_v54 }
 0x21d   : > { %v1788_v2 = vsel %vm1769_vm1, %v1753_v61, %v1737_v44  ;;  %v1772_v7 = vsel %vm1769_vm1, %v1737_v44, %v1753_v61  ;;  %1382 = vmatmul.f32.gmra.mxu2 %v3905_v37  ;;  %v1659_v43 = vadd.f32 %v1561_v39, %v1174_v52  ;;  %v1064_v61 = vadd.f32 %v3465_v47, %v3460_v32  ;;  %v3943_v32 = vld [vmem:[%s2749_s14 + $0xd0] sm:$0xff] }
 0x21e   : > { %1495 = vmatmul.f32.gmra.mxu3 %v3905_v37  ;;  %v1894_v30 = vsel %vm1868_vm2, %v1876_v12, %v1788_v2  ;;  %v1981_v34 = vadd.f32 %v1772_v7, %v1655_v15 }
 0x21f   : > { %v1980_v24 = vadd.f32 %v1894_v30, %v1652_v13  ;;  %1608 = vmatmul.f32.gmra.mxu0 %v3905_v37  ;;  %v1805_v12 = vrot.slane %v1659_v43, 1 }
 0x220   : > { %v2013_v33 = vadd.f32 %v1981_v34, %v1949_v5  ;;  %v1335_v1 = vpop.f32.mrf.mxu2  ;;  %v1448_v31 = vpop.f32.mrf.mxu3 }
 0x221   : > { %v2012_v23 = vadd.f32 %v1980_v24, %v1837_v28  ;;  %v1176_v56 = vpop.f32.mrf.mxu1  ;;  %v1657_v9 = vadd.f32 %v1335_v1, %v3458_v25 }
 0x222   : > { %v2048_v49 = vadd.f32 %v3827_v8, %v2013_v33  ;;  %v1177_v41 = vadd.f32 %v1176_v56, %v3477_v11 }
 0x223   : > { %v2047_v21 = vadd.f32 %v3827_v8, %v2012_v23  ;;  %v1877_v39 = vperm.slane %v1657_v9, 1 }
 0x224   : > { %2080 = vst [vmem:[%s3838_s10 + $0x28] sm:$0xff] %v2048_v49  ;;  %v1564_v22 = vpop.f32.mrf.mxu0  ;;  %1223 = vmatmul.f32.gmra.mxu1 %v3848_v38  ;;  %v2149_v55 = vmul.f32 %v2048_v49, %v2048_v49 }
 0x225   : > { %2079 = vst [vmem:[%s3838_s10 + $0x20] sm:$0xff] %v2047_v21  ;;  %v2110_v14 = vadd.f32 %v2109_v17, %v2047_v21  ;;  %v2148_v50 = vmul.f32 %v2047_v21, %v2047_v21  ;;  %v1662_v59 = vadd.f32 %v1564_v22, %v1177_v41  ;;  %1385 = vmatmul.f32.gmra.mxu2 %v3924_v53 }
 0x226   : > { %1498 = vmatmul.f32.gmra.mxu3 %v3924_v53  ;;  %v954_v41 = vadd.f32 %v3495_v16, %v3186_v35 }
 0x227   : > { %v2111_v48 = vadd.f32 %v2110_v14, %v2048_v49  ;;  %v2179_v11 = vadd.f32 %v2178_v36, %v2148_v50  ;;  %1611 = vmatmul.f32.gmra.mxu0 %v3924_v53  ;;  %v1821_v63 = vrot.slane %v1662_v59, 1  ;;  %v1738_v36 = vrot.slane %v1657_v9, 7 }
 0x228   : > { %v1338_v38 = vpop.f32.mrf.mxu2  ;;  %v1451_v46 = vpop.f32.mrf.mxu3  ;;  %v1931_v15 = vperm.slane %v1662_v59, 6  ;;  %v3964_v59 = vld [vmem:[%s2749_s14 + $0xd8] sm:$0xff] }
 0x229   : > { %v2180_v17 = vadd.f32 %v2179_v11, %v2149_v55  ;;  %v1660_v44 = vadd.f32 %v1338_v38, %v3480_v29  ;;  %v1179_v57 = vpop.f32.mrf.mxu1  ;;  %v1854_v13 = vsel %vm1834_vm0, %v1821_v63, %v1805_v12  ;;  %v1661_v2 = vadd.f32 %v1451_v46, %v1064_v61  ;;  %v4437_v46 = vld [vmem:[#allocation26_spill] sm:$0xff]  ;;  %v4438_v61 = vld [vmem:[#allocation24_spill] sm:$0xff] }
 0x22a   : > { %v1658_v29 = vadd.f32 %v1448_v31, %v1061_v18  ;;  %v1838_v24 = vsel %vm1834_vm0, %v1805_v12, %v1821_v63  ;;  %v1180_v56 = vadd.f32 %v1179_v57, %v3493_v19  ;;  %v957_v19 = vadd.f32 %v3516_v60, %v3201_v45  ;;  %v4439_v45 = vld [vmem:[#allocation25_spill] sm:$0xff] }
 0x22b   : > { %v1754_v25 = vrot.slane %v1660_v44, 7  ;;  %v1070_v44 = vadd.f32 %v4437_v46, %v3497_v51  ;;  %v1067_v60 = vadd.f32 %v4439_v45, %v4438_v61  ;;  %v4444_v46 = vld [vmem:[#allocation30_spill] sm:$0xff]  ;;  %v4446_v45 = vld [vmem:[#allocation27_spill] sm:$0xff] }
 0x22c   : > { %v1567_v7 = vpop.f32.mrf.mxu0  ;;  %1226 = vmatmul.f32.gmra.mxu1 %v3867_v62  ;;  %v1951_v62 = vsel %vm1923_vm3, %v1931_v15, %v1854_v13 }
 0x22d   : > { %v1789_v30 = vsel %vm1769_vm1, %v1754_v25, %v1738_v36  ;;  %v1773_v47 = vsel %vm1769_vm1, %v1738_v36, %v1754_v25  ;;  %1388 = vmatmul.f32.gmra.mxu2 %v3943_v32 }
 0x22e   : > { %1501 = vmatmul.f32.gmra.mxu3 %v3943_v32  ;;  %v1896_v42 = vsel %vm1868_vm2, %v1877_v39, %v1789_v30  ;;  %v1983_v54 = vadd.f32 %v1773_v47, %v1661_v2 }
 0x22f   : > { %v1982_v34 = vadd.f32 %v1896_v42, %v1658_v29  ;;  %1614 = vmatmul.f32.gmra.mxu0 %v3943_v32 }
 0x230   : > { %v2015_v5 = vadd.f32 %v1983_v54, %v1951_v62  ;;  %v1341_v28 = vpop.f32.mrf.mxu2  ;;  %v1454_v33 = vpop.f32.mrf.mxu3 }
 0x231   : > { %v2014_v1 = vadd.f32 %v1982_v34, %v1838_v24  ;;  %v1182_v31 = vpop.f32.mrf.mxu1  ;;  %v1663_v55 = vadd.f32 %v1341_v28, %v954_v41  ;;  %v1664_v13 = vadd.f32 %v1454_v33, %v1067_v60 }
 0x232   : > { %v2050_v23 = vadd.f32 %v3827_v8, %v2015_v5  ;;  %v1183_v49 = vadd.f32 %v1182_v31, %v3514_v0  ;;  %v1665_v0 = vadd.f32 %v1567_v7, %v1180_v56  ;;  %v3983_v7 = vld [vmem:[%s2749_s14 + $0xe0] sm:$0xff] }
 0x233   : > { %v2049_v52 = vadd.f32 %v3827_v8, %v2014_v1  ;;  %v1739_v12 = vrot.slane %v1663_v55, 7  ;;  %v1878_v36 = vperm.slane %v1663_v55, 1  ;;  %v4440_v1 = vld [vmem:[#allocation32_spill] sm:$0xff]  ;;  %v4441_v56 = vld [vmem:[#allocation6_spill] sm:$0xff] }
 0x234   : > { %2082 = vst [vmem:[%s3838_s10 + $0x38] sm:$0xff] %v2050_v23  ;;  %v1570_v21 = vpop.f32.mrf.mxu0  ;;  %1229 = vmatmul.f32.gmra.mxu1 %v3886_v26  ;;  %v2151_v35 = vmul.f32 %v2050_v23, %v2050_v23  ;;  %v1806_v57 = vrot.slane %v1665_v0, 1 }
 0x235   : > { %2081 = vst [vmem:[%s3838_s10 + $0x30] sm:$0xff] %v2049_v52  ;;  %v2112_v22 = vadd.f32 %v2111_v48, %v2049_v52  ;;  %v2150_v14 = vmul.f32 %v2049_v52, %v2049_v52  ;;  %v1668_v50 = vadd.f32 %v1570_v21, %v1183_v49  ;;  %1391 = vmatmul.f32.gmra.mxu2 %v3964_v59  ;;  %v4442_v49 = vld [vmem:[#allocation29_spill] sm:$0xff] }
 0x236   : > { %1504 = vmatmul.f32.gmra.mxu3 %v3964_v59  ;;  %v960_v52 = vadd.f32 %v4442_v49, %v4441_v56  ;;  %v4450_v56 = vld [vmem:[#allocation36_spill] sm:$0xff] }
 0x237   : > { %v2113_v43 = vadd.f32 %v2112_v22, %v2050_v23  ;;  %v2181_v16 = vadd.f32 %v2180_v17, %v2150_v14  ;;  %1617 = vmatmul.f32.gmra.mxu0 %v3964_v59  ;;  %v1822_v26 = vrot.slane %v1668_v50, 1  ;;  %v1932_v18 = vperm.slane %v1668_v50, 6  ;;  %v4004_v50 = vld [vmem:[%s2749_s14 + $0xe8] sm:$0xff] }
 0x238   : > { %v1344_v48 = vpop.f32.mrf.mxu2  ;;  %v1457_v11 = vpop.f32.mrf.mxu3 }
 0x239   : > { %v2182_v9 = vadd.f32 %v2181_v16, %v2151_v35  ;;  %v1666_v63 = vadd.f32 %v1344_v48, %v957_v19  ;;  %v1185_v38 = vpop.f32.mrf.mxu1  ;;  %v1855_v15 = vsel %vm1834_vm0, %v1822_v26, %v1806_v57  ;;  %v1667_v25 = vadd.f32 %v1457_v11, %v1070_v44  ;;  %v4445_v44 = vld [vmem:[#allocation31_spill] sm:$0xff] }
 0x23a   : > { %v1839_v42 = vsel %vm1834_vm0, %v1806_v57, %v1822_v26  ;;  %v1186_v33 = vadd.f32 %v1185_v38, %v3529_v3  ;;  %v4443_v3 = vld [vmem:[#allocation9_spill] sm:$0xff]  ;;  %v1076_v57 = vadd.f32 %v4445_v44, %v4444_v46 }
 0x23b   : > { %v1755_v17 = vrot.slane %v1666_v63, 7  ;;  %v963_v19 = vadd.f32 %v3552_v10, %v4443_v3  ;;  %v4447_v10 = vld [vmem:[#allocation28_spill] sm:$0xff]  ;;  %v4451_v3 = vld [vmem:[#allocation15_spill] sm:$0xff] }
 0x23c   : > { %v1573_v39 = vpop.f32.mrf.mxu0  ;;  %1232 = vmatmul.f32.gmra.mxu1 %v3905_v37  ;;  %v1953_v37 = vsel %vm1923_vm3, %v1932_v18, %v1855_v15  ;;  %v1073_v60 = vadd.f32 %v4447_v10, %v4446_v45 }
 0x23d   : > { %v1790_v2 = vsel %vm1769_vm1, %v1755_v17, %v1739_v12  ;;  %v1774_v51 = vsel %vm1769_vm1, %v1739_v12, %v1755_v17  ;;  %1394 = vmatmul.f32.gmra.mxu2 %v3983_v7  ;;  %v1671_v0 = vadd.f32 %v1573_v39, %v1186_v33 }
 0x23e   : > { %1507 = vmatmul.f32.gmra.mxu3 %v3983_v7  ;;  %v1898_v29 = vsel %vm1868_vm2, %v1878_v36, %v1790_v2  ;;  %v1985_v30 = vadd.f32 %v1774_v51, %v1667_v25  ;;  %v2611_v51 = vld [vmem:[%s2749_s14 + $0xf0] sm:$0xff] }
 0x23f   : > { %v1984_v47 = vadd.f32 %v1898_v29, %v1664_v13  ;;  %1620 = vmatmul.f32.gmra.mxu0 %v3983_v7  ;;  %v1807_v61 = vrot.slane %v1671_v0, 1 }
 0x240   : > { %v2017_v54 = vadd.f32 %v1985_v30, %v1953_v37  ;;  %v1347_v34 = vpop.f32.mrf.mxu2  ;;  %v1460_v62 = vpop.f32.mrf.mxu3 }
 0x241   : > { %v2016_v24 = vadd.f32 %v1984_v47, %v1839_v42  ;;  %v1188_v5 = vpop.f32.mrf.mxu1  ;;  %v1669_v26 = vadd.f32 %v1347_v34, %v960_v52  ;;  %v1670_v39 = vadd.f32 %v1460_v62, %v1073_v60 }
 0x242   : > { %v2052_v28 = vadd.f32 %v3827_v8, %v2017_v54  ;;  %v1189_v31 = vadd.f32 %v1188_v5, %v4440_v1 }
 0x243   : > { %v2051_v23 = vadd.f32 %v3827_v8, %v2016_v24  ;;  %v1740_v12 = vrot.slane %v1669_v26, 7  ;;  %v1879_v17 = vperm.slane %v1669_v26, 1 }
 0x244   : > { %2084 = vst [vmem:[%s3838_s10 + $0x48] sm:$0xff] %v2052_v28  ;;  %v1576_v41 = vpop.f32.mrf.mxu0  ;;  %1235 = vmatmul.f32.gmra.mxu1 %v3924_v53  ;;  %v2153_v16 = vmul.f32 %v2052_v28, %v2052_v28 }
 0x245   : > { %2083 = vst [vmem:[%s3838_s10 + $0x40] sm:$0xff] %v2051_v23  ;;  %v2114_v21 = vadd.f32 %v2113_v43, %v2051_v23  ;;  %v2152_v22 = vmul.f32 %v2051_v23, %v2051_v23  ;;  %v1674_v14 = vadd.f32 %v1576_v41, %v1189_v31  ;;  %1397 = vmatmul.f32.gmra.mxu2 %v4004_v50  ;;  %v4449_v23 = vld [vmem:[#allocation12_spill] sm:$0xff] }
 0x246   : > { %1510 = vmatmul.f32.gmra.mxu3 %v4004_v50  ;;  %v966_v49 = vadd.f32 %v4450_v56, %v4449_v23 }
 0x247   : > { %v2115_v35 = vadd.f32 %v2114_v21, %v2052_v28  ;;  %v2183_v55 = vadd.f32 %v2182_v9, %v2152_v22  ;;  %1623 = vmatmul.f32.gmra.mxu0 %v4004_v50  ;;  %v1823_v53 = vrot.slane %v1674_v14, 1  ;;  %v1933_v18 = vperm.slane %v1674_v14, 6  ;;  %v4448_v28 = vld [vmem:[#allocation35_spill] sm:$0xff]  ;;  %v2612_v14 = vld [vmem:[%s2749_s14 + $0xf8] sm:$0xff] }
 0x248   : > { %v1350_v43 = vpop.f32.mrf.mxu2  ;;  %v1463_v48 = vpop.f32.mrf.mxu3 }
 0x249   : > { %v2184_v11 = vadd.f32 %v2183_v55, %v2153_v16  ;;  %v1672_v63 = vadd.f32 %v1350_v43, %v963_v19  ;;  %v1191_v38 = vpop.f32.mrf.mxu1  ;;  %v1856_v36 = vsel %vm1834_vm0, %v1823_v53, %v1807_v61  ;;  %v1673_v15 = vadd.f32 %v1463_v48, %v1076_v57  ;;  %v473_v57 = vld [vmem:[%s4045_s7] sm:$0xff] }
 0x24a   : > { %v1955_v37 = vsel %vm1923_vm3, %v1933_v18, %v1856_v36  ;;  %v1192_v33 = vadd.f32 %v1191_v38, %v4448_v28  ;;  %v4452_v38 = vld [vmem:[#allocation37_spill] sm:$0xff]  ;;  %v4456_v28 = vld [vmem:[#allocation18_spill] sm:$0xff] }
 0x24b   : > { %v1756_v9 = vrot.slane %v1672_v63, 7 }
 0x24c   : > { %v1579_v25 = vpop.f32.mrf.mxu0  ;;  %1238 = vmatmul.f32.gmra.mxu1 %v3943_v32  ;;  %v1840_v32 = vsel %vm1834_vm0, %v1807_v61, %v1823_v53  ;;  %v4455_v61 = vld [vmem:[#allocation34_spill] sm:$0xff] }
 0x24d   : > { %v1791_v13 = vsel %vm1769_vm1, %v1756_v9, %v1740_v12  ;;  %v1775_v2 = vsel %vm1769_vm1, %v1740_v12, %v1756_v9  ;;  %1400 = vmatmul.f32.gmra.mxu2 %v2611_v51  ;;  %v1677_v19 = vadd.f32 %v1579_v25, %v1192_v33  ;;  %v4457_v33 = vld [vmem:[#allocation41_spill] sm:$0xff] }
 0x24e   : > { %1513 = vmatmul.f32.gmra.mxu3 %v2611_v51  ;;  %v1900_v29 = vsel %vm1868_vm2, %v1879_v17, %v1791_v13  ;;  %v1987_v30 = vadd.f32 %v1775_v2, %v1673_v15 }
 0x24f   : > { %v1986_v47 = vadd.f32 %v1900_v29, %v1670_v39  ;;  %1626 = vmatmul.f32.gmra.mxu0 %v2611_v51  ;;  %v1808_v44 = vrot.slane %v1677_v19, 1 }
 0x250   : > { %v2019_v42 = vadd.f32 %v1987_v30, %v1955_v37  ;;  %v1353_v54 = vpop.f32.mrf.mxu2  ;;  %v1466_v34 = vpop.f32.mrf.mxu3 }
 0x251   : > { %v2018_v62 = vadd.f32 %v1986_v47, %v1840_v32  ;;  %v1194_v24 = vpop.f32.mrf.mxu1  ;;  %v1675_v26 = vadd.f32 %v1353_v54, %v966_v49 }
 0x252   : > { %v2054_v5 = vadd.f32 %v3827_v8, %v2019_v42  ;;  %v1195_v1 = vadd.f32 %v1194_v24, %v3574_v40  ;;  %v969_v40 = vadd.f32 %v3576_v20, %v4451_v3  ;;  %v4453_v20 = vld [vmem:[#allocation38_spill] sm:$0xff]  ;;  %v474_v24 = vld [vmem:[%s4045_s7 + $0x8] sm:$0xff] }
 0x253   : > { %v2053_v31 = vadd.f32 %v3827_v8, %v2018_v62  ;;  %v1082_v46 = vadd.f32 %v4453_v20, %v4452_v38  ;;  %v1741_v10 = vrot.slane %v1675_v26, 7  ;;  %v1880_v18 = vperm.slane %v1675_v26, 1 }
 0x254   : > { %2086 = vst [vmem:[%s3838_s10 + $0x58] sm:$0xff] %v2054_v5  ;;  %v1582_v52 = vpop.f32.mrf.mxu0  ;;  %1241 = vmatmul.f32.gmra.mxu1 %v3964_v59  ;;  %v2155_v16 = vmul.f32 %v2054_v5, %v2054_v5 }
 0x255   : > { %2085 = vst [vmem:[%s3838_s10 + $0x50] sm:$0xff] %v2053_v31  ;;  %v2116_v41 = vadd.f32 %v2115_v35, %v2053_v31  ;;  %v2154_v21 = vmul.f32 %v2053_v31, %v2053_v31  ;;  %v1680_v22 = vadd.f32 %v1582_v52, %v1195_v1  ;;  %1403 = vmatmul.f32.gmra.mxu2 %v2612_v14  ;;  %v4458_v52 = vld [vmem:[#allocation21_spill] sm:$0xff] }
 0x256   : > { %1516 = vmatmul.f32.gmra.mxu3 %v2612_v14  ;;  %v972_v1 = vadd.f32 %v4457_v33, %v4456_v28  ;;  %v4468_v28 = vld [vmem:[#allocation4_spill] sm:$0xff] }
 0x257   : > { %v2117_v0 = vadd.f32 %v2116_v41, %v2054_v5  ;;  %v2185_v55 = vadd.f32 %v2184_v11, %v2154_v21  ;;  %1629 = vmatmul.f32.gmra.mxu0 %v2612_v14  ;;  %v1824_v59 = vrot.slane %v1680_v22, 1  ;;  %v4454_v11 = vld [vmem:[#allocation33_spill] sm:$0xff]  ;;  %v1934_v60 = vperm.slane %v1680_v22, 6  ;;  %v4469_v33 = vld [vmem:[#allocation52_spill] sm:$0xff] }
 0x258   : > { %v1356_v35 = vpop.f32.mrf.mxu2  ;;  %v1469_v53 = vpop.f32.mrf.mxu3  ;;  %v1079_v45 = vadd.f32 %v4455_v61, %v4454_v11 }
 0x259   : > { %v2186_v43 = vadd.f32 %v2185_v55, %v2155_v16  ;;  %v1678_v48 = vadd.f32 %v1356_v35, %v969_v40  ;;  %v1197_v63 = vpop.f32.mrf.mxu1  ;;  %v1857_v9 = vsel %vm1834_vm0, %v1824_v59, %v1808_v44  ;;  %v1679_v17 = vadd.f32 %v1469_v53, %v1082_v46 }
 0x25a   : > { %v1676_v15 = vadd.f32 %v1466_v34, %v1079_v45  ;;  %v1957_v29 = vsel %vm1923_vm3, %v1934_v60, %v1857_v9  ;;  %v1198_v34 = vadd.f32 %v1197_v63, %v3586_v27  ;;  %v4459_v27 = vld [vmem:[#allocation44_spill] sm:$0xff] }
 0x25b   : > { %v1757_v12 = vrot.slane %v1678_v48, 7  ;;  %v975_v41 = vadd.f32 %v4459_v27, %v4458_v52  ;;  %v4462_v48 = vld [vmem:[#allocation39_spill] sm:$0xff]  ;;  %v4463_v63 = vld [vmem:[#allocation40_spill] sm:$0xff] }
 0x25c   : > { %v1585_v36 = vpop.f32.mrf.mxu0  ;;  %1244 = vmatmul.f32.gmra.mxu1 %v3983_v7  ;;  %v1841_v7 = vsel %vm1834_vm0, %v1808_v44, %v1824_v59  ;;  %v4461_v59 = vld [vmem:[#allocation43_spill] sm:$0xff]  ;;  %v1085_v38 = vadd.f32 %v4463_v63, %v4462_v48 }
 0x25d   : > { %v1792_v25 = vsel %vm1769_vm1, %v1757_v12, %v1741_v10  ;;  %v1776_v39 = vsel %vm1769_vm1, %v1741_v10, %v1757_v12  ;;  %1406 = vmatmul.f32.gmra.mxu2 %v473_v57 }
 0x25e   : > { %1519 = vmatmul.f32.gmra.mxu3 %v473_v57  ;;  %v1902_v13 = vsel %vm1868_vm2, %v1880_v18, %v1792_v25  ;;  %v1989_v2 = vadd.f32 %v1776_v39, %v1679_v17 }
 0x25f   : > { %v1988_v51 = vadd.f32 %v1902_v13, %v1676_v15  ;;  %1632 = vmatmul.f32.gmra.mxu0 %v473_v57 }
 0x260   : > { %v2021_v30 = vadd.f32 %v1989_v2, %v1957_v29  ;;  %v1359_v47 = vpop.f32.mrf.mxu2  ;;  %v1472_v37 = vpop.f32.mrf.mxu3  ;;  %v4464_v29 = vld [vmem:[#allocation47_spill] sm:$0xff] }
 0x261   : > { %v2020_v32 = vadd.f32 %v1988_v51, %v1841_v7  ;;  %v1200_v42 = vpop.f32.mrf.mxu1  ;;  %v1681_v3 = vadd.f32 %v1359_v47, %v972_v1  ;;  %v1682_v45 = vadd.f32 %v1472_v37, %v1085_v38  ;;  %v981_v1 = vadd.f32 %v4469_v33, %v4468_v28 }
 0x262   : > { %v2056_v54 = vadd.f32 %v3827_v8, %v2021_v30  ;;  %v1201_v62 = vadd.f32 %v1200_v42, %v3598_v58  ;;  %v1683_v58 = vadd.f32 %v1585_v36, %v1198_v34  ;;  %v4465_v30 = vld [vmem:[#allocation51_spill] sm:$0xff]  ;;  %v4466_v42 = vld [vmem:[#allocation2_spill] sm:$0xff] }
 0x263   : > { %v2055_v5 = vadd.f32 %v3827_v8, %v2020_v32  ;;  %v1742_v20 = vrot.slane %v1681_v3, 7  ;;  %v1881_v57 = vperm.slane %v1681_v3, 1 }
 0x264   : > { %2088 = vst [vmem:[%s3838_s10 + $0x68] sm:$0xff] %v2056_v54  ;;  %v1588_v31 = vpop.f32.mrf.mxu0  ;;  %1247 = vmatmul.f32.gmra.mxu1 %v4004_v50  ;;  %v2157_v22 = vmul.f32 %v2056_v54, %v2056_v54  ;;  %v1809_v53 = vrot.slane %v1683_v58, 1 }
 0x265   : > { %2087 = vst [vmem:[%s3838_s10 + $0x60] sm:$0xff] %v2055_v5  ;;  %v2118_v23 = vadd.f32 %v2117_v0, %v2055_v5  ;;  %v2156_v56 = vmul.f32 %v2055_v5, %v2055_v5  ;;  %v1686_v49 = vadd.f32 %v1588_v31, %v1201_v62  ;;  %1409 = vmatmul.f32.gmra.mxu2 %v474_v24  ;;  %v4460_v0 = vld [vmem:[#allocation42_spill] sm:$0xff] }
 0x266   : > { %1522 = vmatmul.f32.gmra.mxu3 %v474_v24  ;;  %v1088_v35 = vadd.f32 %v4461_v59, %v4460_v0 }
 0x267   : > { %v2119_v21 = vadd.f32 %v2118_v23, %v2056_v54  ;;  %v2187_v14 = vadd.f32 %v2186_v43, %v2156_v56  ;;  %1635 = vmatmul.f32.gmra.mxu0 %v474_v24  ;;  %v1825_v40 = vrot.slane %v1686_v49, 1  ;;  %v1935_v46 = vperm.slane %v1686_v49, 6  ;;  %v4467_v54 = vld [vmem:[#allocation48_spill] sm:$0xff] }
 0x268   : > { %v1362_v19 = vpop.f32.mrf.mxu2  ;;  %v1475_v16 = vpop.f32.mrf.mxu3  ;;  %v978_v34 = vadd.f32 %v4467_v54, %v4466_v42  ;;  %v4479_v42 = vld [vmem:[#allocation60_spill] sm:$0xff] }
 0x269   : > { %v2188_v55 = vadd.f32 %v2187_v14, %v2157_v22  ;;  %v1684_v50 = vadd.f32 %v1362_v19, %v975_v41  ;;  %v1203_v26 = vpop.f32.mrf.mxu1  ;;  %v1858_v43 = vsel %vm1834_vm0, %v1825_v40, %v1809_v53  ;;  %v1685_v11 = vadd.f32 %v1475_v16, %v1088_v35  ;;  %v4471_v19 = vld [vmem:[#allocation50_spill] sm:$0xff] }
 0x26a   : > { %v1959_v17 = vsel %vm1923_vm3, %v1935_v46, %v1858_v43  ;;  %v1842_v36 = vsel %vm1834_vm0, %v1809_v53, %v1825_v40  ;;  %v1204_v7 = vadd.f32 %v1203_v26, %v4464_v29  ;;  %v4470_v40 = vld [vmem:[#allocation49_spill] sm:$0xff]  ;;  %v4473_v26 = vld [vmem:[#allocation46_spill] sm:$0xff]  ;;  %v4477_v29 = vld [vmem:[#allocation56_spill] sm:$0xff] }
 0x26b   : > { %v1758_v44 = vrot.slane %v1684_v50, 7  ;;  %v1094_v16 = vadd.f32 %v4471_v19, %v4470_v40  ;;  %v4472_v50 = vld [vmem:[#allocation45_spill] sm:$0xff] }
 0x26c   : > { %v1591_v61 = vpop.f32.mrf.mxu0  ;;  %v1091_v0 = vadd.f32 %v4473_v26, %v4472_v50 }
 0x26d   : > { %v1793_v10 = vsel %vm1769_vm1, %v1758_v44, %v1742_v20  ;;  %v1777_v60 = vsel %vm1769_vm1, %v1742_v20, %v1758_v44  ;;  %v1689_v31 = vadd.f32 %v1591_v61, %v1204_v7 }
 0x26e   : > { %v1904_v12 = vsel %vm1868_vm2, %v1881_v57, %v1793_v10  ;;  %v1991_v18 = vadd.f32 %v1777_v60, %v1685_v11 }
 0x26f   : > { %v1990_v9 = vadd.f32 %v1904_v12, %v1682_v45 }
 0x270   : > { %v2023_v15 = vadd.f32 %v1991_v18, %v1959_v17  ;;  %v1365_v25 = vpop.f32.mrf.mxu2  ;;  %v1478_v39 = vpop.f32.mrf.mxu3 }
 0x271   : > { %v2022_v13 = vadd.f32 %v1990_v9, %v1842_v36  ;;  %v1206_v2 = vpop.f32.mrf.mxu1  ;;  %v1687_v52 = vadd.f32 %v1365_v25, %v978_v34  ;;  %v1688_v20 = vadd.f32 %v1478_v39, %v1091_v0  ;;  %v4474_v36 = vld [vmem:[#allocation55_spill] sm:$0xff] }
 0x272   : > { %v2058_v51 = vadd.f32 %v3827_v8, %v2023_v15  ;;  %v1207_v47 = vadd.f32 %v1206_v2, %v4465_v30  ;;  %v4475_v25 = vld [vmem:[#allocation59_spill] sm:$0xff] }
 0x273   : > { %v2057_v37 = vadd.f32 %v3827_v8, %v2022_v13  ;;  %v1743_v59 = vrot.slane %v1687_v52, 7  ;;  %v1882_v48 = vperm.slane %v1687_v52, 1 }
 0x274   : > { %2090 = vst [vmem:[%s3838_s10 + $0x78] sm:$0xff] %v2058_v51  ;;  %v1594_v32 = vpop.f32.mrf.mxu0  ;;  %v2159_v56 = vmul.f32 %v2058_v51, %v2058_v51 }
 0x275   : > { %2089 = vst [vmem:[%s3838_s10 + $0x70] sm:$0xff] %v2057_v37  ;;  %v2120_v62 = vadd.f32 %v2119_v21, %v2057_v37  ;;  %v2158_v24 = vmul.f32 %v2057_v37, %v2057_v37  ;;  %v1692_v5 = vadd.f32 %v1594_v32, %v1207_v47  ;;  %v1810_v21 = vrot.slane %v1689_v31, 1  ;;  %v4478_v32 = vld [vmem:[#allocation10_spill] sm:$0xff] }
 0x276   : > { %v987_v54 = vadd.f32 %v4479_v42, %v4478_v32 }
 0x277   : > { %v2121_v23 = vadd.f32 %v2120_v62, %v2058_v51  ;;  %v2189_v49 = vadd.f32 %v2188_v55, %v2158_v24  ;;  %v1826_v27 = vrot.slane %v1692_v5, 1  ;;  %v1936_v35 = vperm.slane %v1692_v5, 6  ;;  %v4476_v51 = vld [vmem:[#allocation7_spill] sm:$0xff] }
 0x278   : > { %v1368_v41 = vpop.f32.mrf.mxu2  ;;  %v1481_v58 = vpop.f32.mrf.mxu3  ;;  %v984_v7 = vadd.f32 %v4477_v29, %v4476_v51  ;;  %v4489_v51 = vld [vmem:[#allocation68_spill] sm:$0xff] }
 0x279   : > { %v2190_v22 = vadd.f32 %v2189_v49, %v2159_v56  ;;  %v1690_v14 = vadd.f32 %v1368_v41, %v981_v1  ;;  %v1209_v3 = vpop.f32.mrf.mxu1  ;;  %v1859_v55 = vsel %vm1834_vm0, %v1826_v27, %v1810_v21  ;;  %v1691_v63 = vadd.f32 %v1481_v58, %v1094_v16  ;;  %v4481_v41 = vld [vmem:[#allocation58_spill] sm:$0xff] }
 0x27a   : > { %v1961_v61 = vsel %vm1923_vm3, %v1936_v35, %v1859_v55  ;;  %v1843_v45 = vsel %vm1834_vm0, %v1810_v21, %v1826_v27  ;;  %v1210_v15 = vadd.f32 %v1209_v3, %v4474_v36  ;;  %v4480_v27 = vld [vmem:[#allocation57_spill] sm:$0xff]  ;;  %v4483_v3 = vld [vmem:[#allocation54_spill] sm:$0xff]  ;;  %v4487_v36 = vld [vmem:[#allocation64_spill] sm:$0xff] }
 0x27b   : > { %v1759_v53 = vrot.slane %v1690_v14, 7  ;;  %v1100_v58 = vadd.f32 %v4481_v41, %v4480_v27  ;;  %v4482_v14 = vld [vmem:[#allocation53_spill] sm:$0xff] }
 0x27c   : > { %v1597_v38 = vpop.f32.mrf.mxu0  ;;  %v1097_v40 = vadd.f32 %v4483_v3, %v4482_v14 }
 0x27d   : > { %v1794_v46 = vsel %vm1769_vm1, %v1759_v53, %v1743_v59  ;;  %v1778_v44 = vsel %vm1769_vm1, %v1743_v59, %v1759_v53  ;;  %v1695_v34 = vadd.f32 %v1597_v38, %v1210_v15 }
 0x27e   : > { %v1906_v57 = vsel %vm1868_vm2, %v1882_v48, %v1794_v46  ;;  %v1993_v43 = vadd.f32 %v1778_v44, %v1691_v63 }
 0x27f   : > { %v1992_v11 = vadd.f32 %v1906_v57, %v1688_v20 }
 0x280   : > { %v2025_v10 = vadd.f32 %v1993_v43, %v1961_v61  ;;  %v1371_v60 = vpop.f32.mrf.mxu2  ;;  %v1484_v12 = vpop.f32.mrf.mxu3 }
 0x281   : > { %v2024_v18 = vadd.f32 %v1992_v11, %v1843_v45  ;;  %v1212_v9 = vpop.f32.mrf.mxu1  ;;  %v1693_v28 = vadd.f32 %v1371_v60, %v984_v7  ;;  %v1694_v59 = vadd.f32 %v1484_v12, %v1097_v40  ;;  %v4484_v45 = vld [vmem:[#allocation63_spill] sm:$0xff] }
 0x282   : > { %v2060_v17 = vadd.f32 %v3827_v8, %v2025_v10  ;;  %v1213_v39 = vadd.f32 %v1212_v9, %v4475_v25  ;;  %v4485_v60 = vld [vmem:[#allocation67_spill] sm:$0xff] }
 0x283   : > { %v2059_v13 = vadd.f32 %v3827_v8, %v2024_v18  ;;  %v1744_v19 = vrot.slane %v1693_v28, 7  ;;  %v1883_v50 = vperm.slane %v1693_v28, 1  ;;  %v4490_v28 = vld [vmem:[#allocation65_spill] sm:$0xff] }
 0x284   : > { %2092 = vst [vmem:[%s3838_s10 + $0x88] sm:$0xff] %v2060_v17  ;;  %v1600_v2 = vpop.f32.mrf.mxu0  ;;  %v2161_v24 = vmul.f32 %v2060_v17, %v2060_v17 }
 0x285   : > { %2091 = vst [vmem:[%s3838_s10 + $0x80] sm:$0xff] %v2059_v13  ;;  %v2122_v30 = vadd.f32 %v2121_v23, %v2059_v13  ;;  %v2160_v47 = vmul.f32 %v2059_v13, %v2059_v13  ;;  %v1698_v37 = vadd.f32 %v1600_v2, %v1213_v39  ;;  %v1811_v23 = vrot.slane %v1695_v34, 1  ;;  %v4488_v2 = vld [vmem:[#allocation16_spill] sm:$0xff] }
 0x286   : > { %v993_v29 = vadd.f32 %v4489_v51, %v4488_v2 }
 0x287   : > { %v2123_v62 = vadd.f32 %v2122_v30, %v2060_v17  ;;  %v2191_v5 = vadd.f32 %v2190_v22, %v2160_v47  ;;  %v1827_v33 = vrot.slane %v1698_v37, 1  ;;  %v1937_v16 = vperm.slane %v1698_v37, 6  ;;  %v4486_v17 = vld [vmem:[#allocation13_spill] sm:$0xff] }
 0x288   : > { %v1374_v1 = vpop.f32.mrf.mxu2  ;;  %v990_v15 = vadd.f32 %v4487_v36, %v4486_v17  ;;  %v4499_v17 = vld [vmem:[#allocation76_spill] sm:$0xff] }
 0x289   : > { %v1487_v31 = vpop.f32.mrf.mxu3  ;;  %v2192_v56 = vadd.f32 %v2191_v5, %v2161_v24  ;;  %v1696_v49 = vadd.f32 %v1374_v1, %v987_v54  ;;  %v1215_v52 = vpop.f32.mrf.mxu1  ;;  %v1860_v22 = vsel %vm1834_vm0, %v1827_v33, %v1811_v23  ;;  %v1844_v20 = vsel %vm1834_vm0, %v1811_v23, %v1827_v33  ;;  %v4491_v33 = vld [vmem:[#allocation66_spill] sm:$0xff] }
 0x28a   : > { %v1697_v26 = vadd.f32 %v1487_v31, %v1100_v58  ;;  %v1963_v38 = vsel %vm1923_vm3, %v1937_v16, %v1860_v22  ;;  %v1216_v10 = vadd.f32 %v1215_v52, %v4484_v45  ;;  %v1106_v1 = vadd.f32 %v4491_v33, %v4490_v28  ;;  %v4492_v31 = vld [vmem:[#allocation61_spill] sm:$0xff]  ;;  %v4497_v45 = vld [vmem:[#allocation72_spill] sm:$0xff] }
 0x28b   : > { %v1760_v21 = vrot.slane %v1696_v49, 7  ;;  %v4493_v49 = vld [vmem:[#allocation62_spill] sm:$0xff] }
 0x28c   : > { %v1603_v0 = vpop.f32.mrf.mxu0  ;;  %v1103_v52 = vadd.f32 %v4493_v49, %v4492_v31 }
 0x28d   : > { %v1795_v35 = vsel %vm1769_vm1, %v1760_v21, %v1744_v19  ;;  %v1779_v53 = vsel %vm1769_vm1, %v1744_v19, %v1760_v21  ;;  %v1701_v7 = vadd.f32 %v1603_v0, %v1216_v10 }
 0x28e   : > { %v1908_v48 = vsel %vm1868_vm2, %v1883_v50, %v1795_v35  ;;  %v1995_v55 = vadd.f32 %v1779_v53, %v1697_v26 }
 0x28f   : > { %v1994_v63 = vadd.f32 %v1908_v48, %v1694_v59 }
 0x290   : > { %v2027_v46 = vadd.f32 %v1995_v55, %v1963_v38  ;;  %v1377_v44 = vpop.f32.mrf.mxu2 }
 0x291   : > { %v1490_v57 = vpop.f32.mrf.mxu3  ;;  %v2026_v43 = vadd.f32 %v1994_v63, %v1844_v20  ;;  %v1218_v11 = vpop.f32.mrf.mxu1  ;;  %v1699_v32 = vadd.f32 %v1377_v44, %v990_v15  ;;  %v4174_v63 = vld [vmem:[%s4327_s4] ss:$0 sm:$0xff]  ;;  %v4494_v20 = vld [vmem:[#allocation71_spill] sm:$0xff] }
 0x292   : > { %v2062_v61 = vadd.f32 %v3827_v8, %v2027_v46  ;;  %v1219_v12 = vadd.f32 %v1218_v11, %v4485_v60  ;;  %v1700_v40 = vadd.f32 %v1490_v57, %v1103_v52  ;;  %v4495_v44 = vld [vmem:[#allocation75_spill] sm:$0xff] }
 0x293   : > { %v2061_v18 = vadd.f32 %v3827_v8, %v2026_v43  ;;  %v1745_v27 = vrot.slane %v1699_v32, 7  ;;  %v1884_v23 = vperm.slane %v1699_v32, 1 }
 0x294   : > { %2094 = vst [vmem:[%s3838_s10 + $0x98] sm:$0xff] %v2062_v61  ;;  %v1606_v9 = vpop.f32.mrf.mxu0  ;;  %v2163_v47 = vmul.f32 %v2062_v61, %v2062_v61 }
 0x295   : > { %2093 = vst [vmem:[%s3838_s10 + $0x90] sm:$0xff] %v2061_v18  ;;  %v2124_v25 = vadd.f32 %v2123_v62, %v2061_v18  ;;  %v2162_v39 = vmul.f32 %v2061_v18, %v2061_v18  ;;  %v1704_v13 = vadd.f32 %v1606_v9, %v1219_v12  ;;  %v1812_v62 = vrot.slane %v1701_v7, 1  ;;  %v4498_v9 = vld [vmem:[#allocation22_spill] sm:$0xff] }
 0x296   : > { %v999_v36 = vadd.f32 %v4499_v17, %v4498_v9 }
 0x297   : > { %v2125_v30 = vadd.f32 %v2124_v25, %v2062_v61  ;;  %v2193_v37 = vadd.f32 %v2192_v56, %v2162_v39  ;;  %v1828_v42 = vrot.slane %v1704_v13, 1  ;;  %v1938_v41 = vperm.slane %v1704_v13, 6  ;;  %v4496_v61 = vld [vmem:[#allocation19_spill] sm:$0xff] }
 0x298   : > { %v1380_v54 = vpop.f32.mrf.mxu2  ;;  %v996_v10 = vadd.f32 %v4497_v45, %v4496_v61  ;;  %v4509_v61 = vld [vmem:[#allocation84_spill] sm:$0xff] }
 0x299   : > { %v1493_v8 = vpop.f32.mrf.mxu3  ;;  %v2194_v34 = vadd.f32 %v2193_v37, %v2163_v47  ;;  %v1702_v24 = vadd.f32 %v1380_v54, %v993_v29  ;;  %v1221_v5 = vpop.f32.mrf.mxu1  ;;  %v1861_v56 = vsel %vm1834_vm0, %v1828_v42, %v1812_v62  ;;  %v1845_v0 = vsel %vm1834_vm0, %v1812_v62, %v1828_v42  ;;  %v4500_v42 = vld [vmem:[#allocation73_spill] sm:$0xff]  ;;  %v4501_v54 = vld [vmem:[#allocation74_spill] sm:$0xff] }
 0x29a   : > { %v1703_v14 = vadd.f32 %v1493_v8, %v1106_v1  ;;  %v1965_v26 = vsel %vm1923_vm3, %v1938_v41, %v1861_v56  ;;  %v1222_v46 = vadd.f32 %v1221_v5, %v4494_v20  ;;  %v1112_v8 = vadd.f32 %v4501_v54, %v4500_v42  ;;  %v4503_v5 = vld [vmem:[#allocation70_spill] sm:$0xff]  ;;  %v4507_v20 = vld [vmem:[#allocation80_spill] sm:$0xff] }
 0x29b   : > { %v1761_v58 = vrot.slane %v1702_v24, 7  ;;  %v4502_v24 = vld [vmem:[#allocation69_spill] sm:$0xff] }
 0x29c   : > { %v1609_v3 = vpop.f32.mrf.mxu0  ;;  %v1109_v28 = vadd.f32 %v4503_v5, %v4502_v24 }
 0x29d   : > { %v1796_v19 = vsel %vm1769_vm1, %v1761_v58, %v1745_v27  ;;  %v1780_v16 = vsel %vm1769_vm1, %v1745_v27, %v1761_v58  ;;  %v1707_v15 = vadd.f32 %v1609_v3, %v1222_v46 }
 0x29e   : > { %v1910_v21 = vsel %vm1868_vm2, %v1884_v23, %v1796_v19  ;;  %v1997_v50 = vadd.f32 %v1780_v16, %v1703_v14 }
 0x29f   : > { %v1996_v22 = vadd.f32 %v1910_v21, %v1700_v40 }
 0x2a0   : > { %v2029_v59 = vadd.f32 %v1997_v50, %v1965_v26  ;;  %v1383_v35 = vpop.f32.mrf.mxu2 }
 0x2a1   : > { %v1496_v53 = vpop.f32.mrf.mxu3  ;;  %v2028_v48 = vadd.f32 %v1996_v22, %v1845_v0  ;;  %v1224_v55 = vpop.f32.mrf.mxu1  ;;  %v1705_v2 = vadd.f32 %v1383_v35, %v996_v10  ;;  %v4504_v0 = vld [vmem:[#allocation79_spill] sm:$0xff] }
 0x2a2   : > { %v2064_v38 = vadd.f32 %v4174_v63, %v2029_v59  ;;  %v1225_v57 = vadd.f32 %v1224_v55, %v4495_v44  ;;  %v1706_v27 = vadd.f32 %v1496_v53, %v1109_v28  ;;  %v4505_v35 = vld [vmem:[#allocation83_spill] sm:$0xff] }
 0x2a3   : > { %v2063_v43 = vadd.f32 %v4174_v63, %v2028_v48  ;;  %v1746_v33 = vrot.slane %v1705_v2, 7  ;;  %v1885_v31 = vperm.slane %v1705_v2, 1 }
 0x2a4   : > { %2096 = vst [vmem:[%s3838_s10 + $0xa8] sm:$0xff] %v2064_v38  ;;  %v1612_v11 = vpop.f32.mrf.mxu0  ;;  %v2165_v39 = vmul.f32 %v2064_v38, %v2064_v38 }
 0x2a5   : > { %2095 = vst [vmem:[%s3838_s10 + $0xa0] sm:$0xff] %v2063_v43  ;;  %v2126_v60 = vadd.f32 %v2125_v30, %v2063_v43  ;;  %v2164_v12 = vmul.f32 %v2063_v43, %v2063_v43  ;;  %v1710_v18 = vadd.f32 %v1612_v11, %v1225_v57  ;;  %v1813_v30 = vrot.slane %v1707_v15, 1  ;;  %v4508_v11 = vld [vmem:[#allocation5_spill] sm:$0xff] }
 0x2a6   : > { %v1005_v45 = vadd.f32 %v4509_v61, %v4508_v11 }
 0x2a7   : > { %v2127_v25 = vadd.f32 %v2126_v60, %v2064_v38  ;;  %v2195_v13 = vadd.f32 %v2194_v34, %v2164_v12  ;;  %v1829_v51 = vrot.slane %v1710_v18, 1  ;;  %v1939_v1 = vperm.slane %v1710_v18, 6  ;;  %v4506_v38 = vld [vmem:[#allocation3_spill] sm:$0xff] }
 0x2a8   : > { %v1386_v29 = vpop.f32.mrf.mxu2  ;;  %v1002_v46 = vadd.f32 %v4507_v20, %v4506_v38  ;;  %v4519_v38 = vld [vmem:[#allocation92_spill] sm:$0xff] }
 0x2a9   : > { %v1499_v7 = vpop.f32.mrf.mxu3  ;;  %v2196_v47 = vadd.f32 %v2195_v13, %v2165_v39  ;;  %v1708_v37 = vadd.f32 %v1386_v29, %v999_v36  ;;  %v1227_v32 = vpop.f32.mrf.mxu1  ;;  %v1862_v34 = vsel %vm1834_vm0, %v1829_v51, %v1813_v30  ;;  %v1846_v40 = vsel %vm1834_vm0, %v1813_v30, %v1829_v51  ;;  %v4510_v51 = vld [vmem:[#allocation81_spill] sm:$0xff]  ;;  %v4511_v29 = vld [vmem:[#allocation82_spill] sm:$0xff] }
 0x2aa   : > { %v1709_v49 = vadd.f32 %v1499_v7, %v1112_v8  ;;  %v1967_v3 = vsel %vm1923_vm3, %v1939_v1, %v1862_v34  ;;  %v1228_v59 = vadd.f32 %v1227_v32, %v4504_v0  ;;  %v1118_v7 = vadd.f32 %v4511_v29, %v4510_v51  ;;  %v4513_v32 = vld [vmem:[#allocation78_spill] sm:$0xff]  ;;  %v4517_v0 = vld [vmem:[#allocation88_spill] sm:$0xff] }
 0x2ab   : > { %v1762_v62 = vrot.slane %v1708_v37, 7  ;;  %v4512_v37 = vld [vmem:[#allocation77_spill] sm:$0xff] }
 0x2ac   : > { %v1615_v52 = vpop.f32.mrf.mxu0  ;;  %v1115_v42 = vadd.f32 %v4513_v32, %v4512_v37 }
 0x2ad   : > { %v1797_v41 = vsel %vm1769_vm1, %v1762_v62, %v1746_v33  ;;  %v1781_v58 = vsel %vm1769_vm1, %v1746_v33, %v1762_v62  ;;  %v1713_v10 = vadd.f32 %v1615_v52, %v1228_v59 }
 0x2ae   : > { %v1912_v23 = vsel %vm1868_vm2, %v1885_v31, %v1797_v41  ;;  %v1999_v56 = vadd.f32 %v1781_v58, %v1709_v49 }
 0x2af   : > { %v1998_v14 = vadd.f32 %v1912_v23, %v1706_v27 }
 0x2b0   : > { %v2031_v19 = vadd.f32 %v1999_v56, %v1967_v3  ;;  %v1389_v16 = vpop.f32.mrf.mxu2 }
 0x2b1   : > { %v1502_v21 = vpop.f32.mrf.mxu3  ;;  %v2030_v50 = vadd.f32 %v1998_v14, %v1846_v40  ;;  %v1230_v22 = vpop.f32.mrf.mxu1  ;;  %v1711_v9 = vadd.f32 %v1389_v16, %v1002_v46  ;;  %v4514_v40 = vld [vmem:[#allocation87_spill] sm:$0xff] }
 0x2b2   : > { %v2066_v26 = vadd.f32 %v4174_v63, %v2031_v19  ;;  %v1231_v53 = vadd.f32 %v1230_v22, %v4505_v35  ;;  %v1712_v33 = vadd.f32 %v1502_v21, %v1115_v42  ;;  %v4515_v16 = vld [vmem:[#allocation91_spill] sm:$0xff] }
 0x2b3   : > { %v2065_v48 = vadd.f32 %v4174_v63, %v2030_v50  ;;  %v1747_v54 = vrot.slane %v1711_v9, 7  ;;  %v1886_v24 = vperm.slane %v1711_v9, 1 }
 0x2b4   : > { %2098 = vst [vmem:[%s3838_s10 + $0xb8] sm:$0xff] %v2066_v26  ;;  %v1618_v55 = vpop.f32.mrf.mxu0  ;;  %v2167_v12 = vmul.f32 %v2066_v26, %v2066_v26 }
 0x2b5   : > { %2097 = vst [vmem:[%s3838_s10 + $0xb0] sm:$0xff] %v2065_v48  ;;  %v2128_v44 = vadd.f32 %v2127_v25, %v2065_v48  ;;  %v2166_v57 = vmul.f32 %v2065_v48, %v2065_v48  ;;  %v1716_v43 = vadd.f32 %v1618_v55, %v1231_v53  ;;  %v1814_v25 = vrot.slane %v1713_v10, 1  ;;  %v4518_v55 = vld [vmem:[#allocation11_spill] sm:$0xff] }
 0x2b6   : > { %v1011_v20 = vadd.f32 %v4519_v38, %v4518_v55 }
 0x2b7   : > { %v2129_v60 = vadd.f32 %v2128_v44, %v2066_v26  ;;  %v2197_v18 = vadd.f32 %v2196_v47, %v2166_v57  ;;  %v1830_v17 = vrot.slane %v1716_v43, 1  ;;  %v1940_v8 = vperm.slane %v1716_v43, 6  ;;  %v4516_v26 = vld [vmem:[#allocation8_spill] sm:$0xff] }
 0x2b8   : > { %v1392_v36 = vpop.f32.mrf.mxu2  ;;  %v1008_v59 = vadd.f32 %v4517_v0, %v4516_v26  ;;  %v4529_v26 = vld [vmem:[#allocation100_spill] sm:$0xff] }
 0x2b9   : > { %v1505_v15 = vpop.f32.mrf.mxu3  ;;  %v2198_v39 = vadd.f32 %v2197_v18, %v2167_v12  ;;  %v1714_v13 = vadd.f32 %v1392_v36, %v1005_v45  ;;  %v1233_v2 = vpop.f32.mrf.mxu1  ;;  %v1863_v47 = vsel %vm1834_vm0, %v1830_v17, %v1814_v25  ;;  %v1847_v27 = vsel %vm1834_vm0, %v1814_v25, %v1830_v17  ;;  %v4520_v17 = vld [vmem:[#allocation89_spill] sm:$0xff]  ;;  %v4521_v36 = vld [vmem:[#allocation90_spill] sm:$0xff] }
 0x2ba   : > { %v1715_v5 = vadd.f32 %v1505_v15, %v1118_v7  ;;  %v1969_v52 = vsel %vm1923_vm3, %v1940_v8, %v1863_v47  ;;  %v1234_v19 = vadd.f32 %v1233_v2, %v4514_v40  ;;  %v1124_v15 = vadd.f32 %v4521_v36, %v4520_v17  ;;  %v4523_v2 = vld [vmem:[#allocation86_spill] sm:$0xff]  ;;  %v4527_v40 = vld [vmem:[#allocation96_spill] sm:$0xff] }
 0x2bb   : > { %v1763_v30 = vrot.slane %v1714_v13, 7  ;;  %v4522_v13 = vld [vmem:[#allocation85_spill] sm:$0xff] }
 0x2bc   : > { %v1621_v28 = vpop.f32.mrf.mxu0  ;;  %v1121_v51 = vadd.f32 %v4523_v2, %v4522_v13 }
 0x2bd   : > { %v1798_v1 = vsel %vm1769_vm1, %v1763_v30, %v1747_v54  ;;  %v1782_v62 = vsel %vm1769_vm1, %v1747_v54, %v1763_v30  ;;  %v1719_v46 = vadd.f32 %v1621_v28, %v1234_v19 }
 0x2be   : > { %v1914_v31 = vsel %vm1868_vm2, %v1886_v24, %v1798_v1  ;;  %v2001_v34 = vadd.f32 %v1782_v62, %v1715_v5 }
 0x2bf   : > { %v2000_v49 = vadd.f32 %v1914_v31, %v1712_v33 }
 0x2c0   : > { %v2033_v41 = vadd.f32 %v2001_v34, %v1969_v52  ;;  %v1395_v58 = vpop.f32.mrf.mxu2 }
 0x2c1   : > { %v1508_v23 = vpop.f32.mrf.mxu3  ;;  %v2032_v56 = vadd.f32 %v2000_v49, %v1847_v27  ;;  %v1236_v14 = vpop.f32.mrf.mxu1  ;;  %v1717_v11 = vadd.f32 %v1395_v58, %v1008_v59  ;;  %v4524_v27 = vld [vmem:[#allocation95_spill] sm:$0xff] }
 0x2c2   : > { %v2068_v3 = vadd.f32 %v4174_v63, %v2033_v41  ;;  %v1237_v21 = vadd.f32 %v1236_v14, %v4515_v16  ;;  %v1718_v54 = vadd.f32 %v1508_v23, %v1121_v51  ;;  %v4525_v58 = vld [vmem:[#allocation99_spill] sm:$0xff] }
 0x2c3   : > { %v2067_v50 = vadd.f32 %v4174_v63, %v2032_v56  ;;  %v1748_v29 = vrot.slane %v1717_v11, 7  ;;  %v1887_v37 = vperm.slane %v1717_v11, 1 }
 0x2c4   : > { %2100 = vst [vmem:[%s3838_s10 + $0xc8] sm:$0xff] %v2068_v3  ;;  %v1624_v22 = vpop.f32.mrf.mxu0  ;;  %v2169_v57 = vmul.f32 %v2068_v3, %v2068_v3 }
 0x2c5   : > { %2099 = vst [vmem:[%s3838_s10 + $0xc0] sm:$0xff] %v2067_v50  ;;  %v2130_v35 = vadd.f32 %v2129_v60, %v2067_v50  ;;  %v2168_v53 = vmul.f32 %v2067_v50, %v2067_v50  ;;  %v1722_v48 = vadd.f32 %v1624_v22, %v1237_v21  ;;  %v1815_v60 = vrot.slane %v1719_v46, 1  ;;  %v4528_v22 = vld [vmem:[#allocation17_spill] sm:$0xff] }
 0x2c6   : > { %v1017_v0 = vadd.f32 %v4529_v26, %v4528_v22 }
 0x2c7   : > { %v2131_v44 = vadd.f32 %v2130_v35, %v2068_v3  ;;  %v2199_v43 = vadd.f32 %v2198_v39, %v2168_v53  ;;  %v1831_v61 = vrot.slane %v1722_v48, 1  ;;  %v1941_v7 = vperm.slane %v1722_v48, 6  ;;  %v4526_v3 = vld [vmem:[#allocation14_spill] sm:$0xff] }
 0x2c8   : > { %v1398_v45 = vpop.f32.mrf.mxu2  ;;  %v1014_v19 = vadd.f32 %v4527_v40, %v4526_v3  ;;  %v4539_v3 = vld [vmem:[#allocation108_spill] sm:$0xff] }
 0x2c9   : > { %v1511_v10 = vpop.f32.mrf.mxu3  ;;  %v2200_v12 = vadd.f32 %v2199_v43, %v2169_v57  ;;  %v1720_v18 = vadd.f32 %v1398_v45, %v1011_v20  ;;  %v1239_v9 = vpop.f32.mrf.mxu1  ;;  %v1864_v39 = vsel %vm1834_vm0, %v1831_v61, %v1815_v60  ;;  %v1848_v33 = vsel %vm1834_vm0, %v1815_v60, %v1831_v61  ;;  %v4530_v61 = vld [vmem:[#allocation97_spill] sm:$0xff]  ;;  %v4531_v45 = vld [vmem:[#allocation98_spill] sm:$0xff] }
 0x2ca   : > { %v1721_v32 = vadd.f32 %v1511_v10, %v1124_v15  ;;  %v1971_v28 = vsel %vm1923_vm3, %v1941_v7, %v1864_v39  ;;  %v1240_v41 = vadd.f32 %v1239_v9, %v4524_v27  ;;  %v1130_v10 = vadd.f32 %v4531_v45, %v4530_v61  ;;  %v4533_v9 = vld [vmem:[#allocation94_spill] sm:$0xff]  ;;  %v4537_v27 = vld [vmem:[#allocation104_spill] sm:$0xff] }
 0x2cb   : > { %v1764_v25 = vrot.slane %v1720_v18, 7  ;;  %v4532_v18 = vld [vmem:[#allocation93_spill] sm:$0xff] }
 0x2cc   : > { %v1627_v42 = vpop.f32.mrf.mxu0  ;;  %v1127_v17 = vadd.f32 %v4533_v9, %v4532_v18 }
 0x2cd   : > { %v1799_v8 = vsel %vm1769_vm1, %v1764_v25, %v1748_v29  ;;  %v1783_v30 = vsel %vm1769_vm1, %v1748_v29, %v1764_v25  ;;  %v1725_v59 = vadd.f32 %v1627_v42, %v1240_v41 }
 0x2ce   : > { %v1916_v24 = vsel %vm1868_vm2, %v1887_v37, %v1799_v8  ;;  %v2003_v47 = vadd.f32 %v1783_v30, %v1721_v32 }
 0x2cf   : > { %v2002_v5 = vadd.f32 %v1916_v24, %v1718_v54 }
 0x2d0   : > { %v2035_v1 = vadd.f32 %v2003_v47, %v1971_v28  ;;  %v1401_v62 = vpop.f32.mrf.mxu2 }
 0x2d1   : > { %v1514_v31 = vpop.f32.mrf.mxu3  ;;  %v2034_v34 = vadd.f32 %v2002_v5, %v1848_v33  ;;  %v1242_v49 = vpop.f32.mrf.mxu1  ;;  %v1723_v55 = vadd.f32 %v1401_v62, %v1014_v19  ;;  %v4534_v33 = vld [vmem:[#allocation103_spill] sm:$0xff] }
 0x2d2   : > { %v2070_v52 = vadd.f32 %v4174_v63, %v2035_v1  ;;  %v1243_v23 = vadd.f32 %v1242_v49, %v4525_v58  ;;  %v1724_v29 = vadd.f32 %v1514_v31, %v1127_v17  ;;  %v4535_v62 = vld [vmem:[#allocation107_spill] sm:$0xff] }
 0x2d3   : > { %v2069_v56 = vadd.f32 %v4174_v63, %v2034_v34  ;;  %v1749_v36 = vrot.slane %v1723_v55, 7  ;;  %v1888_v13 = vperm.slane %v1723_v55, 1  ;;  %v4540_v55 = vld [vmem:[#allocation105_spill] sm:$0xff] }
 0x2d4   : > { %2102 = vst [vmem:[%s3838_s10 + $0xd8] sm:$0xff] %v2070_v52  ;;  %v1630_v14 = vpop.f32.mrf.mxu0  ;;  %v2171_v53 = vmul.f32 %v2070_v52, %v2070_v52 }
 0x2d5   : > { %2101 = vst [vmem:[%s3838_s10 + $0xd0] sm:$0xff] %v2069_v56  ;;  %v2132_v16 = vadd.f32 %v2131_v44, %v2069_v56  ;;  %v2170_v21 = vmul.f32 %v2069_v56, %v2069_v56  ;;  %v1728_v50 = vadd.f32 %v1630_v14, %v1243_v23  ;;  %v1816_v44 = vrot.slane %v1725_v59, 1  ;;  %v4538_v14 = vld [vmem:[#allocation23_spill] sm:$0xff] }
 0x2d6   : > { %v1023_v40 = vadd.f32 %v4539_v3, %v4538_v14 }
 0x2d7   : > { %v2133_v35 = vadd.f32 %v2132_v16, %v2070_v52  ;;  %v2201_v48 = vadd.f32 %v2200_v12, %v2170_v21  ;;  %v1832_v38 = vrot.slane %v1728_v50, 1  ;;  %v1942_v15 = vperm.slane %v1728_v50, 6  ;;  %v4536_v52 = vld [vmem:[#allocation20_spill] sm:$0xff] }
 0x2d8   : > { %v1404_v20 = vpop.f32.mrf.mxu2  ;;  %v1020_v41 = vadd.f32 %v4537_v27, %v4536_v52 }
 0x2d9   : > { %v1517_v46 = vpop.f32.mrf.mxu3  ;;  %v2202_v57 = vadd.f32 %v2201_v48, %v2171_v53  ;;  %v1726_v43 = vadd.f32 %v1404_v20, %v1017_v0  ;;  %v1245_v11 = vpop.f32.mrf.mxu1  ;;  %v1865_v12 = vsel %vm1834_vm0, %v1832_v38, %v1816_v44  ;;  %v1849_v54 = vsel %vm1834_vm0, %v1816_v44, %v1832_v38  ;;  %v4541_v38 = vld [vmem:[#allocation106_spill] sm:$0xff] }
 0x2da   : > { %v1727_v2 = vadd.f32 %v1517_v46, %v1130_v10  ;;  %v1973_v42 = vsel %vm1923_vm3, %v1942_v15, %v1865_v12  ;;  %v1246_v1 = vadd.f32 %v1245_v11, %v4534_v33  ;;  %v1136_v20 = vadd.f32 %v4541_v38, %v4540_v55 }
 0x2db   : > { %v1765_v60 = vrot.slane %v1726_v43, 7  ;;  %v4543_v43 = vld [vmem:[#allocation102_spill] sm:$0xff] }
 0x2dc   : > { %v1633_v51 = vpop.f32.mrf.mxu0 }
 0x2dd   : > { %v1800_v7 = vsel %vm1769_vm1, %v1765_v60, %v1749_v36  ;;  %v1784_v25 = vsel %vm1769_vm1, %v1749_v36, %v1765_v60  ;;  %v1731_v19 = vadd.f32 %v1633_v51, %v1246_v1 }
 0x2de   : > { %v1918_v37 = vsel %vm1868_vm2, %v1888_v13, %v1800_v7  ;;  %v2005_v39 = vadd.f32 %v1784_v25, %v1727_v2 }
 0x2df   : > { %v2004_v32 = vadd.f32 %v1918_v37, %v1724_v29  ;;  %v1817_v46 = vrot.slane %v1731_v19, 1 }
 0x2e0   : > { %v2037_v8 = vadd.f32 %v2005_v39, %v1973_v42  ;;  %v1407_v30 = vpop.f32.mrf.mxu2 }
 0x2e1   : > { %v1520_v24 = vpop.f32.mrf.mxu3  ;;  %v2036_v47 = vadd.f32 %v2004_v32, %v1849_v54  ;;  %v1248_v5 = vpop.f32.mrf.mxu1  ;;  %v1729_v22 = vadd.f32 %v1407_v30, %v1020_v41 }
 0x2e2   : > { %v2072_v28 = vadd.f32 %v4174_v63, %v2037_v8  ;;  %v1249_v31 = vadd.f32 %v1248_v5, %v4535_v62 }
 0x2e3   : > { %v2071_v34 = vadd.f32 %v4174_v63, %v2036_v47  ;;  %v1750_v61 = vrot.slane %v1729_v22, 7  ;;  %v1889_v44 = vperm.slane %v1729_v22, 1 }
 0x2e4   : > { %2104 = vst [vmem:[%s3838_s10 + $0xe8] sm:$0xff] %v2072_v28  ;;  %v1636_v49 = vpop.f32.mrf.mxu0  ;;  %v2173_v21 = vmul.f32 %v2072_v28, %v2072_v28 }
 0x2e5   : > { %2103 = vst [vmem:[%s3838_s10 + $0xe0] sm:$0xff] %v2071_v34  ;;  %v2134_v58 = vadd.f32 %v2133_v35, %v2071_v34  ;;  %v2172_v23 = vmul.f32 %v2071_v34, %v2071_v34  ;;  %v1734_v56 = vadd.f32 %v1636_v49, %v1249_v31  ;;  %v4542_v35 = vld [vmem:[#allocation101_spill] sm:$0xff] }
 0x2e6   : > { %v1133_v11 = vadd.f32 %v4543_v43, %v4542_v35 }
 0x2e7   : > { %v2135_v16 = vadd.f32 %v2134_v58, %v2072_v28  ;;  %v2203_v50 = vadd.f32 %v2202_v57, %v2172_v23  ;;  %v1833_v26 = vrot.slane %v1734_v56, 1  ;;  %v1943_v45 = vperm.slane %v1734_v56, 6 }
 0x2e8   : > { %v1410_v0 = vpop.f32.mrf.mxu2  ;;  %v1730_v9 = vadd.f32 %v1520_v24, %v1133_v11 }
 0x2e9   : > { %v2204_v59 = vadd.f32 %v2203_v50, %v2173_v21  ;;  %v1732_v53 = vadd.f32 %v1410_v0, %v1023_v40  ;;  %v1523_v48 = vpop.f32.mrf.mxu3  ;;  %v1866_v57 = vsel %vm1834_vm0, %v1833_v26, %v1817_v46  ;;  %v1850_v2 = vsel %vm1834_vm0, %v1817_v46, %v1833_v26 }
 0x2ea   : > { %v1733_v18 = vadd.f32 %v1523_v48, %v1136_v20  ;;  %v1975_v12 = vsel %vm1923_vm3, %v1943_v45, %v1866_v57 }
 0x2eb   : > { %v1766_v10 = vrot.slane %v1732_v53, 7 }
 0x2ed   : > { %v1801_v17 = vsel %vm1769_vm1, %v1766_v10, %v1750_v61  ;;  %v1785_v36 = vsel %vm1769_vm1, %v1750_v61, %v1766_v10 }
 0x2ee   : > { %v1920_v15 = vsel %vm1868_vm2, %v1889_v44, %v1801_v17  ;;  %v2007_v60 = vadd.f32 %v1785_v36, %v1733_v18 }
 0x2ef   : > { %v2006_v13 = vadd.f32 %v1920_v15, %v1730_v9 }
 0x2f0   : > { %v2039_v51 = vadd.f32 %v2007_v60, %v1975_v12 }
 0x2f1   : > { %v2038_v29 = vadd.f32 %v2006_v13, %v1850_v2 }
 0x2f2   : > { %v2074_v7 = vadd.f32 %v4174_v63, %v2039_v51 }
 0x2f3   : > { %v2073_v25 = vadd.f32 %v4174_v63, %v2038_v29 }
 0x2f4   : > { %2106 = vst [vmem:[%s3838_s10 + $0xf8] sm:$0xff] %v2074_v7  ;;  %v2175_v42 = vmul.f32 %v2074_v7, %v2074_v7 }
 0x2f5   : > { %2105 = vst [vmem:[%s3838_s10 + $0xf0] sm:$0xff] %v2073_v25  ;;  %v2136_v37 = vadd.f32 %v2135_v16, %v2073_v25  ;;  %v2174_v39 = vmul.f32 %v2073_v25, %v2073_v25 }
 0x2f7   : > { %v2137_v32 = vadd.f32 %v2136_v37, %v2074_v7  ;;  %v2205_v54 = vadd.f32 %v2204_v59, %v2174_v39 }
 0x2f9   : > { %v2138_v8 = vrot.slane %v2137_v32, 4  ;;  %v2206_v6 = vadd.f32 %v2205_v54, %v2175_v42 }
 0x2fb   : > { %v2139_v30 = vadd.f32 %v2138_v8, %v2137_v32  ;;  %v2207_v24 = vrot.slane %v2206_v6, 4 }
 0x2fd   : > { %v2140_v4 = vrot.slane %v2139_v30, 2  ;;  %v2208_v47 = vadd.f32 %v2207_v24, %v2206_v6 }
 0x2ff   : > { %v2141_v5 = vadd.f32 %v2140_v4, %v2139_v30  ;;  %v2209_v28 = vrot.slane %v2208_v47, 2 }
 0x301   : > { %v2142_v33 = vrot.slane %v2141_v5, 1  ;;  %v2210_v1 = vadd.f32 %v2209_v28, %v2208_v47 }
 0x303   : > { %v2211_v63 = vrot.slane %v2210_v1, 1  ;;  %v2143_v62 = vadd.f32 %v2142_v33, %v2141_v5 }
 0x305   : > { %v2212_v31 = vadd.f32 %v2211_v63, %v2210_v1 }
 0x307   : > { %v2214_v34 = vsel %vm2213_vm4, %v2143_v62, %v2212_v31 }
 0x308   : > { %2215 = vst [vmem:[%s438_s19] sm:$0x3] %v2214_v34 }
 0x309 PF: > { %s17_s23 = sadd.s32 1, %s2636_s23   ;;  %s4544_s21 = smov %s2632_s22 }
 0x30a   : > { %p14_p5 = scmp.ge.s32.totalorder %s17_s23, 4   ;;  %s4545_s22 = smov %s4547_s24 }
 0x30c   :  { %16 = sbr.rel (!%p14_p5) target bundleno = 2 (0x2), region = 90 }

// kernel: residual_block_nhwc.4
= control target key start
LH: loop header
LB: loop body
LE: loop exit
PB: predicated region body
PF: predicated region fallthrough
CT: control target
= control target key end

     0   :  { %13 = vsyncpa [#allocation3], 0  ;;  %s2806_s24 = smov 0   ;;  %s2808_s25 = smov 0   ;;  %s4094_s0 = inlined_call_operand.vmem [shape: f32[2,16,16,128], index: 0, kind: input, shape index: {}, may-alias: {0,1,2}]   ;;  %s4095_s1 = inlined_call_operand.vmem [shape: f32[2,16,16,128], index: 1, kind: input, shape index: {}, may-alias: {0,1,2}]   ;;  %s4096_s2 = inlined_call_operand.vmem [shape: f32[2,16,16,128], index: 2, kind: input, shape index: {}, may-alias: {0,1,2}]   ;;  %s4097_s3 = inlined_call_operand.vmem [shape: f32[2,2,128], index: 3, kind: input, shape index: {}]   ;;  %s4098_s4 = inlined_call_operand.hbm [shape: f32[3,128,384], index: 4, kind: input, shape index: {}]   ;;  %s4099_s5 = inlined_call_operand.vmem [shape: f32[1,128], index: 5, kind: input, shape index: {}]   ;;  %s4100_s6 = inlined_call_operand.vmem [shape: f32[2,16,16,128], index: 6, kind: output, shape index: {0}]   ;;  %s4101_s7 = inlined_call_operand.vmem [shape: f32[2,1,2,128], index: 7, kind: output, shape index: {1}]  }
   0x1   :  { %s2810_s26 = smov 0  }
   0x2 LB: > { %s2591_s27 = sadd.s32 4294967295, %s2761_s26   ;;  %s31_s28 = sadd.s32 1, %s2757_s25  ;;  %s2761_s26 = sphi %s2810_s26, %s19_s26   ;;  %s2757_s25 = sphi %s2808_s25, %s4351_s25   ;;  %s2753_s24 = sphi %s2806_s24, %s4350_s24  }
   0x3   : > { %p33_p0 = scmp.ge.s32.totalorder %s31_s28, 2  ;;  %p2593_p1 = scmp.ge.s32.totalorder %s2761_s26, 1 }
   0x4   : > { %p260_p2 = scmp.lt.s32.totalorder %s2761_s26, 3  ;;  %p2674_p4 = scmp.eq.s32.totalorder %s2591_s27, 0 }
   0x5   : > { %s4353_s28 = smov (%p33_p0, %s31_s28), 0  ;;  %s271_s8 = sshll.u32 %s4098_s4, 4  ;;  %s272_s8 = int_to_ptr.hbm [resolvable:$true] %s271_s8 }
   0x6   : > { %p261_p3 = pnand %p2593_p1, %p260_p2  ;;  %s2763_s9 = smov [#allocation2]  }
   0x7   : > { %s273_s10 = sshll.u32 %s2763_s9, 4  ;;  %s2764_s11 = smov 384   ;;  %s274_s10 = int_to_ptr.vmem [resolvable:$true] %s273_s10 }
   0x8   : > { %p2670_p5 = pneg %p261_p3  ;;  %s2765_s12 = smov 24  }
   0x9   : > { %353 = sbr.rel (%p261_p3) target bundleno = 780 (0x30c), region = 44 }
   0xa   : > { %p2671_p6 = pnand %p2674_p4, %p2670_p5 }
   0xc   : > { %2673 = dma.hbm_to_vmem [thread:$0]  (!%p2671_p6), %s272_s8, 18432, %s274_s10, [#allocation3], %s2764_s11, %s2764_s11, %s2765_s12  }
   0xe   : > { %2748 = dma.done.wait (%p2674_p4), [#allocation3], 18432  }
   0xf   : > { %2750 = vsyncadd (%p2674_p4), [#allocation3], 4294948864  ;;  %p434_p7 = scmp.lt.s32.totalorder %s2753_s24, 1  ;;  %v742_v0 = vld [vmem:[#allocation2 + $0x2e8] sm:$0xff]  ;;  %v739_v1 = vld [vmem:[#allocation2 + $0x2d0] sm:$0xff]  ;;  %vm2385_vm4 = vcmask 1040384  }
  0x10   : > { %2618 = vmatpush.msra.mxu1 %v742_v0  ;;  %2619 = vmatpush.msra.mxu2 %v742_v0  ;;  %v736_v2 = vld [vmem:[#allocation2 + $0x2b8] sm:$0xff]  ;;  %v733_v3 = vld [vmem:[#allocation2 + $0x2a0] sm:$0xff]  ;;  %v730_v4 = vld [vmem:[#allocation2 + $0x288] sm:$0xff] }
  0x11   : > { %2620 = vmatpush.msra.mxu3 %v742_v0  ;;  %745 = vmatpush.msra.mxu0 %v742_v0  ;;  %s4355_s24 = smov (!%p434_p7, %s2753_s24), 1  ;;  %v727_v5 = vld [vmem:[#allocation2 + $0x270] sm:$0xff]  ;;  %v724_v6 = vld [vmem:[#allocation2 + $0x258] sm:$0xff]  ;;  %v721_v7 = vld [vmem:[#allocation2 + $0x240] sm:$0xff] }
  0x12   : > { %2621 = vmatpush.msra.mxu1 %v739_v1  ;;  %2622 = vmatpush.msra.mxu2 %v739_v1  ;;  %s2604_s13 = sshll.u32 %s4355_s24, 1  ;;  %s2841_s17 = sshll.u32 %s4355_s24, 8  ;;  %v718_v9 = vld [vmem:[#allocation2 + $0x228] sm:$0xff]  ;;  %v715_v10 = vld [vmem:[#allocation2 + $0x210] sm:$0xff]  ;;  %v712_v13 = vld [vmem:[#allocation2 + $0x1f8] sm:$0xff] }
  0x13   : > { %2623 = vmatpush.msra.mxu3 %v739_v1  ;;  %746 = vmatpush.msra.mxu0 %v739_v1  ;;  %s481_s16 = scalar_lea.vmem %s4097_s3, %s2604_s13  ;;  %s2847_s20 = scalar_lea.vmem %s4094_s0, %s2841_s17  ;;  %v709_v16 = vld [vmem:[#allocation2 + $0x1e0] sm:$0xff]  ;;  %v706_v22 = vld [vmem:[#allocation2 + $0x1c8] sm:$0xff]  ;;  %v703_v24 = vld [vmem:[#allocation2 + $0x1b0] sm:$0xff] }
  0x14   : > { %2624 = vmatpush.msra.mxu1 %v736_v2  ;;  %2625 = vmatpush.msra.mxu2 %v736_v2  ;;  %v500_v8 = vld [vmem:[%s481_s16] sm:$0x3]  ;;  %v512_v28 = vld [vmem:[%s2847_s20 + $0x48] sm:$0xff]  ;;  %v700_v29 = vld [vmem:[#allocation2 + $0x198] sm:$0xff]  ;;  %s2612_s21 = sadd.s32 16, %s2841_s17  ;;  %s3627_s10 = scalar_lea.vmem %s4100_s6, %s2841_s17 }
  0x15   : > { %2626 = vmatpush.msra.mxu3 %v736_v2  ;;  %747 = vmatpush.msra.mxu0 %v736_v2  ;;  %v2849_v11 = vperm.slane %v500_v8, 0  ;;  %v511_v12 = vld [vmem:[%s2847_s20 + $0x40] sm:$0xff]  ;;  %v2855_v18 = vperm.slane %v500_v8, 1  ;;  %v520_v30 = vld [vmem:[%s2847_s20 + $0x88] sm:$0xff]  ;;  %v744_v41 = vld [vmem:[#allocation2 + $0x2f8] sm:$0xff]  ;;  %s456_s27 = scalar_lea.vmem %s4095_s1, %s2612_s21  ;;  %s2614_s11 = sadd.s32 224, %s2841_s17 }
  0x16   : > { %2627 = vmatpush.msra.mxu1 %v733_v3  ;;  %2628 = vmatpush.msra.mxu2 %v733_v3  ;;  %v519_v14 = vld [vmem:[%s2847_s20 + $0x80] sm:$0xff]  ;;  %v528_v31 = vld [vmem:[%s2847_s20 + $0xc8] sm:$0xff]  ;;  %v743_v47 = vld [vmem:[#allocation2 + $0x2f0] sm:$0xff]  ;;  %s3779_s15 = scalar_lea.vmem %s4096_s2, %s2614_s11 }
  0x17   : > { %2629 = vmatpush.msra.mxu3 %v733_v3  ;;  %748 = vmatpush.msra.mxu0 %v733_v3  ;;  %4106 = vst [vmem:[#allocation5_spill] sm:$0xff] %v2849_v11  ;;  %v527_v15 = vld [vmem:[%s2847_s20 + $0xc0] sm:$0xff]  ;;  %v548_v17 = vsub.f32 %v511_v12, %v2849_v11  ;;  %v556_v20 = vsub.f32 %v519_v14, %v2849_v11  ;;  %v504_v36 = vld [vmem:[%s2847_s20 + $0x8] sm:$0xff]  ;;  %v694_v50 = vld [vmem:[#allocation2 + $0x170] sm:$0xff] }
  0x18   : > { %2630 = vmatpush.msra.mxu1 %v730_v4  ;;  %2631 = vmatpush.msra.mxu2 %v730_v4  ;;  %4107 = vst [vmem:[#allocation6_spill] sm:$0xff] %v2855_v18  ;;  %v503_v19 = vld [vmem:[%s2847_s20] sm:$0xff]  ;;  %v564_v21 = vsub.f32 %v527_v15, %v2849_v11  ;;  %v549_v35 = vsub.f32 %v512_v28, %v2849_v11  ;;  %v693_v45 = vld [vmem:[#allocation2 + $0x168] sm:$0xff]  ;;  %v513_v51 = vld [vmem:[%s2847_s20 + $0x50] sm:$0xff] }
  0x19   : > { %2632 = vmatpush.msra.mxu3 %v730_v4  ;;  %749 = vmatpush.msra.mxu0 %v730_v4  ;;  %v540_v23 = vsub.f32 %v503_v19, %v2849_v11  ;;  %v585_v25 = vmul.f32 %v2855_v18, %v548_v17  ;;  %v593_v26 = vmul.f32 %v2855_v18, %v556_v20  ;;  %v697_v33 = vld [vmem:[#allocation2 + $0x180] sm:$0xff]  ;;  %v690_v52 = vld [vmem:[#allocation2 + $0x150] sm:$0xff]  ;;  %v738_v55 = vld [vmem:[#allocation2 + $0x2c8] sm:$0xff] }
  0x1a   : > { %2633 = vmatpush.msra.mxu1 %v727_v5  ;;  %2634 = vmatpush.msra.mxu2 %v727_v5  ;;  %v601_v27 = vmul.f32 %v2855_v18, %v564_v21  ;;  %v557_v39 = vsub.f32 %v520_v30, %v2849_v11  ;;  %v565_v40 = vsub.f32 %v528_v31, %v2849_v11  ;;  %v741_v44 = vld [vmem:[#allocation2 + $0x2e0] sm:$0xff]  ;;  %v521_v53 = vld [vmem:[%s2847_s20 + $0x90] sm:$0xff]  ;;  %v740_v57 = vld [vmem:[#allocation2 + $0x2d8] sm:$0xff] }
  0x1b   : > { %2635 = vmatpush.msra.mxu3 %v727_v5  ;;  %750 = vmatpush.msra.mxu0 %v727_v5  ;;  %v577_v32 = vmul.f32 %v2855_v18, %v540_v23  ;;  %v2868_v34 = vmax.f32 %v585_v25, 0.0  ;;  %v2872_v37 = vmax.f32 %v593_v26, 0.0  ;;  %v541_v43 = vsub.f32 %v504_v36, %v2849_v11  ;;  %v529_v54 = vld [vmem:[%s2847_s20 + $0xd0] sm:$0xff]  ;;  %v691_v59 = vld [vmem:[#allocation2 + $0x158] sm:$0xff]  ;;  %v737_v5 = vld [vmem:[#allocation2 + $0x2c0] sm:$0xff] }
  0x1c   : > { %2636 = vmatpush.msra.mxu1 %v724_v6  ;;  %2637 = vmatpush.msra.mxu2 %v724_v6  ;;  %v2874_v38 = vmax.f32 %v601_v27, 0.0  ;;  %v586_v46 = vmul.f32 %v2855_v18, %v549_v35  ;;  %v594_v48 = vmul.f32 %v2855_v18, %v557_v39  ;;  %v602_v49 = vmul.f32 %v2855_v18, %v565_v40  ;;  %v687_v60 = vld [vmem:[#allocation2 + $0x138] sm:$0xff]  ;;  %v505_v62 = vld [vmem:[%s2847_s20 + $0x10] sm:$0xff]  ;;  %v734_v14 = vld [vmem:[#allocation2 + $0x2a8] sm:$0xff] }
  0x1d   : > { %2638 = vmatpush.msra.mxu3 %v724_v6  ;;  %751 = vmatpush.msra.mxu0 %v724_v6  ;;  %v2878_v42 = vmax.f32 %v577_v32, 0.0  ;;  %v578_v56 = vmul.f32 %v2855_v18, %v541_v43  ;;  %v550_v61 = vsub.f32 %v513_v51, %v2849_v11  ;;  %v735_v1 = vld [vmem:[#allocation2 + $0x2b0] sm:$0xff]  ;;  %v558_v2 = vsub.f32 %v521_v53, %v2849_v11  ;;  %v732_v6 = vld [vmem:[#allocation2 + $0x298] sm:$0xff]  ;;  %v729_v17 = vld [vmem:[#allocation2 + $0x280] sm:$0xff] }
  0x1e   : > { %2639 = vmatpush.msra.mxu1 %v721_v7  ;;  %2640 = vmatpush.msra.mxu2 %v721_v7  ;;  %v2892_v58 = vmax.f32 %v586_v46, 0.0  ;;  %v2896_v63 = vmax.f32 %v594_v48, 0.0  ;;  %v2898_v0 = vmax.f32 %v602_v49, 0.0  ;;  %v566_v3 = vsub.f32 %v529_v54, %v2849_v11  ;;  %v514_v15 = vld [vmem:[%s2847_s20 + $0x58] sm:$0xff]  ;;  %v681_v19 = vld [vmem:[#allocation2 + $0x108] sm:$0xff]  ;;  %v731_v23 = vld [vmem:[#allocation2 + $0x290] sm:$0xff] }
  0x1f   : > { %2641 = vmatpush.msra.mxu3 %v721_v7  ;;  %752 = vmatpush.msra.mxu0 %v721_v7  ;;  %v2902_v4 = vmax.f32 %v578_v56, 0.0  ;;  %v542_v7 = vsub.f32 %v505_v62, %v2849_v11  ;;  %v587_v8 = vmul.f32 %v2855_v18, %v550_v61  ;;  %v595_v12 = vmul.f32 %v2855_v18, %v558_v2  ;;  %v530_v20 = vld [vmem:[%s2847_s20 + $0xd8] sm:$0xff]  ;;  %v726_v26 = vld [vmem:[#allocation2 + $0x268] sm:$0xff]  ;;  %v678_v28 = vld [vmem:[#allocation2 + $0xf0] sm:$0xff] }
  0x20   : > { %2642 = vmatpush.msra.mxu1 %v718_v9  ;;  %2643 = vmatpush.msra.mxu2 %v718_v9  ;;  %v551_v25 = vsub.f32 %v514_v15, %v2849_v11  ;;  %v506_v27 = vld [vmem:[%s2847_s20 + $0x18] sm:$0xff]  ;;  %v567_v32 = vsub.f32 %v530_v20, %v2849_v11  ;;  %v723_v40 = vld [vmem:[#allocation2 + $0x250] sm:$0xff]  ;;  %v725_v48 = vld [vmem:[#allocation2 + $0x260] sm:$0xff] }
  0x21   : > { %2644 = vmatpush.msra.mxu3 %v718_v9  ;;  %753 = vmatpush.msra.mxu0 %v718_v9  ;;  %v688_v9 = vld [vmem:[#allocation2 + $0x140] sm:$0xff]  ;;  %v579_v21 = vmul.f32 %v2855_v18, %v542_v7  ;;  %v543_v36 = vsub.f32 %v506_v27, %v2849_v11  ;;  %v728_v39 = vld [vmem:[#allocation2 + $0x278] sm:$0xff]  ;;  %v669_v61 = vld [vmem:[#allocation2 + $0xa8] sm:$0xff] }
  0x22   : > { %2645 = vmatpush.msra.mxu1 %v715_v10  ;;  %2646 = vmatpush.msra.mxu2 %v715_v10  ;;  %v675_v43 = vld [vmem:[#allocation2 + $0xd8] sm:$0xff]  ;;  %v604_v46 = vmul.f32 %v2855_v18, %v567_v32  ;;  %v523_v49 = vld [vmem:[%s2847_s20 + $0xa0] sm:$0xff]  ;;  %v532_v20 = vld [vmem:[%s2847_s20 + $0xe8] sm:$0xff] }
  0x23   : > { %2647 = vmatpush.msra.mxu3 %v715_v10  ;;  %754 = vmatpush.msra.mxu0 %v715_v10  ;;  %v684_v10 = vld [vmem:[#allocation2 + $0x120] sm:$0xff]  ;;  %v2926_v35 = vmax.f32 %v579_v21, 0.0  ;;  %v720_v51 = vld [vmem:[#allocation2 + $0x238] sm:$0xff]  ;;  %v580_v53 = vmul.f32 %v2855_v18, %v543_v36  ;;  %v560_v2 = vsub.f32 %v523_v49, %v2849_v11  ;;  %v711_v21 = vld [vmem:[#allocation2 + $0x1f0] sm:$0xff] }
  0x24   : > { %2648 = vmatpush.msra.mxu1 %v712_v13  ;;  %2649 = vmatpush.msra.mxu2 %v712_v13  ;;  %v676_v54 = vld [vmem:[#allocation2 + $0xe0] sm:$0xff]  ;;  %v708_v32 = vld [vmem:[#allocation2 + $0x1d8] sm:$0xff]  ;;  %v517_v49 = vld [vmem:[%s2847_s20 + $0x70] sm:$0xff] }
  0x25   : > { %2650 = vmatpush.msra.mxu3 %v712_v13  ;;  %755 = vmatpush.msra.mxu0 %v712_v13  ;;  %v603_v13 = vmul.f32 %v2855_v18, %v566_v3 }
  0x26   : > { %2651 = vmatpush.msra.mxu1 %v709_v16  ;;  %2652 = vmatpush.msra.mxu2 %v709_v16 }
  0x27   : > { %2653 = vmatpush.msra.mxu3 %v709_v16  ;;  %756 = vmatpush.msra.mxu0 %v709_v16  ;;  %v522_v16 = vld [vmem:[%s2847_s20 + $0x98] sm:$0xff]  ;;  %v2922_v30 = vmax.f32 %v603_v13, 0.0  ;;  %v666_v13 = vld [vmem:[#allocation2 + $0x90] sm:$0xff] }
  0x28   : > { %2654 = vmatpush.msra.mxu1 %v706_v22  ;;  %2655 = vmatpush.msra.mxu2 %v706_v22  ;;  %v559_v31 = vsub.f32 %v522_v16, %v2849_v11  ;;  %v524_v16 = vld [vmem:[%s2847_s20 + $0xa8] sm:$0xff] }
  0x29   : > { %2656 = vmatpush.msra.mxu3 %v706_v22  ;;  %757 = vmatpush.msra.mxu0 %v706_v22  ;;  %v685_v22 = vld [vmem:[#allocation2 + $0x128] sm:$0xff] }
  0x2a   : > { %2657 = vmatpush.msra.mxu1 %v703_v24  ;;  %2658 = vmatpush.msra.mxu2 %v703_v24 }
  0x2b   : > { %2659 = vmatpush.msra.mxu3 %v703_v24  ;;  %758 = vmatpush.msra.mxu0 %v703_v24  ;;  %v2916_v24 = vmax.f32 %v587_v8, 0.0  ;;  %v719_v8 = vld [vmem:[#allocation2 + $0x230] sm:$0xff] }
  0x2c   : > { %2660 = vmatpush.msra.mxu1 %v700_v29  ;;  %2661 = vmatpush.msra.mxu2 %v700_v29 }
  0x2d   : > { %2662 = vmatpush.msra.mxu3 %v700_v29  ;;  %759 = vmatpush.msra.mxu0 %v700_v29  ;;  %v2920_v29 = vmax.f32 %v595_v12, 0.0  ;;  %v516_v12 = vld [vmem:[%s2847_s20 + $0x68] sm:$0xff] }
  0x2e   : > { %2663 = vmatpush.msra.mxu1 %v697_v33  ;;  %2664 = vmatpush.msra.mxu2 %v697_v33 }
  0x2f   : > { %2665 = vmatpush.msra.mxu3 %v697_v33  ;;  %785 = vmatmul.f32.vlgmr.msra.gmra.mxu1 %v2868_v34 }
  0x30   : > { %809 = vmatmul.f32.vlgmr.msra.gmra.mxu2 %v2872_v37  ;;  %833 = vmatmul.f32.vlgmr.msra.gmra.mxu3 %v2874_v38 }
  0x31   : > { %971 = vmatpush.msrb.mxu2 %v744_v41  ;;  %760 = vmatpush.msra.mxu0 %v697_v33  ;;  %v682_v33 = vld [vmem:[#allocation2 + $0x110] sm:$0xff]  ;;  %v588_v41 = vmul.f32 %v2855_v18, %v551_v25  ;;  %v667_v25 = vld [vmem:[#allocation2 + $0x98] sm:$0xff] }
  0x32   : > { %761 = vmatmul.f32.vlgmr.msra.gmra.mxu0 %v2878_v42  ;;  %1084 = vmatpush.msrb.mxu3 %v693_v45  ;;  %v596_v45 = vmul.f32 %v2855_v18, %v559_v31  ;;  %v508_v31 = vld [vmem:[%s2847_s20 + $0x28] sm:$0xff] }
  0x33   : > { %972 = vmatpush.msrb.mxu2 %v741_v44  ;;  %858 = vmatpush.msrb.mxu1 %v743_v47  ;;  %v515_v44 = vld [vmem:[%s2847_s20 + $0x60] sm:$0xff]  ;;  %v679_v47 = vld [vmem:[#allocation2 + $0xf8] sm:$0xff]  ;;  %v2940_v56 = vmax.f32 %v588_v41, 0.0  ;;  %v569_v41 = vsub.f32 %v532_v20, %v2849_v11 }
  0x34   : > { %1197 = vmatpush.msrb.mxu0 %v694_v50  ;;  %1085 = vmatpush.msrb.mxu3 %v690_v52  ;;  %v531_v50 = vld [vmem:[%s2847_s20 + $0xe0] sm:$0xff]  ;;  %v2944_v62 = vmax.f32 %v596_v45, 0.0  ;;  %v545_v45 = vsub.f32 %v508_v31, %v2849_v11  ;;  %v526_v31 = vld [vmem:[%s2847_s20 + $0xb8] sm:$0xff] }
  0x35   : > { %973 = vmatpush.msrb.mxu2 %v738_v55  ;;  %859 = vmatpush.msrb.mxu1 %v740_v57  ;;  %v672_v52 = vld [vmem:[#allocation2 + $0xc0] sm:$0xff]  ;;  %v722_v55 = vld [vmem:[#allocation2 + $0x248] sm:$0xff]  ;;  %v552_v57 = vsub.f32 %v515_v44, %v2849_v11  ;;  %v568_v3 = vsub.f32 %v531_v50, %v2849_v11 }
  0x36   : > { %1198 = vmatpush.msrb.mxu0 %v691_v59  ;;  %1086 = vmatpush.msrb.mxu3 %v687_v60  ;;  %v507_v59 = vld [vmem:[%s2847_s20 + $0x20] sm:$0xff]  ;;  %v657_v50 = vld [vmem:[#allocation2 + $0x48] sm:$0xff] }
  0x37   : > { %788 = vmatmul.f32.gmra.mxu1 %v2892_v58  ;;  %974 = vmatpush.msrb.mxu2 %v735_v1  ;;  %v717_v60 = vld [vmem:[#allocation2 + $0x220] sm:$0xff]  ;;  %v2946_v1 = vmax.f32 %v604_v46, 0.0  ;;  %v544_v7 = vsub.f32 %v507_v59, %v2849_v11  ;;  %v605_v15 = vmul.f32 %v2855_v18, %v568_v3  ;;  %v710_v46 = vld [vmem:[#allocation2 + $0x1e8] sm:$0xff]  ;;  %v704_v3 = vld [vmem:[#allocation2 + $0x1b8] sm:$0xff] }
  0x38   : > { %812 = vmatmul.f32.gmra.mxu2 %v2896_v63  ;;  %836 = vmatmul.f32.gmra.mxu3 %v2898_v0  ;;  %v702_v59 = vld [vmem:[#allocation2 + $0x1a8] sm:$0xff]  ;;  %v701_v20 = vld [vmem:[#allocation2 + $0x1a0] sm:$0xff] }
  0x39   : > { %860 = vmatpush.msrb.mxu1 %v737_v5  ;;  %975 = vmatpush.msrb.mxu2 %v732_v6  ;;  %v673_v5 = vld [vmem:[#allocation2 + $0xc8] sm:$0xff]  ;;  %v2950_v6 = vmax.f32 %v580_v53, 0.0  ;;  %v525_v53 = vld [vmem:[%s2847_s20 + $0xb0] sm:$0xff] }
  0x3a   : > { %764 = vmatmul.f32.gmra.mxu0 %v2902_v4  ;;  %1087 = vmatpush.msrb.mxu3 %v684_v10  ;;  %v589_v10 = vmul.f32 %v2855_v18, %v552_v57  ;;  %v533_v57 = vld [vmem:[%s2847_s20 + $0xf0] sm:$0xff] }
  0x3b   : > { %1199 = vmatpush.msrb.mxu0 %v688_v9  ;;  %861 = vmatpush.msrb.mxu1 %v734_v14  ;;  %v714_v9 = vld [vmem:[#allocation2 + $0x208] sm:$0xff]  ;;  %v597_v14 = vmul.f32 %v2855_v18, %v560_v2  ;;  %v658_v2 = vld [vmem:[#allocation2 + $0x50] sm:$0xff] }
  0x3c   : > { %976 = vmatpush.msrb.mxu2 %v729_v17  ;;  %1088 = vmatpush.msrb.mxu3 %v681_v19  ;;  %v670_v17 = vld [vmem:[#allocation2 + $0xb0] sm:$0xff]  ;;  %v716_v19 = vld [vmem:[#allocation2 + $0x218] sm:$0xff]  ;;  %v2964_v27 = vmax.f32 %v589_v10, 0.0 }
  0x3d   : > { %1200 = vmatpush.msrb.mxu0 %v685_v22  ;;  %862 = vmatpush.msrb.mxu1 %v731_v23  ;;  %v663_v22 = vld [vmem:[#allocation2 + $0x78] sm:$0xff]  ;;  %v581_v23 = vmul.f32 %v2855_v18, %v544_v7  ;;  %v2968_v36 = vmax.f32 %v597_v14, 0.0  ;;  %v554_v7 = vsub.f32 %v517_v49, %v2849_v11  ;;  %v562_v14 = vsub.f32 %v525_v53, %v2849_v11 }
  0x3e   : > { %977 = vmatpush.msrb.mxu2 %v726_v26  ;;  %1089 = vmatpush.msrb.mxu3 %v678_v28  ;;  %v713_v26 = vld [vmem:[#allocation2 + $0x200] sm:$0xff]  ;;  %v553_v28 = vsub.f32 %v516_v12, %v2849_v11  ;;  %v651_v10 = vld [vmem:[#allocation2 + $0x18] sm:$0xff]  ;;  %v563_v53 = vsub.f32 %v526_v31, %v2849_v11 }
  0x3f   : > { %791 = vmatmul.f32.gmra.mxu1 %v2916_v24  ;;  %1201 = vmatpush.msrb.mxu0 %v682_v33  ;;  %v660_v33 = vld [vmem:[#allocation2 + $0x60] sm:$0xff]  ;;  %v2974_v44 = vmax.f32 %v581_v23, 0.0  ;;  %v518_v23 = vld [vmem:[%s2847_s20 + $0x78] sm:$0xff] }
  0x40   : > { %815 = vmatmul.f32.gmra.mxu2 %v2920_v29  ;;  %839 = vmatmul.f32.gmra.mxu3 %v2922_v30  ;;  %v510_v49 = vld [vmem:[%s2847_s20 + $0x38] sm:$0xff]  ;;  %v1464_v31 = vld [vmem:[#allocation2 + $0x440] sm:$0xff] }
  0x41   : > { %863 = vmatpush.msrb.mxu1 %v728_v39  ;;  %978 = vmatpush.msrb.mxu2 %v723_v40  ;;  %v2970_v39 = vmax.f32 %v605_v15, 0.0  ;;  %v561_v40 = vsub.f32 %v524_v16, %v2849_v11  ;;  %v570_v15 = vsub.f32 %v533_v57, %v2849_v11  ;;  %v655_v16 = vld [vmem:[#allocation2 + $0x38] sm:$0xff]  ;;  %v547_v57 = vsub.f32 %v510_v49, %v2849_v11  ;;  %v1458_v49 = vld [vmem:[#allocation2 + $0x410] sm:$0xff] }
  0x42   : > { %767 = vmatmul.f32.gmra.mxu0 %v2926_v35  ;;  %1090 = vmatpush.msrb.mxu3 %v675_v43  ;;  %v664_v43 = vld [vmem:[#allocation2 + $0x80] sm:$0xff] }
  0x43   : > { %1202 = vmatpush.msrb.mxu0 %v679_v47  ;;  %864 = vmatpush.msrb.mxu1 %v725_v48  ;;  %v705_v47 = vld [vmem:[#allocation2 + $0x1c0] sm:$0xff]  ;;  %v590_v48 = vmul.f32 %v2855_v18, %v553_v28  ;;  %v607_v28 = vmul.f32 %v2855_v18, %v570_v15 }
  0x44   : > { %979 = vmatpush.msrb.mxu2 %v720_v51  ;;  %1091 = vmatpush.msrb.mxu3 %v672_v52  ;;  %v598_v51 = vmul.f32 %v2855_v18, %v561_v40  ;;  %v606_v52 = vmul.f32 %v2855_v18, %v569_v41  ;;  %v534_v40 = vld [vmem:[%s2847_s20 + $0xf8] sm:$0xff]  ;;  %v1470_v41 = vld [vmem:[#allocation2 + $0x470] sm:$0xff] }
  0x45   : > { %1203 = vmatpush.msrb.mxu0 %v676_v54  ;;  %865 = vmatpush.msrb.mxu1 %v722_v55  ;;  %v661_v54 = vld [vmem:[#allocation2 + $0x68] sm:$0xff]  ;;  %v707_v55 = vld [vmem:[#allocation2 + $0x1d0] sm:$0xff] }
  0x46   : > { %980 = vmatpush.msrb.mxu2 %v717_v60  ;;  %1092 = vmatpush.msrb.mxu3 %v669_v61  ;;  %v654_v60 = vld [vmem:[#allocation2 + $0x30] sm:$0xff]  ;;  %v582_v61 = vmul.f32 %v2855_v18, %v545_v45  ;;  %v2992_v12 = vmax.f32 %v598_v51, 0.0 }
  0x47   : > { %794 = vmatmul.f32.gmra.mxu1 %v2940_v56  ;;  %1204 = vmatpush.msrb.mxu0 %v673_v5  ;;  %v2988_v5 = vmax.f32 %v590_v48, 0.0  ;;  %v555_v48 = vsub.f32 %v518_v23, %v2849_v11 }
  0x48   : > { %818 = vmatmul.f32.gmra.mxu2 %v2944_v62  ;;  %842 = vmatmul.f32.gmra.mxu3 %v2946_v1 }
  0x49   : > { %866 = vmatpush.msrb.mxu1 %v719_v8  ;;  %981 = vmatpush.msrb.mxu2 %v714_v9  ;;  %v509_v8 = vld [vmem:[%s2847_s20 + $0x30] sm:$0xff]  ;;  %s499_s20 = scalar_lea.vmem %s4101_s7, %s2604_s13 }
  0x4a   : > { %770 = vmatmul.f32.gmra.mxu0 %v2950_v6  ;;  %1093 = vmatpush.msrb.mxu3 %v666_v13  ;;  %v699_v9 = vld [vmem:[#allocation2 + $0x190] sm:$0xff]  ;;  %v2994_v13 = vmax.f32 %v606_v52, 0.0  ;;  %v3019_v52 = vmax.f32 %v607_v28, 0.0  ;;  %v1463_v28 = vld [vmem:[#allocation2 + $0x438] sm:$0xff] }
  0x4b   : > { %1205 = vmatpush.msrb.mxu0 %v670_v17  ;;  %867 = vmatpush.msrb.mxu1 %v716_v19  ;;  %v2998_v17 = vmax.f32 %v582_v61, 0.0  ;;  %v546_v19 = vsub.f32 %v509_v8, %v2849_v11  ;;  %v1467_v8 = vld [vmem:[#allocation2 + $0x458] sm:$0xff] }
  0x4c   : > { %982 = vmatpush.msrb.mxu2 %v711_v21  ;;  %1094 = vmatpush.msrb.mxu3 %v663_v22  ;;  %v648_v21 = vld [vmem:[#allocation2] sm:$0xff]  ;;  %v591_v22 = vmul.f32 %v2855_v18, %v554_v7  ;;  %v584_v7 = vmul.f32 %v2855_v18, %v547_v57  ;;  %v1455_v57 = vld [vmem:[#allocation2 + $0x3f8] sm:$0xff] }
  0x4d   : > { %1206 = vmatpush.msrb.mxu0 %v667_v25  ;;  %868 = vmatpush.msrb.mxu1 %v713_v26  ;;  %v1469_v25 = vld [vmem:[#allocation2 + $0x468] sm:$0xff]  ;;  %v599_v26 = vmul.f32 %v2855_v18, %v562_v14  ;;  %v583_v45 = vmul.f32 %v2855_v18, %v546_v19 }
  0x4e   : > { %983 = vmatpush.msrb.mxu2 %v708_v32  ;;  %1095 = vmatpush.msrb.mxu3 %v660_v33  ;;  %v698_v32 = vld [vmem:[#allocation2 + $0x188] sm:$0xff]  ;;  %v652_v33 = vld [vmem:[#allocation2 + $0x20] sm:$0xff]  ;;  %v3044_v19 = vmax.f32 %v584_v7, 0.0 }
  0x4f   : > { %797 = vmatmul.f32.gmra.mxu1 %v2964_v27  ;;  %1207 = vmatpush.msrb.mxu0 %v664_v43  ;;  %v695_v43 = vld [vmem:[#allocation2 + $0x178] sm:$0xff]  ;;  %v3017_v51 = vmax.f32 %v599_v26, 0.0 }
  0x50   : > { %821 = vmatmul.f32.gmra.mxu2 %v2968_v36  ;;  %845 = vmatmul.f32.gmra.mxu3 %v2970_v39 }
  0x51   : > { %869 = vmatpush.msrb.mxu1 %v710_v46  ;;  %984 = vmatpush.msrb.mxu2 %v705_v47  ;;  %v649_v46 = vld [vmem:[#allocation2 + $0x8] sm:$0xff]  ;;  %v3012_v47 = vmax.f32 %v591_v22, 0.0 }
  0x52   : > { %773 = vmatmul.f32.gmra.mxu0 %v2974_v44  ;;  %1096 = vmatpush.msrb.mxu3 %v657_v50  ;;  %v1471_v50 = vld [vmem:[#allocation2 + $0x478] sm:$0xff]  ;;  %v502_v22 = vld [vmem:[%s456_s27 + $0x8] sm:$0xff] }
  0x53   : > { %1208 = vmatpush.msrb.mxu0 %v661_v54  ;;  %870 = vmatpush.msrb.mxu1 %v707_v55  ;;  %v571_v54 = vsub.f32 %v534_v40, %v2849_v11  ;;  %v3023_v55 = vmax.f32 %v583_v45, 0.0  ;;  %v1465_v40 = vld [vmem:[#allocation2 + $0x448] sm:$0xff]  ;;  %v686_v45 = vld [vmem:[#allocation2 + $0x130] sm:$0xff] }
  0x54   : > { %985 = vmatpush.msrb.mxu2 %v702_v59  ;;  %1097 = vmatpush.msrb.mxu3 %v654_v60  ;;  %v592_v59 = vmul.f32 %v2855_v18, %v555_v48  ;;  %v600_v60 = vmul.f32 %v2855_v18, %v563_v53  ;;  %v1457_v48 = vld [vmem:[#allocation2 + $0x408] sm:$0xff]  ;;  %v1459_v53 = vld [vmem:[#allocation2 + $0x418] sm:$0xff] }
  0x55   : > { %1209 = vmatpush.msrb.mxu0 %v658_v2  ;;  %871 = vmatpush.msrb.mxu1 %v704_v3  ;;  %v608_v61 = vmul.f32 %v2855_v18, %v571_v54  ;;  %v1466_v2 = vld [vmem:[#allocation2 + $0x450] sm:$0xff]  ;;  %v501_v3 = vld [vmem:[%s456_s27] sm:$0xff] }
  0x56   : > { %986 = vmatpush.msrb.mxu2 %v699_v9  ;;  %1098 = vmatpush.msrb.mxu3 %v651_v10  ;;  %v692_v9 = vld [vmem:[#allocation2 + $0x160] sm:$0xff]  ;;  %v3037_v10 = vmax.f32 %v592_v59, 0.0  ;;  %v3039_v14 = vmax.f32 %v600_v60, 0.0  ;;  %v1454_v54 = vld [vmem:[#allocation2 + $0x3f0] sm:$0xff] }
  0x57   : > { %800 = vmatmul.f32.gmra.mxu1 %v2988_v5  ;;  %1210 = vmatpush.msrb.mxu0 %v655_v16  ;;  %v3041_v15 = vmax.f32 %v608_v61, 0.0  ;;  %v538_v16 = vsub.f32 %v501_v3, %v2849_v11  ;;  %v680_v59 = vld [vmem:[#allocation2 + $0x100] sm:$0xff]  ;;  %v1451_v3 = vld [vmem:[#allocation2 + $0x3d8] sm:$0xff] }
  0x58   : > { %824 = vmatmul.f32.gmra.mxu2 %v2992_v12  ;;  %848 = vmatmul.f32.gmra.mxu3 %v2994_v13  ;;  %v1456_v60 = vld [vmem:[#allocation2 + $0x400] sm:$0xff] }
  0x59   : > { %872 = vmatpush.msrb.mxu1 %v701_v20  ;;  %1099 = vmatpush.msrb.mxu3 %v648_v21  ;;  %v575_v20 = vmul.f32 %v2855_v18, %v538_v16  ;;  %v1468_v21 = vld [vmem:[#allocation2 + $0x460] sm:$0xff] }
  0x5a   : > { %776 = vmatmul.f32.gmra.mxu0 %v2998_v17  ;;  %1472 = vmatpush.msra.mxu2 %v1469_v25  ;;  %v539_v25 = vsub.f32 %v502_v22, %v2849_v11  ;;  %v1452_v16 = vld [vmem:[#allocation2 + $0x3e0] sm:$0xff]  ;;  %v1453_v22 = vld [vmem:[#allocation2 + $0x3e8] sm:$0xff] }
  0x5b   : > { %873 = vmatpush.msrb.mxu1 %v698_v32  ;;  %1211 = vmatpush.msrb.mxu0 %v652_v33  ;;  %v3051_v23 = vmax.f32 %v575_v20, 0.0  ;;  %v689_v32 = vld [vmem:[#allocation2 + $0x148] sm:$0xff] }
  0x5c   : > { %1585 = vmatpush.msra.mxu3 %v1470_v41  ;;  %1473 = vmatpush.msra.mxu2 %v1466_v2  ;;  %v576_v26 = vmul.f32 %v2855_v18, %v539_v25  ;;  %v1460_v41 = vld [vmem:[#allocation2 + $0x420] sm:$0xff]  ;;  %v1438_v18 = vld [vmem:[#allocation2 + $0x370] sm:$0xff] }
  0x5d   : > { %1310 = vmatpush.msra.mxu1 %v695_v43  ;;  %1212 = vmatpush.msrb.mxu0 %v649_v46  ;;  %v1461_v43 = vld [vmem:[#allocation2 + $0x428] sm:$0xff]  ;;  %v1462_v46 = vld [vmem:[#allocation2 + $0x430] sm:$0xff] }
  0x5e   : > { %1586 = vmatpush.msra.mxu3 %v1467_v8  ;;  %1474 = vmatpush.msra.mxu2 %v1463_v28  ;;  %v3059_v33 = vmax.f32 %v576_v26, 0.0 }
  0x5f   : > { %1698 = vmatpush.msra.mxu0 %v1471_v50  ;;  %803 = vmatmul.f32.gmra.mxu1 %v3012_v47  ;;  %v683_v50 = vld [vmem:[#allocation2 + $0x118] sm:$0xff] }
  0x60   : > { %827 = vmatmul.f32.gmra.mxu2 %v3017_v51  ;;  %851 = vmatmul.f32.gmra.mxu3 %v3019_v52 }
  0x61   : > { %1311 = vmatpush.msra.mxu1 %v692_v9  ;;  %1699 = vmatpush.msra.mxu0 %v1468_v21  ;;  %v677_v21 = vld [vmem:[#allocation2 + $0xe8] sm:$0xff] }
  0x62   : > { %779 = vmatmul.f32.gmra.mxu0 %v3023_v55  ;;  %1587 = vmatpush.msra.mxu3 %v1464_v31 }
  0x63   : > { %1312 = vmatpush.msra.mxu1 %v689_v32  ;;  %1700 = vmatpush.msra.mxu0 %v1465_v40  ;;  %v1448_v32 = vld [vmem:[#allocation2 + $0x3c0] sm:$0xff] }
  0x64   : > { %1475 = vmatpush.msra.mxu2 %v1460_v41  ;;  %1588 = vmatpush.msra.mxu3 %v1461_v43 }
  0x65   : > { %1313 = vmatpush.msra.mxu1 %v686_v45  ;;  %1701 = vmatpush.msra.mxu0 %v1462_v46  ;;  %v1449_v45 = vld [vmem:[#allocation2 + $0x3c8] sm:$0xff] }
  0x66   : > { %1476 = vmatpush.msra.mxu2 %v1457_v48  ;;  %1589 = vmatpush.msra.mxu3 %v1458_v49  ;;  %v674_v48 = vld [vmem:[#allocation2 + $0xd0] sm:$0xff] }
  0x67   : > { %806 = vmatmul.f32.gmra.mxu1 %v3037_v10  ;;  %1702 = vmatpush.msra.mxu0 %v1459_v53  ;;  %v1450_v49 = vld [vmem:[#allocation2 + $0x3d0] sm:$0xff] }
  0x68   : > { %830 = vmatmul.f32.gmra.mxu2 %v3039_v14  ;;  %854 = vmatmul.f32.gmra.mxu3 %v3041_v15 }
  0x69   : > { %1314 = vmatpush.msra.mxu1 %v683_v50  ;;  %1477 = vmatpush.msra.mxu2 %v1454_v54 }
  0x6a   : > { %782 = vmatmul.f32.gmra.mxu0 %v3044_v19  ;;  %1590 = vmatpush.msra.mxu3 %v1455_v57 }
  0x6b   : > { %1315 = vmatpush.msra.mxu1 %v680_v59  ;;  %1703 = vmatpush.msra.mxu0 %v1456_v60  ;;  %v1445_v59 = vld [vmem:[#allocation2 + $0x3a8] sm:$0xff] }
  0x6c   : > { %1478 = vmatpush.msra.mxu2 %v1451_v3  ;;  %1591 = vmatpush.msra.mxu3 %v1452_v16 }
  0x6d   : > { %1316 = vmatpush.msra.mxu1 %v677_v21  ;;  %1704 = vmatpush.msra.mxu0 %v1453_v22  ;;  %v1446_v21 = vld [vmem:[#allocation2 + $0x3b0] sm:$0xff] }
  0x6e   : > { %1479 = vmatpush.msra.mxu2 %v1448_v32  ;;  %1592 = vmatpush.msra.mxu3 %v1449_v45  ;;  %v671_v32 = vld [vmem:[#allocation2 + $0xb8] sm:$0xff] }
  0x6f   : > { %874 = vmatmul.f32.vlgmr.msrb.gmra.mxu1 %v2878_v42  ;;  %1705 = vmatpush.msra.mxu0 %v1450_v49  ;;  %v1447_v45 = vld [vmem:[#allocation2 + $0x3b8] sm:$0xff] }
  0x70   : > { %987 = vmatmul.f32.vlgmr.msrb.gmra.mxu2 %v2878_v42  ;;  %1100 = vmatmul.f32.vlgmr.msrb.gmra.mxu3 %v3051_v23 }
  0x71   : > { %1317 = vmatpush.msra.mxu1 %v674_v48  ;;  %1480 = vmatpush.msra.mxu2 %v1445_v59 }
  0x72   : > { %1213 = vmatmul.f32.vlgmr.msrb.gmra.mxu0 %v3051_v23  ;;  %1593 = vmatpush.msra.mxu3 %v1446_v21 }
  0x73   : > { %1318 = vmatpush.msra.mxu1 %v671_v32  ;;  %1706 = vmatpush.msra.mxu0 %v1447_v45 }
  0x77   : > { %877 = vmatmul.f32.gmra.mxu1 %v2902_v4 }
  0x78   : > { %990 = vmatmul.f32.gmra.mxu2 %v2902_v4  ;;  %1103 = vmatmul.f32.gmra.mxu3 %v3059_v33 }
  0x7a   : > { %1216 = vmatmul.f32.gmra.mxu0 %v3059_v33 }
  0x7f   : > { %880 = vmatmul.f32.gmra.mxu1 %v2926_v35 }
  0x80   : > { %993 = vmatmul.f32.gmra.mxu2 %v2926_v35  ;;  %1106 = vmatmul.f32.gmra.mxu3 %v2878_v42 }
  0x82   : > { %1219 = vmatmul.f32.gmra.mxu0 %v2878_v42 }
  0x87   : > { %883 = vmatmul.f32.gmra.mxu1 %v2950_v6 }
  0x88   : > { %996 = vmatmul.f32.gmra.mxu2 %v2950_v6  ;;  %1109 = vmatmul.f32.gmra.mxu3 %v2902_v4 }
  0x8a   : > { %1222 = vmatmul.f32.gmra.mxu0 %v2902_v4 }
  0x8f   : > { %886 = vmatmul.f32.gmra.mxu1 %v2974_v44 }
  0x90   : > { %999 = vmatmul.f32.gmra.mxu2 %v2974_v44  ;;  %1112 = vmatmul.f32.gmra.mxu3 %v2926_v35 }
  0x92   : > { %1225 = vmatmul.f32.gmra.mxu0 %v2926_v35 }
  0x97   : > { %889 = vmatmul.f32.gmra.mxu1 %v2998_v17 }
  0x98   : > { %1002 = vmatmul.f32.gmra.mxu2 %v2998_v17  ;;  %1115 = vmatmul.f32.gmra.mxu3 %v2950_v6 }
  0x9a   : > { %1228 = vmatmul.f32.gmra.mxu0 %v2950_v6 }
  0x9f   : > { %892 = vmatmul.f32.gmra.mxu1 %v3023_v55 }
  0xa0   : > { %1005 = vmatmul.f32.gmra.mxu2 %v3023_v55  ;;  %1118 = vmatmul.f32.gmra.mxu3 %v2974_v44 }
  0xa2   : > { %1231 = vmatmul.f32.gmra.mxu0 %v2974_v44 }
  0xa7   : > { %895 = vmatmul.f32.gmra.mxu1 %v3044_v19 }
  0xa8   : > { %1008 = vmatmul.f32.gmra.mxu2 %v3044_v19  ;;  %1121 = vmatmul.f32.gmra.mxu3 %v2998_v17 }
  0xaa   : > { %1234 = vmatmul.f32.gmra.mxu0 %v2998_v17 }
  0xac   : > { %v3089_v61 = vpop.f32.mrf.mxu1 }
  0xad   : > { %4108 = vst [vmem:[#allocation7_spill] sm:$0xff] %v3089_v61  ;;  %v1435_v61 = vld [vmem:[#allocation2 + $0x358] sm:$0xff] }
  0xaf   : > { %v3091_v2 = vpop.f32.mrf.mxu0  ;;  %898 = vmatmul.f32.gmra.mxu1 %v2868_v34 }
  0xb0   : > { %1011 = vmatmul.f32.gmra.mxu2 %v2868_v34  ;;  %1124 = vmatmul.f32.gmra.mxu3 %v3023_v55 }
  0xb2   : > { %1237 = vmatmul.f32.gmra.mxu0 %v3023_v55 }
  0xb3   : > { %v3097_v7 = vpop.f32.mrf.mxu2  ;;  %v3099_v8 = vpop.f32.mrf.mxu3 }
  0xb4   : > { %4109 = vst [vmem:[#allocation8_spill] sm:$0xff] %v3097_v7  ;;  %v3101_v9 = vpop.f32.mrf.mxu1 }
  0xb5   : > { %4110 = vst [vmem:[#allocation9_spill] sm:$0xff] %v3099_v8 }
  0xb6   : > { %4111 = vst [vmem:[#allocation10_spill] sm:$0xff] %v3101_v9 }
  0xb7   : > { %v3103_v20 = vpop.f32.mrf.mxu0  ;;  %901 = vmatmul.f32.gmra.mxu1 %v2892_v58 }
  0xb8   : > { %1014 = vmatmul.f32.gmra.mxu2 %v2892_v58  ;;  %1127 = vmatmul.f32.gmra.mxu3 %v3044_v19 }
  0xba   : > { %1240 = vmatmul.f32.gmra.mxu0 %v3044_v19 }
  0xbb   : > { %v3109_v25 = vpop.f32.mrf.mxu2  ;;  %v3111_v26 = vpop.f32.mrf.mxu3 }
  0xbc   : > { %4112 = vst [vmem:[#allocation11_spill] sm:$0xff] %v3109_v25  ;;  %v3113_v28 = vpop.f32.mrf.mxu1 }
  0xbd   : > { %4113 = vst [vmem:[#allocation12_spill] sm:$0xff] %v3111_v26  ;;  %v668_v26 = vld [vmem:[#allocation2 + $0xa0] sm:$0xff] }
  0xbe   : > { %4114 = vst [vmem:[#allocation13_spill] sm:$0xff] %v3113_v28  ;;  %1319 = vmatpush.msra.mxu1 %v668_v26  ;;  %v1434_v28 = vld [vmem:[#allocation2 + $0x350] sm:$0xff] }
  0xbf   : > { %v3115_v31 = vpop.f32.mrf.mxu0  ;;  %904 = vmatmul.f32.gmra.mxu1 %v2916_v24 }
  0xc0   : > { %1017 = vmatmul.f32.gmra.mxu2 %v2916_v24  ;;  %1130 = vmatmul.f32.gmra.mxu3 %v2868_v34 }
  0xc2   : > { %1243 = vmatmul.f32.gmra.mxu0 %v2868_v34 }
  0xc3   : > { %v3121_v40 = vpop.f32.mrf.mxu2  ;;  %v3123_v41 = vpop.f32.mrf.mxu3 }
  0xc4   : > { %4115 = vst [vmem:[#allocation14_spill] sm:$0xff] %v3121_v40  ;;  %v3125_v43 = vpop.f32.mrf.mxu1  ;;  %v1441_v40 = vld [vmem:[#allocation2 + $0x388] sm:$0xff] }
  0xc5   : > { %4116 = vst [vmem:[#allocation15_spill] sm:$0xff] %v3123_v41 }
  0xc6   : > { %4117 = vst [vmem:[#allocation16_spill] sm:$0xff] %v3125_v43 }
  0xc7   : > { %v3127_v46 = vpop.f32.mrf.mxu0  ;;  %907 = vmatmul.f32.gmra.mxu1 %v2940_v56 }
  0xc8   : > { %1020 = vmatmul.f32.gmra.mxu2 %v2940_v56  ;;  %1133 = vmatmul.f32.gmra.mxu3 %v2892_v58 }
  0xca   : > { %1246 = vmatmul.f32.gmra.mxu0 %v2892_v58 }
  0xcb   : > { %v3133_v50 = vpop.f32.mrf.mxu2  ;;  %v3135_v53 = vpop.f32.mrf.mxu3 }
  0xcc   : > { %4118 = vst [vmem:[#allocation17_spill] sm:$0xff] %v3133_v50  ;;  %v3137_v54 = vpop.f32.mrf.mxu1 }
  0xcd   : > { %4119 = vst [vmem:[#allocation18_spill] sm:$0xff] %v3135_v53 }
  0xce   : > { %4120 = vst [vmem:[#allocation19_spill] sm:$0xff] %v3137_v54 }
  0xcf   : > { %v3139_v57 = vpop.f32.mrf.mxu0  ;;  %910 = vmatmul.f32.gmra.mxu1 %v2964_v27 }
  0xd0   : > { %1023 = vmatmul.f32.gmra.mxu2 %v2964_v27  ;;  %1136 = vmatmul.f32.gmra.mxu3 %v2916_v24 }
  0xd2   : > { %1249 = vmatmul.f32.gmra.mxu0 %v2916_v24 }
  0xd3   : > { %v3145_v60 = vpop.f32.mrf.mxu2  ;;  %v3147_v3 = vpop.f32.mrf.mxu3 }
  0xd4   : > { %4121 = vst [vmem:[#allocation20_spill] sm:$0xff] %v3145_v60  ;;  %v3149_v16 = vpop.f32.mrf.mxu1  ;;  %v1440_v60 = vld [vmem:[#allocation2 + $0x380] sm:$0xff] }
  0xd5   : > { %4122 = vst [vmem:[#allocation21_spill] sm:$0xff] %v3147_v3  ;;  %v1442_v3 = vld [vmem:[#allocation2 + $0x390] sm:$0xff] }
  0xd6   : > { %4123 = vst [vmem:[#allocation22_spill] sm:$0xff] %v3149_v16  ;;  %1481 = vmatpush.msra.mxu2 %v1442_v3  ;;  %v1444_v3 = vld [vmem:[#allocation2 + $0x3a0] sm:$0xff] }
  0xd7   : > { %v3151_v22 = vpop.f32.mrf.mxu0  ;;  %913 = vmatmul.f32.gmra.mxu1 %v2988_v5  ;;  %1707 = vmatpush.msra.mxu0 %v1444_v3 }
  0xd8   : > { %1026 = vmatmul.f32.gmra.mxu2 %v2988_v5  ;;  %1139 = vmatmul.f32.gmra.mxu3 %v2940_v56 }
  0xd9   : > { %1708 = vmatpush.msra.mxu0 %v1441_v40 }
  0xda   : > { %1252 = vmatmul.f32.gmra.mxu0 %v2940_v56 }
  0xdb   : > { %v3157_v48 = vpop.f32.mrf.mxu2  ;;  %v3159_v49 = vpop.f32.mrf.mxu3  ;;  %1709 = vmatpush.msra.mxu0 %v1438_v18 }
  0xdc   : > { %4124 = vst [vmem:[#allocation23_spill] sm:$0xff] %v3157_v48  ;;  %v3161_v59 = vpop.f32.mrf.mxu1  ;;  %v1439_v48 = vld [vmem:[#allocation2 + $0x378] sm:$0xff] }
  0xdd   : > { %4125 = vst [vmem:[#allocation24_spill] sm:$0xff] %v3159_v49  ;;  %v1443_v49 = vld [vmem:[#allocation2 + $0x398] sm:$0xff]  ;;  %1482 = vmatpush.msra.mxu2 %v1439_v48  ;;  %v665_v48 = vld [vmem:[#allocation2 + $0x88] sm:$0xff]  ;;  %1710 = vmatpush.msra.mxu0 %v1435_v61 }
  0xde   : > { %4126 = vst [vmem:[#allocation25_spill] sm:$0xff] %v3161_v59  ;;  %1594 = vmatpush.msra.mxu3 %v1443_v49  ;;  %1320 = vmatpush.msra.mxu1 %v665_v48  ;;  %v1436_v48 = vld [vmem:[#allocation2 + $0x360] sm:$0xff]  ;;  %v1437_v59 = vld [vmem:[#allocation2 + $0x368] sm:$0xff] }
  0xdf   : > { %v3163_v21 = vpop.f32.mrf.mxu0  ;;  %916 = vmatmul.f32.gmra.mxu1 %v3012_v47  ;;  %1483 = vmatpush.msra.mxu2 %v1436_v48  ;;  %v662_v48 = vld [vmem:[#allocation2 + $0x70] sm:$0xff] }
  0xe0   : > { %1029 = vmatmul.f32.gmra.mxu2 %v3012_v47  ;;  %1142 = vmatmul.f32.gmra.mxu3 %v2964_v27 }
  0xe1   : > { %1595 = vmatpush.msra.mxu3 %v1440_v60  ;;  %1321 = vmatpush.msra.mxu1 %v662_v48  ;;  %v1433_v48 = vld [vmem:[#allocation2 + $0x348] sm:$0xff] }
  0xe2   : > { %1255 = vmatmul.f32.gmra.mxu0 %v2964_v27  ;;  %1484 = vmatpush.msra.mxu2 %v1433_v48  ;;  %v659_v48 = vld [vmem:[#allocation2 + $0x58] sm:$0xff] }
  0xe3   : > { %v3169_v32 = vpop.f32.mrf.mxu2  ;;  %v3171_v45 = vpop.f32.mrf.mxu3  ;;  %1596 = vmatpush.msra.mxu3 %v1437_v59  ;;  %1322 = vmatpush.msra.mxu1 %v659_v48  ;;  %v1430_v48 = vld [vmem:[#allocation2 + $0x330] sm:$0xff] }
  0xe4   : > { %4127 = vst [vmem:[#allocation26_spill] sm:$0xff] %v3169_v32  ;;  %v3173_v53 = vpop.f32.mrf.mxu1  ;;  %1485 = vmatpush.msra.mxu2 %v1430_v48  ;;  %v656_v48 = vld [vmem:[#allocation2 + $0x40] sm:$0xff] }
  0xe5   : > { %4128 = vst [vmem:[#allocation27_spill] sm:$0xff] %v3171_v45  ;;  %1597 = vmatpush.msra.mxu3 %v1434_v28  ;;  %1323 = vmatpush.msra.mxu1 %v656_v48  ;;  %v1427_v48 = vld [vmem:[#allocation2 + $0x318] sm:$0xff] }
  0xe6   : > { %4129 = vst [vmem:[#allocation28_spill] sm:$0xff] %v3173_v53  ;;  %1486 = vmatpush.msra.mxu2 %v1427_v48  ;;  %v1429_v48 = vld [vmem:[#allocation2 + $0x328] sm:$0xff] }
  0xe7   : > { %v3175_v41 = vpop.f32.mrf.mxu0  ;;  %919 = vmatmul.f32.gmra.mxu1 %v3037_v10 }
  0xe8   : > { %1032 = vmatmul.f32.gmra.mxu2 %v3037_v10  ;;  %1145 = vmatmul.f32.gmra.mxu3 %v2988_v5 }
  0xea   : > { %1258 = vmatmul.f32.gmra.mxu0 %v2988_v5 }
  0xeb   : > { %v3181_v8 = vpop.f32.mrf.mxu2  ;;  %v3183_v45 = vpop.f32.mrf.mxu3 }
  0xec   : > { %4130 = vst [vmem:[#allocation29_spill] sm:$0xff] %v3181_v8  ;;  %v3185_v32 = vpop.f32.mrf.mxu1 }
  0xed   : > { %4131 = vst [vmem:[#allocation30_spill] sm:$0xff] %v3183_v45 }
  0xef   : > { %v3187_v49 = vpop.f32.mrf.mxu0  ;;  %922 = vmatmul.f32.gmra.mxu1 %v2872_v37 }
  0xf0   : > { %1035 = vmatmul.f32.gmra.mxu2 %v2872_v37  ;;  %1148 = vmatmul.f32.gmra.mxu3 %v3012_v47 }
  0xf2   : > { %1261 = vmatmul.f32.gmra.mxu0 %v3012_v47 }
  0xf3   : > { %v3193_v26 = vpop.f32.mrf.mxu2  ;;  %v1101_v3 = vpop.f32.mrf.mxu3 }
  0xf4   : > { %v3196_v8 = vadd.f32 %v1101_v3, %v3091_v2  ;;  %v3198_v45 = vpop.f32.mrf.mxu1 }
  0xf7   : > { %v3200_v50 = vpop.f32.mrf.mxu0  ;;  %925 = vmatmul.f32.gmra.mxu1 %v2896_v63 }
  0xf8   : > { %1038 = vmatmul.f32.gmra.mxu2 %v2896_v63  ;;  %1151 = vmatmul.f32.gmra.mxu3 %v3037_v10 }
  0xfa   : > { %1264 = vmatmul.f32.gmra.mxu0 %v3037_v10 }
  0xfb   : > { %v3206_v2 = vpop.f32.mrf.mxu2  ;;  %v1104_v3 = vpop.f32.mrf.mxu3 }
  0xfc   : > { %v3209_v25 = vadd.f32 %v1104_v3, %v3103_v20  ;;  %v3211_v60 = vpop.f32.mrf.mxu1 }
  0xff   : > { %v3213_v7 = vpop.f32.mrf.mxu0  ;;  %928 = vmatmul.f32.gmra.mxu1 %v2920_v29 }
 0x100   : > { %1041 = vmatmul.f32.gmra.mxu2 %v2920_v29  ;;  %1154 = vmatmul.f32.gmra.mxu3 %v2872_v37 }
 0x102   : > { %1267 = vmatmul.f32.gmra.mxu0 %v2872_v37 }
 0x103   : > { %v3219_v40 = vpop.f32.mrf.mxu2  ;;  %v1107_v53 = vpop.f32.mrf.mxu3 }
 0x104   : > { %v3222_v20 = vadd.f32 %v1107_v53, %v3115_v31  ;;  %v3224_v3 = vpop.f32.mrf.mxu1 }
 0x107   : > { %v3226_v16 = vpop.f32.mrf.mxu0  ;;  %931 = vmatmul.f32.gmra.mxu1 %v2944_v62 }
 0x108   : > { %1044 = vmatmul.f32.gmra.mxu2 %v2944_v62  ;;  %1157 = vmatmul.f32.gmra.mxu3 %v2896_v63 }
 0x10a   : > { %1270 = vmatmul.f32.gmra.mxu0 %v2896_v63 }
 0x10b   : > { %v3232_v31 = vpop.f32.mrf.mxu2  ;;  %v1110_v53 = vpop.f32.mrf.mxu3 }
 0x10c   : > { %v3235_v54 = vadd.f32 %v1110_v53, %v3127_v46  ;;  %v3237_v59 = vpop.f32.mrf.mxu1 }
 0x10d   : > { %4132 = vst [vmem:[#allocation31_spill] sm:$0xff] %v3237_v59 }
 0x10f   : > { %v3239_v11 = vpop.f32.mrf.mxu0  ;;  %934 = vmatmul.f32.gmra.mxu1 %v2968_v36 }
 0x110   : > { %4133 = vst [vmem:[#allocation32_spill] sm:$0xff] %v3239_v11  ;;  %1047 = vmatmul.f32.gmra.mxu2 %v2968_v36  ;;  %1160 = vmatmul.f32.gmra.mxu3 %v2920_v29 }
 0x112   : > { %1273 = vmatmul.f32.gmra.mxu0 %v2920_v29 }
 0x113   : > { %v3245_v18 = vpop.f32.mrf.mxu2  ;;  %v1113_v43 = vpop.f32.mrf.mxu3 }
 0x114   : > { %v3248_v46 = vadd.f32 %v1113_v43, %v3139_v57  ;;  %v3250_v53 = vpop.f32.mrf.mxu1 }
 0x115   : > { %4134 = vst [vmem:[#allocation33_spill] sm:$0xff] %v3250_v53  ;;  %v1432_v53 = vld [vmem:[#allocation2 + $0x340] sm:$0xff] }
 0x116   : > { %1711 = vmatpush.msra.mxu0 %v1432_v53 }
 0x117   : > { %v3252_v9 = vpop.f32.mrf.mxu0  ;;  %937 = vmatmul.f32.gmra.mxu1 %v2992_v12 }
 0x118   : > { %4135 = vst [vmem:[#allocation34_spill] sm:$0xff] %v3252_v9  ;;  %1050 = vmatmul.f32.gmra.mxu2 %v2992_v12  ;;  %1163 = vmatmul.f32.gmra.mxu3 %v2944_v62 }
 0x119   : > { %1712 = vmatpush.msra.mxu0 %v1429_v48 }
 0x11a   : > { %1276 = vmatmul.f32.gmra.mxu0 %v2944_v62 }
 0x11b   : > { %v3258_v43 = vpop.f32.mrf.mxu2  ;;  %v1116_v57 = vpop.f32.mrf.mxu3 }
 0x11c   : > { %v3261_v11 = vadd.f32 %v1116_v57, %v3151_v22  ;;  %v3263_v28 = vpop.f32.mrf.mxu1 }
 0x11d   : > { %4136 = vst [vmem:[#allocation35_spill] sm:$0xff] %v3263_v28  ;;  %v1431_v28 = vld [vmem:[#allocation2 + $0x338] sm:$0xff] }
 0x11e   : > { %1598 = vmatpush.msra.mxu3 %v1431_v28 }
 0x11f   : > { %v3265_v59 = vpop.f32.mrf.mxu0  ;;  %940 = vmatmul.f32.gmra.mxu1 %v3017_v51 }
 0x120   : > { %4137 = vst [vmem:[#allocation36_spill] sm:$0xff] %v3265_v59  ;;  %1053 = vmatmul.f32.gmra.mxu2 %v3017_v51  ;;  %1166 = vmatmul.f32.gmra.mxu3 %v2968_v36 }
 0x122   : > { %1279 = vmatmul.f32.gmra.mxu0 %v2968_v36 }
 0x123   : > { %v3271_v61 = vpop.f32.mrf.mxu2  ;;  %v1119_v9 = vpop.f32.mrf.mxu3 }
 0x124   : > { %v3274_v22 = vadd.f32 %v1119_v9, %v3163_v21  ;;  %v3276_v57 = vpop.f32.mrf.mxu1 }
 0x125   : > { %4139 = vst [vmem:[#allocation38_spill] sm:$0xff] %v3276_v57 }
 0x126   : > { %4138 = vst [vmem:[#allocation37_spill] sm:$0xff] %v3274_v22 }
 0x127   : > { %v3278_v59 = vpop.f32.mrf.mxu0  ;;  %943 = vmatmul.f32.gmra.mxu1 %v3039_v14 }
 0x128   : > { %4140 = vst [vmem:[#allocation39_spill] sm:$0xff] %v3278_v59  ;;  %1056 = vmatmul.f32.gmra.mxu2 %v3039_v14  ;;  %1169 = vmatmul.f32.gmra.mxu3 %v2992_v12 }
 0x12a   : > { %1282 = vmatmul.f32.gmra.mxu0 %v2992_v12 }
 0x12b   : > { %v3284_v9 = vpop.f32.mrf.mxu2  ;;  %v1122_v21 = vpop.f32.mrf.mxu3 }
 0x12c   : > { %v3287_v57 = vadd.f32 %v1122_v21, %v3175_v41  ;;  %v3289_v28 = vpop.f32.mrf.mxu1  ;;  %v1428_v21 = vld [vmem:[#allocation2 + $0x320] sm:$0xff] }
 0x12d   : > { %4141 = vst [vmem:[#allocation40_spill] sm:$0xff] %v3289_v28  ;;  %1599 = vmatpush.msra.mxu3 %v1428_v21 }
 0x12f   : > { %v3291_v59 = vpop.f32.mrf.mxu0  ;;  %946 = vmatmul.f32.gmra.mxu1 %v2874_v38 }
 0x130   : > { %4142 = vst [vmem:[#allocation41_spill] sm:$0xff] %v3291_v59  ;;  %1059 = vmatmul.f32.gmra.mxu2 %v2874_v38  ;;  %1172 = vmatmul.f32.gmra.mxu3 %v3017_v51  ;;  %v653_v59 = vld [vmem:[#allocation2 + $0x28] sm:$0xff] }
 0x131   : > { %1324 = vmatpush.msra.mxu1 %v653_v59 }
 0x132   : > { %1285 = vmatmul.f32.gmra.mxu0 %v3017_v51 }
 0x133   : > { %v3297_v53 = vpop.f32.mrf.mxu2  ;;  %v3299_v22 = vpop.f32.mrf.mxu3 }
 0x134   : > { %4143 = vst [vmem:[#allocation42_spill] sm:$0xff] %v3297_v53  ;;  %v3301_v41 = vpop.f32.mrf.mxu1 }
 0x135   : > { %4144 = vst [vmem:[#allocation43_spill] sm:$0xff] %v3299_v22 }
 0x136   : > { %4145 = vst [vmem:[#allocation44_spill] sm:$0xff] %v3301_v41 }
 0x137   : > { %v3303_v28 = vpop.f32.mrf.mxu0  ;;  %949 = vmatmul.f32.gmra.mxu1 %v2898_v0 }
 0x138   : > { %4146 = vst [vmem:[#allocation45_spill] sm:$0xff] %v3303_v28  ;;  %1062 = vmatmul.f32.gmra.mxu2 %v2898_v0  ;;  %1175 = vmatmul.f32.gmra.mxu3 %v3039_v14  ;;  %v1424_v28 = vld [vmem:[#allocation2 + $0x300] sm:$0xff] }
 0x139   : > { %1487 = vmatpush.msra.mxu2 %v1424_v28  ;;  %v1426_v28 = vld [vmem:[#allocation2 + $0x310] sm:$0xff] }
 0x13a   : > { %1288 = vmatmul.f32.gmra.mxu0 %v3039_v14 }
 0x13b   : > { %v3309_v53 = vpop.f32.mrf.mxu2  ;;  %v3311_v22 = vpop.f32.mrf.mxu3  ;;  %1713 = vmatpush.msra.mxu0 %v1426_v28 }
 0x13c   : > { %4147 = vst [vmem:[#allocation46_spill] sm:$0xff] %v3309_v53  ;;  %v3313_v41 = vpop.f32.mrf.mxu1 }
 0x13d   : > { %4148 = vst [vmem:[#allocation47_spill] sm:$0xff] %v3311_v22  ;;  %v1425_v22 = vld [vmem:[#allocation2 + $0x308] sm:$0xff] }
 0x13e   : > { %4149 = vst [vmem:[#allocation48_spill] sm:$0xff] %v3313_v41  ;;  %1600 = vmatpush.msra.mxu3 %v1425_v22 }
 0x13f   : > { %v3315_v21 = vpop.f32.mrf.mxu0  ;;  %952 = vmatmul.f32.gmra.mxu1 %v2922_v30 }
 0x140   : > { %4150 = vst [vmem:[#allocation49_spill] sm:$0xff] %v3315_v21  ;;  %1065 = vmatmul.f32.gmra.mxu2 %v2922_v30  ;;  %1178 = vmatmul.f32.gmra.mxu3 %v2874_v38  ;;  %v650_v21 = vld [vmem:[#allocation2 + $0x10] sm:$0xff] }
 0x141   : > { %1325 = vmatpush.msra.mxu1 %v650_v21 }
 0x142   : > { %1291 = vmatmul.f32.gmra.mxu0 %v2874_v38 }
 0x143   : > { %v3321_v59 = vpop.f32.mrf.mxu2  ;;  %v3323_v48 = vpop.f32.mrf.mxu3 }
 0x144   : > { %4151 = vst [vmem:[#allocation50_spill] sm:$0xff] %v3321_v59  ;;  %v3325_v53 = vpop.f32.mrf.mxu1 }
 0x145   : > { %4152 = vst [vmem:[#allocation51_spill] sm:$0xff] %v3323_v48 }
 0x146   : > { %4153 = vst [vmem:[#allocation52_spill] sm:$0xff] %v3325_v53 }
 0x147   : > { %v3327_v41 = vpop.f32.mrf.mxu0  ;;  %955 = vmatmul.f32.gmra.mxu1 %v2946_v1 }
 0x148   : > { %4154 = vst [vmem:[#allocation53_spill] sm:$0xff] %v3327_v41  ;;  %1068 = vmatmul.f32.gmra.mxu2 %v2946_v1  ;;  %1181 = vmatmul.f32.gmra.mxu3 %v2898_v0 }
 0x14a   : > { %1294 = vmatmul.f32.gmra.mxu0 %v2898_v0 }
 0x14b   : > { %v3333_v59 = vpop.f32.mrf.mxu2  ;;  %v3335_v48 = vpop.f32.mrf.mxu3 }
 0x14c   : > { %4155 = vst [vmem:[#allocation54_spill] sm:$0xff] %v3333_v59  ;;  %v3337_v53 = vpop.f32.mrf.mxu1 }
 0x14d   : > { %4156 = vst [vmem:[#allocation55_spill] sm:$0xff] %v3335_v48 }
 0x14e   : > { %4157 = vst [vmem:[#allocation56_spill] sm:$0xff] %v3337_v53 }
 0x14f   : > { %v3339_v22 = vpop.f32.mrf.mxu0  ;;  %958 = vmatmul.f32.gmra.mxu1 %v2970_v39 }
 0x150   : > { %4158 = vst [vmem:[#allocation57_spill] sm:$0xff] %v3339_v22  ;;  %1071 = vmatmul.f32.gmra.mxu2 %v2970_v39  ;;  %1184 = vmatmul.f32.gmra.mxu3 %v2922_v30 }
 0x152   : > { %1297 = vmatmul.f32.gmra.mxu0 %v2922_v30 }
 0x153   : > { %v3345_v21 = vpop.f32.mrf.mxu2  ;;  %v3347_v28 = vpop.f32.mrf.mxu3 }
 0x154   : > { %4159 = vst [vmem:[#allocation58_spill] sm:$0xff] %v3345_v21  ;;  %v3349_v41 = vpop.f32.mrf.mxu1 }
 0x155   : > { %4160 = vst [vmem:[#allocation59_spill] sm:$0xff] %v3347_v28 }
 0x156   : > { %4161 = vst [vmem:[#allocation60_spill] sm:$0xff] %v3349_v41 }
 0x157   : > { %v3351_v59 = vpop.f32.mrf.mxu0  ;;  %961 = vmatmul.f32.gmra.mxu1 %v2994_v13 }
 0x158   : > { %4162 = vst [vmem:[#allocation61_spill] sm:$0xff] %v3351_v59  ;;  %1074 = vmatmul.f32.gmra.mxu2 %v2994_v13  ;;  %1187 = vmatmul.f32.gmra.mxu3 %v2946_v1 }
 0x15a   : > { %1300 = vmatmul.f32.gmra.mxu0 %v2946_v1 }
 0x15b   : > { %v3357_v22 = vpop.f32.mrf.mxu2  ;;  %v3359_v53 = vpop.f32.mrf.mxu3 }
 0x15c   : > { %4163 = vst [vmem:[#allocation62_spill] sm:$0xff] %v3357_v22  ;;  %v3361_v48 = vpop.f32.mrf.mxu1 }
 0x15d   : > { %4164 = vst [vmem:[#allocation63_spill] sm:$0xff] %v3359_v53 }
 0x15e   : > { %4165 = vst [vmem:[#allocation64_spill] sm:$0xff] %v3361_v48 }
 0x15f   : > { %v3363_v21 = vpop.f32.mrf.mxu0  ;;  %964 = vmatmul.f32.gmra.mxu1 %v3019_v52 }
 0x160   : > { %4166 = vst [vmem:[#allocation65_spill] sm:$0xff] %v3363_v21  ;;  %1077 = vmatmul.f32.gmra.mxu2 %v3019_v52  ;;  %1190 = vmatmul.f32.gmra.mxu3 %v2970_v39 }
 0x162   : > { %1303 = vmatmul.f32.gmra.mxu0 %v2970_v39 }
 0x163   : > { %v3369_v59 = vpop.f32.mrf.mxu2  ;;  %v3371_v41 = vpop.f32.mrf.mxu3 }
 0x164   : > { %4167 = vst [vmem:[#allocation66_spill] sm:$0xff] %v3369_v59  ;;  %v3373_v28 = vpop.f32.mrf.mxu1 }
 0x165   : > { %4168 = vst [vmem:[#allocation67_spill] sm:$0xff] %v3371_v41 }
 0x166   : > { %4169 = vst [vmem:[#allocation68_spill] sm:$0xff] %v3373_v28 }
 0x167   : > { %v3375_v22 = vpop.f32.mrf.mxu0  ;;  %967 = vmatmul.f32.gmra.mxu1 %v3041_v15 }
 0x168   : > { %4170 = vst [vmem:[#allocation69_spill] sm:$0xff] %v3375_v22  ;;  %1080 = vmatmul.f32.gmra.mxu2 %v3041_v15  ;;  %1193 = vmatmul.f32.gmra.mxu3 %v2994_v13 }
 0x16a   : > { %1306 = vmatmul.f32.gmra.mxu0 %v2994_v13 }
 0x16b   : > { %v3381_v21 = vpop.f32.mrf.mxu2  ;;  %v3383_v48 = vpop.f32.mrf.mxu3 }
 0x16c   : > { %4171 = vst [vmem:[#allocation70_spill] sm:$0xff] %v3381_v21  ;;  %v3385_v53 = vpop.f32.mrf.mxu1 }
 0x16d   : > { %4172 = vst [vmem:[#allocation71_spill] sm:$0xff] %v3385_v53 }
 0x16f   : > { %v3387_v59 = vpop.f32.mrf.mxu0  ;;  %1326 = vmatmul.f32.vlgmr.msra.gmra.mxu1 %v3051_v23 }
 0x170   : > { %4173 = vst [vmem:[#allocation72_spill] sm:$0xff] %v3387_v59  ;;  %1488 = vmatmul.f32.vlgmr.msra.gmra.mxu2 %v2926_v35  ;;  %1601 = vmatmul.f32.vlgmr.msra.gmra.mxu3 %v2926_v35 }
 0x172   : > { %1714 = vmatmul.f32.vlgmr.msra.gmra.mxu0 %v2926_v35 }
 0x173   : > { %v3393_v22 = vpop.f32.mrf.mxu2  ;;  %v3395_v28 = vpop.f32.mrf.mxu3 }
 0x174   : > { %4174 = vst [vmem:[#allocation73_spill] sm:$0xff] %v3393_v22  ;;  %v3397_v41 = vpop.f32.mrf.mxu1 }
 0x175   : > { %4175 = vst [vmem:[#allocation74_spill] sm:$0xff] %v3395_v28 }
 0x176   : > { %4176 = vst [vmem:[#allocation75_spill] sm:$0xff] %v3397_v41 }
 0x177   : > { %v3399_v21 = vpop.f32.mrf.mxu0  ;;  %1329 = vmatmul.f32.gmra.mxu1 %v3059_v33 }
 0x178   : > { %4177 = vst [vmem:[#allocation76_spill] sm:$0xff] %v3399_v21  ;;  %1491 = vmatmul.f32.gmra.mxu2 %v2950_v6  ;;  %1604 = vmatmul.f32.gmra.mxu3 %v2950_v6 }
 0x17a   : > { %1717 = vmatmul.f32.gmra.mxu0 %v2950_v6 }
 0x17b   : > { %v3405_v23 = vpop.f32.mrf.mxu2  ;;  %v3407_v59 = vpop.f32.mrf.mxu3 }
 0x17c   : > { %v3409_v53 = vpop.f32.mrf.mxu1 }
 0x17d   : > { %4178 = vst [vmem:[#allocation77_spill] sm:$0xff] %v3409_v53 }
 0x17f   : > { %v3411_v22 = vpop.f32.mrf.mxu0  ;;  %1332 = vmatmul.f32.gmra.mxu1 %v2878_v42 }
 0x180   : > { %4179 = vst [vmem:[#allocation78_spill] sm:$0xff] %v3411_v22  ;;  %1494 = vmatmul.f32.gmra.mxu2 %v2974_v44  ;;  %1607 = vmatmul.f32.gmra.mxu3 %v2974_v44 }
 0x182   : > { %1720 = vmatmul.f32.gmra.mxu0 %v2974_v44 }
 0x183   : > { %v3417_v33 = vpop.f32.mrf.mxu2  ;;  %v3419_v21 = vpop.f32.mrf.mxu3 }
 0x184   : > { %4180 = vst [vmem:[#allocation79_spill] sm:$0xff] %v3417_v33  ;;  %v3421_v41 = vpop.f32.mrf.mxu1 }
 0x185   : > { %4181 = vst [vmem:[#allocation80_spill] sm:$0xff] %v3419_v21 }
 0x186   : > { %4182 = vst [vmem:[#allocation81_spill] sm:$0xff] %v3421_v41 }
 0x187   : > { %v3423_v28 = vpop.f32.mrf.mxu0  ;;  %1335 = vmatmul.f32.gmra.mxu1 %v2902_v4 }
 0x188   : > { %4183 = vst [vmem:[#allocation82_spill] sm:$0xff] %v3423_v28  ;;  %1497 = vmatmul.f32.gmra.mxu2 %v2998_v17  ;;  %1610 = vmatmul.f32.gmra.mxu3 %v2998_v17 }
 0x18a   : > { %1723 = vmatmul.f32.gmra.mxu0 %v2998_v17 }
 0x18b   : > { %v3429_v42 = vpop.f32.mrf.mxu2  ;;  %v3431_v22 = vpop.f32.mrf.mxu3 }
 0x18c   : > { %v3433_v53 = vpop.f32.mrf.mxu1 }
 0x18d   : > { %4184 = vst [vmem:[#allocation83_spill] sm:$0xff] %v3433_v53 }
 0x18f   : > { %v3435_v33 = vpop.f32.mrf.mxu0  ;;  %1338 = vmatmul.f32.gmra.mxu1 %v2926_v35 }
 0x190   : > { %4185 = vst [vmem:[#allocation84_spill] sm:$0xff] %v3435_v33  ;;  %1500 = vmatmul.f32.gmra.mxu2 %v3023_v55  ;;  %1613 = vmatmul.f32.gmra.mxu3 %v3023_v55 }
 0x192   : > { %1726 = vmatmul.f32.gmra.mxu0 %v3023_v55 }
 0x193   : > { %v3441_v4 = vpop.f32.mrf.mxu2  ;;  %v3443_v28 = vpop.f32.mrf.mxu3 }
 0x194   : > { %4186 = vst [vmem:[#allocation85_spill] sm:$0xff] %v3441_v4  ;;  %v3445_v41 = vpop.f32.mrf.mxu1 }
 0x195   : > { %4187 = vst [vmem:[#allocation86_spill] sm:$0xff] %v3443_v28 }
 0x196   : > { %4188 = vst [vmem:[#allocation87_spill] sm:$0xff] %v3445_v41 }
 0x197   : > { %v3447_v21 = vpop.f32.mrf.mxu0  ;;  %1341 = vmatmul.f32.gmra.mxu1 %v2950_v6 }
 0x198   : > { %4189 = vst [vmem:[#allocation88_spill] sm:$0xff] %v3447_v21  ;;  %1503 = vmatmul.f32.gmra.mxu2 %v3044_v19  ;;  %1616 = vmatmul.f32.gmra.mxu3 %v3044_v19 }
 0x19a   : > { %1729 = vmatmul.f32.gmra.mxu0 %v3044_v19 }
 0x19b   : > { %v3453_v35 = vpop.f32.mrf.mxu2  ;;  %v3455_v33 = vpop.f32.mrf.mxu3 }
 0x19c   : > { %v3457_v53 = vpop.f32.mrf.mxu1 }
 0x19d   : > { %4190 = vst [vmem:[#allocation89_spill] sm:$0xff] %v3457_v53 }
 0x19f   : > { %v3459_v4 = vpop.f32.mrf.mxu0  ;;  %1344 = vmatmul.f32.gmra.mxu1 %v2974_v44 }
 0x1a0   : > { %4191 = vst [vmem:[#allocation90_spill] sm:$0xff] %v3459_v4  ;;  %1506 = vmatmul.f32.gmra.mxu2 %v2868_v34  ;;  %1619 = vmatmul.f32.gmra.mxu3 %v2868_v34 }
 0x1a2   : > { %1732 = vmatmul.f32.gmra.mxu0 %v2868_v34 }
 0x1a3   : > { %v3465_v6 = vpop.f32.mrf.mxu2  ;;  %v3467_v21 = vpop.f32.mrf.mxu3 }
 0x1a4   : > { %4192 = vst [vmem:[#allocation91_spill] sm:$0xff] %v3465_v6  ;;  %v3469_v41 = vpop.f32.mrf.mxu1 }
 0x1a5   : > { %4193 = vst [vmem:[#allocation92_spill] sm:$0xff] %v3467_v21 }
 0x1a6   : > { %4194 = vst [vmem:[#allocation93_spill] sm:$0xff] %v3469_v41 }
 0x1a7   : > { %v3471_v28 = vpop.f32.mrf.mxu0  ;;  %1347 = vmatmul.f32.gmra.mxu1 %v2998_v17 }
 0x1a8   : > { %4195 = vst [vmem:[#allocation94_spill] sm:$0xff] %v3471_v28  ;;  %1509 = vmatmul.f32.gmra.mxu2 %v2892_v58  ;;  %1622 = vmatmul.f32.gmra.mxu3 %v2892_v58 }
 0x1aa   : > { %1735 = vmatmul.f32.gmra.mxu0 %v2892_v58 }
 0x1ab   : > { %v3477_v44 = vpop.f32.mrf.mxu2  ;;  %v3479_v4 = vpop.f32.mrf.mxu3 }
 0x1ac   : > { %v3481_v53 = vpop.f32.mrf.mxu1 }
 0x1ad   : > { %4196 = vst [vmem:[#allocation95_spill] sm:$0xff] %v3481_v53 }
 0x1af   : > { %v3483_v6 = vpop.f32.mrf.mxu0  ;;  %1350 = vmatmul.f32.gmra.mxu1 %v3023_v55 }
 0x1b0   : > { %4197 = vst [vmem:[#allocation96_spill] sm:$0xff] %v3483_v6  ;;  %1512 = vmatmul.f32.gmra.mxu2 %v2916_v24  ;;  %1625 = vmatmul.f32.gmra.mxu3 %v2916_v24 }
 0x1b2   : > { %1738 = vmatmul.f32.gmra.mxu0 %v2916_v24 }
 0x1b3   : > { %v3489_v17 = vpop.f32.mrf.mxu2  ;;  %v3491_v28 = vpop.f32.mrf.mxu3 }
 0x1b4   : > { %4198 = vst [vmem:[#allocation97_spill] sm:$0xff] %v3489_v17  ;;  %v3493_v41 = vpop.f32.mrf.mxu1 }
 0x1b5   : > { %4199 = vst [vmem:[#allocation98_spill] sm:$0xff] %v3491_v28 }
 0x1b6   : > { %4200 = vst [vmem:[#allocation99_spill] sm:$0xff] %v3493_v41 }
 0x1b7   : > { %v3495_v21 = vpop.f32.mrf.mxu0  ;;  %1353 = vmatmul.f32.gmra.mxu1 %v3044_v19 }
 0x1b8   : > { %4201 = vst [vmem:[#allocation100_spill] sm:$0xff] %v3495_v21  ;;  %1515 = vmatmul.f32.gmra.mxu2 %v2940_v56  ;;  %1628 = vmatmul.f32.gmra.mxu3 %v2940_v56 }
 0x1ba   : > { %1741 = vmatmul.f32.gmra.mxu0 %v2940_v56 }
 0x1bb   : > { %v3501_v55 = vpop.f32.mrf.mxu2  ;;  %v3503_v6 = vpop.f32.mrf.mxu3 }
 0x1bc   : > { %4202 = vst [vmem:[#allocation101_spill] sm:$0xff] %v3501_v55  ;;  %v3505_v53 = vpop.f32.mrf.mxu1 }
 0x1bd   : > { %4203 = vst [vmem:[#allocation102_spill] sm:$0xff] %v3503_v6 }
 0x1be   : > { %4204 = vst [vmem:[#allocation103_spill] sm:$0xff] %v3505_v53 }
 0x1bf   : > { %v3507_v17 = vpop.f32.mrf.mxu0  ;;  %1356 = vmatmul.f32.gmra.mxu1 %v2868_v34 }
 0x1c0   : > { %4205 = vst [vmem:[#allocation104_spill] sm:$0xff] %v3507_v17  ;;  %1518 = vmatmul.f32.gmra.mxu2 %v2964_v27  ;;  %1631 = vmatmul.f32.gmra.mxu3 %v2964_v27 }
 0x1c2   : > { %1744 = vmatmul.f32.gmra.mxu0 %v2964_v27 }
 0x1c3   : > { %v3513_v19 = vpop.f32.mrf.mxu2  ;;  %v3515_v21 = vpop.f32.mrf.mxu3 }
 0x1c4   : > { %4206 = vst [vmem:[#allocation105_spill] sm:$0xff] %v3513_v19  ;;  %v3517_v41 = vpop.f32.mrf.mxu1 }
 0x1c5   : > { %4207 = vst [vmem:[#allocation106_spill] sm:$0xff] %v3515_v21 }
 0x1c6   : > { %4208 = vst [vmem:[#allocation107_spill] sm:$0xff] %v3517_v41 }
 0x1c7   : > { %v3519_v28 = vpop.f32.mrf.mxu0  ;;  %1359 = vmatmul.f32.gmra.mxu1 %v2892_v58 }
 0x1c8   : > { %4209 = vst [vmem:[#allocation108_spill] sm:$0xff] %v3519_v28  ;;  %1521 = vmatmul.f32.gmra.mxu2 %v2988_v5  ;;  %1634 = vmatmul.f32.gmra.mxu3 %v2988_v5 }
 0x1ca   : > { %1747 = vmatmul.f32.gmra.mxu0 %v2988_v5 }
 0x1cb   : > { %v3525_v34 = vpop.f32.mrf.mxu2  ;;  %v3527_v17 = vpop.f32.mrf.mxu3 }
 0x1cc   : > { %4210 = vst [vmem:[#allocation109_spill] sm:$0xff] %v3525_v34  ;;  %v3529_v53 = vpop.f32.mrf.mxu1 }
 0x1cd   : > { %4211 = vst [vmem:[#allocation110_spill] sm:$0xff] %v3527_v17 }
 0x1ce   : > { %4212 = vst [vmem:[#allocation111_spill] sm:$0xff] %v3529_v53 }
 0x1cf   : > { %v3531_v19 = vpop.f32.mrf.mxu0  ;;  %1362 = vmatmul.f32.gmra.mxu1 %v2916_v24 }
 0x1d0   : > { %4213 = vst [vmem:[#allocation112_spill] sm:$0xff] %v3531_v19  ;;  %1524 = vmatmul.f32.gmra.mxu2 %v3012_v47  ;;  %1637 = vmatmul.f32.gmra.mxu3 %v3012_v47 }
 0x1d2   : > { %1750 = vmatmul.f32.gmra.mxu0 %v3012_v47 }
 0x1d3   : > { %v3537_v58 = vpop.f32.mrf.mxu2  ;;  %v3539_v28 = vpop.f32.mrf.mxu3 }
 0x1d4   : > { %4214 = vst [vmem:[#allocation113_spill] sm:$0xff] %v3537_v58  ;;  %v3541_v41 = vpop.f32.mrf.mxu1 }
 0x1d5   : > { %4215 = vst [vmem:[#allocation114_spill] sm:$0xff] %v3539_v28 }
 0x1d6   : > { %4216 = vst [vmem:[#allocation115_spill] sm:$0xff] %v3541_v41 }
 0x1d7   : > { %v3543_v21 = vpop.f32.mrf.mxu0  ;;  %1365 = vmatmul.f32.gmra.mxu1 %v2940_v56 }
 0x1d8   : > { %4217 = vst [vmem:[#allocation116_spill] sm:$0xff] %v3543_v21  ;;  %1527 = vmatmul.f32.gmra.mxu2 %v3037_v10  ;;  %1640 = vmatmul.f32.gmra.mxu3 %v3037_v10 }
 0x1da   : > { %1753 = vmatmul.f32.gmra.mxu0 %v3037_v10 }
 0x1db   : > { %v3549_v24 = vpop.f32.mrf.mxu2  ;;  %v3551_v19 = vpop.f32.mrf.mxu3 }
 0x1dc   : > { %4218 = vst [vmem:[#allocation117_spill] sm:$0xff] %v3549_v24  ;;  %v3553_v53 = vpop.f32.mrf.mxu1 }
 0x1dd   : > { %4219 = vst [vmem:[#allocation118_spill] sm:$0xff] %v3551_v19 }
 0x1de   : > { %4220 = vst [vmem:[#allocation119_spill] sm:$0xff] %v3553_v53 }
 0x1df   : > { %v3555_v58 = vpop.f32.mrf.mxu0  ;;  %1368 = vmatmul.f32.gmra.mxu1 %v2964_v27 }
 0x1e0   : > { %4221 = vst [vmem:[#allocation120_spill] sm:$0xff] %v3555_v58  ;;  %1530 = vmatmul.f32.gmra.mxu2 %v2872_v37  ;;  %1643 = vmatmul.f32.gmra.mxu3 %v2872_v37 }
 0x1e2   : > { %1756 = vmatmul.f32.gmra.mxu0 %v2872_v37 }
 0x1e3   : > { %v3561_v56 = vpop.f32.mrf.mxu2  ;;  %v3563_v21 = vpop.f32.mrf.mxu3 }
 0x1e4   : > { %4222 = vst [vmem:[#allocation121_spill] sm:$0xff] %v3561_v56  ;;  %v3565_v41 = vpop.f32.mrf.mxu1 }
 0x1e5   : > { %4223 = vst [vmem:[#allocation122_spill] sm:$0xff] %v3563_v21 }
 0x1e6   : > { %4224 = vst [vmem:[#allocation123_spill] sm:$0xff] %v3565_v41  ;;  %v1939_v41 = vlaneseq }
 0x1e7   : > { %v3567_v28 = vpop.f32.mrf.mxu0  ;;  %1371 = vmatmul.f32.gmra.mxu1 %v2988_v5 }
 0x1e8   : > { %4225 = vst [vmem:[#allocation124_spill] sm:$0xff] %v3567_v28  ;;  %1533 = vmatmul.f32.gmra.mxu2 %v2896_v63  ;;  %1646 = vmatmul.f32.gmra.mxu3 %v2896_v63 }
 0x1ea   : > { %1759 = vmatmul.f32.gmra.mxu0 %v2896_v63 }
 0x1eb   : > { %v3573_v27 = vpop.f32.mrf.mxu2  ;;  %v3575_v58 = vpop.f32.mrf.mxu3 }
 0x1ec   : > { %4226 = vst [vmem:[#allocation125_spill] sm:$0xff] %v3573_v27  ;;  %v1327_v53 = vpop.f32.mrf.mxu1 }
 0x1ed   : > { %4227 = vst [vmem:[#allocation126_spill] sm:$0xff] %v3575_v58  ;;  %v1328_v19 = vadd.f32 %v1327_v53, %v3193_v26  ;;  %v3583_v58 = vshrl.u32 %v1939_v41, 7  ;;  %v1215_v41 = vadd.f32 %v3187_v49, %v3185_v32 }
 0x1ef   : > { %v1715_v56 = vpop.f32.mrf.mxu0  ;;  %1374 = vmatmul.f32.gmra.mxu1 %v3012_v47  ;;  %vm2006_vm0 = vcmp.lt.s32.totalorder %v3583_v58, 7  ;;  %vm1941_vm1 = vcmp.lt.s32.totalorder %v3583_v58, 1  ;;  %vm2040_vm2 = vcmp.eq.s32.totalorder %v3583_v58, 0 }
 0x1f0   : > { %1536 = vmatmul.f32.gmra.mxu2 %v2920_v29  ;;  %1649 = vmatmul.f32.gmra.mxu3 %v2920_v29  ;;  %v1813_v17 = vadd.f32 %v1715_v56, %v1328_v19 }
 0x1f2   : > { %1762 = vmatmul.f32.gmra.mxu0 %v2920_v29 }
 0x1f3   : > { %v1489_v5 = vpop.f32.mrf.mxu2  ;;  %v1602_v28 = vpop.f32.mrf.mxu3 }
 0x1f4   : > { %v1330_v21 = vpop.f32.mrf.mxu1  ;;  %v1811_v34 = vadd.f32 %v1489_v5, %v3196_v8  ;;  %v1974_v8 = vrot.slane %v1813_v17, 1  ;;  %v3616_v17 = vld [vmem:[%s4099_s5] ss:$0 sm:$0xff] }
 0x1f5   : > { %v1331_v27 = vadd.f32 %v1330_v21, %v3206_v2  ;;  %v3591_v2 = vadd.s32 8, %v3583_v58  ;;  %v1218_v21 = vadd.f32 %v3200_v50, %v3198_v45  ;;  %v1812_v50 = vadd.f32 %v1602_v28, %v1215_v41 }
 0x1f6   : > { %v1907_v19 = vrot.slane %v1811_v34, 7 }
 0x1f7   : > { %v1718_v24 = vpop.f32.mrf.mxu0  ;;  %1377 = vmatmul.f32.gmra.mxu1 %v3037_v10  ;;  %vm2095_vm3 = vcmp.eq.s32.totalorder %v3591_v2, 15 }
 0x1f8   : > { %v1816_v47 = vadd.f32 %v1718_v24, %v1331_v27  ;;  %1539 = vmatmul.f32.gmra.mxu2 %v2944_v62  ;;  %1652 = vmatmul.f32.gmra.mxu3 %v2944_v62  ;;  %v2046_v27 = vperm.slane %v1811_v34, 1 }
 0x1fa   : > { %1765 = vmatmul.f32.gmra.mxu0 %v2944_v62  ;;  %v1990_v6 = vrot.slane %v1816_v47, 1  ;;  %v2100_v24 = vperm.slane %v1816_v47, 6 }
 0x1fb   : > { %v1492_v55 = vpop.f32.mrf.mxu2  ;;  %v1605_v26 = vpop.f32.mrf.mxu3 }
 0x1fc   : > { %v1814_v10 = vadd.f32 %v1492_v55, %v3209_v25  ;;  %v1333_v53 = vpop.f32.mrf.mxu1  ;;  %v2023_v5 = vsel %vm2006_vm0, %v1990_v6, %v1974_v8  ;;  %v1815_v25 = vadd.f32 %v1605_v26, %v1218_v21  ;;  %v2007_v47 = vsel %vm2006_vm0, %v1974_v8, %v1990_v6 }
 0x1fd   : > { %v2117_v34 = vsel %vm2095_vm3, %v2100_v24, %v2023_v5  ;;  %v1334_v24 = vadd.f32 %v1333_v53, %v3219_v40 }
 0x1fe   : > { %v1923_v56 = vrot.slane %v1814_v10, 7 }
 0x1ff   : > { %v1721_v55 = vpop.f32.mrf.mxu0  ;;  %1380 = vmatmul.f32.gmra.mxu1 %v2872_v37 }
 0x200   : > { %v1958_v32 = vsel %vm1941_vm1, %v1923_v56, %v1907_v19  ;;  %v1942_v45 = vsel %vm1941_vm1, %v1907_v19, %v1923_v56  ;;  %1542 = vmatmul.f32.gmra.mxu2 %v2968_v36  ;;  %1655 = vmatmul.f32.gmra.mxu3 %v2968_v36 }
 0x201   : > { %v2062_v49 = vsel %vm2040_vm2, %v2046_v27, %v1958_v32  ;;  %v2149_v37 = vadd.f32 %v1942_v45, %v1815_v25  ;;  %v1819_v45 = vadd.f32 %v1721_v55, %v1334_v24 }
 0x202   : > { %v2148_v28 = vadd.f32 %v2062_v49, %v1812_v50  ;;  %1768 = vmatmul.f32.gmra.mxu0 %v2968_v36 }
 0x203   : > { %v2181_v26 = vadd.f32 %v2149_v37, %v2117_v34  ;;  %v1495_v10 = vpop.f32.mrf.mxu2  ;;  %v1608_v41 = vpop.f32.mrf.mxu3  ;;  %v1224_v34 = vadd.f32 %v3226_v16, %v3224_v3 }
 0x204   : > { %v2180_v21 = vadd.f32 %v2148_v28, %v2007_v47  ;;  %v1336_v19 = vpop.f32.mrf.mxu1  ;;  %v1817_v40 = vadd.f32 %v1495_v10, %v3222_v20  ;;  %v1975_v47 = vrot.slane %v1819_v45, 1 }
 0x205   : > { %v2216_v56 = vadd.f32 %v3616_v17, %v2181_v26  ;;  %v1337_v27 = vadd.f32 %v1336_v19, %v3232_v31  ;;  %v1221_v26 = vadd.f32 %v3213_v7, %v3211_v60 }
 0x206   : > { %v2215_v6 = vadd.f32 %v3616_v17, %v2180_v21  ;;  %v1908_v21 = vrot.slane %v1817_v40, 7 }
 0x207   : > { %2248 = vst [vmem:[%s3627_s10 + $0x8] sm:$0xff] %v2216_v56  ;;  %v2317_v8 = vmul.f32 %v2216_v56, %v2216_v56  ;;  %v1724_v5 = vpop.f32.mrf.mxu0  ;;  %1383 = vmatmul.f32.gmra.mxu1 %v2896_v63 }
 0x208   : > { %2247 = vst [vmem:[%s3627_s10] sm:$0xff] %v2215_v6  ;;  %v2279_v25 = vadd.f32 %v2216_v56, %v2215_v6  ;;  %v2316_v50 = vmul.f32 %v2215_v6, %v2215_v6  ;;  %v1822_v32 = vadd.f32 %v1724_v5, %v1337_v27  ;;  %1545 = vmatmul.f32.gmra.mxu2 %v2992_v12  ;;  %v2047_v56 = vperm.slane %v1817_v40, 1 }
 0x209   : > { %1658 = vmatmul.f32.gmra.mxu3 %v2992_v12 }
 0x20a   : > { %v2348_v49 = vadd.f32 %v2317_v8, %v2316_v50  ;;  %1771 = vmatmul.f32.gmra.mxu0 %v2992_v12  ;;  %v1991_v31 = vrot.slane %v1822_v32, 1  ;;  %v2101_v55 = vperm.slane %v1822_v32, 6 }
 0x20b   : > { %v1498_v53 = vpop.f32.mrf.mxu2  ;;  %v1611_v37 = vpop.f32.mrf.mxu3 }
 0x20c   : > { %v1820_v28 = vadd.f32 %v1498_v53, %v3235_v54  ;;  %v1339_v63 = vpop.f32.mrf.mxu1  ;;  %v2024_v20 = vsel %vm2006_vm0, %v1991_v31, %v1975_v47  ;;  %v1821_v10 = vadd.f32 %v1611_v37, %v1224_v34  ;;  %v1818_v54 = vadd.f32 %v1608_v41, %v1221_v26 }
 0x20d   : > { %v2008_v41 = vsel %vm2006_vm0, %v1975_v47, %v1991_v31  ;;  %v1340_v40 = vadd.f32 %v1339_v63, %v3245_v18 }
 0x20e   : > { %v1924_v19 = vrot.slane %v1820_v28, 7 }
 0x20f   : > { %v1727_v24 = vpop.f32.mrf.mxu0  ;;  %1386 = vmatmul.f32.gmra.mxu1 %v2920_v29  ;;  %v2119_v29 = vsel %vm2095_vm3, %v2101_v55, %v2024_v20 }
 0x210   : > { %v1959_v27 = vsel %vm1941_vm1, %v1924_v19, %v1908_v21  ;;  %v1943_v16 = vsel %vm1941_vm1, %v1908_v21, %v1924_v19  ;;  %1548 = vmatmul.f32.gmra.mxu2 %v3017_v51  ;;  %v1825_v26 = vadd.f32 %v1727_v24, %v1340_v40  ;;  %v4231_v24 = vld [vmem:[#allocation32_spill] sm:$0xff] }
 0x211   : > { %1661 = vmatmul.f32.gmra.mxu3 %v3017_v51  ;;  %v2064_v7 = vsel %vm2040_vm2, %v2047_v56, %v1959_v27  ;;  %v2151_v60 = vadd.f32 %v1943_v16, %v1821_v10  ;;  %v4228_v10 = vld [vmem:[#allocation33_spill] sm:$0xff] }
 0x212   : > { %v2150_v3 = vadd.f32 %v2064_v7, %v1818_v54  ;;  %1774 = vmatmul.f32.gmra.mxu0 %v3017_v51  ;;  %v4229_v54 = vld [vmem:[#allocation34_spill] sm:$0xff]  ;;  %v1976_v16 = vrot.slane %v1825_v26, 1  ;;  %v4230_v7 = vld [vmem:[#allocation31_spill] sm:$0xff] }
 0x213   : > { %v2183_v6 = vadd.f32 %v2151_v60, %v2119_v29  ;;  %v1501_v8 = vpop.f32.mrf.mxu2  ;;  %v1614_v5 = vpop.f32.mrf.mxu3  ;;  %v1230_v27 = vadd.f32 %v4229_v54, %v4228_v10  ;;  %v1227_v60 = vadd.f32 %v4231_v24, %v4230_v7 }
 0x214   : > { %v2182_v50 = vadd.f32 %v2150_v3, %v2008_v41  ;;  %v1342_v32 = vpop.f32.mrf.mxu1 }
 0x215   : > { %v2218_v45 = vadd.f32 %v3616_v17, %v2183_v6  ;;  %v1343_v53 = vadd.f32 %v1342_v32, %v3258_v43  ;;  %v1823_v43 = vadd.f32 %v1501_v8, %v3248_v46 }
 0x216   : > { %v2217_v37 = vadd.f32 %v3616_v17, %v2182_v50 }
 0x217   : > { %2250 = vst [vmem:[%s3627_s10 + $0x18] sm:$0xff] %v2218_v45  ;;  %v1730_v28 = vpop.f32.mrf.mxu0  ;;  %1389 = vmatmul.f32.gmra.mxu1 %v2944_v62  ;;  %v2319_v55 = vmul.f32 %v2218_v45, %v2218_v45  ;;  %v1909_v3 = vrot.slane %v1823_v43, 7  ;;  %v2048_v46 = vperm.slane %v1823_v43, 1 }
 0x218   : > { %2249 = vst [vmem:[%s3627_s10 + $0x10] sm:$0xff] %v2217_v37  ;;  %v2280_v34 = vadd.f32 %v2279_v25, %v2217_v37  ;;  %v2318_v31 = vmul.f32 %v2217_v37, %v2217_v37  ;;  %v1828_v47 = vadd.f32 %v1730_v28, %v1343_v53  ;;  %1551 = vmatmul.f32.gmra.mxu2 %v3039_v14 }
 0x219   : > { %1664 = vmatmul.f32.gmra.mxu3 %v3039_v14 }
 0x21a   : > { %v2281_v21 = vadd.f32 %v2280_v34, %v2218_v45  ;;  %v2349_v18 = vadd.f32 %v2348_v49, %v2318_v31  ;;  %1777 = vmatmul.f32.gmra.mxu0 %v3039_v14  ;;  %v1992_v63 = vrot.slane %v1828_v47, 1  ;;  %v2102_v49 = vperm.slane %v1828_v47, 6 }
 0x21b   : > { %v1504_v19 = vpop.f32.mrf.mxu2  ;;  %v1617_v56 = vpop.f32.mrf.mxu3 }
 0x21c   : > { %v2350_v62 = vadd.f32 %v2349_v18, %v2319_v55  ;;  %v1826_v25 = vadd.f32 %v1504_v19, %v3261_v11  ;;  %v1345_v20 = vpop.f32.mrf.mxu1  ;;  %v2025_v41 = vsel %vm2006_vm0, %v1992_v63, %v1976_v16  ;;  %v1827_v6 = vadd.f32 %v1617_v56, %v1230_v27 }
 0x21d   : > { %v1824_v11 = vadd.f32 %v1614_v5, %v1227_v60  ;;  %v2009_v5 = vsel %vm2006_vm0, %v1976_v16, %v1992_v63  ;;  %v1346_v55 = vadd.f32 %v1345_v20, %v3271_v61  ;;  %v4232_v20 = vld [vmem:[#allocation37_spill] sm:$0xff] }
 0x21e   : > { %v1925_v29 = vrot.slane %v1826_v25, 7 }
 0x21f   : > { %v1733_v8 = vpop.f32.mrf.mxu0  ;;  %1392 = vmatmul.f32.gmra.mxu1 %v2968_v36  ;;  %v2121_v36 = vsel %vm2095_vm3, %v2102_v49, %v2025_v41  ;;  %v4234_v49 = vld [vmem:[#allocation39_spill] sm:$0xff] }
 0x220   : > { %v1960_v50 = vsel %vm1941_vm1, %v1925_v29, %v1909_v3  ;;  %v1944_v32 = vsel %vm1941_vm1, %v1909_v3, %v1925_v29  ;;  %1554 = vmatmul.f32.gmra.mxu2 %v2874_v38  ;;  %v1831_v10 = vadd.f32 %v1733_v8, %v1346_v55  ;;  %v4233_v3 = vld [vmem:[#allocation38_spill] sm:$0xff]  ;;  %v4235_v41 = vld [vmem:[#allocation35_spill] sm:$0xff] }
 0x221   : > { %1667 = vmatmul.f32.gmra.mxu3 %v2874_v38  ;;  %v2066_v45 = vsel %vm2040_vm2, %v2048_v46, %v1960_v50  ;;  %v2153_v40 = vadd.f32 %v1944_v32, %v1827_v6  ;;  %v1236_v29 = vadd.f32 %v4234_v49, %v4233_v3  ;;  %v4236_v6 = vld [vmem:[#allocation36_spill] sm:$0xff]  ;;  %v4242_v3 = vld [vmem:[#allocation47_spill] sm:$0xff] }
 0x222   : > { %v2152_v53 = vadd.f32 %v2066_v45, %v1824_v11  ;;  %1780 = vmatmul.f32.gmra.mxu0 %v2874_v38  ;;  %v1977_v46 = vrot.slane %v1831_v10, 1  ;;  %v1233_v8 = vadd.f32 %v4236_v6, %v4235_v41 }
 0x223   : > { %v2185_v37 = vadd.f32 %v2153_v40, %v2121_v36  ;;  %v1507_v28 = vpop.f32.mrf.mxu2  ;;  %v1620_v34 = vpop.f32.mrf.mxu3 }
 0x224   : > { %v2184_v31 = vadd.f32 %v2152_v53, %v2009_v5  ;;  %v1348_v47 = vpop.f32.mrf.mxu1 }
 0x225   : > { %v2220_v26 = vadd.f32 %v3616_v17, %v2185_v37  ;;  %v1349_v18 = vadd.f32 %v1348_v47, %v3284_v9  ;;  %v1829_v9 = vadd.f32 %v1507_v28, %v4232_v20  ;;  %v4240_v20 = vld [vmem:[#allocation43_spill] sm:$0xff] }
 0x226   : > { %v2219_v43 = vadd.f32 %v3616_v17, %v2184_v31 }
 0x227   : > { %2252 = vst [vmem:[%s3627_s10 + $0x28] sm:$0xff] %v2220_v26  ;;  %v1736_v19 = vpop.f32.mrf.mxu0  ;;  %1395 = vmatmul.f32.gmra.mxu1 %v2992_v12  ;;  %v2321_v27 = vmul.f32 %v2220_v26, %v2220_v26  ;;  %v1910_v11 = vrot.slane %v1829_v9, 7  ;;  %v2049_v32 = vperm.slane %v1829_v9, 1 }
 0x228   : > { %2251 = vst [vmem:[%s3627_s10 + $0x20] sm:$0xff] %v2219_v43  ;;  %v2282_v56 = vadd.f32 %v2281_v21, %v2219_v43  ;;  %v2320_v63 = vmul.f32 %v2219_v43, %v2219_v43  ;;  %v1834_v25 = vadd.f32 %v1736_v19, %v1349_v18  ;;  %1557 = vmatmul.f32.gmra.mxu2 %v2898_v0 }
 0x229   : > { %1670 = vmatmul.f32.gmra.mxu3 %v2898_v0 }
 0x22a   : > { %v2283_v54 = vadd.f32 %v2282_v56, %v2220_v26  ;;  %v2351_v61 = vadd.f32 %v2350_v62, %v2320_v63  ;;  %1783 = vmatmul.f32.gmra.mxu0 %v2898_v0  ;;  %v1993_v16 = vrot.slane %v1834_v25, 1  ;;  %v2103_v62 = vperm.slane %v1834_v25, 6  ;;  %v4237_v56 = vld [vmem:[#allocation42_spill] sm:$0xff] }
 0x22b   : > { %v1510_v7 = vpop.f32.mrf.mxu2  ;;  %v1623_v24 = vpop.f32.mrf.mxu3  ;;  %v4238_v25 = vld [vmem:[#allocation46_spill] sm:$0xff] }
 0x22c   : > { %v2352_v12 = vadd.f32 %v2351_v61, %v2321_v27  ;;  %v1832_v21 = vadd.f32 %v1510_v7, %v3287_v57  ;;  %v1351_v60 = vpop.f32.mrf.mxu1  ;;  %v2026_v45 = vsel %vm2006_vm0, %v1993_v16, %v1977_v46  ;;  %v1833_v40 = vadd.f32 %v1623_v24, %v1236_v29  ;;  %v4239_v61 = vld [vmem:[#allocation7_spill] sm:$0xff] }
 0x22d   : > { %v1830_v57 = vadd.f32 %v1620_v34, %v1233_v8  ;;  %v2010_v34 = vsel %vm2006_vm0, %v1977_v46, %v1993_v16  ;;  %v1352_v63 = vadd.f32 %v1351_v60, %v4237_v56  ;;  %v1126_v9 = vadd.f32 %v4240_v20, %v4239_v61  ;;  %v4241_v60 = vld [vmem:[#allocation10_spill] sm:$0xff] }
 0x22e   : > { %v1926_v50 = vrot.slane %v1832_v21, 7  ;;  %v1129_v49 = vadd.f32 %v4242_v3, %v4241_v60 }
 0x22f   : > { %v1739_v53 = vpop.f32.mrf.mxu0  ;;  %1398 = vmatmul.f32.gmra.mxu1 %v3017_v51  ;;  %v2123_v51 = vsel %vm2095_vm3, %v2103_v62, %v2026_v45  ;;  %v4243_v45 = vld [vmem:[#allocation44_spill] sm:$0xff] }
 0x230   : > { %v1961_v36 = vsel %vm1941_vm1, %v1926_v50, %v1910_v11  ;;  %v1945_v5 = vsel %vm1941_vm1, %v1910_v11, %v1926_v50  ;;  %1560 = vmatmul.f32.gmra.mxu2 %v2922_v30  ;;  %v1837_v29 = vadd.f32 %v1739_v53, %v1352_v63 }
 0x231   : > { %1673 = vmatmul.f32.gmra.mxu3 %v2922_v30  ;;  %v2068_v37 = vsel %vm2040_vm2, %v2049_v32, %v1961_v36  ;;  %v2155_v28 = vadd.f32 %v1945_v5, %v1833_v40  ;;  %v4244_v40 = vld [vmem:[#allocation45_spill] sm:$0xff]  ;;  %v4245_v5 = vld [vmem:[#allocation40_spill] sm:$0xff] }
 0x232   : > { %v2154_v31 = vadd.f32 %v2068_v37, %v1830_v57  ;;  %1786 = vmatmul.f32.gmra.mxu0 %v2922_v30  ;;  %v1242_v57 = vadd.f32 %v4244_v40, %v4243_v45  ;;  %v1978_v36 = vrot.slane %v1837_v29, 1  ;;  %v4246_v37 = vld [vmem:[#allocation41_spill] sm:$0xff]  ;;  %v4250_v29 = vld [vmem:[#allocation51_spill] sm:$0xff] }
 0x233   : > { %v2187_v47 = vadd.f32 %v2155_v28, %v2123_v51  ;;  %v1513_v26 = vpop.f32.mrf.mxu2  ;;  %v1626_v55 = vpop.f32.mrf.mxu3  ;;  %v1239_v28 = vadd.f32 %v4246_v37, %v4245_v5 }
 0x234   : > { %v2186_v18 = vadd.f32 %v2154_v31, %v2010_v34  ;;  %v1354_v43 = vpop.f32.mrf.mxu1  ;;  %v1835_v8 = vadd.f32 %v1513_v26, %v1126_v9 }
 0x235   : > { %v2222_v19 = vadd.f32 %v3616_v17, %v2187_v47  ;;  %v1355_v10 = vadd.f32 %v1354_v43, %v4238_v25 }
 0x236   : > { %v2221_v27 = vadd.f32 %v3616_v17, %v2186_v18  ;;  %v1911_v53 = vrot.slane %v1835_v8, 7  ;;  %v1836_v18 = vadd.f32 %v1626_v55, %v1239_v28 }
 0x237   : > { %2254 = vst [vmem:[%s3627_s10 + $0x38] sm:$0xff] %v2222_v19  ;;  %v1742_v7 = vpop.f32.mrf.mxu0  ;;  %1401 = vmatmul.f32.gmra.mxu1 %v3039_v14  ;;  %v2323_v41 = vmul.f32 %v2222_v19, %v2222_v19 }
 0x238   : > { %2253 = vst [vmem:[%s3627_s10 + $0x30] sm:$0xff] %v2221_v27  ;;  %v2284_v16 = vadd.f32 %v2283_v54, %v2221_v27  ;;  %v2322_v24 = vmul.f32 %v2221_v27, %v2221_v27  ;;  %v1840_v21 = vadd.f32 %v1742_v7, %v1355_v10  ;;  %1563 = vmatmul.f32.gmra.mxu2 %v2946_v1 }
 0x239   : > { %1676 = vmatmul.f32.gmra.mxu3 %v2946_v1 }
 0x23a   : > { %v2285_v46 = vadd.f32 %v2284_v16, %v2222_v19  ;;  %v2353_v6 = vadd.f32 %v2352_v12, %v2322_v24  ;;  %1789 = vmatmul.f32.gmra.mxu0 %v2946_v1  ;;  %v1994_v11 = vrot.slane %v1840_v21, 1  ;;  %v2104_v31 = vperm.slane %v1840_v21, 6  ;;  %v4247_v16 = vld [vmem:[#allocation50_spill] sm:$0xff] }
 0x23b   : > { %v1516_v14 = vpop.f32.mrf.mxu2  ;;  %v1629_v62 = vpop.f32.mrf.mxu3  ;;  %v2050_v12 = vperm.slane %v1835_v8, 1  ;;  %v4248_v21 = vld [vmem:[#allocation54_spill] sm:$0xff] }
 0x23c   : > { %v2354_v54 = vadd.f32 %v2353_v6, %v2323_v41  ;;  %v1838_v50 = vadd.f32 %v1516_v14, %v1129_v49  ;;  %v1357_v32 = vpop.f32.mrf.mxu1  ;;  %v2027_v34 = vsel %vm2006_vm0, %v1994_v11, %v1978_v36  ;;  %v1839_v47 = vadd.f32 %v1629_v62, %v1242_v57  ;;  %v4249_v49 = vld [vmem:[#allocation13_spill] sm:$0xff]  ;;  %v4251_v62 = vld [vmem:[#allocation16_spill] sm:$0xff] }
 0x23d   : > { %v2011_v55 = vsel %vm2006_vm0, %v1978_v36, %v1994_v11  ;;  %v1358_v24 = vadd.f32 %v1357_v32, %v4247_v16  ;;  %v1132_v41 = vadd.f32 %v4250_v29, %v4249_v49  ;;  %v4257_v49 = vld [vmem:[#allocation5_spill] sm:$0xff] }
 0x23e   : > { %v1927_v51 = vrot.slane %v1838_v50, 7  ;;  %v4252_v50 = vld [vmem:[#allocation55_spill] sm:$0xff] }
 0x23f   : > { %v1745_v26 = vpop.f32.mrf.mxu0  ;;  %1404 = vmatmul.f32.gmra.mxu1 %v2874_v38  ;;  %v2125_v38 = vsel %vm2095_vm3, %v2104_v31, %v2027_v34  ;;  %v1135_v32 = vadd.f32 %v4252_v50, %v4251_v62  ;;  %v4259_v62 = vld [vmem:[#allocation62_spill] sm:$0xff] }
 0x240   : > { %v1962_v43 = vsel %vm1941_vm1, %v1927_v51, %v1911_v53  ;;  %v1946_v19 = vsel %vm1941_vm1, %v1911_v53, %v1927_v51  ;;  %1566 = vmatmul.f32.gmra.mxu2 %v2970_v39  ;;  %v1843_v45 = vadd.f32 %v1745_v26, %v1358_v24  ;;  %v4253_v51 = vld [vmem:[#allocation52_spill] sm:$0xff]  ;;  %v4256_v26 = vld [vmem:[#allocation49_spill] sm:$0xff] }
 0x241   : > { %1679 = vmatmul.f32.gmra.mxu3 %v2970_v39  ;;  %v2070_v56 = vsel %vm2040_vm2, %v2050_v12, %v1962_v43  ;;  %v2157_v63 = vadd.f32 %v1946_v19, %v1839_v47  ;;  %v4254_v12 = vld [vmem:[#allocation53_spill] sm:$0xff] }
 0x242   : > { %v2156_v25 = vadd.f32 %v2070_v56, %v1836_v18  ;;  %1792 = vmatmul.f32.gmra.mxu0 %v2970_v39  ;;  %v1248_v34 = vadd.f32 %v4254_v12, %v4253_v51  ;;  %v1979_v47 = vrot.slane %v1843_v45, 1  ;;  %v4261_v45 = vld [vmem:[#allocation59_spill] sm:$0xff]  ;;  %v4263_v51 = vld [vmem:[#allocation22_spill] sm:$0xff] }
 0x243   : > { %v2189_v10 = vadd.f32 %v2157_v63, %v2125_v38  ;;  %v1519_v27 = vpop.f32.mrf.mxu2  ;;  %v1632_v61 = vpop.f32.mrf.mxu3  ;;  %v4264_v12 = vld [vmem:[#allocation63_spill] sm:$0xff] }
 0x244   : > { %v2188_v20 = vadd.f32 %v2156_v25, %v2011_v55  ;;  %v1360_v9 = vpop.f32.mrf.mxu1  ;;  %v1841_v5 = vadd.f32 %v1519_v27, %v1132_v41 }
 0x245   : > { %v2224_v7 = vadd.f32 %v3616_v17, %v2189_v10  ;;  %v1361_v60 = vadd.f32 %v1360_v9, %v4248_v21  ;;  %v535_v9 = vld [vmem:[%s3779_s15] sm:$0xff] }
 0x246   : > { %v2223_v3 = vadd.f32 %v3616_v17, %v2188_v20  ;;  %v1912_v43 = vrot.slane %v1841_v5, 7  ;;  %v2051_v63 = vperm.slane %v1841_v5, 1  ;;  %v572_v29 = vsub.f32 %v535_v9, %v4257_v49  ;;  %v4262_v5 = vld [vmem:[#allocation6_spill] sm:$0xff] }
 0x247   : > { %2256 = vst [vmem:[%s3627_s10 + $0x48] sm:$0xff] %v2224_v7  ;;  %v1748_v6 = vpop.f32.mrf.mxu0  ;;  %1407 = vmatmul.f32.gmra.mxu1 %v2898_v0  ;;  %v2325_v57 = vmul.f32 %v2224_v7, %v2224_v7 }
 0x248   : > { %2255 = vst [vmem:[%s3627_s10 + $0x40] sm:$0xff] %v2223_v3  ;;  %v2286_v8 = vadd.f32 %v2285_v46, %v2223_v3  ;;  %v2324_v11 = vmul.f32 %v2223_v3, %v2223_v3  ;;  %v1846_v14 = vadd.f32 %v1748_v6, %v1361_v60  ;;  %1569 = vmatmul.f32.gmra.mxu2 %v2994_v13 }
 0x249   : > { %1682 = vmatmul.f32.gmra.mxu3 %v2994_v13 }
 0x24a   : > { %v2287_v40 = vadd.f32 %v2286_v8, %v2224_v7  ;;  %v2355_v36 = vadd.f32 %v2354_v54, %v2324_v11  ;;  %1795 = vmatmul.f32.gmra.mxu0 %v2994_v13  ;;  %v1995_v0 = vrot.slane %v1846_v14, 1  ;;  %v4255_v54 = vld [vmem:[#allocation48_spill] sm:$0xff]  ;;  %v2105_v19 = vperm.slane %v1846_v14, 6  ;;  %v4258_v11 = vld [vmem:[#allocation58_spill] sm:$0xff] }
 0x24b   : > { %v1522_v37 = vpop.f32.mrf.mxu2  ;;  %v1635_v46 = vpop.f32.mrf.mxu3  ;;  %v1245_v18 = vadd.f32 %v4256_v26, %v4255_v54 }
 0x24c   : > { %v2356_v28 = vadd.f32 %v2355_v36, %v2325_v57  ;;  %v1844_v53 = vadd.f32 %v1522_v37, %v1135_v32  ;;  %v1363_v31 = vpop.f32.mrf.mxu1  ;;  %v2028_v25 = vsel %vm2006_vm0, %v1995_v0, %v1979_v47  ;;  %v1845_v38 = vadd.f32 %v1635_v46, %v1248_v34  ;;  %v4260_v32 = vld [vmem:[#allocation19_spill] sm:$0xff] }
 0x24d   : > { %v1842_v10 = vadd.f32 %v1632_v61, %v1245_v18  ;;  %v2012_v61 = vsel %vm2006_vm0, %v1979_v47, %v1995_v0  ;;  %v1364_v14 = vadd.f32 %v1363_v31, %v4258_v11  ;;  %v1138_v57 = vadd.f32 %v4261_v45, %v4260_v32  ;;  %v536_v31 = vld [vmem:[%s3779_s15 + $0x8] sm:$0xff] }
 0x24e   : > { %v1928_v56 = vrot.slane %v1844_v53, 7  ;;  %v609_v0 = vmul.f32 %v4262_v5, %v572_v29  ;;  %v1141_v34 = vadd.f32 %v4264_v12, %v4263_v51  ;;  %v4271_v51 = vld [vmem:[#allocation25_spill] sm:$0xff]  ;;  %v4272_v12 = vld [vmem:[#allocation67_spill] sm:$0xff] }
 0x24f   : > { %v1751_v55 = vpop.f32.mrf.mxu0  ;;  %1410 = vmatmul.f32.gmra.mxu1 %v2922_v30  ;;  %v2127_v30 = vsel %vm2095_vm3, %v2105_v19, %v2028_v25 }
 0x250   : > { %v1963_v27 = vsel %vm1941_vm1, %v1928_v56, %v1912_v43  ;;  %v1947_v20 = vsel %vm1941_vm1, %v1912_v43, %v1928_v56  ;;  %1572 = vmatmul.f32.gmra.mxu2 %v3019_v52  ;;  %v1849_v47 = vadd.f32 %v1751_v55, %v1364_v14  ;;  %v573_v56 = vsub.f32 %v536_v31, %v4257_v49  ;;  %v4267_v55 = vld [vmem:[#allocation56_spill] sm:$0xff] }
 0x251   : > { %1685 = vmatmul.f32.gmra.mxu3 %v3019_v52  ;;  %v2072_v7 = vsel %vm2040_vm2, %v2051_v63, %v1963_v27  ;;  %v2159_v16 = vadd.f32 %v1947_v20, %v1845_v38  ;;  %v4265_v27 = vld [vmem:[#allocation60_spill] sm:$0xff]  ;;  %v4266_v20 = vld [vmem:[#allocation61_spill] sm:$0xff] }
 0x252   : > { %v2158_v24 = vadd.f32 %v2072_v7, %v1842_v10  ;;  %1798 = vmatmul.f32.gmra.mxu0 %v3019_v52  ;;  %v645_v10 = vmax.f32 %v609_v0, 0.0  ;;  %v1254_v9 = vadd.f32 %v4266_v20, %v4265_v27  ;;  %v1980_v7 = vrot.slane %v1849_v47, 1  ;;  %v4269_v0 = vld [vmem:[#allocation66_spill] sm:$0xff] }
 0x253   : > { %v2191_v21 = vadd.f32 %v2159_v16, %v2127_v30  ;;  %v1525_v60 = vpop.f32.mrf.mxu2  ;;  %v1638_v3 = vpop.f32.mrf.mxu3  ;;  %v4268_v16 = vld [vmem:[#allocation57_spill] sm:$0xff]  ;;  %v610_v29 = vmul.f32 %v4262_v5, %v573_v56 }
 0x254   : > { %v2190_v41 = vadd.f32 %v2158_v24, %v2012_v61  ;;  %v1366_v6 = vpop.f32.mrf.mxu1  ;;  %v1847_v43 = vadd.f32 %v1525_v60, %v1138_v57  ;;  %v1251_v24 = vadd.f32 %v4268_v16, %v4267_v55  ;;  %v4275_v16 = vld [vmem:[#allocation69_spill] sm:$0xff] }
 0x255   : > { %v2226_v8 = vadd.f32 %v3616_v17, %v2191_v21  ;;  %v1367_v50 = vadd.f32 %v1366_v6, %v4259_v62 }
 0x256   : > { %v2225_v52 = vadd.f32 %v3616_v17, %v2190_v41  ;;  %v1848_v41 = vadd.f32 %v1638_v3, %v1251_v24 }
 0x257   : > { %2258 = vst [vmem:[%s3627_s10 + $0x58] sm:$0xff] %v2226_v8  ;;  %v1754_v36 = vpop.f32.mrf.mxu0  ;;  %1413 = vmatmul.f32.gmra.mxu1 %v2946_v1  ;;  %v2327_v26 = vmul.f32 %v2226_v8, %v2226_v8 }
 0x258   : > { %2257 = vst [vmem:[%s3627_s10 + $0x50] sm:$0xff] %v2225_v52  ;;  %v2288_v37 = vadd.f32 %v2287_v40, %v2225_v52  ;;  %v2326_v46 = vmul.f32 %v2225_v52, %v2225_v52  ;;  %v1852_v53 = vadd.f32 %v1754_v36, %v1367_v50  ;;  %1575 = vmatmul.f32.gmra.mxu2 %v3041_v15  ;;  %v646_v36 = vmax.f32 %v610_v29, 0.0 }
 0x259   : > { %1688 = vmatmul.f32.gmra.mxu3 %v3041_v15 }
 0x25a   : > { %v2289_v54 = vadd.f32 %v2288_v37, %v2226_v8  ;;  %v2357_v18 = vadd.f32 %v2356_v28, %v2326_v46  ;;  %1801 = vmatmul.f32.gmra.mxu0 %v3041_v15  ;;  %v1996_v1 = vrot.slane %v1852_v53, 1  ;;  %v1913_v28 = vrot.slane %v1847_v43, 7  ;;  %v4270_v46 = vld [vmem:[#allocation70_spill] sm:$0xff] }
 0x25b   : > { %v1528_v19 = vpop.f32.mrf.mxu2  ;;  %v1641_v40 = vpop.f32.mrf.mxu3  ;;  %v2106_v30 = vperm.slane %v1852_v53, 6  ;;  %v2052_v15 = vperm.slane %v1847_v43, 1 }
 0x25c   : > { %v2358_v63 = vadd.f32 %v2357_v18, %v2327_v26  ;;  %v1850_v25 = vadd.f32 %v1528_v19, %v1141_v34  ;;  %v1369_v38 = vpop.f32.mrf.mxu1  ;;  %v2029_v21 = vsel %vm2006_vm0, %v1996_v1, %v1980_v7  ;;  %v1851_v60 = vadd.f32 %v1641_v40, %v1254_v9 }
 0x25d   : > { %v2013_v3 = vsel %vm2006_vm0, %v1980_v7, %v1996_v1  ;;  %v1370_v37 = vadd.f32 %v1369_v38, %v4269_v0  ;;  %v1144_v34 = vadd.f32 %v4272_v12, %v4271_v51  ;;  %v4273_v1 = vld [vmem:[#allocation28_spill] sm:$0xff]  ;;  %v4278_v0 = vld [vmem:[#allocation73_spill] sm:$0xff]  ;;  %v4280_v12 = vld [vmem:[#allocation74_spill] sm:$0xff] }
 0x25e   : > { %v1929_v61 = vrot.slane %v1850_v25, 7  ;;  %v1147_v19 = vadd.f32 %v3383_v48, %v4273_v1  ;;  %v4279_v51 = vld [vmem:[#allocation8_spill] sm:$0xff] }
 0x25f   : > { %v1757_v49 = vpop.f32.mrf.mxu0  ;;  %1416 = vmatmul.f32.gmra.mxu1 %v2970_v39  ;;  %v2129_v39 = vsel %vm2095_vm3, %v2106_v30, %v2029_v21  ;;  %v4276_v30 = vld [vmem:[#allocation64_spill] sm:$0xff] }
 0x260   : > { %v1964_v6 = vsel %vm1941_vm1, %v1929_v61, %v1913_v28  ;;  %v1948_v8 = vsel %vm1941_vm1, %v1913_v28, %v1929_v61  ;;  %1578 = vmatmul.f32.gmra.mxu2 %v645_v10  ;;  %v1855_v40 = vadd.f32 %v1757_v49, %v1370_v37  ;;  %v4277_v61 = vld [vmem:[#allocation65_spill] sm:$0xff] }
 0x261   : > { %1691 = vmatmul.f32.gmra.mxu3 %v645_v10  ;;  %v2074_v11 = vsel %vm2040_vm2, %v2052_v15, %v1964_v6  ;;  %v2161_v14 = vadd.f32 %v1948_v8, %v1851_v60  ;;  %v1257_v15 = vadd.f32 %v4277_v61, %v4276_v30  ;;  %v4285_v30 = vld [vmem:[#allocation72_spill] sm:$0xff] }
 0x262   : > { %v2160_v62 = vadd.f32 %v2074_v11, %v1848_v41  ;;  %1804 = vmatmul.f32.gmra.mxu0 %v645_v10  ;;  %v1981_v28 = vrot.slane %v1855_v40, 1 }
 0x263   : > { %v2193_v50 = vadd.f32 %v2161_v14, %v2129_v39  ;;  %v1531_v52 = vpop.f32.mrf.mxu2  ;;  %v1644_v32 = vpop.f32.mrf.mxu3 }
 0x264   : > { %v2192_v45 = vadd.f32 %v2160_v62, %v2013_v3  ;;  %v1372_v57 = vpop.f32.mrf.mxu1  ;;  %v1853_v10 = vadd.f32 %v1531_v52, %v1144_v34  ;;  %v1854_v6 = vadd.f32 %v1644_v32, %v1257_v15  ;;  %v1150_v34 = vadd.f32 %v4280_v12, %v4279_v51 }
 0x265   : > { %v2228_v5 = vadd.f32 %v3616_v17, %v2193_v50  ;;  %v1373_v53 = vadd.f32 %v1372_v57, %v4270_v46 }
 0x266   : > { %v2227_v31 = vadd.f32 %v3616_v17, %v2192_v45  ;;  %v1914_v48 = vrot.slane %v1853_v10, 7  ;;  %v2053_v49 = vperm.slane %v1853_v10, 1 }
 0x267   : > { %2260 = vst [vmem:[%s3627_s10 + $0x68] sm:$0xff] %v2228_v5  ;;  %v1760_v47 = vpop.f32.mrf.mxu0  ;;  %1419 = vmatmul.f32.gmra.mxu1 %v2994_v13  ;;  %v2329_v25 = vmul.f32 %v2228_v5, %v2228_v5 }
 0x268   : > { %2259 = vst [vmem:[%s3627_s10 + $0x60] sm:$0xff] %v2227_v31  ;;  %v2290_v26 = vadd.f32 %v2289_v54, %v2227_v31  ;;  %v2328_v18 = vmul.f32 %v2227_v31, %v2227_v31  ;;  %v1858_v43 = vadd.f32 %v1760_v47, %v1373_v53  ;;  %1581 = vmatmul.f32.gmra.mxu2 %v646_v36  ;;  %v4274_v54 = vld [vmem:[#allocation68_spill] sm:$0xff] }
 0x269   : > { %1694 = vmatmul.f32.gmra.mxu3 %v646_v36  ;;  %v1260_v24 = vadd.f32 %v4275_v16, %v4274_v54  ;;  %v4282_v54 = vld [vmem:[#allocation75_spill] sm:$0xff]  ;;  %v4283_v16 = vld [vmem:[#allocation76_spill] sm:$0xff] }
 0x26a   : > { %v2291_v56 = vadd.f32 %v2290_v26, %v2228_v5  ;;  %v2359_v38 = vadd.f32 %v2358_v63, %v2328_v18  ;;  %1807 = vmatmul.f32.gmra.mxu0 %v646_v36  ;;  %v1997_v27 = vrot.slane %v1858_v43, 1  ;;  %v2107_v21 = vperm.slane %v1858_v43, 6  ;;  %v4281_v43 = vld [vmem:[#allocation11_spill] sm:$0xff] }
 0x26b   : > { %v1534_v20 = vpop.f32.mrf.mxu2  ;;  %v1647_v9 = vpop.f32.mrf.mxu3  ;;  %v1153_v1 = vadd.f32 %v3407_v59, %v4281_v43 }
 0x26c   : > { %v2360_v7 = vadd.f32 %v2359_v38, %v2329_v25  ;;  %v1856_v13 = vadd.f32 %v1534_v20, %v1147_v19  ;;  %v1375_v55 = vpop.f32.mrf.mxu1  ;;  %v2030_v63 = vsel %vm2006_vm0, %v1997_v27, %v1981_v28  ;;  %v1857_v29 = vadd.f32 %v1647_v9, %v1260_v24 }
 0x26d   : > { %v2131_v3 = vsel %vm2095_vm3, %v2107_v21, %v2030_v63  ;;  %v2014_v50 = vsel %vm2006_vm0, %v1981_v28, %v1997_v27  ;;  %v1376_v37 = vadd.f32 %v1375_v55, %v4278_v0  ;;  %v1266_v24 = vadd.f32 %v4283_v16, %v4282_v54  ;;  %v4284_v28 = vld [vmem:[#allocation71_spill] sm:$0xff]  ;;  %v4292_v16 = vld [vmem:[#allocation77_spill] sm:$0xff] }
 0x26e   : > { %v1930_v60 = vrot.slane %v1856_v13, 7  ;;  %v1263_v61 = vadd.f32 %v4285_v30, %v4284_v28 }
 0x26f   : > { %v1763_v41 = vpop.f32.mrf.mxu0 }
 0x270   : > { %v1965_v8 = vsel %vm1941_vm1, %v1930_v60, %v1914_v48  ;;  %v1949_v11 = vsel %vm1941_vm1, %v1914_v48, %v1930_v60  ;;  %v1861_v19 = vadd.f32 %v1763_v41, %v1376_v37 }
 0x271   : > { %v2076_v14 = vsel %vm2040_vm2, %v2053_v49, %v1965_v8  ;;  %v2163_v62 = vadd.f32 %v1949_v11, %v1857_v29 }
 0x272   : > { %v2162_v39 = vadd.f32 %v2076_v14, %v1854_v6 }
 0x273   : > { %v2195_v52 = vadd.f32 %v2163_v62, %v2131_v3  ;;  %v1537_v32 = vpop.f32.mrf.mxu2  ;;  %v1650_v45 = vpop.f32.mrf.mxu3 }
 0x274   : > { %v2194_v57 = vadd.f32 %v2162_v39, %v2014_v50  ;;  %v1378_v36 = vpop.f32.mrf.mxu1  ;;  %v1859_v10 = vadd.f32 %v1537_v32, %v1150_v34  ;;  %v1860_v63 = vadd.f32 %v1650_v45, %v1263_v61 }
 0x275   : > { %v2230_v5 = vadd.f32 %v3616_v17, %v2195_v52  ;;  %v1379_v46 = vadd.f32 %v1378_v36, %v3405_v23 }
 0x276   : > { %v2229_v53 = vadd.f32 %v3616_v17, %v2194_v57  ;;  %v1915_v15 = vrot.slane %v1859_v10, 7  ;;  %v2054_v21 = vperm.slane %v1859_v10, 1  ;;  %v4286_v57 = vld [vmem:[#allocation79_spill] sm:$0xff] }
 0x277   : > { %2262 = vst [vmem:[%s3627_s10 + $0x78] sm:$0xff] %v2230_v5  ;;  %v1766_v31 = vpop.f32.mrf.mxu0  ;;  %v2331_v25 = vmul.f32 %v2230_v5, %v2230_v5 }
 0x278   : > { %2261 = vst [vmem:[%s3627_s10 + $0x70] sm:$0xff] %v2229_v53  ;;  %v2292_v47 = vadd.f32 %v2291_v56, %v2229_v53  ;;  %v2330_v26 = vmul.f32 %v2229_v53, %v2229_v53  ;;  %v1864_v18 = vadd.f32 %v1766_v31, %v1379_v46  ;;  %v1982_v56 = vrot.slane %v1861_v19, 1  ;;  %v4287_v46 = vld [vmem:[#allocation14_spill] sm:$0xff]  ;;  %v4288_v53 = vld [vmem:[#allocation80_spill] sm:$0xff] }
 0x279   : > { %v1156_v31 = vadd.f32 %v4288_v53, %v4287_v46  ;;  %v4297_v53 = vld [vmem:[#allocation23_spill] sm:$0xff] }
 0x27a   : > { %v2293_v40 = vadd.f32 %v2292_v47, %v2230_v5  ;;  %v2361_v38 = vadd.f32 %v2360_v7, %v2330_v26  ;;  %v1998_v23 = vrot.slane %v1864_v18, 1  ;;  %v2108_v59 = vperm.slane %v1864_v18, 6  ;;  %v4289_v47 = vld [vmem:[#allocation17_spill] sm:$0xff] }
 0x27b   : > { %v1540_v27 = vpop.f32.mrf.mxu2  ;;  %v1653_v20 = vpop.f32.mrf.mxu3  ;;  %v1159_v26 = vadd.f32 %v3431_v22, %v4289_v47 }
 0x27c   : > { %v2362_v9 = vadd.f32 %v2361_v38, %v2331_v25  ;;  %v1862_v13 = vadd.f32 %v1540_v27, %v1153_v1  ;;  %v1381_v55 = vpop.f32.mrf.mxu1  ;;  %v2031_v7 = vsel %vm2006_vm0, %v1998_v23, %v1982_v56  ;;  %v1863_v60 = vadd.f32 %v1653_v20, %v1266_v24  ;;  %v4293_v24 = vld [vmem:[#allocation78_spill] sm:$0xff] }
 0x27d   : > { %v2133_v14 = vsel %vm2095_vm3, %v2108_v59, %v2031_v7  ;;  %v2015_v62 = vsel %vm2006_vm0, %v1982_v56, %v1998_v23  ;;  %v1382_v36 = vadd.f32 %v1381_v55, %v4286_v57  ;;  %v4291_v55 = vld [vmem:[#allocation82_spill] sm:$0xff]  ;;  %v1269_v56 = vadd.f32 %v4293_v24, %v4292_v16  ;;  %v4295_v57 = vld [vmem:[#allocation20_spill] sm:$0xff] }
 0x27e   : > { %v1931_v48 = vrot.slane %v1862_v13, 7  ;;  %v4290_v13 = vld [vmem:[#allocation81_spill] sm:$0xff] }
 0x27f   : > { %v1769_v49 = vpop.f32.mrf.mxu0  ;;  %v1272_v54 = vadd.f32 %v4291_v55, %v4290_v13 }
 0x280   : > { %v1966_v29 = vsel %vm1941_vm1, %v1931_v48, %v1915_v15  ;;  %v1950_v41 = vsel %vm1941_vm1, %v1915_v15, %v1931_v48  ;;  %v1867_v18 = vadd.f32 %v1769_v49, %v1382_v36  ;;  %v4296_v36 = vld [vmem:[#allocation86_spill] sm:$0xff] }
 0x281   : > { %v2078_v6 = vsel %vm2040_vm2, %v2054_v21, %v1966_v29  ;;  %v2165_v8 = vadd.f32 %v1950_v41, %v1863_v60 }
 0x282   : > { %v2164_v11 = vadd.f32 %v2078_v6, %v1860_v63 }
 0x283   : > { %v2197_v39 = vadd.f32 %v2165_v8, %v2133_v14  ;;  %v1543_v3 = vpop.f32.mrf.mxu2  ;;  %v1656_v50 = vpop.f32.mrf.mxu3 }
 0x284   : > { %v2196_v52 = vadd.f32 %v2164_v11, %v2015_v62  ;;  %v1384_v32 = vpop.f32.mrf.mxu1  ;;  %v1865_v25 = vadd.f32 %v1543_v3, %v1156_v31  ;;  %v1866_v48 = vadd.f32 %v1656_v50, %v1269_v56  ;;  %v4294_v3 = vld [vmem:[#allocation85_spill] sm:$0xff]  ;;  %v1165_v31 = vadd.f32 %v3455_v33, %v4297_v53 }
 0x285   : > { %v2232_v45 = vadd.f32 %v3616_v17, %v2197_v39  ;;  %v1385_v5 = vadd.f32 %v1384_v32, %v3429_v42 }
 0x286   : > { %v2231_v0 = vadd.f32 %v3616_v17, %v2196_v52  ;;  %v1916_v28 = vrot.slane %v1865_v25, 7  ;;  %v2055_v61 = vperm.slane %v1865_v25, 1 }
 0x287   : > { %2264 = vst [vmem:[%s3627_s10 + $0x88] sm:$0xff] %v2232_v45  ;;  %v1772_v37 = vpop.f32.mrf.mxu0  ;;  %v2333_v1 = vmul.f32 %v2232_v45, %v2232_v45 }
 0x288   : > { %2263 = vst [vmem:[%s3627_s10 + $0x80] sm:$0xff] %v2231_v0  ;;  %v2294_v51 = vadd.f32 %v2293_v40, %v2231_v0  ;;  %v2332_v12 = vmul.f32 %v2231_v0, %v2231_v0  ;;  %v1870_v34 = vadd.f32 %v1772_v37, %v1385_v5  ;;  %v1983_v40 = vrot.slane %v1867_v18, 1 }
 0x289   : > { %v1162_v5 = vadd.f32 %v4296_v36, %v4295_v57 }
 0x28a   : > { %v2295_v43 = vadd.f32 %v2294_v51, %v2232_v45  ;;  %v2363_v19 = vadd.f32 %v2362_v9, %v2332_v12  ;;  %v1999_v42 = vrot.slane %v1870_v34, 1  ;;  %v2109_v22 = vperm.slane %v1870_v34, 6 }
 0x28b   : > { %v1546_v38 = vpop.f32.mrf.mxu2 }
 0x28c   : > { %v1659_v10 = vpop.f32.mrf.mxu3  ;;  %v2364_v23 = vadd.f32 %v2363_v19, %v2333_v1  ;;  %v1868_v27 = vadd.f32 %v1546_v38, %v1159_v26  ;;  %v1387_v20 = vpop.f32.mrf.mxu1  ;;  %v2032_v9 = vsel %vm2006_vm0, %v1999_v42, %v1983_v40  ;;  %v2016_v41 = vsel %vm2006_vm0, %v1983_v40, %v1999_v42  ;;  %v4298_v42 = vld [vmem:[#allocation87_spill] sm:$0xff]  ;;  %v4299_v38 = vld [vmem:[#allocation88_spill] sm:$0xff] }
 0x28d   : > { %v1869_v15 = vadd.f32 %v1659_v10, %v1272_v54  ;;  %v2135_v29 = vsel %vm2095_vm3, %v2109_v22, %v2032_v9  ;;  %v1388_v50 = vadd.f32 %v1387_v20, %v4294_v3  ;;  %v1278_v10 = vadd.f32 %v4299_v38, %v4298_v42  ;;  %v4301_v20 = vld [vmem:[#allocation84_spill] sm:$0xff] }
 0x28e   : > { %v1932_v30 = vrot.slane %v1868_v27, 7  ;;  %v4300_v27 = vld [vmem:[#allocation83_spill] sm:$0xff] }
 0x28f   : > { %v1775_v59 = vpop.f32.mrf.mxu0  ;;  %v1275_v13 = vadd.f32 %v4301_v20, %v4300_v27 }
 0x290   : > { %v1967_v21 = vsel %vm1941_vm1, %v1932_v30, %v1916_v28  ;;  %v1951_v7 = vsel %vm1941_vm1, %v1916_v28, %v1932_v30  ;;  %v1873_v51 = vadd.f32 %v1775_v59, %v1388_v50 }
 0x291   : > { %v2080_v60 = vsel %vm2040_vm2, %v2055_v61, %v1967_v21  ;;  %v2167_v49 = vadd.f32 %v1951_v7, %v1869_v15 }
 0x292   : > { %v2166_v63 = vadd.f32 %v2080_v60, %v1866_v48 }
 0x293   : > { %v2199_v6 = vadd.f32 %v2167_v49, %v2135_v29  ;;  %v1549_v8 = vpop.f32.mrf.mxu2 }
 0x294   : > { %v1662_v11 = vpop.f32.mrf.mxu3  ;;  %v2198_v14 = vadd.f32 %v2166_v63, %v2016_v41  ;;  %v1390_v62 = vpop.f32.mrf.mxu1  ;;  %v1871_v26 = vadd.f32 %v1549_v8, %v1162_v5  ;;  %v3944_v63 = vld [vmem:[%s4099_s5] ss:$0 sm:$0xff]  ;;  %v4302_v41 = vld [vmem:[#allocation91_spill] sm:$0xff] }
 0x295   : > { %v2234_v39 = vadd.f32 %v3616_v17, %v2199_v6  ;;  %v1391_v52 = vadd.f32 %v1390_v62, %v3453_v35  ;;  %v1872_v56 = vadd.f32 %v1662_v11, %v1275_v13  ;;  %v4303_v62 = vld [vmem:[#allocation26_spill] sm:$0xff] }
 0x296   : > { %v2233_v32 = vadd.f32 %v3616_v17, %v2198_v14  ;;  %v1917_v55 = vrot.slane %v1871_v26, 7  ;;  %v2056_v40 = vperm.slane %v1871_v26, 1  ;;  %v4306_v26 = vld [vmem:[#allocation93_spill] sm:$0xff] }
 0x297   : > { %2266 = vst [vmem:[%s3627_s10 + $0x98] sm:$0xff] %v2234_v39  ;;  %v1778_v45 = vpop.f32.mrf.mxu0  ;;  %v2335_v34 = vmul.f32 %v2234_v39, %v2234_v39 }
 0x298   : > { %2265 = vst [vmem:[%s3627_s10 + $0x90] sm:$0xff] %v2233_v32  ;;  %v2296_v0 = vadd.f32 %v2295_v43, %v2233_v32  ;;  %v2334_v37 = vmul.f32 %v2233_v32, %v2233_v32  ;;  %v1876_v46 = vadd.f32 %v1778_v45, %v1391_v52  ;;  %v1984_v43 = vrot.slane %v1873_v51, 1  ;;  %v4305_v45 = vld [vmem:[#allocation29_spill] sm:$0xff] }
 0x299   : > { %v1171_v57 = vadd.f32 %v3479_v4, %v4305_v45 }
 0x29a   : > { %v2297_v12 = vadd.f32 %v2296_v0, %v2234_v39  ;;  %v2365_v47 = vadd.f32 %v2364_v23, %v2334_v37  ;;  %v2000_v35 = vrot.slane %v1876_v46, 1  ;;  %v2110_v33 = vperm.slane %v1876_v46, 6  ;;  %v4304_v39 = vld [vmem:[#allocation92_spill] sm:$0xff] }
 0x29b   : > { %v1552_v18 = vpop.f32.mrf.mxu2  ;;  %v1168_v3 = vadd.f32 %v4304_v39, %v4303_v62 }
 0x29c   : > { %v1665_v17 = vpop.f32.mrf.mxu3  ;;  %v2366_v1 = vadd.f32 %v2365_v47, %v2335_v34  ;;  %v1874_v19 = vadd.f32 %v1552_v18, %v1165_v31  ;;  %v1393_v25 = vpop.f32.mrf.mxu1  ;;  %v2033_v23 = vsel %vm2006_vm0, %v2000_v35, %v1984_v43  ;;  %v2017_v59 = vsel %vm2006_vm0, %v1984_v43, %v2000_v35  ;;  %v4307_v35 = vld [vmem:[#allocation94_spill] sm:$0xff] }
 0x29d   : > { %v1875_v16 = vadd.f32 %v1665_v17, %v1278_v10  ;;  %v2137_v15 = vsel %vm2095_vm3, %v2110_v33, %v2033_v23  ;;  %v1394_v6 = vadd.f32 %v1393_v25, %v4302_v41  ;;  %v1284_v18 = vadd.f32 %v4307_v35, %v4306_v26  ;;  %v4308_v17 = vld [vmem:[#allocation89_spill] sm:$0xff] }
 0x29e   : > { %v1933_v54 = vrot.slane %v1874_v19, 7  ;;  %v4309_v19 = vld [vmem:[#allocation90_spill] sm:$0xff] }
 0x29f   : > { %v1781_v24 = vpop.f32.mrf.mxu0  ;;  %v1281_v25 = vadd.f32 %v4309_v19, %v4308_v17 }
 0x2a0   : > { %v1968_v28 = vsel %vm1941_vm1, %v1933_v54, %v1917_v55  ;;  %v1952_v22 = vsel %vm1941_vm1, %v1917_v55, %v1933_v54  ;;  %v1879_v36 = vadd.f32 %v1781_v24, %v1394_v6 }
 0x2a1   : > { %v2082_v30 = vsel %vm2040_vm2, %v2056_v40, %v1968_v28  ;;  %v2169_v61 = vadd.f32 %v1952_v22, %v1875_v16 }
 0x2a2   : > { %v2168_v9 = vadd.f32 %v2082_v30, %v1872_v56 }
 0x2a3   : > { %v2201_v48 = vadd.f32 %v2169_v61, %v2137_v15  ;;  %v1555_v21 = vpop.f32.mrf.mxu2 }
 0x2a4   : > { %v1668_v7 = vpop.f32.mrf.mxu3  ;;  %v2200_v60 = vadd.f32 %v2168_v9, %v2017_v59  ;;  %v1396_v49 = vpop.f32.mrf.mxu1  ;;  %v1877_v46 = vadd.f32 %v1555_v21, %v1168_v3  ;;  %v4310_v9 = vld [vmem:[#allocation97_spill] sm:$0xff] }
 0x2a5   : > { %v2236_v29 = vadd.f32 %v3944_v63, %v2201_v48  ;;  %v1397_v8 = vadd.f32 %v1396_v49, %v3477_v44  ;;  %v1878_v20 = vadd.f32 %v1668_v7, %v1281_v25  ;;  %v4311_v59 = vld [vmem:[#allocation101_spill] sm:$0xff]  ;;  %v4313_v49 = vld [vmem:[#allocation98_spill] sm:$0xff] }
 0x2a6   : > { %v2235_v11 = vadd.f32 %v3944_v63, %v2200_v60  ;;  %v1918_v42 = vrot.slane %v1877_v46, 7  ;;  %v2057_v10 = vperm.slane %v1877_v46, 1  ;;  %v4312_v60 = vld [vmem:[#allocation9_spill] sm:$0xff] }
 0x2a7   : > { %2268 = vst [vmem:[%s3627_s10 + $0xa8] sm:$0xff] %v2236_v29  ;;  %v1784_v14 = vpop.f32.mrf.mxu0  ;;  %v2337_v0 = vmul.f32 %v2236_v29, %v2236_v29 }
 0x2a8   : > { %2267 = vst [vmem:[%s3627_s10 + $0xa0] sm:$0xff] %v2235_v11  ;;  %v2298_v50 = vadd.f32 %v2297_v12, %v2235_v11  ;;  %v2336_v52 = vmul.f32 %v2235_v11, %v2235_v11  ;;  %v1882_v32 = vadd.f32 %v1784_v14, %v1397_v8  ;;  %v1985_v12 = vrot.slane %v1879_v36, 1  ;;  %v4314_v11 = vld [vmem:[#allocation12_spill] sm:$0xff]  ;;  %v4315_v14 = vld [vmem:[#allocation102_spill] sm:$0xff] }
 0x2a9   : > { %v1177_v62 = vadd.f32 %v4315_v14, %v4314_v11 }
 0x2aa   : > { %v2299_v5 = vadd.f32 %v2298_v50, %v2236_v29  ;;  %v2367_v37 = vadd.f32 %v2366_v1, %v2336_v52  ;;  %v2001_v44 = vrot.slane %v1882_v32, 1  ;;  %v2111_v4 = vperm.slane %v1882_v32, 6 }
 0x2ab   : > { %v1558_v53 = vpop.f32.mrf.mxu2  ;;  %v1174_v29 = vadd.f32 %v4313_v49, %v4312_v60  ;;  %v4325_v60 = vld [vmem:[#allocation110_spill] sm:$0xff] }
 0x2ac   : > { %v1671_v31 = vpop.f32.mrf.mxu3  ;;  %v2368_v51 = vadd.f32 %v2367_v37, %v2337_v0  ;;  %v1880_v34 = vadd.f32 %v1558_v53, %v1171_v57  ;;  %v1399_v47 = vpop.f32.mrf.mxu1  ;;  %v2034_v1 = vsel %vm2006_vm0, %v2001_v44, %v1985_v12  ;;  %v2018_v16 = vsel %vm2006_vm0, %v1985_v12, %v2001_v44  ;;  %v4316_v44 = vld [vmem:[#allocation99_spill] sm:$0xff]  ;;  %v4317_v53 = vld [vmem:[#allocation100_spill] sm:$0xff] }
 0x2ad   : > { %v1881_v43 = vadd.f32 %v1671_v31, %v1284_v18  ;;  %v2139_v23 = vsel %vm2095_vm3, %v2111_v4, %v2034_v1  ;;  %v1400_v15 = vadd.f32 %v1399_v47, %v4310_v9  ;;  %v1290_v31 = vadd.f32 %v4317_v53, %v4316_v44  ;;  %v4319_v47 = vld [vmem:[#allocation96_spill] sm:$0xff]  ;;  %v4323_v9 = vld [vmem:[#allocation106_spill] sm:$0xff] }
 0x2ae   : > { %v1934_v38 = vrot.slane %v1880_v34, 7  ;;  %v4318_v34 = vld [vmem:[#allocation95_spill] sm:$0xff] }
 0x2af   : > { %v1787_v27 = vpop.f32.mrf.mxu0  ;;  %v1287_v26 = vadd.f32 %v4319_v47, %v4318_v34 }
 0x2b0   : > { %v1969_v13 = vsel %vm1941_vm1, %v1934_v38, %v1918_v42  ;;  %v1953_v55 = vsel %vm1941_vm1, %v1918_v42, %v1934_v38  ;;  %v1885_v39 = vadd.f32 %v1787_v27, %v1400_v15 }
 0x2b1   : > { %v2084_v33 = vsel %vm2040_vm2, %v2057_v10, %v1969_v13  ;;  %v2171_v54 = vadd.f32 %v1953_v55, %v1881_v43 }
 0x2b2   : > { %v2170_v40 = vadd.f32 %v2084_v33, %v1878_v20 }
 0x2b3   : > { %v2203_v24 = vadd.f32 %v2171_v54, %v2139_v23  ;;  %v1561_v56 = vpop.f32.mrf.mxu2 }
 0x2b4   : > { %v1674_v28 = vpop.f32.mrf.mxu3  ;;  %v2202_v22 = vadd.f32 %v2170_v40, %v2018_v16  ;;  %v1402_v30 = vpop.f32.mrf.mxu1  ;;  %v1883_v32 = vadd.f32 %v1561_v56, %v1174_v29  ;;  %v4320_v16 = vld [vmem:[#allocation105_spill] sm:$0xff] }
 0x2b5   : > { %v2238_v61 = vadd.f32 %v3944_v63, %v2203_v24  ;;  %v1403_v48 = vadd.f32 %v1402_v30, %v4311_v59  ;;  %v1884_v42 = vadd.f32 %v1674_v28, %v1287_v26  ;;  %v4321_v56 = vld [vmem:[#allocation109_spill] sm:$0xff] }
 0x2b6   : > { %v2237_v21 = vadd.f32 %v3944_v63, %v2202_v22  ;;  %v1919_v35 = vrot.slane %v1883_v32, 7  ;;  %v2058_v17 = vperm.slane %v1883_v32, 1 }
 0x2b7   : > { %2270 = vst [vmem:[%s3627_s10 + $0xb8] sm:$0xff] %v2238_v61  ;;  %v1790_v7 = vpop.f32.mrf.mxu0  ;;  %v2339_v50 = vmul.f32 %v2238_v61, %v2238_v61 }
 0x2b8   : > { %2269 = vst [vmem:[%s3627_s10 + $0xb0] sm:$0xff] %v2237_v21  ;;  %v2300_v41 = vadd.f32 %v2299_v5, %v2237_v21  ;;  %v2338_v6 = vmul.f32 %v2237_v21, %v2237_v21  ;;  %v1888_v8 = vadd.f32 %v1790_v7, %v1403_v48  ;;  %v1986_v5 = vrot.slane %v1885_v39, 1  ;;  %v4324_v7 = vld [vmem:[#allocation18_spill] sm:$0xff] }
 0x2b9   : > { %v1183_v49 = vadd.f32 %v4325_v60, %v4324_v7 }
 0x2ba   : > { %v2301_v3 = vadd.f32 %v2300_v41, %v2238_v61  ;;  %v2369_v52 = vadd.f32 %v2368_v51, %v2338_v6  ;;  %v2002_v45 = vrot.slane %v1888_v8, 1  ;;  %v2112_v18 = vperm.slane %v1888_v8, 6  ;;  %v4322_v61 = vld [vmem:[#allocation15_spill] sm:$0xff] }
 0x2bb   : > { %v1564_v57 = vpop.f32.mrf.mxu2  ;;  %v1180_v15 = vadd.f32 %v4323_v9, %v4322_v61  ;;  %v4335_v61 = vld [vmem:[#allocation118_spill] sm:$0xff] }
 0x2bc   : > { %v1677_v36 = vpop.f32.mrf.mxu3  ;;  %v2370_v0 = vadd.f32 %v2369_v52, %v2339_v50  ;;  %v1886_v37 = vadd.f32 %v1564_v57, %v1177_v62  ;;  %v1405_v46 = vpop.f32.mrf.mxu1  ;;  %v2035_v51 = vsel %vm2006_vm0, %v2002_v45, %v1986_v5  ;;  %v2019_v20 = vsel %vm2006_vm0, %v1986_v5, %v2002_v45  ;;  %v4326_v45 = vld [vmem:[#allocation107_spill] sm:$0xff]  ;;  %v4327_v57 = vld [vmem:[#allocation108_spill] sm:$0xff] }
 0x2bd   : > { %v1887_v19 = vadd.f32 %v1677_v36, %v1290_v31  ;;  %v2141_v27 = vsel %vm2095_vm3, %v2112_v18, %v2035_v51  ;;  %v1406_v24 = vadd.f32 %v1405_v46, %v4320_v16  ;;  %v1296_v36 = vadd.f32 %v4327_v57, %v4326_v45  ;;  %v4329_v46 = vld [vmem:[#allocation104_spill] sm:$0xff]  ;;  %v4333_v16 = vld [vmem:[#allocation114_spill] sm:$0xff] }
 0x2be   : > { %v1935_v12 = vrot.slane %v1886_v37, 7  ;;  %v4328_v37 = vld [vmem:[#allocation103_spill] sm:$0xff] }
 0x2bf   : > { %v1793_v25 = vpop.f32.mrf.mxu0  ;;  %v1293_v44 = vadd.f32 %v4329_v46, %v4328_v37 }
 0x2c0   : > { %v1970_v4 = vsel %vm1941_vm1, %v1935_v12, %v1919_v35  ;;  %v1954_v38 = vsel %vm1941_vm1, %v1919_v35, %v1935_v12  ;;  %v1891_v29 = vadd.f32 %v1793_v25, %v1406_v24 }
 0x2c1   : > { %v2086_v10 = vsel %vm2040_vm2, %v2058_v17, %v1970_v4  ;;  %v2173_v1 = vadd.f32 %v1954_v38, %v1887_v19 }
 0x2c2   : > { %v2172_v43 = vadd.f32 %v2086_v10, %v1884_v42 }
 0x2c3   : > { %v2205_v13 = vadd.f32 %v2173_v1, %v2141_v27  ;;  %v1567_v55 = vpop.f32.mrf.mxu2 }
 0x2c4   : > { %v1680_v33 = vpop.f32.mrf.mxu3  ;;  %v2204_v54 = vadd.f32 %v2172_v43, %v2019_v20  ;;  %v1408_v40 = vpop.f32.mrf.mxu1  ;;  %v1889_v11 = vadd.f32 %v1567_v55, %v1180_v15  ;;  %v4330_v20 = vld [vmem:[#allocation113_spill] sm:$0xff] }
 0x2c5   : > { %v2240_v23 = vadd.f32 %v3944_v63, %v2205_v13  ;;  %v1409_v28 = vadd.f32 %v1408_v40, %v4321_v56  ;;  %v1890_v35 = vadd.f32 %v1680_v33, %v1293_v44  ;;  %v4331_v55 = vld [vmem:[#allocation117_spill] sm:$0xff] }
 0x2c6   : > { %v2239_v22 = vadd.f32 %v3944_v63, %v2204_v54  ;;  %v1920_v53 = vrot.slane %v1889_v11, 7  ;;  %v2059_v34 = vperm.slane %v1889_v11, 1 }
 0x2c7   : > { %2272 = vst [vmem:[%s3627_s10 + $0xc8] sm:$0xff] %v2240_v23  ;;  %v1796_v30 = vpop.f32.mrf.mxu0  ;;  %v2341_v6 = vmul.f32 %v2240_v23, %v2240_v23 }
 0x2c8   : > { %2271 = vst [vmem:[%s3627_s10 + $0xc0] sm:$0xff] %v2239_v22  ;;  %v2302_v59 = vadd.f32 %v2301_v3, %v2239_v22  ;;  %v2340_v48 = vmul.f32 %v2239_v22, %v2239_v22  ;;  %v1894_v21 = vadd.f32 %v1796_v30, %v1409_v28  ;;  %v1987_v3 = vrot.slane %v1891_v29, 1  ;;  %v4334_v30 = vld [vmem:[#allocation24_spill] sm:$0xff] }
 0x2c9   : > { %v1189_v9 = vadd.f32 %v4335_v61, %v4334_v30 }
 0x2ca   : > { %v2303_v41 = vadd.f32 %v2302_v59, %v2240_v23  ;;  %v2371_v8 = vadd.f32 %v2370_v0, %v2340_v48  ;;  %v2003_v14 = vrot.slane %v1894_v21, 1  ;;  %v2113_v31 = vperm.slane %v1894_v21, 6  ;;  %v4332_v23 = vld [vmem:[#allocation21_spill] sm:$0xff] }
 0x2cb   : > { %v1570_v62 = vpop.f32.mrf.mxu2  ;;  %v1186_v24 = vadd.f32 %v4333_v16, %v4332_v23  ;;  %v4345_v23 = vld [vmem:[#allocation126_spill] sm:$0xff] }
 0x2cc   : > { %v1683_v39 = vpop.f32.mrf.mxu3  ;;  %v2372_v50 = vadd.f32 %v2371_v8, %v2341_v6  ;;  %v1892_v52 = vadd.f32 %v1570_v62, %v1183_v49  ;;  %v1411_v32 = vpop.f32.mrf.mxu1  ;;  %v2036_v0 = vsel %vm2006_vm0, %v2003_v14, %v1987_v3  ;;  %v2020_v42 = vsel %vm2006_vm0, %v1987_v3, %v2003_v14  ;;  %v4336_v14 = vld [vmem:[#allocation115_spill] sm:$0xff]  ;;  %v4337_v62 = vld [vmem:[#allocation116_spill] sm:$0xff] }
 0x2cd   : > { %v1893_v47 = vadd.f32 %v1683_v39, %v1296_v36  ;;  %v2143_v25 = vsel %vm2095_vm3, %v2113_v31, %v2036_v0  ;;  %v1412_v13 = vadd.f32 %v1411_v32, %v4330_v20  ;;  %v1302_v39 = vadd.f32 %v4337_v62, %v4336_v14  ;;  %v4339_v32 = vld [vmem:[#allocation112_spill] sm:$0xff]  ;;  %v4343_v20 = vld [vmem:[#allocation122_spill] sm:$0xff] }
 0x2ce   : > { %v1936_v5 = vrot.slane %v1892_v52, 7  ;;  %v4338_v52 = vld [vmem:[#allocation111_spill] sm:$0xff] }
 0x2cf   : > { %v1799_v26 = vpop.f32.mrf.mxu0  ;;  %v1299_v45 = vadd.f32 %v4339_v32, %v4338_v52 }
 0x2d0   : > { %v1971_v18 = vsel %vm1941_vm1, %v1936_v5, %v1920_v53  ;;  %v1955_v12 = vsel %vm1941_vm1, %v1920_v53, %v1936_v5  ;;  %v1897_v15 = vadd.f32 %v1799_v26, %v1412_v13 }
 0x2d1   : > { %v2088_v17 = vsel %vm2040_vm2, %v2059_v34, %v1971_v18  ;;  %v2175_v51 = vadd.f32 %v1955_v12, %v1893_v47 }
 0x2d2   : > { %v2174_v19 = vadd.f32 %v2088_v17, %v1890_v35 }
 0x2d3   : > { %v2207_v4 = vadd.f32 %v2175_v51, %v2143_v25  ;;  %v1573_v38 = vpop.f32.mrf.mxu2 }
 0x2d4   : > { %v1686_v10 = vpop.f32.mrf.mxu3  ;;  %v2206_v1 = vadd.f32 %v2174_v19, %v2020_v42  ;;  %v1414_v43 = vpop.f32.mrf.mxu1  ;;  %v1895_v7 = vadd.f32 %v1573_v38, %v1186_v24  ;;  %v4340_v42 = vld [vmem:[#allocation121_spill] sm:$0xff] }
 0x2d5   : > { %v2242_v27 = vadd.f32 %v3944_v63, %v2207_v4  ;;  %v1415_v33 = vadd.f32 %v1414_v43, %v4331_v55  ;;  %v1896_v53 = vadd.f32 %v1686_v10, %v1299_v45  ;;  %v4341_v38 = vld [vmem:[#allocation125_spill] sm:$0xff] }
 0x2d6   : > { %v2241_v54 = vadd.f32 %v3944_v63, %v2206_v1  ;;  %v1921_v57 = vrot.slane %v1895_v7, 7  ;;  %v2060_v37 = vperm.slane %v1895_v7, 1  ;;  %v4346_v7 = vld [vmem:[#allocation123_spill] sm:$0xff] }
 0x2d7   : > { %2274 = vst [vmem:[%s3627_s10 + $0xd8] sm:$0xff] %v2242_v27  ;;  %v1802_v40 = vpop.f32.mrf.mxu0  ;;  %v2343_v48 = vmul.f32 %v2242_v27, %v2242_v27 }
 0x2d8   : > { %2273 = vst [vmem:[%s3627_s10 + $0xd0] sm:$0xff] %v2241_v54  ;;  %v2304_v56 = vadd.f32 %v2303_v41, %v2241_v54  ;;  %v2342_v28 = vmul.f32 %v2241_v54, %v2241_v54  ;;  %v1900_v22 = vadd.f32 %v1802_v40, %v1415_v33  ;;  %v1988_v41 = vrot.slane %v1897_v15, 1  ;;  %v4344_v40 = vld [vmem:[#allocation30_spill] sm:$0xff] }
 0x2d9   : > { %v1195_v16 = vadd.f32 %v4345_v23, %v4344_v40 }
 0x2da   : > { %v2305_v59 = vadd.f32 %v2304_v56, %v2242_v27  ;;  %v2373_v21 = vadd.f32 %v2372_v50, %v2342_v28  ;;  %v2004_v60 = vrot.slane %v1900_v22, 1  ;;  %v2114_v36 = vperm.slane %v1900_v22, 6  ;;  %v4342_v27 = vld [vmem:[#allocation27_spill] sm:$0xff] }
 0x2db   : > { %v1576_v49 = vpop.f32.mrf.mxu2  ;;  %v1192_v13 = vadd.f32 %v4343_v20, %v4342_v27 }
 0x2dc   : > { %v1689_v29 = vpop.f32.mrf.mxu3  ;;  %v2374_v6 = vadd.f32 %v2373_v21, %v2343_v48  ;;  %v1898_v8 = vadd.f32 %v1576_v49, %v1189_v9  ;;  %v1417_v11 = vpop.f32.mrf.mxu1  ;;  %v2037_v50 = vsel %vm2006_vm0, %v2004_v60, %v1988_v41  ;;  %v2021_v35 = vsel %vm2006_vm0, %v1988_v41, %v2004_v60  ;;  %v4347_v60 = vld [vmem:[#allocation124_spill] sm:$0xff] }
 0x2dd   : > { %v1899_v46 = vadd.f32 %v1689_v29, %v1302_v39  ;;  %v2145_v26 = vsel %vm2095_vm3, %v2114_v36, %v2037_v50  ;;  %v1418_v4 = vadd.f32 %v1417_v11, %v4340_v42  ;;  %v1308_v49 = vadd.f32 %v4347_v60, %v4346_v7 }
 0x2de   : > { %v1937_v3 = vrot.slane %v1898_v8, 7  ;;  %v4349_v8 = vld [vmem:[#allocation120_spill] sm:$0xff] }
 0x2df   : > { %v1805_v44 = vpop.f32.mrf.mxu0 }
 0x2e0   : > { %v1972_v31 = vsel %vm1941_vm1, %v1937_v3, %v1921_v57  ;;  %v1956_v5 = vsel %vm1941_vm1, %v1921_v57, %v1937_v3  ;;  %v1903_v24 = vadd.f32 %v1805_v44, %v1418_v4 }
 0x2e1   : > { %v2090_v34 = vsel %vm2040_vm2, %v2060_v37, %v1972_v31  ;;  %v2177_v0 = vadd.f32 %v1956_v5, %v1899_v46 }
 0x2e2   : > { %v2176_v47 = vadd.f32 %v2090_v34, %v1896_v53  ;;  %v1989_v29 = vrot.slane %v1903_v24, 1 }
 0x2e3   : > { %v2209_v18 = vadd.f32 %v2177_v0, %v2145_v26  ;;  %v1579_v12 = vpop.f32.mrf.mxu2 }
 0x2e4   : > { %v1692_v17 = vpop.f32.mrf.mxu3  ;;  %v2208_v51 = vadd.f32 %v2176_v47, %v2021_v35  ;;  %v1420_v19 = vpop.f32.mrf.mxu1  ;;  %v1901_v30 = vadd.f32 %v1579_v12, %v1192_v13 }
 0x2e5   : > { %v2244_v25 = vadd.f32 %v3944_v63, %v2209_v18  ;;  %v1421_v10 = vadd.f32 %v1420_v19, %v4341_v38 }
 0x2e6   : > { %v2243_v1 = vadd.f32 %v3944_v63, %v2208_v51  ;;  %v1922_v14 = vrot.slane %v1901_v30, 7  ;;  %v2061_v41 = vperm.slane %v1901_v30, 1 }
 0x2e7   : > { %2276 = vst [vmem:[%s3627_s10 + $0xe8] sm:$0xff] %v2244_v25  ;;  %v1808_v43 = vpop.f32.mrf.mxu0  ;;  %v2345_v28 = vmul.f32 %v2244_v25, %v2244_v25 }
 0x2e8   : > { %2275 = vst [vmem:[%s3627_s10 + $0xe0] sm:$0xff] %v2243_v1  ;;  %v2306_v55 = vadd.f32 %v2305_v59, %v2243_v1  ;;  %v2344_v33 = vmul.f32 %v2243_v1, %v2243_v1  ;;  %v1906_v54 = vadd.f32 %v1808_v43, %v1421_v10  ;;  %v4348_v59 = vld [vmem:[#allocation119_spill] sm:$0xff] }
 0x2e9   : > { %v1305_v11 = vadd.f32 %v4349_v8, %v4348_v59 }
 0x2ea   : > { %v2307_v56 = vadd.f32 %v2306_v55, %v2244_v25  ;;  %v2375_v22 = vadd.f32 %v2374_v6, %v2344_v33  ;;  %v2005_v61 = vrot.slane %v1906_v54, 1  ;;  %v2115_v62 = vperm.slane %v1906_v54, 6 }
 0x2eb   : > { %v1582_v9 = vpop.f32.mrf.mxu2  ;;  %v1902_v32 = vadd.f32 %v1692_v17, %v1305_v11 }
 0x2ec   : > { %v2376_v15 = vadd.f32 %v2375_v22, %v2345_v28  ;;  %v1904_v48 = vadd.f32 %v1582_v9, %v1195_v16  ;;  %v1695_v21 = vpop.f32.mrf.mxu3  ;;  %v2038_v6 = vsel %vm2006_vm0, %v2005_v61, %v1989_v29  ;;  %v2022_v46 = vsel %vm2006_vm0, %v1989_v29, %v2005_v61 }
 0x2ed   : > { %v1905_v52 = vadd.f32 %v1695_v21, %v1308_v49  ;;  %v2147_v50 = vsel %vm2095_vm3, %v2115_v62, %v2038_v6 }
 0x2ee   : > { %v1938_v39 = vrot.slane %v1904_v48, 7 }
 0x2f0   : > { %v1973_v45 = vsel %vm1941_vm1, %v1938_v39, %v1922_v14  ;;  %v1957_v57 = vsel %vm1941_vm1, %v1922_v14, %v1938_v39 }
 0x2f1   : > { %v2092_v36 = vsel %vm2040_vm2, %v2061_v41, %v1973_v45  ;;  %v2179_v3 = vadd.f32 %v1957_v57, %v1905_v52 }
 0x2f2   : > { %v2178_v37 = vadd.f32 %v2092_v36, %v1902_v32 }
 0x2f3   : > { %v2211_v44 = vadd.f32 %v2179_v3, %v2147_v50 }
 0x2f4   : > { %v2210_v53 = vadd.f32 %v2178_v37, %v2022_v46 }
 0x2f5   : > { %v2246_v31 = vadd.f32 %v3944_v63, %v2211_v44 }
 0x2f6   : > { %v2245_v5 = vadd.f32 %v3944_v63, %v2210_v53 }
 0x2f7   : > { %2278 = vst [vmem:[%s3627_s10 + $0xf8] sm:$0xff] %v2246_v31  ;;  %v2347_v26 = vmul.f32 %v2246_v31, %v2246_v31 }
 0x2f8   : > { %2277 = vst [vmem:[%s3627_s10 + $0xf0] sm:$0xff] %v2245_v5  ;;  %v2308_v34 = vadd.f32 %v2307_v56, %v2245_v5  ;;  %v2346_v0 = vmul.f32 %v2245_v5, %v2245_v5 }
 0x2fa   : > { %v2309_v47 = vadd.f32 %v2308_v34, %v2246_v31  ;;  %v2377_v35 = vadd.f32 %v2376_v15, %v2346_v0 }
 0x2fc   : > { %v2310_v18 = vrot.slane %v2309_v47, 4  ;;  %v2378_v2 = vadd.f32 %v2377_v35, %v2347_v26 }
 0x2fe   : > { %v2311_v12 = vadd.f32 %v2310_v18, %v2309_v47  ;;  %v2379_v17 = vrot.slane %v2378_v2, 4 }
 0x300   : > { %v2312_v58 = vrot.slane %v2311_v12, 2  ;;  %v2380_v51 = vadd.f32 %v2379_v17, %v2378_v2 }
 0x302   : > { %v2313_v19 = vadd.f32 %v2312_v58, %v2311_v12  ;;  %v2381_v25 = vrot.slane %v2380_v51, 2 }
 0x304   : > { %v2314_v42 = vrot.slane %v2313_v19, 1  ;;  %v2382_v4 = vadd.f32 %v2381_v25, %v2380_v51 }
 0x306   : > { %v2383_v38 = vrot.slane %v2382_v4, 1  ;;  %v2315_v63 = vadd.f32 %v2314_v42, %v2313_v19 }
 0x308   : > { %v2384_v10 = vadd.f32 %v2383_v38, %v2382_v4 }
 0x30a   : > { %v2386_v1 = vsel %vm2385_vm4, %v2315_v63, %v2384_v10 }
 0x30b   : > { %2387 = vst [vmem:[%s499_s20] sm:$0x3] %v2386_v1 }
 0x30c PF: > { %s19_s26 = sadd.s32 1, %s2761_s26   ;;  %s4350_s24 = smov %s2757_s25 }
 0x30d   : > { %p16_p8 = scmp.ge.s32.totalorder %s19_s26, 4   ;;  %s4351_s25 = smov %s4353_s28 }
 0x30f   :  { %18 = sbr.rel (!%p16_p8) target bundleno = 2 (0x2), region = 102 }
 0x314   :  { %2440 = vsyncpa [#allocation3], 1 }
 0x315   :  { %2442 = vsyncpa [#allocation3 + $0x1], 1 }

</bundles_post_ra>
